<compile_context>
chip_gen: v7x
topology: tpu7x:2x2x1
jax: 0.10.0
libtpu: 0.0.40
codegen_flags: <defaults>
</compile_context>

<pallas_src>
import functools

import numpy as np

import jax
import jax.numpy as jnp
from jax.experimental import pallas as pl
from jax.experimental.pallas import tpu as pltpu


def _hardswish(x):
    return x * jnp.clip(x + 3.0, 0.0, 6.0) * (1.0 / 6.0)


def _hardsigmoid(x):
    return jnp.clip(x * (1.0 / 6.0) + 0.5, 0.0, 1.0)


def _inverted_residual_kernel(
    x_ref,        # (Cin, L)    f32, L = NB*H*W (lane-dense)
    mask_ref,     # (K*K, L)    f32 boundary masks per depthwise tap
    ind_ref,      # (NB, L)     f32 per-image lane indicators (for SE pooling)
    w_exp_ref,    # (E, Cin)    matmul dtype, BN1 scale folded in
    b1_ref,       # (E, 1)      f32 BN1 shift
    w_dw_ref,     # (E, K*K)    f32, BN2 scale folded in (used on the VPU)
    b2_ref,       # (E, 1)      f32 BN2 shift
    w_se1_ref,    # (S, E)      f32
    b_se1_ref,    # (S, 1)      f32
    w_se2_ref,    # (E, S)      f32
    b_se2_ref,    # (E, 1)      f32
    w_pw_ref,     # (Cout, E)   matmul dtype, BN3 scale folded in
    b3_ref,       # (Cout, 1)   f32 BN3 shift
    o_ref,        # (Cout, L)
    dw_acc_ref,   # scratch (E, L) f32 depthwise accumulator
    *, NB, H, W, K, P, use_residual,
):
    L = x_ref.shape[-1]
    E = w_exp_ref.shape[0]
    inv_hw = 1.0 / float(H * W)

    x = x_ref[...]                                            # (Cin, L) f32

    # --- expansion: 1x1 conv (BN scale pre-folded) + shift + Hardswish ---
    y = jnp.dot(w_exp_ref[...], x.astype(w_exp_ref.dtype),
                preferred_element_type=jnp.float32)           # (E, L) f32
    y = _hardswish(y + b1_ref[...])

    # --- depthwise KxK conv (stride 1, pad K//2) ---
    # Each tap = static lane roll (XLU) + precomputed boundary mask + per-channel weight.
    # Accumulate into VMEM scratch to bound live ranges; start from the BN2 shift.
    dw_acc_ref[...] = jnp.broadcast_to(b2_ref[...], dw_acc_ref.shape)
    w_dw = w_dw_ref[...]                                      # (E, K*K)
    for dy in range(K):
        for dx in range(K):
            idx = dy * K + dx
            off = (dy - P) * W + (dx - P)                     # lane offset of this tap
            w_col = w_dw[:, idx:idx + 1]                      # (E, 1)
            if off == 0:
                contrib = y * w_col
            else:
                rolled = pltpu.roll(y, shift=(-off) % L, axis=1)
                contrib = rolled * mask_ref[idx:idx + 1, :] * w_col
            dw_acc_ref[...] += contrib
    a = _hardswish(dw_acc_ref[...])                           # (E, L) f32

    # --- squeeze and excitation (per image, pooled with masked lane reductions) ---
    gate_map = jnp.zeros_like(a)
    for b in range(NB):
        ind = ind_ref[b:b + 1, :]                             # (1, L)
        s = jnp.sum(a * ind, axis=1, keepdims=True) * inv_hw  # (E, 1) global avg pool
        s = jnp.dot(w_se1_ref[...], s,
                    preferred_element_type=jnp.float32) + b_se1_ref[...]
        s = jnp.maximum(s, 0.0)                               # ReLU
        s = jnp.dot(w_se2_ref[...], s,
                    preferred_element_type=jnp.float32) + b_se2_ref[...]
        gate_map = gate_map + _hardsigmoid(s) * ind           # per-channel gate on image b
    a = a * gate_map

    # --- projection: 1x1 conv (BN scale pre-folded) + shift, Identity activation ---
    z = jnp.dot(w_pw_ref[...], a.astype(w_pw_ref.dtype),
                preferred_element_type=jnp.float32) + b3_ref[...]   # (Cout, L)
    if use_residual:
        z = z + x
    o_ref[...] = z.astype(o_ref.dtype)


def _dw_constants(NB, H, W, K):
    """Host-side constants: per-tap boundary masks and per-image lane indicators."""
    P = K // 2
    hh = np.arange(H).reshape(H, 1)
    ww = np.arange(W).reshape(1, W)
    masks = np.zeros((K * K, NB * H * W), np.float32)
    for dy in range(K):
        for dx in range(K):
            oy, ox = dy - P, dx - P
            valid = ((hh + oy >= 0) & (hh + oy < H) &
                     (ww + ox >= 0) & (ww + ox < W)).astype(np.float32)
            masks[dy * K + dx] = np.tile(valid.reshape(-1), NB)
    ind = np.repeat(np.eye(NB, dtype=np.float32), H * W, axis=1)     # (NB, NB*H*W)
    return jnp.asarray(masks), jnp.asarray(ind)


def inverted_residual_block_v3(x, params, *, kernel=3, stride=1, block_batch=None,
                               matmul_dtype=jnp.bfloat16):
    """x: (N, Cin, H, W) float32, NCHW (PyTorch layout)."""
    assert stride == 1, "TODO(synk): stride>1 depthwise path not implemented"
    N, Cin, H, W = x.shape
    E = params["w_exp"].shape[0]
    Cout = params["w_pw"].shape[0]
    K = kernel
    P = K // 2
    HW = H * W
    use_residual = (Cin == Cout and stride == 1)

    # Images processed per grid step (packed along the lane dim).
    NB = block_batch if block_batch is not None else min(N, 8)
    while N % NB:
        NB -= 1
    L = NB * HW
    assert NB == N or L % 128 == 0, "block lane width must be a multiple of 128"

    # --- host-side prep: fold BN scales into conv weights; shifts stay per-channel ---
    s1 = params["bn1_scale"].reshape(E, 1)
    s2 = params["bn2_scale"].reshape(E, 1)
    s3 = params["bn3_scale"].reshape(Cout, 1)
    w_exp = (params["w_exp"] * s1).astype(matmul_dtype)               # (E, Cin)
    w_dw = params["w_dw"].reshape(E, K * K) * s2                      # (E, K*K) f32 (VPU use)
    w_pw = (params["w_pw"] * s3).astype(matmul_dtype)                 # (Cout, E)
    b1 = params["bn1_shift"].reshape(E, 1).astype(jnp.float32)
    b2 = params["bn2_shift"].reshape(E, 1).astype(jnp.float32)
    b3 = params["bn3_shift"].reshape(Cout, 1).astype(jnp.float32)
    w_se1 = params["w_se1"].astype(jnp.float32)                       # (S, E)
    b_se1 = params["b_se1"].reshape(-1, 1).astype(jnp.float32)        # (S, 1)
    w_se2 = params["w_se2"].astype(jnp.float32)                       # (E, S)
    b_se2 = params["b_se2"].reshape(-1, 1).astype(jnp.float32)        # (E, 1)

    tap_masks, img_ind = _dw_constants(NB, H, W, K)

    # Pack activations channels-major so the lane dim is (batch*spatial): (Cin, N*H*W).
    xp = jnp.transpose(x, (1, 0, 2, 3)).reshape(Cin, N * HW)

    param_vals = [tap_masks, img_ind, w_exp, b1, w_dw, b2,
                  w_se1, b_se1, w_se2, b_se2, w_pw, b3]

    kernel_fn = functools.partial(
        _inverted_residual_kernel,
        NB=NB, H=H, W=W, K=K, P=P, use_residual=use_residual)

    out_flat = pl.pallas_call(
        kernel_fn,
        out_shape=jax.ShapeDtypeStruct((Cout, N * HW), x.dtype),
        grid_spec=pltpu.PrefetchScalarGridSpec(
            num_scalar_prefetch=0,
            grid=(N // NB,),
            in_specs=[pl.BlockSpec((Cin, L), lambda n: (0, n))]
                     + [pl.BlockSpec(p.shape, lambda n, _nd=p.ndim: (0,) * _nd)
                        for p in param_vals],
            out_specs=pl.BlockSpec((Cout, L), lambda n: (0, n)),
            scratch_shapes=[pltpu.VMEM((E, L), jnp.float32)],
        ),
        compiler_params=pltpu.CompilerParams(
            dimension_semantics=("parallel",),
            vmem_limit_bytes=32 * 1024 * 1024,
        ),
    )(xp, *param_vals)

    # Layout plumbing back to NCHW (free reinterpret + one small transpose).
    return jnp.transpose(out_flat.reshape(Cout, N, H, W), (1, 0, 2, 3))


# ---------------------------------------------------------------------------
# Pure-JAX f32 reference (matches the PyTorch module) and parameter factory.
# ---------------------------------------------------------------------------
def _reference(x, params, *, kernel=3):
    N, Cin, H, W = x.shape
    K = kernel
    P = K // 2
    E = params["w_exp"].shape[0]
    Cout = params["w_pw"].shape[0]

    xm = x.reshape(N, Cin, H * W).astype(jnp.float32)
    y = jnp.einsum("ec,ncs->nes", params["w_exp"], xm)
    y = y * params["bn1_scale"][None, :, None] + params["bn1_shift"][None, :, None]
    y = _hardswish(y).reshape(N, E, H, W)

    ypad = jnp.pad(y, ((0, 0), (0, 0), (P, P), (P, P)))
    wd = params["w_dw"].reshape(E, K, K)
    acc = jnp.zeros((N, E, H, W), jnp.float32)
    for dy in range(K):
        for dx in range(K):
            acc = acc + ypad[:, :, dy:dy + H, dx:dx + W] * wd[None, :, dy, dx, None, None]
    acc = (acc * params["bn2_scale"][None, :, None, None]
           + params["bn2_shift"][None, :, None, None])
    a = _hardswish(acc)

    s = a.mean(axis=(2, 3))                                            # (N, E)
    s = jnp.maximum(s @ params["w_se1"].T + params["b_se1"], 0.0)      # (N, S)
    s = s @ params["w_se2"].T + params["b_se2"]                        # (N, E)
    a = a * _hardsigmoid(s)[:, :, None, None]

    z = jnp.einsum("oe,nes->nos", params["w_pw"], a.reshape(N, E, H * W))
    z = z * params["bn3_scale"][None, :, None] + params["bn3_shift"][None, :, None]
    z = z.reshape(N, Cout, H, W)
    if Cin == Cout:
        z = z + x
    return z


def _make_params(key, Cin, Cout, E, K, reduction_ratio):
    S = E // reduction_ratio
    ks = jax.random.split(key, 16)

    def bn(k, c):
        k1, k2, k3, k4 = jax.random.split(k, 4)
        gamma = 1.0 + 0.1 * jax.random.normal(k1, (c,), jnp.float32)
        beta = 0.1 * jax.random.normal(k2, (c,), jnp.float32)
        mean = 0.1 * jax.random.normal(k3, (c,), jnp.float32)
        var = 0.5 + 0.1 * jnp.abs(jax.random.normal(k4, (c,), jnp.float32))
        scale = gamma / jnp.sqrt(var + 1e-5)
        return scale, beta - mean * scale

    bn1_scale, bn1_shift = bn(ks[0], E)
    bn2_scale, bn2_shift = bn(ks[1], E)
    bn3_scale, bn3_shift = bn(ks[2], Cout)
    return {
        # 1x1 expansion conv (E, Cin)  [PyTorch weight (E, Cin, 1, 1)]
        "w_exp": 0.2 * jax.random.normal(ks[3], (E, Cin), jnp.float32),
        "bn1_scale": bn1_scale, "bn1_shift": bn1_shift,
        # depthwise KxK conv (E, K*K)  [PyTorch weight (E, 1, K, K)]
        "w_dw": 0.2 * jax.random.normal(ks[4], (E, K * K), jnp.float32),
        "bn2_scale": bn2_scale, "bn2_shift": bn2_shift,
        # squeeze-and-excitation FC layers (with bias)
        "w_se1": 0.2 * jax.random.normal(ks[5], (S, E), jnp.float32),
        "b_se1": 0.1 * jax.random.normal(ks[6], (S,), jnp.float32),
        "w_se2": 0.2 * jax.random.normal(ks[7], (E, S), jnp.float32),
        "b_se2": 0.1 * jax.random.normal(ks[8], (E,), jnp.float32),
        # 1x1 projection conv (Cout, E)  [PyTorch weight (Cout, E, 1, 1)]
        "w_pw": 0.2 * jax.random.normal(ks[9], (Cout, E), jnp.float32),
        "bn3_scale": bn3_scale, "bn3_shift": bn3_shift,
    }


if __name__ == "__main__":
    # InvertedResidualBlockV3(input_channel=16, output_channel=16, kernel=3, stride=1,
    #   expansion_size=64, enable_relu=False, enable_se=True, reduction_ratio=4)
    N, H, W = 2, 16, 16
    Cin, Cout, E, K, r = 16, 16, 64, 3, 4

    key = jax.random.PRNGKey(0)
    kx, kp = jax.random.split(key)
    x = jax.random.normal(kx, (N, Cin, H, W), jnp.float32)   # NCHW, PyTorch layout
    params = _make_params(kp, Cin, Cout, E, K, r)

    out = inverted_residual_block_v3(x, params, kernel=K, stride=1)
    out = jax.block_until_ready(out)

    assert out.shape == (N, Cout, H, W), out.shape
    assert bool(jnp.all(jnp.isfinite(out)))

    # Validate against the f32 reference (bf16 is only used for MXU operands, so drift
    # stays small).
    ref = _reference(x, params, kernel=K)
    max_err = float(jnp.max(jnp.abs(out - ref)))
    assert max_err < 1e-1, f"max abs err vs reference: {max_err}"

    print("KERNEL_OK")
</pallas_src>

<mosaic_0001>
module attributes {stable_mosaic.version = 11 : i64} {
  func.func @_inverted_residual_kernel(%arg0: i32, %arg1: memref<16x512xf32, #tpu.memory_space<vmem>>, %arg2: memref<9x512xf32, #tpu.memory_space<vmem>>, %arg3: memref<2x512xf32, #tpu.memory_space<vmem>>, %arg4: memref<64x16xbf16, #tpu.memory_space<vmem>>, %arg5: memref<64x1xf32, #tpu.memory_space<vmem>>, %arg6: memref<64x9xf32, #tpu.memory_space<vmem>>, %arg7: memref<64x1xf32, #tpu.memory_space<vmem>>, %arg8: memref<16x64xf32, #tpu.memory_space<vmem>>, %arg9: memref<16x1xf32, #tpu.memory_space<vmem>>, %arg10: memref<64x16xf32, #tpu.memory_space<vmem>>, %arg11: memref<64x1xf32, #tpu.memory_space<vmem>>, %arg12: memref<16x64xbf16, #tpu.memory_space<vmem>>, %arg13: memref<16x1xf32, #tpu.memory_space<vmem>>, %arg14: memref<16x512xf32, #tpu.memory_space<vmem>>, %arg15: memref<64x512xf32, #tpu.memory_space<vmem>>) attributes {dimension_semantics = [#tpu.dimension_semantics<parallel>], iteration_bounds = array<i64: 1>, scalar_prefetch = 0 : i64, scratch_operands = 1 : i64, tpu.core_type = #tpu.core_type<tc>, window_params = [{transform_indices = @transform_0, window_bounds = array<i64: 16, 512>}, {pipeline_mode = #tpu.pipeline_mode<synchronous>, transform_indices = @transform_1, window_bounds = array<i64: 9, 512>}, {pipeline_mode = #tpu.pipeline_mode<synchronous>, transform_indices = @transform_2, window_bounds = array<i64: 2, 512>}, {pipeline_mode = #tpu.pipeline_mode<synchronous>, transform_indices = @transform_3, window_bounds = array<i64: 64, 16>}, {pipeline_mode = #tpu.pipeline_mode<synchronous>, transform_indices = @transform_4, window_bounds = array<i64: 64, 1>}, {pipeline_mode = #tpu.pipeline_mode<synchronous>, transform_indices = @transform_5, window_bounds = array<i64: 64, 9>}, {pipeline_mode = #tpu.pipeline_mode<synchronous>, transform_indices = @transform_6, window_bounds = array<i64: 64, 1>}, {pipeline_mode = #tpu.pipeline_mode<synchronous>, transform_indices = @transform_7, window_bounds = array<i64: 16, 64>}, {pipeline_mode = #tpu.pipeline_mode<synchronous>, transform_indices = @transform_8, window_bounds = array<i64: 16, 1>}, {pipeline_mode = #tpu.pipeline_mode<synchronous>, transform_indices = @transform_9, window_bounds = array<i64: 64, 16>}, {pipeline_mode = #tpu.pipeline_mode<synchronous>, transform_indices = @transform_10, window_bounds = array<i64: 64, 1>}, {pipeline_mode = #tpu.pipeline_mode<synchronous>, transform_indices = @transform_11, window_bounds = array<i64: 16, 64>}, {pipeline_mode = #tpu.pipeline_mode<synchronous>, transform_indices = @transform_12, window_bounds = array<i64: 16, 1>}, {transform_indices = @transform_13, window_bounds = array<i64: 16, 512>}]} {
    %c0 = arith.constant 0 : index
    %c0_0 = arith.constant 0 : index
    %0 = vector.load %arg1[%c0, %c0_0] : memref<16x512xf32, #tpu.memory_space<vmem>>, vector<16x512xf32>
    %c0_1 = arith.constant 0 : index
    %c0_2 = arith.constant 0 : index
    %1 = vector.load %arg4[%c0_1, %c0_2] : memref<64x16xbf16, #tpu.memory_space<vmem>>, vector<64x16xbf16>
    %2 = arith.truncf %0 : vector<16x512xf32> to vector<16x512xbf16>
    %cst = arith.constant dense<0.000000e+00> : vector<64x512xf32>
    %3 = tpu.matmul %1, %2, %cst {dimension_numbers = #tpu.dot_dimension_numbers<[1], [0], [0], [1], [0, 0, 1, 1], [], []>} : vector<64x16xbf16>, vector<16x512xbf16>, vector<64x512xf32> -> vector<64x512xf32>
    %c0_3 = arith.constant 0 : index
    %c0_4 = arith.constant 0 : index
    %4 = vector.load %arg5[%c0_3, %c0_4] : memref<64x1xf32, #tpu.memory_space<vmem>>, vector<64x1xf32>
    %5 = vector.broadcast %4 : vector<64x1xf32> to vector<64x512xf32>
    %6 = arith.addf %3, %5 : vector<64x512xf32>
    %cst_5 = arith.constant 3.000000e+00 : f32
    %7 = vector.broadcast %cst_5 : f32 to vector<64x512xf32>
    %8 = arith.addf %6, %7 : vector<64x512xf32>
    %cst_6 = arith.constant 0.000000e+00 : f32
    %cst_7 = arith.constant 6.000000e+00 : f32
    %9 = vector.broadcast %cst_6 : f32 to vector<64x512xf32>
    %10 = arith.maximumf %9, %8 : vector<64x512xf32>
    %11 = vector.broadcast %cst_7 : f32 to vector<64x512xf32>
    %12 = arith.minimumf %11, %10 : vector<64x512xf32>
    %13 = arith.mulf %6, %12 : vector<64x512xf32>
    %cst_8 = arith.constant 0.166666672 : f32
    %14 = vector.broadcast %cst_8 : f32 to vector<64x512xf32>
    %15 = arith.mulf %13, %14 : vector<64x512xf32>
    %c0_9 = arith.constant 0 : index
    %c0_10 = arith.constant 0 : index
    %16 = vector.load %arg7[%c0_9, %c0_10] : memref<64x1xf32, #tpu.memory_space<vmem>>, vector<64x1xf32>
    %17 = vector.shape_cast %16 : vector<64x1xf32> to vector<64x1xf32>
    %18 = vector.broadcast %17 : vector<64x1xf32> to vector<64x512xf32>
    %c0_11 = arith.constant 0 : index
    %c0_12 = arith.constant 0 : index
    %19 = vector.load %arg15[%c0_11, %c0_12] : memref<64x512xf32, #tpu.memory_space<vmem>>, vector<64x512xf32>
    tpu.vector_store %arg15[%c0_11, %c0_12], %18 {strides = array<i32>} : memref<64x512xf32, #tpu.memory_space<vmem>>, vector<64x512xf32>,
    %c0_13 = arith.constant 0 : index
    %c0_14 = arith.constant 0 : index
    %20 = vector.load %arg6[%c0_13, %c0_14] : memref<64x9xf32, #tpu.memory_space<vmem>>, vector<64x9xf32>
    %21 = vector.extract_strided_slice %20 {offsets = [0, 0], sizes = [64, 1], strides = [1, 1]} : vector<64x9xf32> to vector<64x1xf32>
    %c17_i32 = arith.constant 17 : i32
    %22 = tpu.dynamic_rotate %15 by %c17_i32 dim 1 : vector<64x512xf32>, i32 -> vector<64x512xf32>
    %c0_15 = arith.constant 0 : index
    %c0_16 = arith.constant 0 : index
    %23 = vector.load %arg2[%c0_15, %c0_16] : memref<9x512xf32, #tpu.memory_space<vmem>>, vector<1x512xf32>
    %24 = vector.broadcast %23 : vector<1x512xf32> to vector<64x512xf32>
    %25 = arith.mulf %22, %24 : vector<64x512xf32>
    %26 = vector.broadcast %21 : vector<64x1xf32> to vector<64x512xf32>
    %27 = arith.mulf %25, %26 : vector<64x512xf32>
    %c0_17 = arith.constant 0 : index
    %c0_18 = arith.constant 0 : index
    %28 = vector.load %arg15[%c0_17, %c0_18] : memref<64x512xf32, #tpu.memory_space<vmem>>, vector<64x512xf32>
    %29 = arith.addf %28, %27 : vector<64x512xf32>
    %c0_19 = arith.constant 0 : index
    %c0_20 = arith.constant 0 : index
    %30 = vector.load %arg15[%c0_19, %c0_20] : memref<64x512xf32, #tpu.memory_space<vmem>>, vector<64x512xf32>
    tpu.vector_store %arg15[%c0_19, %c0_20], %29 {strides = array<i32>} : memref<64x512xf32, #tpu.memory_space<vmem>>, vector<64x512xf32>,
    %31 = vector.extract_strided_slice %20 {offsets = [0, 1], sizes = [64, 1], strides = [1, 1]} : vector<64x9xf32> to vector<64x1xf32>
    %c16_i32 = arith.constant 16 : i32
    %32 = tpu.dynamic_rotate %15 by %c16_i32 dim 1 : vector<64x512xf32>, i32 -> vector<64x512xf32>
    %c1 = arith.constant 1 : index
    %c0_21 = arith.constant 0 : index
    %33 = vector.load %arg2[%c1, %c0_21] : memref<9x512xf32, #tpu.memory_space<vmem>>, vector<1x512xf32>
    %34 = vector.broadcast %33 : vector<1x512xf32> to vector<64x512xf32>
    %35 = arith.mulf %32, %34 : vector<64x512xf32>
    %36 = vector.broadcast %31 : vector<64x1xf32> to vector<64x512xf32>
    %37 = arith.mulf %35, %36 : vector<64x512xf32>
    %c0_22 = arith.constant 0 : index
    %c0_23 = arith.constant 0 : index
    %38 = vector.load %arg15[%c0_22, %c0_23] : memref<64x512xf32, #tpu.memory_space<vmem>>, vector<64x512xf32>
    %39 = arith.addf %38, %37 : vector<64x512xf32>
    %c0_24 = arith.constant 0 : index
    %c0_25 = arith.constant 0 : index
    %40 = vector.load %arg15[%c0_24, %c0_25] : memref<64x512xf32, #tpu.memory_space<vmem>>, vector<64x512xf32>
    tpu.vector_store %arg15[%c0_24, %c0_25], %39 {strides = array<i32>} : memref<64x512xf32, #tpu.memory_space<vmem>>, vector<64x512xf32>,
    %41 = vector.extract_strided_slice %20 {offsets = [0, 2], sizes = [64, 1], strides = [1, 1]} : vector<64x9xf32> to vector<64x1xf32>
    %c15_i32 = arith.constant 15 : i32
    %42 = tpu.dynamic_rotate %15 by %c15_i32 dim 1 : vector<64x512xf32>, i32 -> vector<64x512xf32>
    %c2 = arith.constant 2 : index
    %c0_26 = arith.constant 0 : index
    %43 = vector.load %arg2[%c2, %c0_26] : memref<9x512xf32, #tpu.memory_space<vmem>>, vector<1x512xf32>
    %44 = vector.broadcast %43 : vector<1x512xf32> to vector<64x512xf32>
    %45 = arith.mulf %42, %44 : vector<64x512xf32>
    %46 = vector.broadcast %41 : vector<64x1xf32> to vector<64x512xf32>
    %47 = arith.mulf %45, %46 : vector<64x512xf32>
    %c0_27 = arith.constant 0 : index
    %c0_28 = arith.constant 0 : index
    %48 = vector.load %arg15[%c0_27, %c0_28] : memref<64x512xf32, #tpu.memory_space<vmem>>, vector<64x512xf32>
    %49 = arith.addf %48, %47 : vector<64x512xf32>
    %c0_29 = arith.constant 0 : index
    %c0_30 = arith.constant 0 : index
    %50 = vector.load %arg15[%c0_29, %c0_30] : memref<64x512xf32, #tpu.memory_space<vmem>>, vector<64x512xf32>
    tpu.vector_store %arg15[%c0_29, %c0_30], %49 {strides = array<i32>} : memref<64x512xf32, #tpu.memory_space<vmem>>, vector<64x512xf32>,
    %51 = vector.extract_strided_slice %20 {offsets = [0, 3], sizes = [64, 1], strides = [1, 1]} : vector<64x9xf32> to vector<64x1xf32>
    %c1_i32 = arith.constant 1 : i32
    %52 = tpu.dynamic_rotate %15 by %c1_i32 dim 1 : vector<64x512xf32>, i32 -> vector<64x512xf32>
    %c3 = arith.constant 3 : index
    %c0_31 = arith.constant 0 : index
    %53 = vector.load %arg2[%c3, %c0_31] : memref<9x512xf32, #tpu.memory_space<vmem>>, vector<1x512xf32>
    %54 = vector.broadcast %53 : vector<1x512xf32> to vector<64x512xf32>
    %55 = arith.mulf %52, %54 : vector<64x512xf32>
    %56 = vector.broadcast %51 : vector<64x1xf32> to vector<64x512xf32>
    %57 = arith.mulf %55, %56 : vector<64x512xf32>
    %c0_32 = arith.constant 0 : index
    %c0_33 = arith.constant 0 : index
    %58 = vector.load %arg15[%c0_32, %c0_33] : memref<64x512xf32, #tpu.memory_space<vmem>>, vector<64x512xf32>
    %59 = arith.addf %58, %57 : vector<64x512xf32>
    %c0_34 = arith.constant 0 : index
    %c0_35 = arith.constant 0 : index
    %60 = vector.load %arg15[%c0_34, %c0_35] : memref<64x512xf32, #tpu.memory_space<vmem>>, vector<64x512xf32>
    tpu.vector_store %arg15[%c0_34, %c0_35], %59 {strides = array<i32>} : memref<64x512xf32, #tpu.memory_space<vmem>>, vector<64x512xf32>,
    %61 = vector.extract_strided_slice %20 {offsets = [0, 4], sizes = [64, 1], strides = [1, 1]} : vector<64x9xf32> to vector<64x1xf32>
    %62 = vector.broadcast %61 : vector<64x1xf32> to vector<64x512xf32>
    %63 = arith.mulf %15, %62 : vector<64x512xf32>
    %c0_36 = arith.constant 0 : index
    %c0_37 = arith.constant 0 : index
    %64 = vector.load %arg15[%c0_36, %c0_37] : memref<64x512xf32, #tpu.memory_space<vmem>>, vector<64x512xf32>
    %65 = arith.addf %64, %63 : vector<64x512xf32>
    %c0_38 = arith.constant 0 : index
    %c0_39 = arith.constant 0 : index
    %66 = vector.load %arg15[%c0_38, %c0_39] : memref<64x512xf32, #tpu.memory_space<vmem>>, vector<64x512xf32>
    tpu.vector_store %arg15[%c0_38, %c0_39], %65 {strides = array<i32>} : memref<64x512xf32, #tpu.memory_space<vmem>>, vector<64x512xf32>,
    %67 = vector.extract_strided_slice %20 {offsets = [0, 5], sizes = [64, 1], strides = [1, 1]} : vector<64x9xf32> to vector<64x1xf32>
    %c511_i32 = arith.constant 511 : i32
    %68 = tpu.dynamic_rotate %15 by %c511_i32 dim 1 : vector<64x512xf32>, i32 -> vector<64x512xf32>
    %c5 = arith.constant 5 : index
    %c0_40 = arith.constant 0 : index
    %69 = vector.load %arg2[%c5, %c0_40] : memref<9x512xf32, #tpu.memory_space<vmem>>, vector<1x512xf32>
    %70 = vector.broadcast %69 : vector<1x512xf32> to vector<64x512xf32>
    %71 = arith.mulf %68, %70 : vector<64x512xf32>
    %72 = vector.broadcast %67 : vector<64x1xf32> to vector<64x512xf32>
    %73 = arith.mulf %71, %72 : vector<64x512xf32>
    %c0_41 = arith.constant 0 : index
    %c0_42 = arith.constant 0 : index
    %74 = vector.load %arg15[%c0_41, %c0_42] : memref<64x512xf32, #tpu.memory_space<vmem>>, vector<64x512xf32>
    %75 = arith.addf %74, %73 : vector<64x512xf32>
    %c0_43 = arith.constant 0 : index
    %c0_44 = arith.constant 0 : index
    %76 = vector.load %arg15[%c0_43, %c0_44] : memref<64x512xf32, #tpu.memory_space<vmem>>, vector<64x512xf32>
    tpu.vector_store %arg15[%c0_43, %c0_44], %75 {strides = array<i32>} : memref<64x512xf32, #tpu.memory_space<vmem>>, vector<64x512xf32>,
    %77 = vector.extract_strided_slice %20 {offsets = [0, 6], sizes = [64, 1], strides = [1, 1]} : vector<64x9xf32> to vector<64x1xf32>
    %c497_i32 = arith.constant 497 : i32
    %78 = tpu.dynamic_rotate %15 by %c497_i32 dim 1 : vector<64x512xf32>, i32 -> vector<64x512xf32>
    %c6 = arith.constant 6 : index
    %c0_45 = arith.constant 0 : index
    %79 = vector.load %arg2[%c6, %c0_45] : memref<9x512xf32, #tpu.memory_space<vmem>>, vector<1x512xf32>
    %80 = vector.broadcast %79 : vector<1x512xf32> to vector<64x512xf32>
    %81 = arith.mulf %78, %80 : vector<64x512xf32>
    %82 = vector.broadcast %77 : vector<64x1xf32> to vector<64x512xf32>
    %83 = arith.mulf %81, %82 : vector<64x512xf32>
    %c0_46 = arith.constant 0 : index
    %c0_47 = arith.constant 0 : index
    %84 = vector.load %arg15[%c0_46, %c0_47] : memref<64x512xf32, #tpu.memory_space<vmem>>, vector<64x512xf32>
    %85 = arith.addf %84, %83 : vector<64x512xf32>
    %c0_48 = arith.constant 0 : index
    %c0_49 = arith.constant 0 : index
    %86 = vector.load %arg15[%c0_48, %c0_49] : memref<64x512xf32, #tpu.memory_space<vmem>>, vector<64x512xf32>
    tpu.vector_store %arg15[%c0_48, %c0_49], %85 {strides = array<i32>} : memref<64x512xf32, #tpu.memory_space<vmem>>, vector<64x512xf32>,
    %87 = vector.extract_strided_slice %20 {offsets = [0, 7], sizes = [64, 1], strides = [1, 1]} : vector<64x9xf32> to vector<64x1xf32>
    %c496_i32 = arith.constant 496 : i32
    %88 = tpu.dynamic_rotate %15 by %c496_i32 dim 1 : vector<64x512xf32>, i32 -> vector<64x512xf32>
    %c7 = arith.constant 7 : index
    %c0_50 = arith.constant 0 : index
    %89 = vector.load %arg2[%c7, %c0_50] : memref<9x512xf32, #tpu.memory_space<vmem>>, vector<1x512xf32>
    %90 = vector.broadcast %89 : vector<1x512xf32> to vector<64x512xf32>
    %91 = arith.mulf %88, %90 : vector<64x512xf32>
    %92 = vector.broadcast %87 : vector<64x1xf32> to vector<64x512xf32>
    %93 = arith.mulf %91, %92 : vector<64x512xf32>
    %c0_51 = arith.constant 0 : index
    %c0_52 = arith.constant 0 : index
    %94 = vector.load %arg15[%c0_51, %c0_52] : memref<64x512xf32, #tpu.memory_space<vmem>>, vector<64x512xf32>
    %95 = arith.addf %94, %93 : vector<64x512xf32>
    %c0_53 = arith.constant 0 : index
    %c0_54 = arith.constant 0 : index
    %96 = vector.load %arg15[%c0_53, %c0_54] : memref<64x512xf32, #tpu.memory_space<vmem>>, vector<64x512xf32>
    tpu.vector_store %arg15[%c0_53, %c0_54], %95 {strides = array<i32>} : memref<64x512xf32, #tpu.memory_space<vmem>>, vector<64x512xf32>,
    %97 = vector.extract_strided_slice %20 {offsets = [0, 8], sizes = [64, 1], strides = [1, 1]} : vector<64x9xf32> to vector<64x1xf32>
    %c495_i32 = arith.constant 495 : i32
    %98 = tpu.dynamic_rotate %15 by %c495_i32 dim 1 : vector<64x512xf32>, i32 -> vector<64x512xf32>
    %c8 = arith.constant 8 : index
    %c0_55 = arith.constant 0 : index
    %99 = vector.load %arg2[%c8, %c0_55] : memref<9x512xf32, #tpu.memory_space<vmem>>, vector<1x512xf32>
    %100 = vector.broadcast %99 : vector<1x512xf32> to vector<64x512xf32>
    %101 = arith.mulf %98, %100 : vector<64x512xf32>
    %102 = vector.broadcast %97 : vector<64x1xf32> to vector<64x512xf32>
    %103 = arith.mulf %101, %102 : vector<64x512xf32>
    %c0_56 = arith.constant 0 : index
    %c0_57 = arith.constant 0 : index
    %104 = vector.load %arg15[%c0_56, %c0_57] : memref<64x512xf32, #tpu.memory_space<vmem>>, vector<64x512xf32>
    %105 = arith.addf %104, %103 : vector<64x512xf32>
    %c0_58 = arith.constant 0 : index
    %c0_59 = arith.constant 0 : index
    %106 = vector.load %arg15[%c0_58, %c0_59] : memref<64x512xf32, #tpu.memory_space<vmem>>, vector<64x512xf32>
    tpu.vector_store %arg15[%c0_58, %c0_59], %105 {strides = array<i32>} : memref<64x512xf32, #tpu.memory_space<vmem>>, vector<64x512xf32>,
    %c0_60 = arith.constant 0 : index
    %c0_61 = arith.constant 0 : index
    %107 = vector.load %arg15[%c0_60, %c0_61] : memref<64x512xf32, #tpu.memory_space<vmem>>, vector<64x512xf32>
    %cst_62 = arith.constant 3.000000e+00 : f32
    %108 = vector.broadcast %cst_62 : f32 to vector<64x512xf32>
    %109 = arith.addf %107, %108 : vector<64x512xf32>
    %cst_63 = arith.constant 0.000000e+00 : f32
    %cst_64 = arith.constant 6.000000e+00 : f32
    %110 = vector.broadcast %cst_63 : f32 to vector<64x512xf32>
    %111 = arith.maximumf %110, %109 : vector<64x512xf32>
    %112 = vector.broadcast %cst_64 : f32 to vector<64x512xf32>
    %113 = arith.minimumf %112, %111 : vector<64x512xf32>
    %114 = arith.mulf %107, %113 : vector<64x512xf32>
    %cst_65 = arith.constant 0.166666672 : f32
    %115 = vector.broadcast %cst_65 : f32 to vector<64x512xf32>
    %116 = arith.mulf %114, %115 : vector<64x512xf32>
    %cst_66 = arith.constant 0.000000e+00 : f32
    %117 = vector.broadcast %cst_66 : f32 to vector<64x512xf32>
    %c0_67 = arith.constant 0 : index
    %c0_68 = arith.constant 0 : index
    %118 = vector.load %arg3[%c0_67, %c0_68] : memref<2x512xf32, #tpu.memory_space<vmem>>, vector<1x512xf32>
    %119 = vector.broadcast %118 : vector<1x512xf32> to vector<64x512xf32>
    %120 = arith.mulf %116, %119 : vector<64x512xf32>
    %cst_69 = arith.constant dense<0.000000e+00> : vector<64xf32>
    %121 = vector.multi_reduction <add>, %120, %cst_69 [1] : vector<64x512xf32> to vector<64xf32>
    %122 = vector.shape_cast %121 : vector<64xf32> to vector<64x1xf32>
    %cst_70 = arith.constant 3.906250e-03 : f32
    %123 = vector.broadcast %cst_70 : f32 to vector<64x1xf32>
    %124 = arith.mulf %122, %123 : vector<64x1xf32>
    %c0_71 = arith.constant 0 : index
    %c0_72 = arith.constant 0 : index
    %125 = vector.load %arg8[%c0_71, %c0_72] : memref<16x64xf32, #tpu.memory_space<vmem>>, vector<16x64xf32>
    %cst_73 = arith.constant dense<0.000000e+00> : vector<16x1xf32>
    %126 = tpu.matmul %125, %124, %cst_73 {dimension_numbers = #tpu.dot_dimension_numbers<[1], [0], [0], [1], [0, 0, 1, 1], [], []>} : vector<16x64xf32>, vector<64x1xf32>, vector<16x1xf32> -> vector<16x1xf32>
    %c0_74 = arith.constant 0 : index
    %c0_75 = arith.constant 0 : index
    %127 = vector.load %arg9[%c0_74, %c0_75] : memref<16x1xf32, #tpu.memory_space<vmem>>, vector<16x1xf32>
    %128 = arith.addf %126, %127 : vector<16x1xf32>
    %cst_76 = arith.constant 0.000000e+00 : f32
    %129 = vector.broadcast %cst_76 : f32 to vector<16x1xf32>
    %130 = arith.maximumf %128, %129 : vector<16x1xf32>
    %c0_77 = arith.constant 0 : index
    %c0_78 = arith.constant 0 : index
    %131 = vector.load %arg10[%c0_77, %c0_78] : memref<64x16xf32, #tpu.memory_space<vmem>>, vector<64x16xf32>
    %cst_79 = arith.constant dense<0.000000e+00> : vector<64x1xf32>
    %132 = tpu.matmul %131, %130, %cst_79 {dimension_numbers = #tpu.dot_dimension_numbers<[1], [0], [0], [1], [0, 0, 1, 1], [], []>} : vector<64x16xf32>, vector<16x1xf32>, vector<64x1xf32> -> vector<64x1xf32>
    %c0_80 = arith.constant 0 : index
    %c0_81 = arith.constant 0 : index
    %133 = vector.load %arg11[%c0_80, %c0_81] : memref<64x1xf32, #tpu.memory_space<vmem>>, vector<64x1xf32>
    %134 = arith.addf %132, %133 : vector<64x1xf32>
    %cst_82 = arith.constant 0.166666672 : f32
    %135 = vector.broadcast %cst_82 : f32 to vector<64x1xf32>
    %136 = arith.mulf %134, %135 : vector<64x1xf32>
    %cst_83 = arith.constant 5.000000e-01 : f32
    %137 = vector.broadcast %cst_83 : f32 to vector<64x1xf32>
    %138 = arith.addf %136, %137 : vector<64x1xf32>
    %cst_84 = arith.constant 0.000000e+00 : f32
    %cst_85 = arith.constant 1.000000e+00 : f32
    %139 = vector.broadcast %cst_84 : f32 to vector<64x1xf32>
    %140 = arith.maximumf %139, %138 : vector<64x1xf32>
    %141 = vector.broadcast %cst_85 : f32 to vector<64x1xf32>
    %142 = arith.minimumf %141, %140 : vector<64x1xf32>
    %143 = vector.broadcast %142 : vector<64x1xf32> to vector<64x512xf32>
    %144 = vector.broadcast %118 : vector<1x512xf32> to vector<64x512xf32>
    %145 = arith.mulf %143, %144 : vector<64x512xf32>
    %146 = arith.addf %117, %145 : vector<64x512xf32>
    %c1_86 = arith.constant 1 : index
    %c0_87 = arith.constant 0 : index
    %147 = vector.load %arg3[%c1_86, %c0_87] : memref<2x512xf32, #tpu.memory_space<vmem>>, vector<1x512xf32>
    %148 = vector.broadcast %147 : vector<1x512xf32> to vector<64x512xf32>
    %149 = arith.mulf %116, %148 : vector<64x512xf32>
    %cst_88 = arith.constant dense<0.000000e+00> : vector<64xf32>
    %150 = vector.multi_reduction <add>, %149, %cst_88 [1] : vector<64x512xf32> to vector<64xf32>
    %151 = vector.shape_cast %150 : vector<64xf32> to vector<64x1xf32>
    %cst_89 = arith.constant 3.906250e-03 : f32
    %152 = vector.broadcast %cst_89 : f32 to vector<64x1xf32>
    %153 = arith.mulf %151, %152 : vector<64x1xf32>
    %c0_90 = arith.constant 0 : index
    %c0_91 = arith.constant 0 : index
    %154 = vector.load %arg8[%c0_90, %c0_91] : memref<16x64xf32, #tpu.memory_space<vmem>>, vector<16x64xf32>
    %cst_92 = arith.constant dense<0.000000e+00> : vector<16x1xf32>
    %155 = tpu.matmul %154, %153, %cst_92 {dimension_numbers = #tpu.dot_dimension_numbers<[1], [0], [0], [1], [0, 0, 1, 1], [], []>} : vector<16x64xf32>, vector<64x1xf32>, vector<16x1xf32> -> vector<16x1xf32>
    %c0_93 = arith.constant 0 : index
    %c0_94 = arith.constant 0 : index
    %156 = vector.load %arg9[%c0_93, %c0_94] : memref<16x1xf32, #tpu.memory_space<vmem>>, vector<16x1xf32>
    %157 = arith.addf %155, %156 : vector<16x1xf32>
    %cst_95 = arith.constant 0.000000e+00 : f32
    %158 = vector.broadcast %cst_95 : f32 to vector<16x1xf32>
    %159 = arith.maximumf %157, %158 : vector<16x1xf32>
    %c0_96 = arith.constant 0 : index
    %c0_97 = arith.constant 0 : index
    %160 = vector.load %arg10[%c0_96, %c0_97] : memref<64x16xf32, #tpu.memory_space<vmem>>, vector<64x16xf32>
    %cst_98 = arith.constant dense<0.000000e+00> : vector<64x1xf32>
    %161 = tpu.matmul %160, %159, %cst_98 {dimension_numbers = #tpu.dot_dimension_numbers<[1], [0], [0], [1], [0, 0, 1, 1], [], []>} : vector<64x16xf32>, vector<16x1xf32>, vector<64x1xf32> -> vector<64x1xf32>
    %c0_99 = arith.constant 0 : index
    %c0_100 = arith.constant 0 : index
    %162 = vector.load %arg11[%c0_99, %c0_100] : memref<64x1xf32, #tpu.memory_space<vmem>>, vector<64x1xf32>
    %163 = arith.addf %161, %162 : vector<64x1xf32>
    %cst_101 = arith.constant 0.166666672 : f32
    %164 = vector.broadcast %cst_101 : f32 to vector<64x1xf32>
    %165 = arith.mulf %163, %164 : vector<64x1xf32>
    %cst_102 = arith.constant 5.000000e-01 : f32
    %166 = vector.broadcast %cst_102 : f32 to vector<64x1xf32>
    %167 = arith.addf %165, %166 : vector<64x1xf32>
    %cst_103 = arith.constant 0.000000e+00 : f32
    %cst_104 = arith.constant 1.000000e+00 : f32
    %168 = vector.broadcast %cst_103 : f32 to vector<64x1xf32>
    %169 = arith.maximumf %168, %167 : vector<64x1xf32>
    %170 = vector.broadcast %cst_104 : f32 to vector<64x1xf32>
    %171 = arith.minimumf %170, %169 : vector<64x1xf32>
    %172 = vector.broadcast %171 : vector<64x1xf32> to vector<64x512xf32>
    %173 = vector.broadcast %147 : vector<1x512xf32> to vector<64x512xf32>
    %174 = arith.mulf %172, %173 : vector<64x512xf32>
    %175 = arith.addf %146, %174 : vector<64x512xf32>
    %176 = arith.mulf %116, %175 : vector<64x512xf32>
    %c0_105 = arith.constant 0 : index
    %c0_106 = arith.constant 0 : index
    %177 = vector.load %arg12[%c0_105, %c0_106] : memref<16x64xbf16, #tpu.memory_space<vmem>>, vector<16x64xbf16>
    %178 = arith.truncf %176 : vector<64x512xf32> to vector<64x512xbf16>
    %cst_107 = arith.constant dense<0.000000e+00> : vector<16x512xf32>
    %179 = tpu.matmul %177, %178, %cst_107 {dimension_numbers = #tpu.dot_dimension_numbers<[1], [0], [0], [1], [0, 0, 1, 1], [], []>} : vector<16x64xbf16>, vector<64x512xbf16>, vector<16x512xf32> -> vector<16x512xf32>
    %c0_108 = arith.constant 0 : index
    %c0_109 = arith.constant 0 : index
    %180 = vector.load %arg13[%c0_108, %c0_109] : memref<16x1xf32, #tpu.memory_space<vmem>>, vector<16x1xf32>
    %181 = vector.broadcast %180 : vector<16x1xf32> to vector<16x512xf32>
    %182 = arith.addf %179, %181 : vector<16x512xf32>
    %183 = arith.addf %182, %0 : vector<16x512xf32>
    %c0_110 = arith.constant 0 : index
    %c0_111 = arith.constant 0 : index
    %184 = vector.load %arg14[%c0_110, %c0_111] : memref<16x512xf32, #tpu.memory_space<vmem>>, vector<16x512xf32>
    tpu.vector_store %arg14[%c0_110, %c0_111], %183 {strides = array<i32>} : memref<16x512xf32, #tpu.memory_space<vmem>>, vector<16x512xf32>,
    return
  }
  func.func @transform_0(%arg0: i32) -> (i32, i32) {
    %c0_i32 = arith.constant 0 : i32
    %c0_i32_0 = arith.constant 0 : i32
    return %c0_i32, %arg0 : i32, i32
  }
  func.func @transform_1(%arg0: i32) -> (i32, i32) {
    %c0_i32 = arith.constant 0 : i32
    %c0_i32_0 = arith.constant 0 : i32
    %c0_i32_1 = arith.constant 0 : i32
    return %c0_i32, %c0_i32_0 : i32, i32
  }
  func.func @transform_2(%arg0: i32) -> (i32, i32) {
    %c0_i32 = arith.constant 0 : i32
    %c0_i32_0 = arith.constant 0 : i32
    %c0_i32_1 = arith.constant 0 : i32
    return %c0_i32, %c0_i32_0 : i32, i32
  }
  func.func @transform_3(%arg0: i32) -> (i32, i32) {
    %c0_i32 = arith.constant 0 : i32
    %c0_i32_0 = arith.constant 0 : i32
    %c0_i32_1 = arith.constant 0 : i32
    return %c0_i32, %c0_i32_0 : i32, i32
  }
  func.func @transform_4(%arg0: i32) -> (i32, i32) {
    %c0_i32 = arith.constant 0 : i32
    %c0_i32_0 = arith.constant 0 : i32
    %c0_i32_1 = arith.constant 0 : i32
    return %c0_i32, %c0_i32_0 : i32, i32
  }
  func.func @transform_5(%arg0: i32) -> (i32, i32) {
    %c0_i32 = arith.constant 0 : i32
    %c0_i32_0 = arith.constant 0 : i32
    %c0_i32_1 = arith.constant 0 : i32
    return %c0_i32, %c0_i32_0 : i32, i32
  }
  func.func @transform_6(%arg0: i32) -> (i32, i32) {
    %c0_i32 = arith.constant 0 : i32
    %c0_i32_0 = arith.constant 0 : i32
    %c0_i32_1 = arith.constant 0 : i32
    return %c0_i32, %c0_i32_0 : i32, i32
  }
  func.func @transform_7(%arg0: i32) -> (i32, i32) {
    %c0_i32 = arith.constant 0 : i32
    %c0_i32_0 = arith.constant 0 : i32
    %c0_i32_1 = arith.constant 0 : i32
    return %c0_i32, %c0_i32_0 : i32, i32
  }
  func.func @transform_8(%arg0: i32) -> (i32, i32) {
    %c0_i32 = arith.constant 0 : i32
    %c0_i32_0 = arith.constant 0 : i32
    %c0_i32_1 = arith.constant 0 : i32
    return %c0_i32, %c0_i32_0 : i32, i32
  }
  func.func @transform_9(%arg0: i32) -> (i32, i32) {
    %c0_i32 = arith.constant 0 : i32
    %c0_i32_0 = arith.constant 0 : i32
    %c0_i32_1 = arith.constant 0 : i32
    return %c0_i32, %c0_i32_0 : i32, i32
  }
  func.func @transform_10(%arg0: i32) -> (i32, i32) {
    %c0_i32 = arith.constant 0 : i32
    %c0_i32_0 = arith.constant 0 : i32
    %c0_i32_1 = arith.constant 0 : i32
    return %c0_i32, %c0_i32_0 : i32, i32
  }
  func.func @transform_11(%arg0: i32) -> (i32, i32) {
    %c0_i32 = arith.constant 0 : i32
    %c0_i32_0 = arith.constant 0 : i32
    %c0_i32_1 = arith.constant 0 : i32
    return %c0_i32, %c0_i32_0 : i32, i32
  }
  func.func @transform_12(%arg0: i32) -> (i32, i32) {
    %c0_i32 = arith.constant 0 : i32
    %c0_i32_0 = arith.constant 0 : i32
    %c0_i32_1 = arith.constant 0 : i32
    return %c0_i32, %c0_i32_0 : i32, i32
  }
  func.func @transform_13(%arg0: i32) -> (i32, i32) {
    %c0_i32 = arith.constant 0 : i32
    %c0_i32_0 = arith.constant 0 : i32
    return %c0_i32, %arg0 : i32, i32
  }
}

</mosaic_0001>

<bundles_post_ra>
// kernel: tpu_custom_call.1
= control target key start
LH: loop header
LB: loop body
LE: loop exit
PB: predicated region body
PF: predicated region fallthrough
CT: control target
= control target key end

     0   :  { %v9639_v3 = vmov 0   ;;  %vm134_vm0 = vcmask 130048   ;;  %s9625_s0 = inlined_call_operand.vmem [shape: f32[16,512], index: 0, kind: input, shape index: {}]   ;;  %s9626_s1 = inlined_call_operand.vmem [shape: f32[9,512], index: 1, kind: input, shape index: {}]   ;;  %s9627_s2 = inlined_call_operand.vmem [shape: f32[2,512], index: 2, kind: input, shape index: {}]   ;;  %s9628_s3 = inlined_call_operand.vmem [shape: bf16[64,16], index: 3, kind: input, shape index: {}]   ;;  %s9629_s4 = inlined_call_operand.vmem [shape: f32[64,1], index: 4, kind: input, shape index: {}]   ;;  %s9630_s5 = inlined_call_operand.vmem [shape: f32[64,9], index: 5, kind: input, shape index: {}]   ;;  %s9631_s6 = inlined_call_operand.vmem [shape: f32[64,1], index: 6, kind: input, shape index: {}]   ;;  %s9632_s7 = inlined_call_operand.vmem [shape: f32[16,64], index: 7, kind: input, shape index: {}]   ;;  %s9633_s8 = inlined_call_operand.vmem [shape: f32[16,1], index: 8, kind: input, shape index: {}]   ;;  %s9634_s9 = inlined_call_operand.vmem [shape: f32[64,16], index: 9, kind: input, shape index: {}]   ;;  %s9635_s10 = inlined_call_operand.vmem [shape: f32[64,1], index: 10, kind: input, shape index: {}]   ;;  %s9636_s11 = inlined_call_operand.vmem [shape: bf16[16,64], index: 11, kind: input, shape index: {}]   ;;  %s9637_s12 = inlined_call_operand.vmem [shape: f32[16,1], index: 12, kind: input, shape index: {}]   ;;  %s9638_s13 = inlined_call_operand.hbm [shape: f32[16,512], index: 13, kind: output, shape index: {}]  }
   0x1   :  { %v68_v0 = vld [vmem:[%s9629_s4 + $0x10] sm:$0xff]  ;;  %v47_v1 = vld [vmem:[%s9625_s0 + $0x8] sm:$0xff]  ;;  %4692 = vset.pattern.permute.xlu1 %v9639_v3  ;;  %v49_v5 = vld [vmem:[%s9625_s0 + $0x18] sm:$0xff]  ;;  %179 = vmatprep.mubr.bf16.mxu0 %v9639_v3 }
   0x2   :  { %v51_v2 = vld [vmem:[%s9625_s0 + $0x28] sm:$0xff]  ;;  %v53_v6 = vld [vmem:[%s9625_s0 + $0x38] sm:$0xff]  ;;  %v46_v7 = vld [vmem:[%s9625_s0] sm:$0xff]  ;;  %86 = vperm.xlu1 %4692, %v68_v0   ;;  %252 = vmatprep.mubr.bf16.mxu1 %v9639_v3 }
   0x3   :  { %v63_v4 = vpack.c.bf16 %v51_v2, %v47_v1  ;;  %v65_v8 = vpack.c.bf16 %v53_v6, %v49_v5  ;;  %v50_v9 = vld [vmem:[%s9625_s0 + $0x20] sm:$0xff]  ;;  %v48_v10 = vld [vmem:[%s9625_s0 + $0x10] sm:$0xff]  ;;  %v69_v14 = vld [vmem:[%s9629_s4 + $0x18] sm:$0xff]  ;;  %4691 = vset.pattern.permute.xlu0 %v9639_v3 }
   0x4   :  { %v52_v11 = vld [vmem:[%s9625_s0 + $0x30] sm:$0xff]  ;;  %v62_v12 = vpack.c.bf16 %v50_v9, %v46_v7  ;;  %v4738_v15 = vld [vmem:[%s9628_s3] sm:$0xff]   ;;  %v71_v16 = vld [vmem:[%s9629_s4 + $0x28] sm:$0xff] }
   0x5   :  { %147 = vmatprep.subr.bf16.mxu0 %v63_v4  ;;  %v64_v13 = vpack.c.bf16 %v52_v11, %v48_v10  ;;  %220 = vmatprep.subr.bf16.mxu1 %v65_v8  ;;  %v73_v17 = vld [vmem:[%s9629_s4 + $0x38] sm:$0xff]  ;;  %v66_v18 = vld [vmem:[%s9629_s4] sm:$0xff]  ;;  %v4739_v19 = vld [vmem:[%s9628_s3 + $0x8] sm:$0xff]  }
   0x6   :  { %148 = vmatpush1.bf16.msra.mxu0 %v62_v12  ;;  %91 = vperm.xlu1 %4692, %v69_v14  }
   0x7   :  { %221 = vmatpush1.bf16.msra.mxu1 %v64_v13  ;;  %76 = vperm.xlu0 %4691, %v66_v18  }
   0x9   :  { %4482 = vmatmul.mubr.msk.bf16.vlgmr.msra.gmra.mrb[0].mxu0 %vm134_vm0, %v4738_v15 }
   0xa   :  { %4486 = vmatmul.mubr.msk.bf16.vlgmr.msra.gmra.mrb[0].mxu1 %vm134_vm0, %v4738_v15  ;;  %189 = vmatprep.mubr.bf16.mxu0 %v9639_v3 }
   0xb   :  { %262 = vmatprep.mubr.bf16.mxu1 %v9639_v3  ;;  %101 = vperm.xlu1 %4692, %v71_v16  }
   0xc   :  { %18 = vsyncpa [#allocation4], 0  ;;  %v454_v20 = vld [vmem:[%s9631_s6 + $0x8] sm:$0xff]  ;;  %v456_v22 = vld [vmem:[%s9631_s6 + $0x18] sm:$0xff]  ;;  %v4787_v30 = vmov 1   ;;  %v9649_v34 = vmov 2  }
   0xd   :  { %v67_v21 = vld [vmem:[%s9629_s4 + $0x8] sm:$0xff]  ;;  %v70_v23 = vld [vmem:[%s9629_s4 + $0x20] sm:$0xff]  ;;  %v4740_v24 = vld [vmem:[%s9628_s3 + $0x10] sm:$0xff]   ;;  %v9647_v36 = vmov 3   ;;  %v9643_v38 = vmov 4   ;;  %v9645_v39 = vmov 5  }
   0xe   :  { %81 = vperm.xlu0 %4691, %v67_v21   ;;  %v458_v25 = vld [vmem:[%s9631_s6 + $0x28] sm:$0xff]  ;;  %v72_v26 = vld [vmem:[%s9629_s4 + $0x30] sm:$0xff]  ;;  %v460_v27 = vld [vmem:[%s9631_s6 + $0x38] sm:$0xff]  ;;  %v9641_v41 = vmov 6   ;;  %s4793_s17 = smov 16   ;;  %s4794_s18 = smov 17  }
   0xf   :  { %111 = vperm.xlu1 %4692, %v73_v17   ;;  %v4741_v28 = vld [vmem:[%s9628_s3 + $0x18] sm:$0xff]   ;;  %v4967_v29 = vld [vmem:[%s9630_s5 + $0x8] sm:$0xff]  ;;  %v4972_v31 = vld [vmem:[%s9630_s5] sm:$0xff]  ;;  %s4795_s19 = smov 15   ;;  %s4796_s20 = smov 1   ;;  %vm3504_vm9 = vcmask 523264  }
  0x10   :  { %v4981_v32 = vld [vmem:[%s9630_s5 + $0x10] sm:$0xff]  ;;  %v4987_v33 = vld [vmem:[%s9630_s5 + $0x20] sm:$0xff]  ;;  %v4999_v35 = vld [vmem:[%s9630_s5 + $0x18] sm:$0xff]  ;;  %s4797_s22 = smov 127   ;;  %s4799_s23 = smov 113  }
  0x11   :  { %4483 = vmatmul.mubr.msk.bf16.gmra.mrb[4].mxu0 %vm134_vm0, %v4739_v19  ;;  %v5007_v37 = vld [vmem:[%s9630_s5 + $0x28] sm:$0xff]  ;;  %v5025_v40 = vld [vmem:[%s9630_s5 + $0x38] sm:$0xff]  ;;  %s4801_s25 = smov 112  }
  0x12   :  { %4487 = vmatmul.mubr.msk.bf16.gmra.mrb[4].mxu1 %vm134_vm0, %v4739_v19  ;;  %199 = vmatprep.mubr.bf16.mxu0 %v9639_v3 }
  0x13   :  { %272 = vmatprep.mubr.bf16.mxu1 %v9639_v3  ;;  %468 = vperm.xlu1 %4692, %v454_v20  }
  0x14   :  { %96 = vperm.xlu0 %4691, %v70_v23  }
  0x17   :  { %478 = vperm.xlu1 %4692, %v456_v22  }
  0x18   :  { %106 = vperm.xlu0 %4691, %v72_v26  }
  0x19   :  { %4484 = vmatmul.mubr.msk.bf16.gmra.mrb[8].mxu0 %vm134_vm0, %v4740_v24 }
  0x1a   :  { %4488 = vmatmul.mubr.msk.bf16.gmra.mrb[8].mxu1 %vm134_vm0, %v4740_v24  ;;  %209 = vmatprep.mubr.bf16.mxu0 %v9639_v3 }
  0x1b   :  { %282 = vmatprep.mubr.bf16.mxu1 %v9639_v3  ;;  %488 = vperm.xlu1 %4692, %v458_v25  }
  0x1c   :  { %4694 = vset.pattern.permute.xlu0 %v4787_v30 }
  0x1d   :  { %1019 = vperm.xlu0 %4694, %v4967_v29  }
  0x1f   :  { %498 = vperm.xlu1 %4692, %v460_v27  }
  0x21   :  { %4485 = vmatmul.mubr.msk.bf16.gmra.mrb[12].mxu0 %vm134_vm0, %v4741_v28  ;;  %1023 = vperm.xlu0 %4694, %v4981_v32  }
  0x22   :  { %4489 = vmatmul.mubr.msk.bf16.gmra.mrb[12].mxu1 %vm134_vm0, %v4741_v28 }
  0x23   :  { %696 = vperm.xlu1 %4692, %v4972_v31  }
  0x25   :  { %1031 = vperm.xlu0 %4694, %v4987_v33  }
  0x27   :  { %4693 = vset.pattern.permute.xlu1 %v4787_v30 }
  0x28   :  { %1015 = vperm.xlu1 %4693, %v4972_v31  }
  0x2c   :  { %4695 = vset.pattern.permute.xlu1 %v9639_v3 }
  0x2d   :  { %706 = vperm.xlu1 %4695, %v4981_v32  }
  0x31   :  { %4696 = vset.pattern.permute.xlu1 %v9649_v34 }
  0x32   :  { %1327 = vperm.xlu1 %4696, %v4972_v31  }
  0x36   :  { %1331 = vperm.xlu1 %4696, %v4967_v29  }
  0x3a   :  { %4697 = vset.pattern.permute.xlu1 %v4787_v30 }
  0x3b   :  { %1027 = vperm.xlu1 %4697, %v4999_v35  }
  0x3f   :  { %4698 = vset.pattern.permute.xlu1 %v9647_v36 }
  0x40   :  { %1639 = vperm.xlu1 %4698, %v4972_v31  }
  0x44   :  { %4699 = vset.pattern.permute.xlu1 %v9639_v3 }
  0x45   :  { %721 = vperm.xlu1 %4699, %v5007_v37  }
  0x49   :  { %4700 = vset.pattern.permute.xlu1 %v9649_v34 }
  0x4a   :  { %1335 = vperm.xlu1 %4700, %v4981_v32  }
  0x4e   :  { %4701 = vset.pattern.permute.xlu1 %v9643_v38 }
  0x4f   :  { %1799 = vperm.xlu1 %4701, %v4972_v31  }
  0x53   :  { %1803 = vperm.xlu1 %4701, %v4967_v29  }
  0x57   :  { %4702 = vset.pattern.permute.xlu1 %v4787_v30 }
  0x58   :  { %1035 = vperm.xlu1 %4702, %v5007_v37  }
  0x5c   :  { %4703 = vset.pattern.permute.xlu1 %v9647_v36 }
  0x5d   :  { %1647 = vperm.xlu1 %4703, %v4981_v32  }
  0x61   :  { %4704 = vset.pattern.permute.xlu1 %v9645_v39 }
  0x62   :  { %2111 = vperm.xlu1 %4704, %v4972_v31  }
  0x66   :  { %2115 = vperm.xlu1 %4704, %v4967_v29  }
  0x6a   :  { %4705 = vset.pattern.permute.xlu1 %v9639_v3 }
  0x6b   :  { %731 = vperm.xlu1 %4705, %v5025_v40  }
  0x6f   :  { %4706 = vset.pattern.permute.xlu1 %v9649_v34 }
  0x70   :  { %1343 = vperm.xlu1 %4706, %v4987_v33  }
  0x74   :  { %4707 = vset.pattern.permute.xlu1 %v9643_v38 }
  0x75   :  { %1811 = vperm.xlu1 %4707, %v4999_v35  }
  0x79   :  { %4708 = vset.pattern.permute.xlu1 %v9641_v41 }
  0x7a   :  { %2423 = vperm.xlu1 %4708, %v4972_v31  }
  0x7e   :  { %4710 = vset.pattern.permute.xlu1 %v4787_v30 }
  0x81   :  { %v5035_v42 = vpop.permute.xlu1 %86 }
  0x85   :  { %v5037_v43 = vpop.permute.xlu1 %91 }
  0x86   :  { %v77_v50 = vpop.permute.xlu0 %76 }
  0x8a   :  { %v5039_v44 = vpop.permute.xlu1 %101 }
  0x8d   :  { %v5055_v5 = vpop.permute.xlu0 %81 }
  0x8e   :  { %v5041_v45 = vpop.permute.xlu1 %111 }
  0x92   :  { %v5043_v46 = vpop.permute.xlu1 %468 }
  0x93   :  { %10078 = vst [vmem:[#allocation6_spill] sm:$0xff] %v5043_v46 }
  0x96   :  { %v5045_v47 = vpop.permute.xlu1 %478 }
  0x97   :  { %10079 = vst [vmem:[#allocation7_spill] sm:$0xff] %v5045_v47 }
  0x9a   :  { %v5047_v48 = vpop.permute.xlu1 %488 }
  0x9b   :  { %10080 = vst [vmem:[#allocation8_spill] sm:$0xff] %v5047_v48 }
  0x9e   :  { %v5049_v49 = vpop.permute.xlu1 %498 }
  0x9f   :  { %10081 = vst [vmem:[#allocation9_spill] sm:$0xff] %v5049_v49 }
  0xa2   :  { %v5061_v10 = vpop.permute.xlu1 %696 }
  0xa3   :  { %10082 = vst [vmem:[#allocation10_spill] sm:$0xff] %v5061_v10 }
  0xdc   :  { %v181_v51 = vpop.f32.mrb[0].mxu0 }
  0xdd   :  { %v254_v52 = vpop.f32.mrb[0].mxu1  ;;  %v182_v53 = vadd.f32 %v181_v51, %v77_v50  ;;  %v183_v55 = vpop.f32.mrb[1].mxu0 }
  0xde   :  { %v255_v54 = vadd.f32 %v254_v52, %v77_v50  ;;  %v256_v56 = vpop.f32.mrb[1].mxu1  ;;  %v184_v57 = vadd.f32 %v183_v55, %v77_v50  ;;  %v185_v58 = vpop.f32.mrb[2].mxu0 }
  0xdf   :  { %v258_v59 = vpop.f32.mrb[2].mxu1  ;;  %v293_v60 = vadd.f32 3.0, %v182_v53  ;;  %v5051_v62 = vpop.f32.mrb[3].mxu0  ;;  %v257_v4 = vadd.f32 %v256_v56, %v77_v50  ;;  %v186_v26 = vadd.f32 %v185_v58, %v5055_v5 }
  0xe0   :  { %v295_v61 = vadd.f32 3.0, %v255_v54  ;;  %v5053_v63 = vpop.f32.mrb[3].mxu1  ;;  %v294_v2 = vadd.f32 3.0, %v184_v57  ;;  %v259_v20 = vadd.f32 %v258_v59, %v5055_v5  ;;  %v5089_v50 = vpop.permute.xlu1 %1015 }
  0xe1   :  { %v325_v0 = vmax.f32 %v293_v60, 0.0  ;;  %v296_v15 = vadd.f32 3.0, %v257_v4  ;;  %10083 = vst [vmem:[#allocation11_spill] sm:$0xff] %v5089_v50  ;;  %v297_v56 = vadd.f32 3.0, %v186_v26 }
  0xe2   :  { %v327_v1 = vmax.f32 %v295_v61, 0.0  ;;  %v326_v14 = vmax.f32 %v294_v2, 0.0  ;;  %v299_v27 = vadd.f32 3.0, %v259_v20 }
  0xe3   :  { %v357_v6 = vmin.f32 %v325_v0, 6.0  ;;  %v328_v25 = vmax.f32 %v296_v15, 0.0  ;;  %v329_v2 = vmax.f32 %v297_v56, 0.0 }
  0xe4   :  { %v359_v7 = vmin.f32 %v327_v1, 6.0  ;;  %v5057_v8 = vpop.f32.mrb[4].mxu0  ;;  %v358_v24 = vmin.f32 %v326_v14, 6.0  ;;  %v331_v58 = vmax.f32 %v299_v27, 0.0  ;;  %v188_v27 = vadd.f32 %v5051_v62, %v5055_v5 }
  0xe5   :  { %v5059_v9 = vpop.f32.mrb[4].mxu1  ;;  %v389_v11 = vmul.f32 %v357_v6, %v182_v53  ;;  %v5063_v13 = vpop.f32.mrb[5].mxu0  ;;  %v360_v55 = vmin.f32 %v328_v25, 6.0 }
  0xe6   :  { %v391_v12 = vmul.f32 %v359_v7, %v255_v54  ;;  %v5065_v16 = vpop.f32.mrb[5].mxu1  ;;  %v5067_v17 = vpop.f32.mrb[6].mxu0  ;;  %v390_v54 = vmul.f32 %v358_v24, %v184_v57  ;;  %v363_v57 = vmin.f32 %v331_v58, 6.0  ;;  %v361_v24 = vmin.f32 %v329_v2, 6.0 }
  0xe7   :  { %v5069_v18 = vmul.f32 0.16666667, %v389_v11  ;;  %v5074_v21 = vpop.f32.mrb[6].mxu1  ;;  %v5076_v22 = vpop.f32.mrb[7].mxu0  ;;  %v392_v1 = vmul.f32 %v360_v55, %v257_v4  ;;  %v298_v2 = vadd.f32 3.0, %v188_v27  ;;  %v267_v34 = vadd.f32 %v5065_v16, %v5035_v42 }
  0xe8   :  { %v5071_v19 = vmul.f32 0.16666667, %v391_v12  ;;  %v5078_v23 = vpop.f32.mrb[7].mxu1  ;;  %v5111_v0 = vmul.f32 0.16666667, %v390_v54  ;;  %v5117_v11 = vpop.permute.xlu1 %706  ;;  %v395_v25 = vmul.f32 %v363_v57, %v259_v20  ;;  %v393_v58 = vmul.f32 %v361_v24, %v186_v26 }
  0xe9   :  { %541 = vrot.lane.b32.xlu0 %v5069_v18, %s4794_s18  ;;  %10084 = vst [vmem:[#allocation12_spill] sm:$0xff] %v5117_v11  ;;  %v5129_v15 = vmul.f32 0.16666667, %v392_v1  ;;  %v261_v20 = vadd.f32 %v5053_v63, %v5055_v5  ;;  %v330_v3 = vmax.f32 %v298_v2, 0.0  ;;  %v304_v46 = vadd.f32 3.0, %v267_v34 }
  0xea   :  { %894 = vrot.lane.b32.xlu1 %v5071_v19, %s4793_s17  ;;  %v5143_v1 = vmul.f32 0.16666667, %v395_v25  ;;  %v5153_v57 = vmul.f32 0.16666667, %v393_v58  ;;  %v269_v48 = vadd.f32 %v5074_v21, %v5037_v43 }
  0xeb   :  { %v300_v41 = vadd.f32 3.0, %v261_v20  ;;  %v362_v63 = vmin.f32 %v330_v3, 6.0 }
  0xec   :  { %v5085_v28 = vpop.f32.mrb[8].mxu0  ;;  %v5147_v62 = vpop.permute.xlu1 %1327 }
  0xed   :  { %v5087_v30 = vpop.f32.mrb[8].mxu1  ;;  %v5091_v51 = vpop.f32.mrb[9].mxu0  ;;  %573 = vrot.lane.b32.xlu0 %v5071_v19, %s4794_s18  ;;  %10085 = vst [vmem:[#allocation13_spill] sm:$0xff] %v5147_v62  ;;  %v332_v5 = vmax.f32 %v300_v41, 0.0  ;;  %v394_v24 = vmul.f32 %v362_v63, %v188_v27  ;;  %v265_v63 = vadd.f32 %v5059_v9, %v5035_v42 }
  0xee   :  { %1174 = vrot.lane.b32.xlu1 %v5069_v18, %s4795_s19  ;;  %v5097_v52 = vpop.f32.mrb[9].mxu1  ;;  %v5099_v53 = vpop.f32.mrb[10].mxu0 }
  0xef   :  { %v5101_v59 = vpop.f32.mrb[10].mxu1  ;;  %v5103_v60 = vpop.f32.mrb[11].mxu0  ;;  %v364_v25 = vmin.f32 %v332_v5, 6.0  ;;  %v5171_v2 = vmul.f32 0.16666667, %v394_v24  ;;  %v303_v5 = vadd.f32 3.0, %v265_v63 }
  0xf0   :  { %v5105_v61 = vpop.f32.mrb[11].mxu1  ;;  %v5159_v26 = vpop.permute.xlu1 %1331 }
  0xf1   :  { %862 = vrot.lane.b32.xlu0 %v5069_v18, %s4793_s17  ;;  %10086 = vst [vmem:[#allocation14_spill] sm:$0xff] %v5159_v26  ;;  %v396_v3 = vmul.f32 %v364_v25, %v261_v20  ;;  %v192_v20 = vadd.f32 %v5057_v8, %v5035_v42  ;;  %v335_v9 = vmax.f32 %v303_v5, 0.0 }
  0xf2   :  { %1206 = vrot.lane.b32.xlu1 %v5071_v19, %s4795_s19 }
  0xf3   :  { %v5179_v27 = vmul.f32 0.16666667, %v396_v3  ;;  %v301_v25 = vadd.f32 3.0, %v192_v20  ;;  %v194_v3 = vadd.f32 %v5063_v13, %v5035_v42  ;;  %v367_v39 = vmin.f32 %v335_v9, 6.0 }
  0xf4   :  { %v5113_v6 = vpop.f32.mrb[12].mxu0  ;;  %v5165_v58 = vpop.permute.xlu1 %1027  ;;  %v336_v9 = vmax.f32 %v304_v46, 0.0 }
  0xf5   :  { %v5115_v7 = vpop.f32.mrb[12].mxu1  ;;  %v5119_v12 = vpop.f32.mrb[13].mxu0  ;;  %878 = vrot.lane.b32.xlu0 %v5111_v0, %s4793_s17  ;;  %10087 = vst [vmem:[#allocation15_spill] sm:$0xff] %v5165_v58  ;;  %v333_v38 = vmax.f32 %v301_v25, 0.0  ;;  %v302_v36 = vadd.f32 3.0, %v194_v3  ;;  %v399_v5 = vmul.f32 %v367_v39, %v265_v63 }
  0xf6   :  { %1486 = vrot.lane.b32.xlu1 %v5069_v18, %s4796_s20  ;;  %v5125_v14 = vpop.f32.mrb[13].mxu1  ;;  %v5127_v4 = vpop.f32.mrb[14].mxu0  ;;  %v368_v63 = vmin.f32 %v336_v9, 6.0 }
  0xf7   :  { %v5133_v54 = vpop.f32.mrb[14].mxu1  ;;  %v5135_v55 = vpop.f32.mrb[15].mxu0  ;;  %v365_v13 = vmin.f32 %v333_v38, 6.0  ;;  %v334_v47 = vmax.f32 %v302_v36, 0.0  ;;  %v5215_v42 = vmul.f32 0.16666667, %v399_v5 }
  0xf8   :  { %v5137_v56 = vpop.f32.mrb[15].mxu1  ;;  %v5177_v41 = vpop.permute.xlu1 %1639 }
  0xf9   :  { %910 = vrot.lane.b32.xlu0 %v5129_v15, %s4793_s17  ;;  %10088 = vst [vmem:[#allocation16_spill] sm:$0xff] %v5177_v41  ;;  %v397_v25 = vmul.f32 %v365_v13, %v192_v20  ;;  %10091 = vst [vmem:[#allocation19_spill] sm:$0xff] %v5215_v42  ;;  %v366_v16 = vmin.f32 %v334_v47, 6.0  ;;  %v400_v47 = vmul.f32 %v368_v63, %v267_v34  ;;  %v307_v13 = vadd.f32 3.0, %v269_v48 }
  0xfa   :  { %1518 = vrot.lane.b32.xlu1 %v5071_v19, %s4796_s20  ;;  %v196_v20 = vadd.f32 %v5067_v17, %v5037_v43  ;;  %v271_v34 = vadd.f32 %v5078_v23, %v5037_v43 }
  0xfb   :  { %v5223_v38 = vmul.f32 0.16666667, %v397_v25  ;;  %v398_v39 = vmul.f32 %v366_v16, %v194_v3  ;;  %v5241_v21 = vmul.f32 0.16666667, %v400_v47  ;;  %v339_v25 = vmax.f32 %v307_v13, 0.0 }
  0xfc   :  { %v5189_v24 = vpop.permute.xlu1 %721  ;;  %v305_v3 = vadd.f32 3.0, %v196_v20  ;;  %v198_v16 = vadd.f32 %v5076_v22, %v5037_v43  ;;  %v97_v22 = vpop.permute.xlu0 %96  ;;  %v308_v47 = vadd.f32 3.0, %v271_v34 }
  0xfd   :  { %896 = vrot.lane.b32.xlu0 %v5143_v1, %s4793_s17  ;;  %10089 = vst [vmem:[#allocation17_spill] sm:$0xff] %v5189_v24  ;;  %10092 = vst [vmem:[#allocation20_spill] sm:$0xff] %v5223_v38  ;;  %v5231_v46 = vmul.f32 0.16666667, %v398_v39  ;;  %v371_v39 = vmin.f32 %v339_v25, 6.0  ;;  %v202_v58 = vadd.f32 %v5085_v28, %v97_v22 }
  0xfe   :  { %557 = vrot.lane.b32.xlu1 %v5111_v0, %s4794_s18  ;;  %10095 = vst [vmem:[#allocation23_spill] sm:$0xff] %v5241_v21  ;;  %v337_v9 = vmax.f32 %v305_v3, 0.0  ;;  %v306_v63 = vadd.f32 3.0, %v198_v16  ;;  %v340_v43 = vmax.f32 %v308_v47, 0.0  ;;  %v204_v47 = vadd.f32 %v5091_v51, %v97_v22 }
  0xff   :  { %10093 = vst [vmem:[#allocation21_spill] sm:$0xff] %v5231_v46  ;;  %v275_v51 = vadd.f32 %v5087_v30, %v97_v22  ;;  %v206_v30 = vadd.f32 %v5099_v53, %v5039_v44 }
 0x100   :  { %v5201_v8 = vpop.permute.xlu1 %1335  ;;  %v369_v13 = vmin.f32 %v337_v9, 6.0  ;;  %v338_v24 = vmax.f32 %v306_v63, 0.0 }
 0x101   :  { %1176 = vrot.lane.b32.xlu0 %v5153_v57, %s4795_s19  ;;  %10090 = vst [vmem:[#allocation18_spill] sm:$0xff] %v5201_v8 }
 0x102   :  { %589 = vrot.lane.b32.xlu1 %v5129_v15, %s4794_s18  ;;  %v401_v23 = vmul.f32 %v369_v13, %v196_v20  ;;  %v370_v25 = vmin.f32 %v338_v24, 6.0  ;;  %v310_v13 = vadd.f32 3.0, %v204_v47 }
 0x104   :  { %v5209_v49 = vpop.permute.xlu1 %1799  ;;  %v5270_v28 = vmul.f32 0.16666667, %v401_v23  ;;  %v402_v9 = vmul.f32 %v370_v25, %v198_v16  ;;  %v5282_v23 = vpop.permute.xlu0 %106  ;;  %v342_v25 = vmax.f32 %v310_v13, 0.0 }
 0x105   :  { %1208 = vrot.lane.b32.xlu0 %v5143_v1, %s4795_s19  ;;  %v287_v50 = vadd.f32 %v5125_v14, %v5282_v23 }
 0x106   :  { %1190 = vrot.lane.b32.xlu1 %v5111_v0, %s4795_s19  ;;  %v5279_v20 = vmul.f32 0.16666667, %v402_v9  ;;  %v311_v9 = vadd.f32 3.0, %v275_v51 }
 0x108   :  { %v5221_v36 = vpop.permute.xlu1 %1803 }
 0x109   :  { %1488 = vrot.lane.b32.xlu0 %v5153_v57, %s4796_s20 }
 0x10a   :  { %1222 = vrot.lane.b32.xlu1 %v5129_v15, %s4795_s19 }
 0x10c   :  { %v5235_v5 = vpop.permute.xlu1 %1035 }
 0x10d   :  { %559 = vrot.lane.b32.xlu0 %v5171_v2, %s4794_s18  ;;  %10094 = vst [vmem:[#allocation22_spill] sm:$0xff] %v5235_v5  ;;  %v403_v5 = vmul.f32 %v371_v39, %v269_v48  ;;  %v372_v48 = vmin.f32 %v340_v43, 6.0  ;;  %v277_v43 = vadd.f32 %v5097_v52, %v97_v22  ;;  %v5297_v52 = vpop.permute.xlu0 %1019 }
 0x10e   :  { %1502 = vrot.lane.b32.xlu1 %v5111_v0, %s4796_s20  ;;  %10100 = vst [vmem:[#allocation28_spill] sm:$0xff] %v5297_v52 }
 0x10f   :  { %v5264_v3 = vmul.f32 0.16666667, %v403_v5  ;;  %v404_v24 = vmul.f32 %v372_v48, %v271_v34  ;;  %v312_v48 = vadd.f32 3.0, %v277_v43 }
 0x110   :  { %v5251_v17 = vpop.permute.xlu1 %1647 }
 0x111   :  { %591 = vrot.lane.b32.xlu0 %v5179_v27, %s4794_s18  ;;  %10096 = vst [vmem:[#allocation24_spill] sm:$0xff] %v5251_v17  ;;  %v309_v17 = vadd.f32 3.0, %v202_v58 }
 0x112   :  { %1534 = vrot.lane.b32.xlu1 %v5129_v15, %s4796_s20 }
 0x113   :  { %v341_v63 = vmax.f32 %v309_v17, 0.0  ;;  %v5291_v17 = vmul.f32 0.16666667, %v404_v24  ;;  %v343_v24 = vmax.f32 %v311_v9, 0.0 }
 0x114   :  { %v5258_v8 = vpop.permute.xlu1 %2111 }
 0x115   :  { %1192 = vrot.lane.b32.xlu0 %v5171_v2, %s4795_s19  ;;  %10097 = vst [vmem:[#allocation25_spill] sm:$0xff] %v5258_v8  ;;  %v373_v5 = vmin.f32 %v341_v63, 6.0 }
 0x116   :  { %543 = vrot.lane.b32.xlu1 %v5153_v57, %s4794_s18 }
 0x117   :  { %v405_v34 = vmul.f32 %v373_v5, %v202_v58  ;;  %v279_v58 = vadd.f32 %v5101_v59, %v5039_v44 }
 0x118   :  { %v5272_v39 = vpop.permute.xlu1 %2115 }
 0x119   :  { %1224 = vrot.lane.b32.xlu0 %v5179_v27, %s4795_s19  ;;  %10098 = vst [vmem:[#allocation26_spill] sm:$0xff] %v5272_v39  ;;  %v5299_v63 = vmul.f32 0.16666667, %v405_v34  ;;  %v344_v39 = vmax.f32 %v312_v48, 0.0  ;;  %v313_v34 = vadd.f32 3.0, %v206_v30  ;;  %v315_v53 = vadd.f32 3.0, %v279_v58 }
 0x11a   :  { %575 = vrot.lane.b32.xlu1 %v5143_v1, %s4794_s18 }
 0x11b   :  { %10101 = vst [vmem:[#allocation29_spill] sm:$0xff] %v5299_v63  ;;  %v376_v13 = vmin.f32 %v344_v39, 6.0  ;;  %v345_v59 = vmax.f32 %v313_v34, 0.0 }
 0x11c   :  { %v5284_v16 = vpop.permute.xlu1 %731 }
 0x11d   :  { %1504 = vrot.lane.b32.xlu0 %v5171_v2, %s4796_s20  ;;  %10099 = vst [vmem:[#allocation27_spill] sm:$0xff] %v5284_v16  ;;  %v374_v16 = vmin.f32 %v342_v25, 6.0  ;;  %v5311_v25 = vpop.permute.xlu0 %1023  ;;  %v408_v11 = vmul.f32 %v376_v13, %v277_v43  ;;  %v281_v43 = vadd.f32 %v5105_v61, %v5039_v44 }
 0x11e   :  { %864 = vrot.lane.b32.xlu1 %v5153_v57, %s4793_s17  ;;  %10103 = vst [vmem:[#allocation31_spill] sm:$0xff] %v5311_v25 }
 0x11f   :  { %v406_v5 = vmul.f32 %v374_v16, %v204_v47  ;;  %v208_v16 = vadd.f32 %v5103_v60, %v5039_v44  ;;  %v5331_v25 = vmul.f32 0.16666667, %v408_v11  ;;  %v316_v44 = vadd.f32 3.0, %v281_v43 }
 0x120   :  { %v5303_v22 = vpop.permute.xlu1 %1343 }
 0x121   :  { %1536 = vrot.lane.b32.xlu0 %v5179_v27, %s4796_s20  ;;  %10102 = vst [vmem:[#allocation30_spill] sm:$0xff] %v5303_v22  ;;  %v375_v22 = vmin.f32 %v343_v24, 6.0  ;;  %v5319_v8 = vmul.f32 0.16666667, %v406_v5  ;;  %v5327_v47 = vpop.permute.xlu0 %1031  ;;  %10107 = vst [vmem:[#allocation35_spill] sm:$0xff] %v5331_v25  ;;  %v377_v24 = vmin.f32 %v345_v59, 6.0 }
 0x122   :  { %1520 = vrot.lane.b32.xlu1 %v5143_v1, %s4796_s20  ;;  %10106 = vst [vmem:[#allocation34_spill] sm:$0xff] %v5327_v47  ;;  %v347_v5 = vmax.f32 %v315_v53, 0.0  ;;  %v314_v47 = vadd.f32 3.0, %v208_v16  ;;  %v5362_v59 = vld [vmem:[%s9630_s5 + $0x30] sm:$0xff] }
 0x123   :  { %10104 = vst [vmem:[#allocation32_spill] sm:$0xff] %v5319_v8  ;;  %v407_v9 = vmul.f32 %v375_v22, %v275_v51  ;;  %v409_v34 = vmul.f32 %v377_v24, %v206_v30 }
 0x124   :  { %v5313_v48 = vpop.permute.xlu1 %1811  ;;  %v346_v53 = vmax.f32 %v314_v47, 0.0 }
 0x125   :  { %577 = vrot.lane.b32.xlu0 %v5215_v42, %s4794_s18  ;;  %v5339_v13 = vmul.f32 0.16666667, %v407_v9  ;;  %v5349_v51 = vmul.f32 0.16666667, %v409_v34 }
 0x126   :  { %880 = vrot.lane.b32.xlu1 %v5171_v2, %s4793_s17 }
 0x127   :  { %10108 = vst [vmem:[#allocation36_spill] sm:$0xff] %v5339_v13  ;;  %10110 = vst [vmem:[#allocation38_spill] sm:$0xff] %v5349_v51 }
 0x128   :  { %v5325_v39 = vpop.permute.xlu1 %2423 }
 0x129   :  { %866 = vrot.lane.b32.xlu0 %v5223_v38, %s4793_s17  ;;  %10105 = vst [vmem:[#allocation33_spill] sm:$0xff] %v5325_v39  ;;  %v379_v39 = vmin.f32 %v347_v5, 6.0 }
 0x12a   :  { %912 = vrot.lane.b32.xlu1 %v5179_v27, %s4793_s17 }
 0x12b   :  { %v411_v22 = vmul.f32 %v379_v39, %v279_v58  ;;  %v378_v58 = vmin.f32 %v346_v53, 6.0  ;;  %v348_v39 = vmax.f32 %v316_v44, 0.0 }
 0x12d   :  { %561 = vrot.lane.b32.xlu0 %v5231_v46, %s4794_s18  ;;  %v5364_v9 = vmul.f32 0.16666667, %v411_v22  ;;  %v410_v5 = vmul.f32 %v378_v58, %v208_v16  ;;  %v380_v34 = vmin.f32 %v348_v39, 6.0  ;;  %v10116_v22 = vmov 2  }
 0x12e   :  { %545 = vrot.lane.b32.xlu1 %v5223_v38, %s4794_s18 }
 0x12f   :  { %10113 = vst [vmem:[#allocation41_spill] sm:$0xff] %v5364_v9  ;;  %v5381_v53 = vmul.f32 0.16666667, %v410_v5  ;;  %v412_v44 = vmul.f32 %v380_v34, %v281_v43  ;;  %v214_v34 = vadd.f32 %v5119_v12, %v5282_v23 }
 0x131   :  { %593 = vrot.lane.b32.xlu0 %v5241_v21, %s4794_s18  ;;  %10117 = vst [vmem:[#allocation44_spill] sm:$0xff] %v5381_v53  ;;  %v5390_v16 = vmul.f32 0.16666667, %v412_v44  ;;  %v318_v10 = vadd.f32 3.0, %v214_v34 }
 0x132   :  { %898 = vrot.lane.b32.xlu1 %v5215_v42, %s4793_s17 }
 0x133   :  { %10120 = vst [vmem:[#allocation47_spill] sm:$0xff] %v5390_v16 }
 0x135   :  { %882 = vrot.lane.b32.xlu0 %v5231_v46, %s4793_s17 }
 0x136   :  { %1178 = vrot.lane.b32.xlu1 %v5223_v38, %s4795_s19 }
 0x139   :  { %914 = vrot.lane.b32.xlu0 %v5241_v21, %s4793_s17 }
 0x13a   :  { %1194 = vrot.lane.b32.xlu1 %v5231_v46, %s4795_s19 }
 0x13d   :  { %900 = vrot.lane.b32.xlu0 %v5264_v3, %s4793_s17 }
 0x13e   :  { %1226 = vrot.lane.b32.xlu1 %v5241_v21, %s4795_s19 }
 0x141   :  { %1180 = vrot.lane.b32.xlu0 %v5270_v28, %s4795_s19 }
 0x142   :  { %547 = vrot.lane.b32.xlu1 %v5270_v28, %s4794_s18 }
 0x145   :  { %1196 = vrot.lane.b32.xlu0 %v5279_v20, %s4795_s19 }
 0x146   :  { %579 = vrot.lane.b32.xlu1 %v5264_v3, %s4794_s18 }
 0x149   :  { %1228 = vrot.lane.b32.xlu0 %v5291_v17, %s4795_s19 }
 0x14a   :  { %868 = vrot.lane.b32.xlu1 %v5270_v28, %s4793_s17 }
 0x14d   :  { %549 = vrot.lane.b32.xlu0 %v5299_v63, %s4794_s18 }
 0x14e   :  { %563 = vrot.lane.b32.xlu1 %v5279_v20, %s4794_s18 }
 0x151   :  { %870 = vrot.lane.b32.xlu0 %v5299_v63, %s4793_s17 }
 0x152   :  { %595 = vrot.lane.b32.xlu1 %v5291_v17, %s4794_s18 }
 0x155   :  { %565 = vrot.lane.b32.xlu0 %v5319_v8, %s4794_s18 }
 0x156   :  { %884 = vrot.lane.b32.xlu1 %v5279_v20, %s4793_s17 }
 0x159   :  { %597 = vrot.lane.b32.xlu0 %v5331_v25, %s4794_s18 }
 0x15a   :  { %916 = vrot.lane.b32.xlu1 %v5291_v17, %s4793_s17 }
 0x15b   :  { %v5343_v11 = vpop.permute.xlu0 %541 }
 0x15c   :  { %v5341_v60 = vpop.permute.xlu1 %894  ;;  %10109 = vst [vmem:[#allocation37_spill] sm:$0xff] %v5343_v11 }
 0x15d   :  { %886 = vrot.lane.b32.xlu0 %v5319_v8, %s4793_s17 }
 0x15e   :  { %581 = vrot.lane.b32.xlu1 %v5339_v13, %s4794_s18 }
 0x15f   :  { %v5353_v30 = vpop.permute.xlu0 %573 }
 0x160   :  { %v5351_v61 = vpop.permute.xlu1 %1174  ;;  %10112 = vst [vmem:[#allocation40_spill] sm:$0xff] %v5353_v30 }
 0x161   :  { %10111 = vst [vmem:[#allocation39_spill] sm:$0xff] %v5351_v61  ;;  %918 = vrot.lane.b32.xlu0 %v5331_v25, %s4793_s17 }
 0x162   :  { %551 = vrot.lane.b32.xlu1 %v5349_v51, %s4794_s18 }
 0x163   :  { %v5368_v24 = vpop.permute.xlu0 %862 }
 0x164   :  { %v5366_v47 = vpop.permute.xlu1 %1206 }
 0x165   :  { %10114 = vst [vmem:[#allocation42_spill] sm:$0xff] %v5366_v47  ;;  %1039 = vperm.xlu0 %4694, %v5362_v59  }
 0x166   :  { %583 = vrot.lane.b32.xlu1 %v5364_v9, %s4794_s18 }
 0x167   :  { %v5375_v26 = vpop.permute.xlu0 %878 }
 0x168   :  { %v5373_v52 = vpop.permute.xlu1 %1486 }
 0x169   :  { %10115 = vst [vmem:[#allocation43_spill] sm:$0xff] %v5373_v52  ;;  %4709 = vset.pattern.permute.xlu0 %v10116_v22  ;;  %v350_v52 = vmax.f32 %v318_v10, 0.0  ;;  %v10131_v10 = vmov 3  }
 0x16a   :  { %872 = vrot.lane.b32.xlu1 %v5349_v51, %s4793_s17  ;;  %1339 = vperm.xlu0 %4709, %v4999_v35  }
 0x16b   :  { %v5385_v62 = vpop.permute.xlu0 %910  ;;  %v382_v47 = vmin.f32 %v350_v52, 6.0 }
 0x16c   :  { %v5383_v41 = vpop.permute.xlu1 %1518  ;;  %10119 = vst [vmem:[#allocation46_spill] sm:$0xff] %v5385_v62 }
 0x16d   :  { %10118 = vst [vmem:[#allocation45_spill] sm:$0xff] %v5383_v41  ;;  %v320_v41 = vadd.f32 3.0, %v287_v50 }
 0x16e   :  { %567 = vrot.lane.b32.xlu1 %v5381_v53, %s4794_s18  ;;  %1347 = vperm.xlu0 %4709, %v5007_v37  }
 0x16f   :  { %v5394_v39 = vpop.permute.xlu0 %896  ;;  %v352_v61 = vmax.f32 %v320_v41, 0.0 }
 0x170   :  { %v5392_v58 = vpop.permute.xlu1 %557  ;;  %10122 = vst [vmem:[#allocation49_spill] sm:$0xff] %v5394_v39 }
 0x171   :  { %10121 = vst [vmem:[#allocation48_spill] sm:$0xff] %v5392_v58 }
 0x172   :  { %599 = vrot.lane.b32.xlu1 %v5390_v16, %s4794_s18  ;;  %1212 = vrot.lane.b32.xlu0 %v5264_v3, %s4795_s19 }
 0x173   :  { %v5402_v5 = vpop.permute.xlu0 %1176 }
 0x174   :  { %v5400_v43 = vpop.permute.xlu1 %589  ;;  %10124 = vst [vmem:[#allocation51_spill] sm:$0xff] %v5402_v5 }
 0x175   :  { %10123 = vst [vmem:[#allocation50_spill] sm:$0xff] %v5400_v43  ;;  %v384_v43 = vmin.f32 %v352_v61, 6.0 }
 0x176   :  { %888 = vrot.lane.b32.xlu1 %v5381_v53, %s4793_s17  ;;  %1492 = vrot.lane.b32.xlu0 %v5270_v28, %s4796_s20 }
 0x177   :  { %v5412_v39 = vpop.permute.xlu0 %1208 }
 0x178   :  { %v5410_v44 = vpop.permute.xlu1 %1190  ;;  %10126 = vst [vmem:[#allocation53_spill] sm:$0xff] %v5412_v39 }
 0x179   :  { %10125 = vst [vmem:[#allocation52_spill] sm:$0xff] %v5410_v44  ;;  %v414_v44 = vmul.f32 %v382_v47, %v214_v34 }
 0x17a   :  { %920 = vrot.lane.b32.xlu1 %v5390_v16, %s4793_s17  ;;  %1508 = vrot.lane.b32.xlu0 %v5279_v20, %s4796_s20 }
 0x17b   :  { %v5422_v5 = vpop.permute.xlu0 %1488 }
 0x17c   :  { %v5420_v12 = vpop.permute.xlu1 %1222  ;;  %10128 = vst [vmem:[#allocation55_spill] sm:$0xff] %v5422_v5 }
 0x17d   :  { %10127 = vst [vmem:[#allocation54_spill] sm:$0xff] %v5420_v12 }
 0x17e   :  { %1043 = vperm.xlu1 %4710, %v5025_v40   ;;  %1540 = vrot.lane.b32.xlu0 %v5291_v17, %s4796_s20 }
 0x17f   :  { %v5429_v14 = vpop.permute.xlu0 %559 }
 0x180   :  { %v5427_v39 = vpop.permute.xlu1 %1502  ;;  %10130 = vst [vmem:[#allocation57_spill] sm:$0xff] %v5429_v14  ;;  %v5448_v14 = vmul.f32 0.16666667, %v414_v44 }
 0x181   :  { %10129 = vst [vmem:[#allocation56_spill] sm:$0xff] %v5427_v39  ;;  %v416_v39 = vmul.f32 %v384_v43, %v287_v50 }
 0x182   :  { %1210 = vrot.lane.b32.xlu1 %v5215_v42, %s4795_s19  ;;  %1974 = vrot.lane.b32.xlu0 %v5111_v0, %s4797_s22  ;;  %10136 = vst [vmem:[#allocation62_spill] sm:$0xff] %v5448_v14 }
 0x183   :  { %4711 = vset.pattern.permute.xlu1 %v10131_v10  ;;  %v5438_v12 = vpop.permute.xlu0 %591  ;;  %v5458_v34 = vmul.f32 0.16666667, %v416_v39  ;;  %v10144_v39 = vmov 5  }
 0x184   :  { %v5436_v5 = vpop.permute.xlu1 %1534  ;;  %10133 = vst [vmem:[#allocation59_spill] sm:$0xff] %v5438_v12  ;;  %v212_v12 = vadd.f32 %v5113_v6, %v5282_v23 }
 0x185   :  { %10132 = vst [vmem:[#allocation58_spill] sm:$0xff] %v5436_v5  ;;  %10139 = vst [vmem:[#allocation65_spill] sm:$0xff] %v5458_v34 }
 0x186   :  { %1490 = vrot.lane.b32.xlu1 %v5223_v38, %s4796_s20  ;;  %1990 = vrot.lane.b32.xlu0 %v5071_v19, %s4797_s22 }
 0x187   :  { %v5446_v52 = vpop.permute.xlu0 %1192 }
 0x188   :  { %v5444_v41 = vpop.permute.xlu1 %543  ;;  %10135 = vst [vmem:[#allocation61_spill] sm:$0xff] %v5446_v52 }
 0x189   :  { %10134 = vst [vmem:[#allocation60_spill] sm:$0xff] %v5444_v41  ;;  %v317_v41 = vadd.f32 3.0, %v212_v12 }
 0x18a   :  { %1506 = vrot.lane.b32.xlu1 %v5231_v46, %s4796_s20  ;;  %569 = vrot.lane.b32.xlu0 %v5448_v14, %s4794_s18 }
 0x18b   :  { %v5456_v47 = vpop.permute.xlu0 %1224 }
 0x18c   :  { %v5454_v61 = vpop.permute.xlu1 %575  ;;  %10138 = vst [vmem:[#allocation64_spill] sm:$0xff] %v5456_v47  ;;  %v216_v47 = vadd.f32 %v5127_v4, %v5041_v45 }
 0x18d   :  { %10137 = vst [vmem:[#allocation63_spill] sm:$0xff] %v5454_v61 }
 0x18e   :  { %1538 = vrot.lane.b32.xlu1 %v5241_v21, %s4796_s20  ;;  %601 = vrot.lane.b32.xlu0 %v5458_v34, %s4794_s18  ;;  %v321_v52 = vadd.f32 3.0, %v216_v47 }
 0x18f   :  { %v5466_v50 = vpop.permute.xlu0 %1504 }
 0x190   :  { %v5464_v44 = vpop.permute.xlu1 %864  ;;  %10141 = vst [vmem:[#allocation67_spill] sm:$0xff] %v5466_v50  ;;  %v353_v30 = vmax.f32 %v321_v52, 0.0 }
 0x191   :  { %10140 = vst [vmem:[#allocation66_spill] sm:$0xff] %v5464_v44 }
 0x192   :  { %1655 = vperm.xlu1 %4711, %v4987_v33   ;;  %902 = vrot.lane.b32.xlu0 %v5339_v13, %s4793_s17 }
 0x193   :  { %v5473_v61 = vpop.permute.xlu0 %1536 }
 0x194   :  { %v5471_v43 = vpop.permute.xlu1 %1520  ;;  %10143 = vst [vmem:[#allocation69_spill] sm:$0xff] %v5473_v61 }
 0x195   :  { %10142 = vst [vmem:[#allocation68_spill] sm:$0xff] %v5471_v43 }
 0x196   :  { %1958 = vrot.lane.b32.xlu1 %v5069_v18, %s4797_s22  ;;  %1182 = vrot.lane.b32.xlu0 %v5299_v63, %s4795_s19 }
 0x197   :  { %4712 = vset.pattern.permute.xlu1 %v10144_v39  ;;  %v5482_v50 = vpop.permute.xlu0 %577 }
 0x198   :  { %v5480_v44 = vpop.permute.xlu1 %880  ;;  %10146 = vst [vmem:[#allocation71_spill] sm:$0xff] %v5482_v50 }
 0x199   :  { %10145 = vst [vmem:[#allocation70_spill] sm:$0xff] %v5480_v44  ;;  %v349_v44 = vmax.f32 %v317_v41, 0.0 }
 0x19a   :  { %1960 = vrot.lane.b32.xlu1 %v5153_v57, %s4797_s22  ;;  %1198 = vrot.lane.b32.xlu0 %v5319_v8, %s4795_s19 }
 0x19b   :  { %v5492_v43 = vpop.permute.xlu0 %866  ;;  %v381_v5 = vmin.f32 %v349_v44, 6.0  ;;  %v9711_v44 = vmov 7  }
 0x19c   :  { %v5490_v61 = vpop.permute.xlu1 %912  ;;  %10148 = vst [vmem:[#allocation73_spill] sm:$0xff] %v5492_v43 }
 0x19d   :  { %10147 = vst [vmem:[#allocation72_spill] sm:$0xff] %v5490_v61  ;;  %v218_v61 = vadd.f32 %v5135_v55, %v5041_v45 }
 0x19e   :  { %1976 = vrot.lane.b32.xlu1 %v5171_v2, %s4797_s22  ;;  %1230 = vrot.lane.b32.xlu0 %v5331_v25, %s4795_s19 }
 0x19f   :  { %v5502_v50 = vpop.permute.xlu0 %561  ;;  %v322_v11 = vadd.f32 3.0, %v218_v61 }
 0x1a0   :  { %v5500_v6 = vpop.permute.xlu1 %545  ;;  %10150 = vst [vmem:[#allocation75_spill] sm:$0xff] %v5502_v50  ;;  %v413_v50 = vmul.f32 %v381_v5, %v212_v12 }
 0x1a1   :  { %10149 = vst [vmem:[#allocation74_spill] sm:$0xff] %v5500_v6  ;;  %v291_v6 = vadd.f32 %v5137_v56, %v5041_v45  ;;  %v354_v58 = vmax.f32 %v322_v11, 0.0 }
 0x1a2   :  { %1992 = vrot.lane.b32.xlu1 %v5143_v1, %s4797_s22  ;;  %1351 = vperm.xlu0 %4709, %v5362_v59  }
 0x1a3   :  { %v5511_v43 = vpop.permute.xlu0 %593  ;;  %v386_v62 = vmin.f32 %v354_v58, 6.0 }
 0x1a4   :  { %v5509_v4 = vpop.permute.xlu1 %898  ;;  %10152 = vst [vmem:[#allocation77_spill] sm:$0xff] %v5511_v43  ;;  %v324_v43 = vadd.f32 3.0, %v291_v6 }
 0x1a5   :  { %10151 = vst [vmem:[#allocation76_spill] sm:$0xff] %v5509_v4  ;;  %v385_v4 = vmin.f32 %v353_v30, 6.0  ;;  %v418_v5 = vmul.f32 %v386_v62, %v218_v61 }
 0x1a6   :  { %2123 = vperm.xlu1 %4712, %v4999_v35   ;;  %4714 = vset.pattern.permute.xlu0 %v10131_v10 }
 0x1a7   :  { %1643 = vperm.xlu0 %4714, %v4967_v29   ;;  %v5520_v41 = vpop.permute.xlu0 %882  ;;  %v417_v29 = vmul.f32 %v385_v4, %v216_v47 }
 0x1a8   :  { %v5517_v55 = vpop.permute.xlu1 %1178  ;;  %10154 = vst [vmem:[#allocation79_spill] sm:$0xff] %v5520_v41  ;;  %v356_v41 = vmax.f32 %v324_v43, 0.0 }
 0x1a9   :  { %10153 = vst [vmem:[#allocation78_spill] sm:$0xff] %v5517_v55  ;;  %v5529_v55 = vmul.f32 0.16666667, %v413_v50  ;;  %v5549_v50 = vmul.f32 0.16666667, %v418_v5 }
 0x1aa   :  { %4713 = vset.pattern.permute.xlu1 %v9711_v44  ;;  %v388_v12 = vmin.f32 %v356_v41, 6.0 }
 0x1ab   :  { %2735 = vperm.xlu1 %4713, %v4972_v31   ;;  %1651 = vperm.xlu0 %4714, %v4999_v35   ;;  %v5527_v52 = vpop.permute.xlu0 %914  ;;  %10155 = vst [vmem:[#allocation80_spill] sm:$0xff] %v5529_v55  ;;  %v5539_v31 = vmul.f32 0.16666667, %v417_v29  ;;  %10160 = vst [vmem:[#allocation85_spill] sm:$0xff] %v5549_v50 }
 0x1ac   :  { %v5524_v56 = vpop.permute.xlu1 %1194  ;;  %v420_v43 = vmul.f32 %v388_v12, %v291_v6 }
 0x1ad   :  { %10157 = vst [vmem:[#allocation82_spill] sm:$0xff] %v5539_v31 }
 0x1ae   :  { %v5559_v61 = vmul.f32 0.16666667, %v420_v43 }
 0x1af   :  { %553 = vrot.lane.b32.xlu1 %v5529_v55, %s4794_s18  ;;  %1659 = vperm.xlu0 %4714, %v5007_v37   ;;  %v5536_v30 = vpop.permute.xlu0 %900 }
 0x1b0   :  { %v5533_v11 = vpop.permute.xlu1 %1226  ;;  %10156 = vst [vmem:[#allocation81_spill] sm:$0xff] %v5536_v30  ;;  %4715 = vset.pattern.permute.xlu1 %v10116_v22  ;;  %10162 = vst [vmem:[#allocation87_spill] sm:$0xff] %v5559_v61  ;;  %v10338_v30 = vld [vmem:[#allocation43_spill] sm:$0xff] }
 0x1b3   :  { %555 = vrot.lane.b32.xlu1 %v5539_v31, %s4794_s18  ;;  %1524 = vrot.lane.b32.xlu0 %v5264_v3, %s4796_s20  ;;  %v5547_v47 = vpop.permute.xlu0 %1180 }
 0x1b4   :  { %v5543_v58 = vpop.permute.xlu1 %547  ;;  %10159 = vst [vmem:[#allocation84_spill] sm:$0xff] %v5547_v47  ;;  %v10345_v47 = vld [vmem:[#allocation10_spill] sm:$0xff] }
 0x1b5   :  { %10158 = vst [vmem:[#allocation83_spill] sm:$0xff] %v5543_v58 }
 0x1b7   :  { %571 = vrot.lane.b32.xlu1 %v5549_v50, %s4794_s18  ;;  %2270 = vrot.lane.b32.xlu0 %v5069_v18, %s4799_s23  ;;  %v5557_v62 = vpop.permute.xlu0 %1196 }
 0x1b8   :  { %v5553_v22 = vpop.permute.xlu1 %579 }
 0x1b9   :  { %10161 = vst [vmem:[#allocation86_spill] sm:$0xff] %v5553_v22 }
 0x1bb   :  { %603 = vrot.lane.b32.xlu1 %v5559_v61, %s4794_s18  ;;  %2286 = vrot.lane.b32.xlu0 %v5111_v0, %s4799_s23  ;;  %v5567_v6 = vpop.permute.xlu0 %1228 }
 0x1bc   :  { %v5563_v4 = vpop.permute.xlu1 %868  ;;  %10163 = vst [vmem:[#allocation88_spill] sm:$0xff] %v5567_v6 }
 0x1bf   :  { %904 = vrot.lane.b32.xlu1 %v5364_v9, %s4793_s17  ;;  %2302 = vrot.lane.b32.xlu0 %v5071_v19, %s4799_s23  ;;  %v5575_v29 = vpop.permute.xlu0 %549 }
 0x1c0   :  { %v5571_v41 = vpop.permute.xlu1 %563  ;;  %10165 = vst [vmem:[#allocation90_spill] sm:$0xff] %v5575_v29 }
 0x1c1   :  { %10164 = vst [vmem:[#allocation89_spill] sm:$0xff] %v5571_v41  ;;  %v289_v41 = vadd.f32 %v5133_v54, %v5041_v45 }
 0x1c3   :  { %1184 = vrot.lane.b32.xlu1 %v5349_v51, %s4795_s19  ;;  %874 = vrot.lane.b32.xlu0 %v5529_v55, %s4793_s17  ;;  %v5589_v43 = vpop.permute.xlu0 %870 }
 0x1c4   :  { %v5579_v5 = vpop.permute.xlu1 %595  ;;  %10167 = vst [vmem:[#allocation92_spill] sm:$0xff] %v5589_v43  ;;  %v10171_v43 = vmov 4  }
 0x1c5   :  { %10166 = vst [vmem:[#allocation91_spill] sm:$0xff] %v5579_v5 }
 0x1c7   :  { %1200 = vrot.lane.b32.xlu1 %v5381_v53, %s4795_s19  ;;  %890 = vrot.lane.b32.xlu0 %v5448_v14, %s4793_s17  ;;  %v5597_v29 = vpop.permute.xlu0 %565 }
 0x1c8   :  { %v5585_v12 = vpop.permute.xlu1 %884  ;;  %10169 = vst [vmem:[#allocation94_spill] sm:$0xff] %v5597_v29  ;;  %v10176_v29 = vmov 6  }
 0x1cb   :  { %1232 = vrot.lane.b32.xlu1 %v5390_v16, %s4795_s19  ;;  %922 = vrot.lane.b32.xlu0 %v5458_v34, %s4793_s17 }
 0x1cc   :  { %v5593_v44 = vpop.permute.xlu1 %916 }
 0x1cd   :  { %10168 = vst [vmem:[#allocation93_spill] sm:$0xff] %v5593_v44  ;;  %v5609_v44 = vpop.permute.xlu0 %597 }
 0x1ce   :  { %10172 = vst [vmem:[#allocation96_spill] sm:$0xff] %v5609_v44 }
 0x1cf   :  { %1355 = vperm.xlu1 %4715, %v5025_v40   ;;  %1214 = vrot.lane.b32.xlu0 %v5339_v13, %s4795_s19 }
 0x1d0   :  { %v5600_v5 = vpop.permute.xlu1 %581 }
 0x1d1   :  { %10170 = vst [vmem:[#allocation95_spill] sm:$0xff] %v5600_v5  ;;  %v5616_v40 = vpop.permute.xlu0 %886 }
 0x1d2   :  { %10174 = vst [vmem:[#allocation98_spill] sm:$0xff] %v5616_v40  ;;  %v285_v40 = vadd.f32 %v5115_v7, %v5282_v23  ;;  %v323_v23 = vadd.f32 3.0, %v289_v41 }
 0x1d3   :  { %1522 = vrot.lane.b32.xlu1 %v5215_v42, %s4796_s20  ;;  %1494 = vrot.lane.b32.xlu0 %v5299_v63, %s4796_s20 }
 0x1d4   :  { %4716 = vset.pattern.permute.xlu1 %v10171_v43  ;;  %v5611_v58 = vpop.permute.xlu1 %551  ;;  %v355_v54 = vmax.f32 %v323_v23, 0.0 }
 0x1d5   :  { %10173 = vst [vmem:[#allocation97_spill] sm:$0xff] %v5611_v58  ;;  %v319_v58 = vadd.f32 3.0, %v285_v40 }
 0x1d7   :  { %1815 = vperm.xlu1 %4716, %v4987_v33   ;;  %1510 = vrot.lane.b32.xlu0 %v5319_v8, %s4796_s20  ;;  %v5628_v33 = vpop.permute.xlu0 %918  ;;  %v351_v7 = vmax.f32 %v319_v58, 0.0  ;;  %v387_v58 = vmin.f32 %v355_v54, 6.0 }
 0x1d8   :  { %v5618_v5 = vpop.permute.xlu1 %583  ;;  %10177 = vst [vmem:[#allocation100_spill] sm:$0xff] %v5628_v33 }
 0x1d9   :  { %10175 = vst [vmem:[#allocation99_spill] sm:$0xff] %v5618_v5  ;;  %v383_v45 = vmin.f32 %v351_v7, 6.0  ;;  %v4743_v7 = vld [vmem:[%s9630_s5] sm:$0xff]  ;;  %v419_v23 = vmul.f32 %v387_v58, %v289_v41 }
 0x1db   :  { %2006 = vrot.lane.b32.xlu1 %v5129_v15, %s4797_s22  ;;  %1542 = vrot.lane.b32.xlu0 %v5331_v25, %s4796_s20  ;;  %v5681_v54 = vmul.f32 0.16666667, %v419_v23 }
 0x1dc   :  { %4717 = vset.pattern.permute.xlu1 %v10176_v29  ;;  %v5630_v44 = vpop.permute.xlu1 %872 }
 0x1dd   :  { %10178 = vst [vmem:[#allocation101_spill] sm:$0xff] %v5630_v44  ;;  %10189 = vst [vmem:[#allocation112_spill] sm:$0xff] %v5681_v54 }
 0x1df   :  { %2008 = vrot.lane.b32.xlu1 %v5179_v27, %s4797_s22  ;;  %1663 = vperm.xlu0 %4714, %v5362_v59  }
 0x1e0   :  { %v5642_v22 = vpop.permute.xlu1 %567 }
 0x1e1   :  { %10180 = vst [vmem:[#allocation103_spill] sm:$0xff] %v5642_v22  ;;  %v9731_v22 = vmov 8  }
 0x1e3   :  { %2272 = vrot.lane.b32.xlu1 %v5153_v57, %s4799_s23  ;;  %4719 = vset.pattern.permute.xlu0 %v10171_v43 }
 0x1e4   :  { %1807 = vperm.xlu0 %4719, %v4981_v32   ;;  %v5638_v5 = vpop.permute.xlu0 %1039  ;;  %v5651_v32 = vpop.permute.xlu1 %599 }
 0x1e5   :  { %10179 = vst [vmem:[#allocation102_spill] sm:$0xff] %v5638_v5  ;;  %10182 = vst [vmem:[#allocation105_spill] sm:$0xff] %v5651_v32  ;;  %v10332_v32 = vld [vmem:[#allocation42_spill] sm:$0xff] }
 0x1e7   :  { %2288 = vrot.lane.b32.xlu1 %v5171_v2, %s4799_s23 }
 0x1e8   :  { %1819 = vperm.xlu0 %4719, %v5007_v37   ;;  %v415_v37 = vmul.f32 %v383_v45, %v285_v40  ;;  %v5662_v44 = vpop.permute.xlu1 %888 }
 0x1e9   :  { %v5647_v33 = vpop.permute.xlu0 %1339  ;;  %10185 = vst [vmem:[#allocation108_spill] sm:$0xff] %v5662_v44 }
 0x1ea   :  { %10181 = vst [vmem:[#allocation104_spill] sm:$0xff] %v5647_v33 }
 0x1eb   :  { %2304 = vrot.lane.b32.xlu1 %v5143_v1, %s4799_s23 }
 0x1ec   :  { %1964 = vrot.lane.b32.xlu0 %v5270_v28, %s4797_s22  ;;  %v5676_v45 = vpop.permute.xlu1 %920 }
 0x1ed   :  { %v5655_v5 = vpop.permute.xlu0 %1347  ;;  %10188 = vst [vmem:[#allocation111_spill] sm:$0xff] %v5676_v45  ;;  %v10330_v45 = vld [vmem:[#allocation39_spill] sm:$0xff] }
 0x1ee   :  { %10183 = vst [vmem:[#allocation106_spill] sm:$0xff] %v5655_v5 }
 0x1ef   :  { %2435 = vperm.xlu1 %4717, %v4999_v35   ;;  %v5670_v35 = vmul.f32 0.16666667, %v415_v37 }
 0x1f0   :  { %1980 = vrot.lane.b32.xlu0 %v5279_v20, %s4797_s22 }
 0x1f1   :  { %v5660_v33 = vpop.permute.xlu0 %1212  ;;  %10186 = vst [vmem:[#allocation109_spill] sm:$0xff] %v5670_v35 }
 0x1f2   :  { %10184 = vst [vmem:[#allocation107_spill] sm:$0xff] %v5660_v33 }
 0x1f3   :  { %4718 = vset.pattern.permute.xlu1 %v9731_v22 }
 0x1f4   :  { %3047 = vperm.xlu1 %4718, %v4743_v7   ;;  %1996 = vrot.lane.b32.xlu0 %v5264_v3, %s4797_s22 }
 0x1f5   :  { %v5672_v40 = vpop.permute.xlu0 %1492 }
 0x1f6   :  { %10187 = vst [vmem:[#allocation110_spill] sm:$0xff] %v5672_v40 }
 0x1f8   :  { %585 = vrot.lane.b32.xlu1 %v5670_v35, %s4794_s18  ;;  %2582 = vrot.lane.b32.xlu0 %v5069_v18, %s4801_s25 }
 0x1f9   :  { %4720 = vset.pattern.permute.xlu1 %v10131_v10  ;;  %v5683_v7 = vpop.permute.xlu0 %1508 }
 0x1fa   :  { %10190 = vst [vmem:[#allocation113_spill] sm:$0xff] %v5683_v7 }
 0x1fc   :  { %587 = vrot.lane.b32.xlu1 %v5681_v54, %s4794_s18  ;;  %2598 = vrot.lane.b32.xlu0 %v5111_v0, %s4801_s25  ;;  %s4802_s18 = smov 111  }
 0x1fd   :  { %v5687_v41 = vpop.permute.xlu1 %1043  ;;  %v5691_v37 = vpop.permute.xlu0 %1540 }
 0x1fe   :  { %10191 = vst [vmem:[#allocation114_spill] sm:$0xff] %v5687_v41  ;;  %10192 = vst [vmem:[#allocation115_spill] sm:$0xff] %v5691_v37 }
 0x200   :  { %876 = vrot.lane.b32.xlu1 %v5539_v31, %s4793_s17  ;;  %2614 = vrot.lane.b32.xlu0 %v5071_v19, %s4801_s25 }
 0x201   :  { %v5695_v58 = vpop.permute.xlu1 %1210  ;;  %v5699_v10 = vpop.permute.xlu0 %1974 }
 0x202   :  { %10193 = vst [vmem:[#allocation116_spill] sm:$0xff] %v5695_v58  ;;  %10194 = vst [vmem:[#allocation117_spill] sm:$0xff] %v5699_v10 }
 0x204   :  { %892 = vrot.lane.b32.xlu1 %v5549_v50, %s4793_s17  ;;  %908 = vrot.lane.b32.xlu0 %v5681_v54, %s4793_s17 }
 0x205   :  { %v5703_v23 = vpop.permute.xlu1 %1490  ;;  %v5707_v22 = vpop.permute.xlu0 %1990 }
 0x206   :  { %10195 = vst [vmem:[#allocation118_spill] sm:$0xff] %v5703_v23  ;;  %10196 = vst [vmem:[#allocation119_spill] sm:$0xff] %v5707_v22 }
 0x208   :  { %924 = vrot.lane.b32.xlu1 %v5559_v61, %s4793_s17  ;;  %1188 = vrot.lane.b32.xlu0 %v5539_v31, %s4795_s19 }
 0x209   :  { %v5711_v41 = vpop.permute.xlu1 %1506  ;;  %v5715_v5 = vpop.permute.xlu0 %569 }
 0x20a   :  { %10197 = vst [vmem:[#allocation120_spill] sm:$0xff] %v5711_v41  ;;  %10198 = vst [vmem:[#allocation121_spill] sm:$0xff] %v5715_v5 }
 0x20c   :  { %1216 = vrot.lane.b32.xlu1 %v5364_v9, %s4795_s19  ;;  %1204 = vrot.lane.b32.xlu0 %v5549_v50, %s4795_s19 }
 0x20d   :  { %v5719_v10 = vpop.permute.xlu1 %1538  ;;  %v5723_v23 = vpop.permute.xlu0 %601 }
 0x20e   :  { %10199 = vst [vmem:[#allocation122_spill] sm:$0xff] %v5719_v10  ;;  %10200 = vst [vmem:[#allocation123_spill] sm:$0xff] %v5723_v23 }
 0x210   :  { %1496 = vrot.lane.b32.xlu1 %v5349_v51, %s4796_s20  ;;  %1236 = vrot.lane.b32.xlu0 %v5559_v61, %s4795_s19 }
 0x211   :  { %v5727_v22 = vpop.permute.xlu1 %1655  ;;  %v5731_v41 = vpop.permute.xlu0 %902 }
 0x212   :  { %10201 = vst [vmem:[#allocation124_spill] sm:$0xff] %v5727_v22  ;;  %10202 = vst [vmem:[#allocation125_spill] sm:$0xff] %v5731_v41  ;;  %v5748_v22 = vld [vmem:[%s9630_s5 + $0x38] sm:$0xff] }
 0x214   :  { %1512 = vrot.lane.b32.xlu1 %v5381_v53, %s4796_s20  ;;  %1528 = vrot.lane.b32.xlu0 %v5364_v9, %s4796_s20 }
 0x215   :  { %v5735_v5 = vpop.permute.xlu1 %1958  ;;  %v5739_v10 = vpop.permute.xlu0 %1182 }
 0x216   :  { %10203 = vst [vmem:[#allocation126_spill] sm:$0xff] %v5735_v5  ;;  %10204 = vst [vmem:[#allocation127_spill] sm:$0xff] %v5739_v10  ;;  %v5760_v10 = vld [vmem:[%s9630_s5 + $0x10] sm:$0xff] }
 0x218   :  { %1544 = vrot.lane.b32.xlu1 %v5390_v16, %s4796_s20  ;;  %1827 = vperm.xlu0 %4719, %v5748_v22  }
 0x219   :  { %v5743_v23 = vpop.permute.xlu1 %1960  ;;  %v5751_v41 = vpop.permute.xlu0 %1198 }
 0x21a   :  { %10205 = vst [vmem:[#allocation128_spill] sm:$0xff] %v5743_v23  ;;  %10206 = vst [vmem:[#allocation129_spill] sm:$0xff] %v5751_v41 }
 0x21c   :  { %1667 = vperm.xlu1 %4720, %v5748_v22   ;;  %4724 = vset.pattern.permute.xlu0 %v10144_v39 }
 0x21d   :  { %v5754_v5 = vpop.permute.xlu1 %1976  ;;  %2119 = vperm.xlu0 %4724, %v5760_v10   ;;  %v5763_v23 = vpop.permute.xlu0 %1230 }
 0x21e   :  { %10207 = vst [vmem:[#allocation130_spill] sm:$0xff] %v5754_v5  ;;  %10208 = vst [vmem:[#allocation131_spill] sm:$0xff] %v5763_v23  ;;  %v5773_v5 = vld [vmem:[%s9630_s5 + $0x28] sm:$0xff] }
 0x220   :  { %1962 = vrot.lane.b32.xlu1 %v5223_v38, %s4797_s22 }
 0x221   :  { %v5767_v37 = vpop.permute.xlu1 %1992  ;;  %4721 = vset.pattern.permute.xlu1 %v10144_v39  ;;  %2131 = vperm.xlu0 %4724, %v5773_v5   ;;  %v5776_v41 = vpop.permute.xlu0 %1351 }
 0x222   :  { %10209 = vst [vmem:[#allocation132_spill] sm:$0xff] %v5767_v37  ;;  %10210 = vst [vmem:[#allocation133_spill] sm:$0xff] %v5776_v41  ;;  %v5797_v41 = vld [vmem:[%s9630_s5 + $0x20] sm:$0xff] }
 0x223   :  { %10215 = vst [vmem:[#allocation138_spill] sm:$0xff] %v5797_v41 }
 0x224   :  { %1978 = vrot.lane.b32.xlu1 %v5231_v46, %s4797_s22 }
 0x225   :  { %v5780_v23 = vpop.permute.xlu1 %2123  ;;  %2274 = vrot.lane.b32.xlu0 %v5223_v38, %s4799_s23 }
 0x226   :  { %10211 = vst [vmem:[#allocation134_spill] sm:$0xff] %v5780_v23  ;;  %v5784_v37 = vpop.permute.xlu0 %1643 }
 0x227   :  { %10212 = vst [vmem:[#allocation135_spill] sm:$0xff] %v5784_v37 }
 0x228   :  { %1994 = vrot.lane.b32.xlu1 %v5215_v42, %s4797_s22 }
 0x229   :  { %2290 = vrot.lane.b32.xlu0 %v5231_v46, %s4799_s23 }
 0x22a   :  { %v5788_v40 = vpop.permute.xlu1 %2735  ;;  %v5792_v7 = vpop.permute.xlu0 %1651 }
 0x22b   :  { %10213 = vst [vmem:[#allocation136_spill] sm:$0xff] %v5788_v40  ;;  %10214 = vst [vmem:[#allocation137_spill] sm:$0xff] %v5792_v7  ;;  %v10218_v40 = vmov 7  }
 0x22c   :  { %2127 = vperm.xlu1 %4721, %v5797_v41  }
 0x22d   :  { %2306 = vrot.lane.b32.xlu0 %v5215_v42, %s4799_s23 }
 0x22e   :  { %v5800_v23 = vpop.permute.xlu1 %553  ;;  %v5804_v37 = vpop.permute.xlu0 %1659 }
 0x22f   :  { %10216 = vst [vmem:[#allocation139_spill] sm:$0xff] %v5800_v23  ;;  %10217 = vst [vmem:[#allocation140_spill] sm:$0xff] %v5804_v37 }
 0x230   :  { %2318 = vrot.lane.b32.xlu1 %v5129_v15, %s4799_s23 }
 0x231   :  { %4722 = vset.pattern.permute.xlu1 %v10218_v40  ;;  %2632 = vrot.lane.b32.xlu0 %v5179_v27, %s4801_s25 }
 0x232   :  { %v5809_v7 = vpop.permute.xlu1 %555  ;;  %v5813_v58 = vpop.permute.xlu0 %1524 }
 0x233   :  { %10219 = vst [vmem:[#allocation141_spill] sm:$0xff] %v5809_v7  ;;  %10220 = vst [vmem:[#allocation142_spill] sm:$0xff] %v5813_v58 }
 0x234   :  { %2320 = vrot.lane.b32.xlu1 %v5179_v27, %s4799_s23 }
 0x235   :  { %2896 = vrot.lane.b32.xlu0 %v5153_v57, %s4802_s18 }
 0x236   :  { %v5817_v23 = vpop.permute.xlu1 %571  ;;  %v5821_v37 = vpop.permute.xlu0 %2270 }
 0x237   :  { %10221 = vst [vmem:[#allocation143_spill] sm:$0xff] %v5817_v23  ;;  %10222 = vst [vmem:[#allocation144_spill] sm:$0xff] %v5821_v37 }
 0x238   :  { %2584 = vrot.lane.b32.xlu1 %v5153_v57, %s4801_s25 }
 0x239   :  { %2912 = vrot.lane.b32.xlu0 %v5171_v2, %s4802_s18 }
 0x23a   :  { %v5825_v7 = vpop.permute.xlu1 %603  ;;  %v5829_v58 = vpop.permute.xlu0 %2286 }
 0x23b   :  { %10223 = vst [vmem:[#allocation145_spill] sm:$0xff] %v5825_v7  ;;  %10224 = vst [vmem:[#allocation146_spill] sm:$0xff] %v5829_v58  ;;  %v5850_v58 = vld [vmem:[%s9630_s5 + $0x18] sm:$0xff] }
 0x23c   :  { %2600 = vrot.lane.b32.xlu1 %v5171_v2, %s4801_s25 }
 0x23d   :  { %2928 = vrot.lane.b32.xlu0 %v5143_v1, %s4802_s18 }
 0x23e   :  { %v5833_v23 = vpop.permute.xlu1 %904  ;;  %v5837_v33 = vpop.permute.xlu0 %2302 }
 0x23f   :  { %10225 = vst [vmem:[#allocation147_spill] sm:$0xff] %v5833_v23  ;;  %10226 = vst [vmem:[#allocation148_spill] sm:$0xff] %v5837_v33 }
 0x240   :  { %2616 = vrot.lane.b32.xlu1 %v5143_v1, %s4801_s25 }
 0x241   :  { %1498 = vrot.lane.b32.xlu0 %v5529_v55, %s4796_s20 }
 0x242   :  { %v5841_v37 = vpop.permute.xlu1 %1184  ;;  %v5845_v7 = vpop.permute.xlu0 %874 }
 0x243   :  { %10227 = vst [vmem:[#allocation149_spill] sm:$0xff] %v5841_v37  ;;  %10228 = vst [vmem:[#allocation150_spill] sm:$0xff] %v5845_v7 }
 0x244   :  { %2747 = vperm.xlu1 %4722, %v5850_v58  }
 0x245   :  { %1514 = vrot.lane.b32.xlu0 %v5448_v14, %s4796_s20 }
 0x246   :  { %v5853_v23 = vpop.permute.xlu1 %1200  ;;  %v5857_v33 = vpop.permute.xlu0 %890 }
 0x247   :  { %10229 = vst [vmem:[#allocation151_spill] sm:$0xff] %v5853_v23  ;;  %10230 = vst [vmem:[#allocation152_spill] sm:$0xff] %v5857_v33 }
 0x248   :  { %906 = vrot.lane.b32.xlu1 %v5670_v35, %s4793_s17 }
 0x249   :  { %4723 = vset.pattern.permute.xlu1 %v10171_v43  ;;  %1546 = vrot.lane.b32.xlu0 %v5458_v34, %s4796_s20 }
 0x24a   :  { %v5862_v7 = vpop.permute.xlu1 %1232  ;;  %v5866_v37 = vpop.permute.xlu0 %922 }
 0x24b   :  { %10231 = vst [vmem:[#allocation153_spill] sm:$0xff] %v5862_v7  ;;  %10232 = vst [vmem:[#allocation154_spill] sm:$0xff] %v5866_v37 }
 0x24c   :  { %1186 = vrot.lane.b32.xlu1 %v5529_v55, %s4795_s19 }
 0x24d   :  { %1966 = vrot.lane.b32.xlu0 %v5299_v63, %s4797_s22 }
 0x24e   :  { %v5870_v23 = vpop.permute.xlu1 %1355  ;;  %v5874_v33 = vpop.permute.xlu0 %1214 }
 0x24f   :  { %10233 = vst [vmem:[#allocation155_spill] sm:$0xff] %v5870_v23  ;;  %10234 = vst [vmem:[#allocation156_spill] sm:$0xff] %v5874_v33 }
 0x250   :  { %1202 = vrot.lane.b32.xlu1 %v5448_v14, %s4795_s19 }
 0x251   :  { %1982 = vrot.lane.b32.xlu0 %v5319_v8, %s4797_s22 }
 0x252   :  { %v5878_v43 = vpop.permute.xlu1 %1522  ;;  %v5882_v7 = vpop.permute.xlu0 %1494 }
 0x253   :  { %10235 = vst [vmem:[#allocation157_spill] sm:$0xff] %v5878_v43  ;;  %10236 = vst [vmem:[#allocation158_spill] sm:$0xff] %v5882_v7 }
 0x254   :  { %1234 = vrot.lane.b32.xlu1 %v5458_v34, %s4795_s19 }
 0x255   :  { %1998 = vrot.lane.b32.xlu0 %v5339_v13, %s4797_s22 }
 0x256   :  { %v5886_v37 = vpop.permute.xlu1 %1815  ;;  %v5890_v23 = vpop.permute.xlu0 %1510 }
 0x257   :  { %10237 = vst [vmem:[#allocation159_spill] sm:$0xff] %v5886_v37  ;;  %10238 = vst [vmem:[#allocation160_spill] sm:$0xff] %v5890_v23  ;;  %v5906_v37 = vld [vmem:[%s9630_s5 + $0x8] sm:$0xff] }
 0x258   :  { %1526 = vrot.lane.b32.xlu1 %v5339_v13, %s4796_s20  ;;  %10242 = vst [vmem:[#allocation164_spill] sm:$0xff] %v5906_v37 }
 0x259   :  { %2135 = vperm.xlu0 %4724, %v5362_v59  }
 0x25a   :  { %v5894_v33 = vpop.permute.xlu1 %2006  ;;  %v5897_v43 = vpop.permute.xlu0 %1542 }
 0x25b   :  { %10239 = vst [vmem:[#allocation161_spill] sm:$0xff] %v5894_v33  ;;  %10240 = vst [vmem:[#allocation162_spill] sm:$0xff] %v5897_v43 }
 0x25c   :  { %1823 = vperm.xlu1 %4723, %v5362_v59  }
 0x25d   :  { %4727 = vset.pattern.permute.xlu0 %v10176_v29 }
 0x25e   :  { %v5900_v7 = vpop.permute.xlu1 %2008  ;;  %2427 = vperm.xlu0 %4727, %v5906_v37   ;;  %v5909_v34 = vpop.permute.xlu0 %1663 }
 0x25f   :  { %10241 = vst [vmem:[#allocation163_spill] sm:$0xff] %v5900_v7  ;;  %10243 = vst [vmem:[#allocation165_spill] sm:$0xff] %v5909_v34 }
 0x260   :  { %2010 = vrot.lane.b32.xlu1 %v5241_v21, %s4797_s22 }
 0x261   :  { %4725 = vset.pattern.permute.xlu1 %v10176_v29 }
 0x262   :  { %v5914_v43 = vpop.permute.xlu1 %2272  ;;  %2431 = vperm.xlu0 %4727, %v5760_v10  }
 0x263   :  { %10244 = vst [vmem:[#allocation166_spill] sm:$0xff] %v5914_v43  ;;  %v5919_v7 = vpop.permute.xlu0 %1807 }
 0x264   :  { %2012 = vrot.lane.b32.xlu1 %v5291_v17, %s4797_s22  ;;  %10245 = vst [vmem:[#allocation167_spill] sm:$0xff] %v5919_v7 }
 0x266   :  { %v5921_v33 = vpop.permute.xlu1 %2288  ;;  %2439 = vperm.xlu0 %4727, %v5797_v41  }
 0x267   :  { %10246 = vst [vmem:[#allocation168_spill] sm:$0xff] %v5921_v33  ;;  %v5926_v34 = vpop.permute.xlu0 %1819 }
 0x268   :  { %2276 = vrot.lane.b32.xlu1 %v5270_v28, %s4799_s23  ;;  %10247 = vst [vmem:[#allocation169_spill] sm:$0xff] %v5926_v34 }
 0x26a   :  { %v5928_v23 = vpop.permute.xlu1 %2304  ;;  %2324 = vrot.lane.b32.xlu0 %v5291_v17, %s4799_s23 }
 0x26b   :  { %10248 = vst [vmem:[#allocation170_spill] sm:$0xff] %v5928_v23  ;;  %v5934_v43 = vpop.permute.xlu0 %1964 }
 0x26c   :  { %2292 = vrot.lane.b32.xlu1 %v5279_v20, %s4799_s23  ;;  %10249 = vst [vmem:[#allocation171_spill] sm:$0xff] %v5934_v43 }
 0x26e   :  { %v5936_v7 = vpop.permute.xlu1 %2435  ;;  %2588 = vrot.lane.b32.xlu0 %v5270_v28, %s4801_s25 }
 0x26f   :  { %10250 = vst [vmem:[#allocation172_spill] sm:$0xff] %v5936_v7  ;;  %v5942_v33 = vpop.permute.xlu0 %1980 }
 0x270   :  { %2308 = vrot.lane.b32.xlu1 %v5264_v3, %s4799_s23  ;;  %10251 = vst [vmem:[#allocation173_spill] sm:$0xff] %v5942_v33  ;;  %v10256_v33 = vmov 8  }
 0x272   :  { %2604 = vrot.lane.b32.xlu0 %v5279_v20, %s4801_s25 }
 0x273   :  { %v5944_v34 = vpop.permute.xlu1 %3047  ;;  %v5949_v23 = vpop.permute.xlu0 %1996 }
 0x274   :  { %10252 = vst [vmem:[#allocation174_spill] sm:$0xff] %v5944_v34  ;;  %2443 = vperm.xlu1 %4725, %v5773_v5   ;;  %10253 = vst [vmem:[#allocation175_spill] sm:$0xff] %v5949_v23 }
 0x276   :  { %2620 = vrot.lane.b32.xlu0 %v5264_v3, %s4801_s25 }
 0x277   :  { %v5951_v43 = vpop.permute.xlu1 %585  ;;  %v5957_v7 = vpop.permute.xlu0 %2582 }
 0x278   :  { %10254 = vst [vmem:[#allocation176_spill] sm:$0xff] %v5951_v43  ;;  %2630 = vrot.lane.b32.xlu1 %v5129_v15, %s4801_s25  ;;  %10255 = vst [vmem:[#allocation177_spill] sm:$0xff] %v5957_v7 }
 0x279   :  { %4726 = vset.pattern.permute.xlu1 %v10256_v33 }
 0x27a   :  { %1530 = vrot.lane.b32.xlu0 %v5670_v35, %s4796_s20 }
 0x27b   :  { %v5960_v34 = vpop.permute.xlu1 %587  ;;  %v5966_v23 = vpop.permute.xlu0 %2598 }
 0x27c   :  { %10257 = vst [vmem:[#allocation178_spill] sm:$0xff] %v5960_v34  ;;  %2894 = vrot.lane.b32.xlu1 %v5069_v18, %s4802_s18  ;;  %10258 = vst [vmem:[#allocation179_spill] sm:$0xff] %v5966_v23 }
 0x27e   :  { %2014 = vrot.lane.b32.xlu0 %v5331_v25, %s4797_s22 }
 0x27f   :  { %v5968_v43 = vpop.permute.xlu1 %876  ;;  %v5974_v7 = vpop.permute.xlu0 %2614 }
 0x280   :  { %10259 = vst [vmem:[#allocation180_spill] sm:$0xff] %v5968_v43  ;;  %2910 = vrot.lane.b32.xlu1 %v5111_v0, %s4802_s18  ;;  %10260 = vst [vmem:[#allocation181_spill] sm:$0xff] %v5974_v7 }
 0x282   :  { %2278 = vrot.lane.b32.xlu0 %v5299_v63, %s4799_s23 }
 0x283   :  { %v5976_v55 = vpop.permute.xlu1 %892  ;;  %v5982_v34 = vpop.permute.xlu0 %908 }
 0x284   :  { %10261 = vst [vmem:[#allocation182_spill] sm:$0xff] %v5976_v55  ;;  %2926 = vrot.lane.b32.xlu1 %v5071_v19, %s4802_s18  ;;  %10262 = vst [vmem:[#allocation183_spill] sm:$0xff] %v5982_v34 }
 0x286   :  { %2294 = vrot.lane.b32.xlu0 %v5319_v8, %s4799_s23 }
 0x287   :  { %v5984_v23 = vpop.permute.xlu1 %924  ;;  %v5989_v43 = vpop.permute.xlu0 %1188 }
 0x288   :  { %10263 = vst [vmem:[#allocation184_spill] sm:$0xff] %v5984_v23  ;;  %3055 = vperm.xlu1 %4726, %v5760_v10   ;;  %10264 = vst [vmem:[#allocation185_spill] sm:$0xff] %v5989_v43 }
 0x28a   :  { %2310 = vrot.lane.b32.xlu0 %v5339_v13, %s4799_s23 }
 0x28b   :  { %v5991_v7 = vpop.permute.xlu1 %1216  ;;  %v5997_v55 = vpop.permute.xlu0 %1204 }
 0x28c   :  { %10265 = vst [vmem:[#allocation186_spill] sm:$0xff] %v5991_v7  ;;  %1218 = vrot.lane.b32.xlu1 %v5670_v35, %s4795_s19  ;;  %10266 = vst [vmem:[#allocation187_spill] sm:$0xff] %v5997_v55 }
 0x28d   :  { %4728 = vset.pattern.permute.xlu1 %v10144_v39 }
 0x28e   :  { %2447 = vperm.xlu0 %4727, %v5362_v59  }
 0x28f   :  { %v6000_v23 = vpop.permute.xlu1 %1496  ;;  %v6005_v43 = vpop.permute.xlu0 %1236 }
 0x290   :  { %10267 = vst [vmem:[#allocation188_spill] sm:$0xff] %v6000_v23  ;;  %1220 = vrot.lane.b32.xlu1 %v5681_v54, %s4795_s19  ;;  %10268 = vst [vmem:[#allocation189_spill] sm:$0xff] %v6005_v43 }
 0x292   :  { %4730 = vset.pattern.permute.xlu0 %v10218_v40 }
 0x293   :  { %v6007_v7 = vpop.permute.xlu1 %1512  ;;  %2739 = vperm.xlu0 %4730, %v5906_v37   ;;  %v6013_v55 = vpop.permute.xlu0 %1528 }
 0x294   :  { %10269 = vst [vmem:[#allocation190_spill] sm:$0xff] %v6007_v7  ;;  %1500 = vrot.lane.b32.xlu1 %v5539_v31, %s4796_s20  ;;  %10270 = vst [vmem:[#allocation191_spill] sm:$0xff] %v6013_v55  ;;  %v6113_v55 = vmul.f32 %v5313_v48, %v5270_v28 }
 0x296   :  { %10296 = vst [vmem:[#allocation217_spill] sm:$0xff] %v6113_v55 }
 0x297   :  { %v6015_v39 = vpop.permute.xlu1 %1544  ;;  %2743 = vperm.xlu0 %4730, %v5760_v10   ;;  %v6020_v23 = vpop.permute.xlu0 %1827 }
 0x298   :  { %10271 = vst [vmem:[#allocation192_spill] sm:$0xff] %v6015_v39  ;;  %1516 = vrot.lane.b32.xlu1 %v5549_v50, %s4796_s20  ;;  %10272 = vst [vmem:[#allocation193_spill] sm:$0xff] %v6020_v23 }
 0x29b   :  { %v6022_v43 = vpop.permute.xlu1 %1667  ;;  %2755 = vperm.xlu0 %4730, %v5773_v5  }
 0x29c   :  { %10273 = vst [vmem:[#allocation194_spill] sm:$0xff] %v6022_v43  ;;  %1548 = vrot.lane.b32.xlu1 %v5559_v61, %s4796_s20  ;;  %v6027_v7 = vpop.permute.xlu0 %2119 }
 0x29d   :  { %10274 = vst [vmem:[#allocation195_spill] sm:$0xff] %v6027_v7 }
 0x29f   :  { %v6029_v34 = vpop.permute.xlu1 %1962  ;;  %2636 = vrot.lane.b32.xlu0 %v5291_v17, %s4801_s25 }
 0x2a0   :  { %10275 = vst [vmem:[#allocation196_spill] sm:$0xff] %v6029_v34  ;;  %1968 = vrot.lane.b32.xlu1 %v5349_v51, %s4797_s22  ;;  %v6035_v10 = vpop.permute.xlu0 %2131 }
 0x2a1   :  { %10276 = vst [vmem:[#allocation197_spill] sm:$0xff] %v6035_v10 }
 0x2a3   :  { %v6037_v23 = vpop.permute.xlu1 %1978  ;;  %2900 = vrot.lane.b32.xlu0 %v5270_v28, %s4802_s18 }
 0x2a4   :  { %10277 = vst [vmem:[#allocation198_spill] sm:$0xff] %v6037_v23  ;;  %1984 = vrot.lane.b32.xlu1 %v5381_v53, %s4797_s22  ;;  %v6043_v43 = vpop.permute.xlu0 %2274 }
 0x2a5   :  { %10278 = vst [vmem:[#allocation199_spill] sm:$0xff] %v6043_v43 }
 0x2a7   :  { %v6045_v7 = vpop.permute.xlu1 %1994  ;;  %2916 = vrot.lane.b32.xlu0 %v5279_v20, %s4802_s18 }
 0x2a8   :  { %10279 = vst [vmem:[#allocation200_spill] sm:$0xff] %v6045_v7  ;;  %2000 = vrot.lane.b32.xlu1 %v5364_v9, %s4797_s22  ;;  %v6051_v34 = vpop.permute.xlu0 %2290 }
 0x2a9   :  { %10280 = vst [vmem:[#allocation201_spill] sm:$0xff] %v6051_v34 }
 0x2ab   :  { %v6053_v10 = vpop.permute.xlu1 %2127  ;;  %2932 = vrot.lane.b32.xlu0 %v5264_v3, %s4802_s18 }
 0x2ac   :  { %10281 = vst [vmem:[#allocation202_spill] sm:$0xff] %v6053_v10  ;;  %2139 = vperm.xlu1 %4728, %v5748_v22   ;;  %v6058_v23 = vpop.permute.xlu0 %2306 }
 0x2ad   :  { %10282 = vst [vmem:[#allocation203_spill] sm:$0xff] %v6058_v23 }
 0x2af   :  { %v6060_v43 = vpop.permute.xlu1 %2318  ;;  %1986 = vrot.lane.b32.xlu0 %v5448_v14, %s4797_s22  ;;  %v10324_v14 = vld [vmem:[#allocation37_spill] sm:$0xff] }
 0x2b0   :  { %10283 = vst [vmem:[#allocation204_spill] sm:$0xff] %v6060_v43  ;;  %2322 = vrot.lane.b32.xlu1 %v5241_v21, %s4799_s23  ;;  %v6066_v7 = vpop.permute.xlu0 %2632 }
 0x2b1   :  { %10284 = vst [vmem:[#allocation205_spill] sm:$0xff] %v6066_v7  ;;  %4729 = vset.pattern.permute.xlu1 %v10218_v40 }
 0x2b3   :  { %v6069_v10 = vpop.permute.xlu1 %2320  ;;  %2002 = vrot.lane.b32.xlu0 %v5670_v35, %s4797_s22 }
 0x2b4   :  { %10285 = vst [vmem:[#allocation206_spill] sm:$0xff] %v6069_v10  ;;  %2586 = vrot.lane.b32.xlu1 %v5223_v38, %s4801_s25  ;;  %v6075_v23 = vpop.permute.xlu0 %2896 }
 0x2b5   :  { %10286 = vst [vmem:[#allocation207_spill] sm:$0xff] %v6075_v23 }
 0x2b7   :  { %v6077_v34 = vpop.permute.xlu1 %2584  ;;  %2326 = vrot.lane.b32.xlu0 %v5331_v25, %s4799_s23 }
 0x2b8   :  { %10287 = vst [vmem:[#allocation208_spill] sm:$0xff] %v6077_v34  ;;  %2602 = vrot.lane.b32.xlu1 %v5231_v46, %s4801_s25  ;;  %v6083_v7 = vpop.permute.xlu0 %2912  ;;  %v605_v34 = vlaneseq }
 0x2b9   :  { %10288 = vst [vmem:[#allocation209_spill] sm:$0xff] %v6083_v7 }
 0x2ba   :  { %v6123_v35 = vand.u32 127, %v605_v34 }
 0x2bb   :  { %v6085_v43 = vpop.permute.xlu1 %2600  ;;  %2590 = vrot.lane.b32.xlu0 %v5299_v63, %s4801_s25  ;;  %v10327_v63 = vld [vmem:[#allocation40_spill] sm:$0xff] }
 0x2bc   :  { %10289 = vst [vmem:[#allocation210_spill] sm:$0xff] %v6085_v43  ;;  %2618 = vrot.lane.b32.xlu1 %v5215_v42, %s4801_s25  ;;  %v6091_v10 = vpop.permute.xlu0 %2928  ;;  %v643_v43 = vshrl.u32 %v605_v34, 7  ;;  %vm926_vm1 = vcmp.lt.s32.totalorder %v6123_v35, 16  ;;  %vm607_vm2 = vcmp.lt.s32.totalorder %v6123_v35, 17  ;;  %vm1238_vm3 = vcmp.lt.s32.totalorder %v6123_v35, 15  ;;  %v10336_v42 = vld [vmem:[#allocation45_spill] sm:$0xff] }
 0x2bd   :  { %10290 = vst [vmem:[#allocation211_spill] sm:$0xff] %v6091_v10  ;;  %vm1550_vm4 = vcmp.lt.s32.totalorder %v6123_v35, 1  ;;  %vm2022_vm5 = vcmp.lt.s32.totalorder %v6123_v35, 127  ;;  %vm2334_vm6 = vcmp.lt.s32.totalorder %v6123_v35, 113  ;;  %vm2646_vm7 = vcmp.lt.s32.totalorder %v6123_v35, 112 }
 0x2be   :  { %v6132_v28 = vsub.s32 1, %v643_v43  ;;  %v6134_v55 = vsub.s32 2, %v643_v43  ;;  %v6143_v34 = vsub.s32 3, %v643_v43  ;;  %vm2958_vm8 = vcmp.lt.s32.totalorder %v6123_v35, 111 }
 0x2bf   :  { %v6093_v23 = vpop.permute.xlu1 %2616  ;;  %2606 = vrot.lane.b32.xlu0 %v5319_v8, %s4801_s25 }
 0x2c0   :  { %10291 = vst [vmem:[#allocation212_spill] sm:$0xff] %v6093_v23  ;;  %2751 = vperm.xlu1 %4729, %v5797_v41   ;;  %v6098_v39 = vpop.permute.xlu0 %1498  ;;  %10300 = vst [vmem:[#allocation221_spill] sm:$0xff] %v6132_v28 }
 0x2c1   :  { %10292 = vst [vmem:[#allocation213_spill] sm:$0xff] %v6098_v39  ;;  %v6121_v39 = vmul.f32 %v5313_v48, %v5264_v3  ;;  %10301 = vst [vmem:[#allocation222_spill] sm:$0xff] %v6134_v55  ;;  %v4490_v3 = vld [vmem:[%s9626_s1 + $0x1] ss:$8 sm:$0xf] }
 0x2c2   :  { %10304 = vst [vmem:[#allocation225_spill] sm:$0xff] %v6143_v34 }
 0x2c3   :  { %v6100_v7 = vpop.permute.xlu1 %2747  ;;  %2622 = vrot.lane.b32.xlu0 %v5339_v13, %s4801_s25  ;;  %10298 = vst [vmem:[#allocation219_spill] sm:$0xff] %v6121_v39  ;;  %v640_v39 = vld [vmem:[%s9626_s1] ss:$8 sm:$0xf] }
 0x2c4   :  { %10293 = vst [vmem:[#allocation214_spill] sm:$0xff] %v6100_v7  ;;  %2942 = vrot.lane.b32.xlu1 %v5129_v15, %s4802_s18  ;;  %v6106_v10 = vpop.permute.xlu0 %1514  ;;  %v6117_v7 = vmul.f32 %v5313_v48, %v5279_v20  ;;  %v6136_v20 = vsub.s32 0, %v643_v43  ;;  %v6164_v43 = vmul.f32 %v5209_v49, %v5069_v18  ;;  %v6189_v18 = vmul.f32 %v5221_v36, %v5179_v27 }
 0x2c5   :  { %10294 = vst [vmem:[#allocation215_spill] sm:$0xff] %v6106_v10  ;;  %4731 = vset.pattern.permute.xlu1 %v10176_v29  ;;  %v6130_v29 = vmul.f32 %v5313_v48, %v5291_v17  ;;  %v6151_v48 = vmul.f32 %v5209_v49, %v5071_v19  ;;  %v6172_v19 = vmul.f32 %v5221_v36, %v5171_v2 }
 0x2c6   :  { %10297 = vst [vmem:[#allocation218_spill] sm:$0xff] %v6117_v7  ;;  %10302 = vst [vmem:[#allocation223_spill] sm:$0xff] %v6136_v20  ;;  %v6198_v2 = vrot.slane %v4490_v3, %v6136_v20 }
 0x2c7   :  { %v6109_v23 = vpop.permute.xlu1 %906  ;;  %2759 = vperm.xlu0 %4730, %v5362_v59   ;;  %10299 = vst [vmem:[#allocation220_spill] sm:$0xff] %v6130_v29  ;;  %v6147_v59 = vmul.f32 %v5209_v49, %v5111_v0  ;;  %10306 = vst [vmem:[#allocation227_spill] sm:$0xff] %v6151_v48  ;;  %v6155_v29 = vmul.f32 %v5209_v49, %v5129_v15  ;;  %v6168_v0 = vmul.f32 %v5221_v36, %v5153_v57  ;;  %v4491_v49 = vld [vmem:[%s9626_s1 + $0x2] ss:$8 sm:$0xf] }
 0x2c8   :  { %10295 = vst [vmem:[#allocation216_spill] sm:$0xff] %v6109_v23  ;;  %2944 = vrot.lane.b32.xlu1 %v5179_v27, %s4802_s18  ;;  %v6138_v7 = vpop.permute.xlu0 %1546  ;;  %10309 = vst [vmem:[#allocation230_spill] sm:$0xff] %v6164_v43  ;;  %v6176_v15 = vmul.f32 %v5221_v36, %v5143_v1  ;;  %v6192_v1 = vrot.slane %v4490_v3, %v6132_v28  ;;  %v6195_v57 = vrot.slane %v4490_v3, %v6134_v55 }
 0x2c9   :  { %10303 = vst [vmem:[#allocation224_spill] sm:$0xff] %v6138_v7  ;;  %10305 = vst [vmem:[#allocation226_spill] sm:$0xff] %v6147_v59  ;;  %v6208_v27 = vrot.slane %v640_v39, %v6132_v28  ;;  %v6211_v36 = vrot.slane %v640_v39, %v6134_v55  ;;  %v6227_v48 = vrot.slane %v4491_v49, %v6132_v28 }
 0x2ca   :  { %10307 = vst [vmem:[#allocation228_spill] sm:$0xff] %v6155_v29  ;;  %10310 = vst [vmem:[#allocation231_spill] sm:$0xff] %v6168_v0  ;;  %v4492_v0 = vld [vmem:[%s9626_s1 + $0x3] ss:$8 sm:$0xf]  ;;  %v943_v29 = vsel %vm926_vm1, %v5368_v24, %v5375_v26  ;;  %v6230_v59 = vrot.slane %v4491_v49, %v6134_v55  ;;  %v6246_v10 = vrot.slane %v4491_v49, %v6143_v34 }
 0x2cb   :  { %v6160_v7 = vpop.permute.xlu1 %1186  ;;  %10311 = vst [vmem:[#allocation232_spill] sm:$0xff] %v6172_v19  ;;  %10312 = vst [vmem:[#allocation233_spill] sm:$0xff] %v6176_v15  ;;  %4733 = vset.pattern.permute.xlu0 %v10256_v33  ;;  %v6205_v19 = vrot.slane %v4490_v3, %v6143_v34  ;;  %v6224_v3 = vrot.slane %v640_v39, %v6143_v34  ;;  %v6262_v13 = vrot.slane %v4492_v0, %v6134_v55 }
 0x2cc   :  { %10308 = vst [vmem:[#allocation229_spill] sm:$0xff] %v6160_v7  ;;  %1532 = vrot.lane.b32.xlu1 %v5681_v54, %s4796_s20  ;;  %10313 = vst [vmem:[#allocation234_spill] sm:$0xff] %v6189_v18  ;;  %3051 = vperm.xlu0 %4733, %v5906_v37   ;;  %v6202_v15 = vpop.permute.xlu0 %1966  ;;  %v6214_v18 = vrot.slane %v640_v39, %v6136_v20  ;;  %v10321_v7 = vld [vmem:[#allocation46_spill] sm:$0xff]  ;;  %v6243_v39 = vrot.slane %v4491_v49, %v6136_v20 }
 0x2cd   :  { %10314 = vst [vmem:[#allocation235_spill] sm:$0xff] %v6195_v57  ;;  %10315 = vst [vmem:[#allocation236_spill] sm:$0xff] %v6202_v15  ;;  %v935_v15 = vsel %vm926_vm1, %v5375_v26, %v5341_v60  ;;  %v951_v23 = vsel %vm926_vm1, %v10321_v7, %v5368_v24  ;;  %v10323_v26 = vld [vmem:[#allocation48_spill] sm:$0xff]  ;;  %v6259_v24 = vrot.slane %v4492_v0, %v6132_v28 }
 0x2ce   :  { %10316 = vst [vmem:[#allocation237_spill] sm:$0xff] %v6205_v19  ;;  %10317 = vst [vmem:[#allocation238_spill] sm:$0xff] %v6211_v36  ;;  %v624_v25 = vsel %vm607_vm2, %v10324_v14, %v10323_v26  ;;  %v983_v8 = vmul.f32 %v6192_v1, %v943_v29  ;;  %v6277_v40 = vrot.slane %v4492_v0, %v6136_v20 }
 0x2cf   :  { %10318 = vst [vmem:[#allocation239_spill] sm:$0xff] %v6224_v3  ;;  %10319 = vst [vmem:[#allocation240_spill] sm:$0xff] %v6230_v59  ;;  %v6232_v43 = vpop.permute.xlu1 %1202  ;;  %v984_v55 = vmul.f32 %v6195_v57, %v935_v15  ;;  %v663_v41 = vmul.f32 %v6208_v27, %v624_v25  ;;  %v10333_v15 = vld [vmem:[#allocation54_spill] sm:$0xff] }
 0x2d0   :  { %10320 = vst [vmem:[#allocation241_spill] sm:$0xff] %v6232_v43  ;;  %10322 = vst [vmem:[#allocation46_spill] sm:$0xff] %v6246_v10  ;;  %2016 = vrot.lane.b32.xlu1 %v5390_v16, %s4797_s22  ;;  %v927_v43 = vsel %vm926_vm1, %v5341_v60, %v10321_v7  ;;  %3059 = vperm.xlu0 %4733, %v5850_v58   ;;  %v6265_v49 = vpop.permute.xlu0 %1982  ;;  %v616_v60 = vsel %vm607_vm2, %v10323_v26, %v10327_v63  ;;  %v10328_v7 = vld [vmem:[#allocation50_spill] sm:$0xff] }
 0x2d1   :  { %10325 = vst [vmem:[#allocation48_spill] sm:$0xff] %v6262_v13  ;;  %10326 = vst [vmem:[#allocation37_spill] sm:$0xff] %v6265_v49  ;;  %v632_v37 = vsel %vm607_vm2, %v10328_v7, %v10324_v14  ;;  %v982_v58 = vmul.f32 %v6198_v2, %v951_v23  ;;  %v608_v29 = vsel %vm607_vm2, %v10327_v63, %v10328_v7  ;;  %v10329_v49 = vld [vmem:[#allocation52_spill] sm:$0xff] }
 0x2d2   :  { %v1255_v26 = vsel %vm1238_vm3, %v10330_v45, %v10329_v49  ;;  %v985_v14 = vmul.f32 %v6205_v19, %v927_v43  ;;  %v1247_v23 = vsel %vm1238_vm3, %v10329_v49, %v10332_v32  ;;  %v1263_v63 = vsel %vm1238_vm3, %v10333_v15, %v10330_v45 }
 0x2d3   :  { %v6289_v44 = vpop.permute.xlu1 %1234  ;;  %v664_v7 = vmul.f32 %v6211_v36, %v616_v60  ;;  %v1239_v25 = vsel %vm1238_vm3, %v10332_v32, %v10333_v15  ;;  %v6310_v43 = vrot.slane %v4492_v0, %v6143_v34  ;;  %v665_v45 = vmul.f32 %v6224_v3, %v608_v29  ;;  %v10337_v60 = vld [vmem:[#allocation56_spill] sm:$0xff]  ;;  %v10339_v0 = vld [vmem:[#allocation11_spill] sm:$0xff] }
 0x2d4   :  { %10331 = vst [vmem:[#allocation40_spill] sm:$0xff] %v6289_v44  ;;  %2280 = vrot.lane.b32.xlu1 %v5349_v51, %s4799_s23  ;;  %v662_v44 = vmul.f32 %v6214_v18, %v632_v37  ;;  %3067 = vperm.xlu0 %4733, %v5773_v5   ;;  %v6313_v49 = vpop.permute.xlu0 %1998  ;;  %v1295_v51 = vmul.f32 %v6227_v48, %v1255_v26 }
 0x2d5   :  { %10334 = vst [vmem:[#allocation50_spill] sm:$0xff] %v6310_v43  ;;  %10335 = vst [vmem:[#allocation52_spill] sm:$0xff] %v6313_v49  ;;  %v1559_v37 = vsel %vm1550_vm4, %v10337_v60, %v10336_v42  ;;  %v1567_v32 = vsel %vm1550_vm4, %v10338_v30, %v10337_v60  ;;  %v6326_v15 = vmul.f32 %v10339_v0, %v983_v8 }
 0x2d6   :  { %v6329_v5 = vmul.f32 %v10339_v0, %v984_v55  ;;  %v1296_v29 = vmul.f32 %v6230_v59, %v1247_v23  ;;  %v1294_v26 = vmul.f32 %v6243_v39, %v1263_v63  ;;  %v6336_v34 = vmul.f32 %v10339_v0, %v982_v58  ;;  %v10347_v63 = vld [vmem:[#allocation58_spill] sm:$0xff] }
 0x2d7   :  { %10340 = vst [vmem:[#allocation39_spill] sm:$0xff] %v6326_v15  ;;  %v6333_v49 = vpop.permute.xlu1 %1526  ;;  %v6339_v6 = vmul.f32 %v10339_v0, %v985_v14  ;;  %v6342_v60 = vmul.f32 %v10345_v47, %v663_v41  ;;  %v1297_v8 = vmul.f32 %v6246_v10, %v1239_v25  ;;  %v1607_v55 = vmul.f32 %v6259_v24, %v1567_v32  ;;  %v10365_v15 = vld [vmem:[#allocation60_spill] sm:$0xff] }
 0x2d8   :  { %10341 = vst [vmem:[#allocation42_spill] sm:$0xff] %v6329_v5  ;;  %10342 = vst [vmem:[#allocation54_spill] sm:$0xff] %v6333_v49  ;;  %2296 = vrot.lane.b32.xlu1 %v5381_v53, %s4799_s23  ;;  %v1608_v23 = vmul.f32 %v6262_v13, %v1559_v37  ;;  %v1551_v58 = vsel %vm1550_vm4, %v10336_v42, %v10347_v63  ;;  %v1575_v41 = vsel %vm1550_vm4, %v10347_v63, %v10338_v30  ;;  %v6359_v14 = vpop.permute.xlu0 %2135  ;;  %v10352_v42 = vld [vmem:[#allocation13_spill] sm:$0xff]  ;;  %v10362_v5 = vld [vmem:[#allocation16_spill] sm:$0xff] }
 0x2d9   :  { %10343 = vst [vmem:[#allocation45_spill] sm:$0xff] %v6336_v34  ;;  %10344 = vst [vmem:[#allocation56_spill] sm:$0xff] %v6339_v6  ;;  %2948 = vrot.lane.b32.xlu0 %v5291_v17, %s4802_s18  ;;  %v6362_v25 = vmul.f32 %v10345_v47, %v664_v7  ;;  %v6365_v37 = vmul.f32 %v10345_v47, %v662_v44  ;;  %v6368_v32 = vmul.f32 %v10345_v47, %v665_v45  ;;  %v10356_v17 = vld [vmem:[#allocation53_spill] sm:$0xff]  ;;  %v10358_v44 = vld [vmem:[#allocation51_spill] sm:$0xff] }
 0x2da   :  { %10346 = vst [vmem:[#allocation43_spill] sm:$0xff] %v6342_v60  ;;  %10348 = vst [vmem:[#allocation11_spill] sm:$0xff] %v6359_v14  ;;  %v6371_v0 = vmul.f32 %v10352_v42, %v1295_v51  ;;  %v6374_v6 = vmul.f32 %v10352_v42, %v1296_v29  ;;  %v6377_v30 = vmul.f32 %v10352_v42, %v1294_v26  ;;  %v10357_v63 = vld [vmem:[#allocation61_spill] sm:$0xff]  ;;  %v10366_v34 = vld [vmem:[#allocation59_spill] sm:$0xff] }
 0x2db   :  { %10349 = vst [vmem:[#allocation10_spill] sm:$0xff] %v6362_v25  ;;  %10350 = vst [vmem:[#allocation58_spill] sm:$0xff] %v6365_v37  ;;  %v1248_v7 = vsel %vm1238_vm3, %v10357_v63, %v10356_v17  ;;  %v1256_v47 = vsel %vm1238_vm3, %v10358_v44, %v10357_v63  ;;  %v6390_v51 = vld [vmem:[%s9626_s1 + $0x5] ss:$8 sm:$0xf]  ;;  %v6392_v45 = vpop.permute.xlu1 %1823  ;;  %v1606_v29 = vmul.f32 %v6277_v40, %v1575_v41 }
 0x2dc   :  { %10351 = vst [vmem:[#allocation242_spill] sm:$0xff] %v6368_v32  ;;  %10353 = vst [vmem:[#allocation13_spill] sm:$0xff] %v6371_v0  ;;  %v1609_v26 = vmul.f32 %v6310_v43, %v1551_v58  ;;  %2312 = vrot.lane.b32.xlu1 %v5364_v9, %s4799_s23  ;;  %v6410_v41 = vmul.f32 %v10362_v5, %v1607_v55  ;;  %v6413_v58 = vmul.f32 %v10362_v5, %v1608_v23  ;;  %v10375_v37 = vld [vmem:[#allocation55_spill] sm:$0xff] }
 0x2dd   :  { %10354 = vst [vmem:[#allocation243_spill] sm:$0xff] %v6374_v6  ;;  %10355 = vst [vmem:[#allocation244_spill] sm:$0xff] %v6377_v30  ;;  %v10360_v6 = vld [vmem:[#allocation64_spill] sm:$0xff]  ;;  %v6407_v30 = vmul.f32 %v10352_v42, %v1297_v8  ;;  %2020 = vrot.lane.b32.xlu0 %v5559_v61, %s4797_s22  ;;  %v1299_v42 = vmul.f32 %v6227_v48, %v1256_v47  ;;  %v1300_v55 = vmul.f32 %v6230_v59, %v1248_v7 }
 0x2de   :  { %10359 = vst [vmem:[#allocation53_spill] sm:$0xff] %v6392_v45  ;;  %v1240_v0 = vsel %vm1238_vm3, %v10356_v17, %v10360_v6  ;;  %v1264_v63 = vsel %vm1238_vm3, %v10360_v6, %v10358_v44  ;;  %10363 = vst [vmem:[#allocation51_spill] sm:$0xff] %v6410_v41  ;;  %v633_v17 = vsel %vm607_vm2, %v10366_v34, %v10365_v15  ;;  %v10367_v6 = vld [vmem:[#allocation57_spill] sm:$0xff]  ;;  %v6431_v44 = vpop.permute.xlu0 %2427 }
 0x2df   :  { %10361 = vst [vmem:[#allocation61_spill] sm:$0xff] %v6407_v30  ;;  %10364 = vst [vmem:[#allocation64_spill] sm:$0xff] %v6413_v58  ;;  %v625_v8 = vsel %vm607_vm2, %v10365_v15, %v10367_v6  ;;  %v6429_v23 = vrot.slane %v6390_v51, %v6132_v28  ;;  %v10369_v58 = vld [vmem:[#allocation63_spill] sm:$0xff]  ;;  %v1298_v47 = vmul.f32 %v6243_v39, %v1264_v63  ;;  %v6443_v30 = vpop.permute.xlu1 %2010  ;;  %v10377_v63 = vld [vmem:[#allocation68_spill] sm:$0xff] }
 0x2e0   :  { %10368 = vst [vmem:[#allocation16_spill] sm:$0xff] %v6431_v44  ;;  %v609_v41 = vsel %vm607_vm2, %v10369_v58, %v10366_v34  ;;  %v617_v15 = vsel %vm607_vm2, %v10367_v6, %v10369_v58  ;;  %v1301_v7 = vmul.f32 %v6246_v10, %v1240_v0  ;;  %10370 = vst [vmem:[#allocation60_spill] sm:$0xff] %v6443_v30  ;;  %v10374_v34 = vld [vmem:[#allocation67_spill] sm:$0xff]  ;;  %2451 = vperm.xlu1 %4731, %v5748_v22   ;;  %v10379_v6 = vld [vmem:[#allocation14_spill] sm:$0xff] }
 0x2e1   :  { %v6446_v32 = vmul.f32 %v10362_v5, %v1606_v29  ;;  %v6449_v25 = vmul.f32 %v10362_v5, %v1609_v26  ;;  %v6452_v60 = vmul.f32 %v6214_v18, %v633_v17  ;;  %v1568_v58 = vsel %vm1550_vm4, %v10375_v37, %v10374_v34  ;;  %v10378_v5 = vld [vmem:[#allocation69_spill] sm:$0xff]  ;;  %2284 = vrot.lane.b32.xlu0 %v5539_v31, %s4799_s23 }
 0x2e2   :  { %v6460_v0 = vmul.f32 %v6208_v27, %v625_v8  ;;  %v1560_v29 = vsel %vm1550_vm4, %v10374_v34, %v10377_v63  ;;  %v1552_v26 = vsel %vm1550_vm4, %v10377_v63, %v10378_v5  ;;  %v1576_v17 = vsel %vm1550_vm4, %v10378_v5, %v10375_v37  ;;  %v6488_v63 = vpop.permute.xlu0 %2431  ;;  %v10387_v5 = vld [vmem:[#allocation70_spill] sm:$0xff] }
 0x2e3   :  { %10371 = vst [vmem:[#allocation59_spill] sm:$0xff] %v6446_v32  ;;  %10372 = vst [vmem:[#allocation57_spill] sm:$0xff] %v6449_v25  ;;  %v6477_v8 = vmul.f32 %v10379_v6, %v1299_v42  ;;  %v6483_v34 = vmul.f32 %v6211_v36, %v617_v15  ;;  %v6491_v25 = vmul.f32 %v10379_v6, %v1298_v47 }
 0x2e4   :  { %10373 = vst [vmem:[#allocation63_spill] sm:$0xff] %v6452_v60  ;;  %10376 = vst [vmem:[#allocation67_spill] sm:$0xff] %v6460_v0  ;;  %v6480_v0 = vmul.f32 %v10379_v6, %v1300_v55  ;;  %v6486_v60 = vmul.f32 %v6224_v3, %v609_v41  ;;  %v6494_v37 = vmul.f32 %v10379_v6, %v1301_v7  ;;  %v10388_v55 = vld [vmem:[#allocation66_spill] sm:$0xff]  ;;  %v10390_v7 = vld [vmem:[#allocation49_spill] sm:$0xff]  ;;  %2634 = vrot.lane.b32.xlu1 %v5241_v21, %s4801_s25 }
 0x2e5   :  { %10380 = vst [vmem:[#allocation55_spill] sm:$0xff] %v6477_v8  ;;  %10382 = vst [vmem:[#allocation69_spill] sm:$0xff] %v6483_v34  ;;  %v6497_v42 = vmul.f32 %v6259_v24, %v1568_v58  ;;  %v944_v15 = vsel %vm926_vm1, %v10388_v55, %v10387_v5  ;;  %v6506_v41 = vmul.f32 %v6262_v13, %v1560_v29  ;;  %v10391_v6 = vld [vmem:[#allocation72_spill] sm:$0xff]  ;;  %2300 = vrot.lane.b32.xlu0 %v5549_v50, %s4799_s23  ;;  %v10395_v34 = vld [vmem:[#allocation77_spill] sm:$0xff] }
 0x2e6   :  { %10381 = vst [vmem:[#allocation68_spill] sm:$0xff] %v6480_v0  ;;  %10383 = vst [vmem:[#allocation14_spill] sm:$0xff] %v6486_v60  ;;  %v6503_v0 = vpop.permute.xlu1 %2012  ;;  %v6509_v8 = vmul.f32 %v6277_v40, %v1576_v17  ;;  %v6512_v47 = vmul.f32 %v6310_v43, %v1552_v26  ;;  %v936_v58 = vsel %vm926_vm1, %v10387_v5, %v10390_v7  ;;  %v10392_v26 = vld [vmem:[#allocation75_spill] sm:$0xff]  ;;  %4732 = vset.pattern.permute.xlu1 %v10256_v33  ;;  %v6548_v32 = vpop.permute.xlu0 %2439  ;;  %v10458_v21 = vld [vmem:[#allocation98_spill] sm:$0xff] }
 0x2e7   :  { %10384 = vst [vmem:[#allocation245_spill] sm:$0xff] %v6488_v63  ;;  %10385 = vst [vmem:[#allocation246_spill] sm:$0xff] %v6491_v25  ;;  %v928_v29 = vsel %vm926_vm1, %v10390_v7, %v10391_v6  ;;  %v952_v17 = vsel %vm926_vm1, %v10391_v6, %v10388_v55  ;;  %v987_v5 = vmul.f32 %v6192_v1, %v944_v15  ;;  %v10394_v60 = vld [vmem:[#allocation71_spill] sm:$0xff]  ;;  %v10397_v15 = vld [vmem:[#allocation76_spill] sm:$0xff] }
 0x2e8   :  { %10386 = vst [vmem:[#allocation247_spill] sm:$0xff] %v6494_v37  ;;  %10389 = vst [vmem:[#allocation70_spill] sm:$0xff] %v6503_v0  ;;  %v10393_v37 = vld [vmem:[#allocation74_spill] sm:$0xff]  ;;  %v618_v7 = vsel %vm607_vm2, %v10392_v26, %v10394_v60  ;;  %v610_v55 = vsel %vm607_vm2, %v10394_v60, %v10395_v34  ;;  %v988_v14 = vmul.f32 %v6195_v57, %v936_v58  ;;  %v10398_v63 = vld [vmem:[#allocation79_spill] sm:$0xff]  ;;  %2898 = vrot.lane.b32.xlu1 %v5223_v38, %s4802_s18 }
 0x2e9   :  { %v626_v25 = vsel %vm607_vm2, %v10393_v37, %v10392_v26  ;;  %v634_v6 = vsel %vm607_vm2, %v10395_v34, %v10393_v37  ;;  %10396 = vst [vmem:[#allocation66_spill] sm:$0xff] %v6548_v32  ;;  %v937_v0 = vsel %vm926_vm1, %v10398_v63, %v10397_v15  ;;  %v10399_v26 = vld [vmem:[#allocation73_spill] sm:$0xff]  ;;  %v10400_v60 = vld [vmem:[#allocation78_spill] sm:$0xff]  ;;  %v986_v37 = vmul.f32 %v6198_v2, %v952_v17  ;;  %v10449_v38 = vld [vmem:[#allocation15_spill] sm:$0xff] }
 0x2ea   :  { %v945_v44 = vsel %vm926_vm1, %v10399_v26, %v10398_v63  ;;  %v1257_v45 = vsel %vm1238_vm3, %v10400_v60, %v5524_v56  ;;  %v6563_v34 = vpop.permute.xlu1 %2276  ;;  %v989_v58 = vmul.f32 %v6205_v19, %v928_v29  ;;  %v671_v32 = vmul.f32 %v6208_v27, %v626_v25  ;;  %2316 = vrot.lane.b32.xlu0 %v5681_v54, %s4799_s23  ;;  %v10456_v33 = vld [vmem:[#allocation111_spill] sm:$0xff]  ;;  %v10463_v13 = vld [vmem:[#allocation80_spill] sm:$0xff] }
 0x2eb   :  { %10401 = vst [vmem:[#allocation49_spill] sm:$0xff] %v6563_v34  ;;  %v953_v30 = vsel %vm926_vm1, %v5527_v52, %v10399_v26  ;;  %v672_v63 = vmul.f32 %v6211_v36, %v618_v7  ;;  %v670_v49 = vmul.f32 %v6214_v18, %v634_v6  ;;  %v673_v34 = vmul.f32 %v6224_v3, %v610_v55  ;;  %v6590_v55 = vpop.permute.xlu0 %2324  ;;  %v10403_v6 = vld [vmem:[#allocation28_spill] sm:$0xff] }
 0x2ec   :  { %v929_v29 = vsel %vm926_vm1, %v10397_v15, %v5527_v52  ;;  %v991_v25 = vmul.f32 %v6192_v1, %v945_v44  ;;  %v992_v17 = vmul.f32 %v6195_v57, %v937_v0  ;;  %v1303_v26 = vmul.f32 %v6227_v48, %v1257_v45  ;;  %10402 = vst [vmem:[#allocation72_spill] sm:$0xff] %v6590_v55  ;;  %v10409_v55 = vld [vmem:[#allocation12_spill] sm:$0xff] }
 0x2ed   :  { %v1265_v7 = vsel %vm1238_vm3, %v5533_v11, %v10400_v60  ;;  %v6593_v61 = vmul.f32 %v10403_v6, %v987_v5  ;;  %v6596_v52 = vmul.f32 %v10403_v6, %v988_v14  ;;  %v990_v15 = vmul.f32 %v6198_v2, %v953_v30  ;;  %2914 = vrot.lane.b32.xlu1 %v5231_v46, %s4802_s18 }
 0x2ee   :  { %v6601_v44 = vrot.slane %v6390_v51, %v6136_v20  ;;  %v6603_v45 = vpop.permute.xlu1 %2292  ;;  %v6606_v0 = vmul.f32 %v10403_v6, %v986_v37  ;;  %v6609_v60 = vmul.f32 %v10403_v6, %v989_v58  ;;  %v6612_v5 = vmul.f32 %v10409_v55, %v671_v32  ;;  %2640 = vrot.lane.b32.xlu0 %v5390_v16, %s4801_s25  ;;  %v10414_v32 = vld [vmem:[#allocation31_spill] sm:$0xff] }
 0x2ef   :  { %10404 = vst [vmem:[#allocation75_spill] sm:$0xff] %v6593_v61  ;;  %10405 = vst [vmem:[#allocation74_spill] sm:$0xff] %v6596_v52  ;;  %v993_v14 = vmul.f32 %v6205_v19, %v929_v29  ;;  %v6618_v30 = vmul.f32 %v10409_v55, %v672_v63  ;;  %v6621_v52 = vmul.f32 %v10409_v55, %v670_v49  ;;  %v10423_v61 = vld [vmem:[#allocation81_spill] sm:$0xff] }
 0x2f0   :  { %10406 = vst [vmem:[#allocation71_spill] sm:$0xff] %v6603_v45  ;;  %10407 = vst [vmem:[#allocation77_spill] sm:$0xff] %v6606_v0  ;;  %v6624_v37 = vmul.f32 %v10409_v55, %v673_v34  ;;  %v1302_v58 = vmul.f32 %v6243_v39, %v1265_v7  ;;  %v6630_v6 = vmul.f32 %v10414_v32, %v991_v25  ;;  %v6642_v34 = vpop.permute.xlu0 %2588  ;;  %v10421_v55 = vld [vmem:[#allocation84_spill] sm:$0xff] }
 0x2f1   :  { %10408 = vst [vmem:[#allocation76_spill] sm:$0xff] %v6609_v60  ;;  %10410 = vst [vmem:[#allocation79_spill] sm:$0xff] %v6612_v5  ;;  %v6633_v29 = vmul.f32 %v10414_v32, %v992_v17  ;;  %v10417_v60 = vld [vmem:[#allocation18_spill] sm:$0xff]  ;;  %v946_v49 = vsel %vm926_vm1, %v5563_v4, %v5585_v12  ;;  %v6645_v7 = vmul.f32 %v10414_v32, %v990_v15  ;;  %v10422_v17 = vld [vmem:[#allocation88_spill] sm:$0xff] }
 0x2f2   :  { %10411 = vst [vmem:[#allocation73_spill] sm:$0xff] %v6618_v30  ;;  %10412 = vst [vmem:[#allocation78_spill] sm:$0xff] %v6621_v52  ;;  %v6636_v63 = vmul.f32 %v10417_v60, %v1303_v26  ;;  %v1258_v25 = vsel %vm1238_vm3, %v10421_v55, %v5557_v62  ;;  %v1266_v26 = vsel %vm1238_vm3, %v10422_v17, %v10421_v55  ;;  %v6662_v15 = vld [vmem:[%s9626_s1 + $0x6] ss:$8 sm:$0xf] }
 0x2f3   :  { %10413 = vst [vmem:[#allocation28_spill] sm:$0xff] %v6624_v37  ;;  %10415 = vst [vmem:[#allocation12_spill] sm:$0xff] %v6630_v6  ;;  %v938_v0 = vsel %vm926_vm1, %v5585_v12, %v10423_v61  ;;  %v10427_v6 = vld [vmem:[#allocation86_spill] sm:$0xff]  ;;  %v10429_v37 = vld [vmem:[#allocation83_spill] sm:$0xff]  ;;  %v6698_v45 = vmul.f32 %v6227_v48, %v1258_v25 }
 0x2f4   :  { %10416 = vst [vmem:[#allocation31_spill] sm:$0xff] %v6633_v29  ;;  %10418 = vst [vmem:[#allocation18_spill] sm:$0xff] %v6636_v63  ;;  %v6664_v63 = vpop.permute.xlu1 %2308  ;;  %v6667_v29 = vmul.f32 %v10414_v32, %v993_v14  ;;  %v10430_v30 = vld [vmem:[#allocation91_spill] sm:$0xff]  ;;  %v6684_v14 = vmul.f32 %v10417_v60, %v1302_v58  ;;  %v6701_v58 = vmul.f32 %v6243_v39, %v1266_v26 }
 0x2f5   :  { %10419 = vst [vmem:[#allocation248_spill] sm:$0xff] %v6642_v34  ;;  %10420 = vst [vmem:[#allocation249_spill] sm:$0xff] %v6645_v7  ;;  %v10428_v7 = vld [vmem:[#allocation89_spill] sm:$0xff]  ;;  %v635_v5 = vsel %vm607_vm2, %v10430_v30, %v10429_v37  ;;  %v10431_v52 = vld [vmem:[#allocation19_spill] sm:$0xff]  ;;  %v611_v32 = vsel %vm607_vm2, %v10427_v6, %v10430_v30  ;;  %v6706_v30 = vrot.slane %v6662_v15, %v6136_v20 }
 0x2f6   :  { %10424 = vst [vmem:[#allocation84_spill] sm:$0xff] %v6662_v15  ;;  %10425 = vst [vmem:[#allocation88_spill] sm:$0xff] %v6664_v63  ;;  %v619_v55 = vsel %vm607_vm2, %v10428_v7, %v10427_v6  ;;  %v627_v12 = vsel %vm607_vm2, %v10429_v37, %v10428_v7  ;;  %2930 = vrot.lane.b32.xlu1 %v10431_v52, %s4802_s18  ;;  %v10433_v34 = vld [vmem:[#allocation94_spill] sm:$0xff]  ;;  %v6708_v6 = vpop.permute.xlu0 %2604  ;;  %v6717_v25 = vmul.f32 %v6214_v18, %v635_v5  ;;  %v10447_v5 = vld [vmem:[#allocation105_spill] sm:$0xff] }
 0x2f7   :  { %10426 = vst [vmem:[#allocation81_spill] sm:$0xff] %v6667_v29  ;;  %10432 = vst [vmem:[#allocation86_spill] sm:$0xff] %v6684_v14  ;;  %v995_v29 = vmul.f32 %v6192_v1, %v946_v49  ;;  %v10434_v7 = vld [vmem:[#allocation90_spill] sm:$0xff]  ;;  %v996_v14 = vmul.f32 %v6195_v57, %v938_v0  ;;  %v6711_v49 = vmul.f32 %v6208_v27, %v627_v12  ;;  %v10445_v12 = vld [vmem:[#allocation103_spill] sm:$0xff] }
 0x2f8   :  { %v628_v63 = vsel %vm607_vm2, %v10434_v7, %v10433_v34  ;;  %v10435_v37 = vld [vmem:[#allocation38_spill] sm:$0xff]  ;;  %10436 = vst [vmem:[#allocation89_spill] sm:$0xff] %v6706_v30  ;;  %10437 = vst [vmem:[#allocation83_spill] sm:$0xff] %v6708_v6  ;;  %v6714_v52 = vmul.f32 %v6211_v36, %v619_v55  ;;  %v6721_v26 = vrot.slane %v6662_v15, %v6132_v28  ;;  %v6723_v0 = vpop.permute.xlu1 %2443 }
 0x2f9   :  { %2904 = vrot.lane.b32.xlu0 %v10435_v37, %s4802_s18  ;;  %10438 = vst [vmem:[#allocation91_spill] sm:$0xff] %v6711_v49  ;;  %10440 = vst [vmem:[#allocation90_spill] sm:$0xff] %v6717_v25  ;;  %v6726_v46 = vmul.f32 %v6224_v3, %v611_v32  ;;  %v6729_v6 = vmul.f32 %v6208_v27, %v628_v63  ;;  %v10446_v49 = vld [vmem:[#allocation97_spill] sm:$0xff]  ;;  %v10448_v25 = vld [vmem:[#allocation138_spill] sm:$0xff] }
 0x2fa   :  { %10439 = vst [vmem:[#allocation94_spill] sm:$0xff] %v6714_v52  ;;  %10441 = vst [vmem:[#allocation38_spill] sm:$0xff] %v6721_v26  ;;  %v629_v55 = vsel %vm607_vm2, %v10446_v49, %v10445_v12  ;;  %v637_v52 = vsel %vm607_vm2, %v10447_v5, %v10446_v49  ;;  %3063 = vperm.xlu1 %4732, %v10448_v25   ;;  %v10451_v32 = vld [vmem:[#allocation93_spill] sm:$0xff]  ;;  %v10454_v25 = vld [vmem:[#allocation108_spill] sm:$0xff] }
 0x2fb   :  { %10442 = vst [vmem:[#allocation250_spill] sm:$0xff] %v6723_v0  ;;  %10443 = vst [vmem:[#allocation251_spill] sm:$0xff] %v6726_v46  ;;  %v6741_v0 = vmul.f32 %v10449_v38, %v995_v29  ;;  %v954_v63 = vsel %vm926_vm1, %v10451_v32, %v5563_v4  ;;  %v6758_v29 = vmul.f32 %v10449_v38, %v996_v14  ;;  %v10459_v14 = vld [vmem:[#allocation92_spill] sm:$0xff] }
 0x2fc   :  { %10444 = vst [vmem:[#allocation252_spill] sm:$0xff] %v6729_v6  ;;  %v10452_v6 = vld [vmem:[#allocation99_spill] sm:$0xff]  ;;  %v930_v4 = vsel %vm926_vm1, %v10423_v61, %v10451_v32  ;;  %v10460_v26 = vld [vmem:[#allocation100_spill] sm:$0xff]  ;;  %v683_v32 = vmul.f32 %v6208_v27, %v629_v55  ;;  %v682_v30 = vmul.f32 %v6214_v18, %v637_v52  ;;  %v6784_v15 = vpop.permute.xlu1 %2630 }
 0x2fd   :  { %10450 = vst [vmem:[#allocation103_spill] sm:$0xff] %v6741_v0  ;;  %v621_v46 = vsel %vm607_vm2, %v10445_v12, %v10452_v6  ;;  %v613_v49 = vsel %vm607_vm2, %v10452_v6, %v10447_v5  ;;  %2920 = vrot.lane.b32.xlu0 %v5381_v53, %s4802_s18  ;;  %10453 = vst [vmem:[#allocation97_spill] sm:$0xff] %v6758_v29  ;;  %v10455_v0 = vld [vmem:[#allocation101_spill] sm:$0xff]  ;;  %v6772_v5 = vpop.permute.xlu0 %2620  ;;  %v947_v29 = vsel %vm926_vm1, %v10459_v14, %v10458_v21 }
 0x2fe   :  { %v948_v12 = vsel %vm926_vm1, %v10455_v0, %v10454_v25  ;;  %v956_v6 = vsel %vm926_vm1, %v10456_v33, %v10455_v0  ;;  %10457 = vst [vmem:[#allocation105_spill] sm:$0xff] %v6772_v5  ;;  %v955_v61 = vsel %vm926_vm1, %v10460_v26, %v10459_v14  ;;  %10461 = vst [vmem:[#allocation138_spill] sm:$0xff] %v6784_v15  ;;  %v10462_v5 = vld [vmem:[#allocation96_spill] sm:$0xff]  ;;  %1970 = vrot.lane.b32.xlu1 %v10463_v13, %s4797_s22  ;;  %v10467_v15 = vld [vmem:[#allocation17_spill] sm:$0xff] }
 0x2ff   :  { %v994_v0 = vmul.f32 %v6198_v2, %v954_v63  ;;  %v636_v43 = vsel %vm607_vm2, %v10462_v5, %v10434_v7  ;;  %v684_v53 = vmul.f32 %v6211_v36, %v621_v46  ;;  %v685_v33 = vmul.f32 %v6224_v3, %v613_v49  ;;  %v10465_v46 = vld [vmem:[#allocation95_spill] sm:$0xff] }
 0x300   :  { %v997_v55 = vmul.f32 %v6205_v19, %v930_v4  ;;  %v1003_v52 = vmul.f32 %v6192_v1, %v948_v12  ;;  %v1002_v14 = vmul.f32 %v6198_v2, %v956_v6  ;;  %v10464_v63 = vmov 7  }
 0x301   :  { %2936 = vrot.lane.b32.xlu0 %v5364_v9, %s4802_s18  ;;  %4734 = vset.pattern.permute.xlu1 %v10464_v63  ;;  %v612_v7 = vsel %vm607_vm2, %v10465_v46, %v10462_v5  ;;  %v620_v49 = vsel %vm607_vm2, %v10433_v34, %v10465_v46  ;;  %v999_v4 = vmul.f32 %v6192_v1, %v947_v29  ;;  %v6812_v6 = vpop.permute.xlu0 %1530  ;;  %v10468_v9 = vld [vmem:[#allocation107_spill] sm:$0xff]  ;;  %v6824_v46 = vpop.permute.xlu1 %2894 }
 0x302   :  { %v998_v12 = vmul.f32 %v6198_v2, %v955_v61  ;;  %10466 = vst [vmem:[#allocation15_spill] sm:$0xff] %v6812_v6  ;;  %v755_v13 = vmul.f32 %v10467_v15, %v683_v32  ;;  %v754_v63 = vmul.f32 %v10467_v15, %v682_v30  ;;  %v1242_v5 = vsel %vm1238_vm3, %v10468_v9, %v10422_v17  ;;  %v10507_v6 = vld [vmem:[#allocation129_spill] sm:$0xff] }
 0x303   :  { %v1250_v34 = vsel %vm1238_vm3, %v5557_v62, %v10468_v9  ;;  %10469 = vst [vmem:[#allocation93_spill] sm:$0xff] %v6824_v46  ;;  %v6827_v29 = vmul.f32 %v10449_v38, %v994_v0  ;;  %v6830_v61 = vmul.f32 %v6214_v18, %v636_v43  ;;  %v756_v30 = vmul.f32 %v10467_v15, %v684_v53  ;;  %v10474_v62 = vld [vmem:[#allocation22_spill] sm:$0xff] }
 0x304   :  { %v757_v32 = vmul.f32 %v10467_v15, %v685_v33  ;;  %1972 = vrot.lane.b32.xlu1 %v5539_v31, %s4797_s22  ;;  %v6837_v17 = vmul.f32 %v10449_v38, %v997_v55  ;;  %v6840_v9 = vmul.f32 %v6211_v36, %v620_v49  ;;  %v1067_v46 = vmul.f32 %v10474_v62, %v1003_v52  ;;  %v10476_v53 = vld [vmem:[#allocation34_spill] sm:$0xff]  ;;  %v10480_v52 = vld [vmem:[#allocation8_spill] sm:$0xff] }
 0x305   :  { %10470 = vst [vmem:[#allocation99_spill] sm:$0xff] %v6827_v29  ;;  %10471 = vst [vmem:[#allocation108_spill] sm:$0xff] %v6830_v61  ;;  %v1066_v0 = vmul.f32 %v10474_v62, %v1002_v14  ;;  %3075 = vperm.xlu0 %4733, %v5748_v22   ;;  %v6846_v43 = vmul.f32 %v6224_v3, %v612_v7  ;;  %v6849_v33 = vmul.f32 %v10476_v53, %v999_v4  ;;  %v6853_v55 = vpop.permute.xlu0 %2014  ;;  %v10481_v22 = vld [vmem:[#allocation222_spill] sm:$0xff]  ;;  %v10512_v3 = vld [vmem:[#allocation132_spill] sm:$0xff] }
 0x306   :  { %10472 = vst [vmem:[#allocation101_spill] sm:$0xff] %v6837_v17  ;;  %10473 = vst [vmem:[#allocation98_spill] sm:$0xff] %v6840_v9  ;;  %v1308_v15 = vmul.f32 %v6230_v59, %v1250_v34  ;;  %v1309_v38 = vmul.f32 %v6246_v10, %v1242_v5  ;;  %v6856_v49 = vmul.f32 %v10476_v53, %v998_v12  ;;  %v453_v4 = vld [vmem:[%s9631_s6] sm:$0xff] }
 0x307   :  { %10475 = vst [vmem:[#allocation92_spill] sm:$0xff] %v6846_v43  ;;  %10477 = vst [vmem:[#allocation100_spill] sm:$0xff] %v6849_v33  ;;  %v819_v9 = vadd.f32 %v755_v13, %v10480_v52  ;;  %v818_v14 = vadd.f32 %v754_v63, %v10480_v52  ;;  %v6862_v7 = vrot.slane %v6390_v51, %v10481_v22  ;;  %v6864_v43 = vpop.permute.xlu1 %2910  ;;  %v10484_v13 = vld [vmem:[#allocation104_spill] sm:$0xff]  ;;  %v10486_v63 = vld [vmem:[#allocation225_spill] sm:$0xff] }
 0x308   :  { %10478 = vst [vmem:[#allocation96_spill] sm:$0xff] %v6853_v55  ;;  %10479 = vst [vmem:[#allocation95_spill] sm:$0xff] %v6856_v49  ;;  %v6870_v5 = vadd.f32 %v756_v30, %v10480_v52  ;;  %v6873_v12 = vadd.f32 %v757_v32, %v10480_v52  ;;  %v6877_v34 = vmul.f32 %v10484_v13, %v6701_v58  ;;  %1988 = vrot.lane.b32.xlu1 %v5549_v50, %s4797_s22  ;;  %v10491_v32 = vld [vmem:[#allocation116_spill] sm:$0xff]  ;;  %v10492_v52 = vmov 0   ;;  %v10509_v50 = vld [vmem:[#allocation130_spill] sm:$0xff] }
 0x309   :  { %10482 = vst [vmem:[#allocation17_spill] sm:$0xff] %v6862_v7  ;;  %10483 = vst [vmem:[#allocation107_spill] sm:$0xff] %v6864_v43  ;;  %v6881_v33 = vrot.slane %v6390_v51, %v10486_v63  ;;  %v6885_v49 = vadd.f32 %v1067_v46, %v819_v9  ;;  %v6889_v30 = vmul.f32 %v10484_v13, %v6698_v45  ;;  %4736 = vset.pattern.permute.xlu0 %v10492_v52  ;;  %v10495_v46 = vld [vmem:[#allocation113_spill] sm:$0xff]  ;;  %v10496_v9 = vld [vmem:[#allocation110_spill] sm:$0xff] }
 0x30a   :  { %10485 = vst [vmem:[#allocation22_spill] sm:$0xff] %v6877_v34  ;;  %v6891_v17 = vadd.f32 %v1066_v0, %v818_v14  ;;  %v1249_v58 = vsel %vm1238_vm3, %v5524_v56, %v10491_v32  ;;  %v6899_v51 = vmul.f32 %v10484_v13, %v1308_v15  ;;  %v6902_v34 = vmul.f32 %v10484_v13, %v1309_v38  ;;  %v10497_v0 = vld [vmem:[#allocation115_spill] sm:$0xff]  ;;  %v6912_v56 = vpop.permute.xlu0 %2278  ;;  %v10500_v13 = vld [vmem:[#allocation117_spill] sm:$0xff] }
 0x30b   :  { %10487 = vst [vmem:[#allocation34_spill] sm:$0xff] %v6881_v33  ;;  %10488 = vst [vmem:[#allocation8_spill] sm:$0xff] %v6885_v49  ;;  %v1570_v45 = vsel %vm1550_vm4, %v10496_v9, %v10495_v46  ;;  %v1578_v14 = vsel %vm1550_vm4, %v10497_v0, %v10496_v9  ;;  %463 = vperm.xlu0 %4736, %v453_v4   ;;  %v1241_v15 = vsel %vm1238_vm3, %v10491_v32, %v5533_v11  ;;  %v10499_v38 = vld [vmem:[#allocation119_spill] sm:$0xff]  ;;  %v10503_v9 = vld [vmem:[#allocation122_spill] sm:$0xff]  ;;  %v6930_v29 = vpop.permute.xlu1 %2926 }
 0x30c   :  { %10489 = vst [vmem:[#allocation104_spill] sm:$0xff] %v6889_v30  ;;  %10490 = vst [vmem:[#allocation253_spill] sm:$0xff] %v6891_v17  ;;  %v10502_v30 = vld [vmem:[#allocation118_spill] sm:$0xff]  ;;  %v455_v11 = vld [vmem:[%s9631_s6 + $0x10] sm:$0xff]  ;;  %v1304_v32 = vmul.f32 %v6230_v59, %v1249_v58  ;;  %2004 = vrot.lane.b32.xlu1 %v5681_v54, %s4797_s22  ;;  %v1305_v54 = vmul.f32 %v6246_v10, %v1241_v15 }
 0x30d   :  { %10493 = vst [vmem:[#allocation116_spill] sm:$0xff] %v6899_v51  ;;  %10494 = vst [vmem:[#allocation254_spill] sm:$0xff] %v6902_v34  ;;  %v2031_v34 = vsel %vm2022_vm5, %v10500_v13, %v10499_v38  ;;  %v10501_v51 = vld [vmem:[#allocation120_spill] sm:$0xff]  ;;  %v1577_v4 = vsel %vm1550_vm4, %v10503_v9, %v10502_v30  ;;  %v10508_v58 = vld [vmem:[#allocation127_spill] sm:$0xff] }
 0x30e   :  { %10498 = vst [vmem:[#allocation113_spill] sm:$0xff] %v6912_v56  ;;  %v1569_v61 = vsel %vm1550_vm4, %v10502_v30, %v10501_v51  ;;  %10504 = vst [vmem:[#allocation110_spill] sm:$0xff] %v6930_v29  ;;  %v10505_v56 = vld [vmem:[#allocation125_spill] sm:$0xff]  ;;  %v10506_v30 = vld [vmem:[#allocation126_spill] sm:$0xff]  ;;  %v1259_v52 = vsel %vm1238_vm3, %v10508_v58, %v10507_v6  ;;  %v2079_v36 = vmul.f32 %v6429_v23, %v2031_v34 }
 0x30f   :  { %v931_v43 = vsel %vm926_vm1, %v10505_v56, %v10460_v26  ;;  %v939_v55 = vsel %vm926_vm1, %v10458_v21, %v10505_v56  ;;  %v2039_v29 = vsel %vm2022_vm5, %v10506_v30, %v10500_v13  ;;  %v10510_v26 = vld [vmem:[#allocation128_spill] sm:$0xff]  ;;  %v10511_v21 = vld [vmem:[#allocation131_spill] sm:$0xff]  ;;  %v2032_v13 = vsel %vm2022_vm5, %v10509_v50, %v10512_v3  ;;  %473 = vperm.xlu0 %4736, %v455_v11  }
 0x310   :  { %v2040_v31 = vsel %vm2022_vm5, %v10510_v26, %v10509_v50  ;;  %v1267_v56 = vsel %vm1238_vm3, %v10511_v21, %v10508_v58  ;;  %v1615_v33 = vmul.f32 %v6259_v24, %v1569_v61  ;;  %v1614_v7 = vmul.f32 %v6277_v40, %v1577_v4  ;;  %v6974_v17 = vld [vmem:[%s9626_s1 + $0x7] ss:$8 sm:$0xf]  ;;  %v6976_v58 = vpop.permute.xlu0 %2294  ;;  %v6982_v26 = vpop.permute.xlu1 %3055  ;;  %2328 = vrot.lane.b32.xlu1 %v5390_v16, %s4799_s23 }
 0x311   :  { %10513 = vst [vmem:[#allocation115_spill] sm:$0xff] %v6976_v58  ;;  %v1619_v50 = vmul.f32 %v6259_v24, %v1570_v45  ;;  %v1000_v49 = vmul.f32 %v6195_v57, %v939_v55  ;;  %v1001_v15 = vmul.f32 %v6205_v19, %v931_v43  ;;  %v2078_v34 = vmul.f32 %v6601_v44, %v2039_v29  ;;  %v457_v61 = vld [vmem:[%s9631_s6 + $0x20] sm:$0xff] }
 0x312   :  { %10514 = vst [vmem:[#allocation119_spill] sm:$0xff] %v6982_v26  ;;  %v1311_v4 = vmul.f32 %v6227_v48, %v1259_v52  ;;  %v2082_v11 = vmul.f32 %v6601_v44, %v2040_v31  ;;  %v1310_v58 = vmul.f32 %v6243_v39, %v1267_v56  ;;  %v2083_v45 = vmul.f32 %v6429_v23, %v2032_v13  ;;  %v10519_v56 = vld [vmem:[#allocation25_spill] sm:$0xff]  ;;  %v10521_v26 = vld [vmem:[#allocation24_spill] sm:$0xff] }
 0x313   :  { %v1618_v43 = vmul.f32 %v6277_v40, %v1578_v14  ;;  %v6995_v29 = vmul.f32 %v10417_v60, %v1304_v32  ;;  %v6999_v55 = vrot.slane %v6974_v17, %v6136_v20  ;;  %v7003_v52 = vrot.slane %v6974_v17, %v6132_v28  ;;  %483 = vperm.xlu0 %4736, %v457_v61   ;;  %v10531_v61 = vld [vmem:[#allocation30_spill] sm:$0xff] }
 0x314   :  { %v7006_v31 = vmul.f32 %v10417_v60, %v1305_v54  ;;  %v7009_v13 = vmul.f32 %v10519_v56, %v2079_v36  ;;  %v7012_v16 = vmul.f32 %v10521_v26, %v1615_v33  ;;  %v7015_v14 = vmul.f32 %v10521_v26, %v1614_v7  ;;  %v7017_v32 = vpop.permute.xlu0 %2310  ;;  %v10528_v36 = vld [vmem:[#allocation143_spill] sm:$0xff]  ;;  %v10529_v60 = vld [vmem:[#allocation141_spill] sm:$0xff]  ;;  %v459_v7 = vld [vmem:[%s9631_s6 + $0x30] sm:$0xff]  ;;  %2592 = vrot.lane.b32.xlu1 %v10435_v37, %s4801_s25 }
 0x315   :  { %10515 = vst [vmem:[#allocation117_spill] sm:$0xff] %v6995_v29  ;;  %10516 = vst [vmem:[#allocation120_spill] sm:$0xff] %v6999_v55  ;;  %v7020_v29 = vmul.f32 %v10476_v53, %v1000_v49  ;;  %v7026_v54 = vmul.f32 %v10519_v56, %v2078_v34  ;;  %v631_v33 = vsel %vm607_vm2, %v10529_v60, %v10528_v36 }
 0x316   :  { %10517 = vst [vmem:[#allocation118_spill] sm:$0xff] %v7003_v52  ;;  %10518 = vst [vmem:[#allocation122_spill] sm:$0xff] %v7006_v31  ;;  %v7023_v52 = vmul.f32 %v10476_v53, %v1001_v15  ;;  %v7038_v49 = vmul.f32 %v10531_v61, %v1311_v4  ;;  %v7044_v15 = vmul.f32 %v10531_v61, %v1310_v58  ;;  %v10553_v31 = vld [vmem:[#allocation146_spill] sm:$0xff] }
 0x317   :  { %10520 = vst [vmem:[#allocation125_spill] sm:$0xff] %v7009_v13  ;;  %10522 = vst [vmem:[#allocation126_spill] sm:$0xff] %v7012_v16  ;;  %v7032_v16 = vpop.permute.xlu1 %1218  ;;  %493 = vperm.xlu0 %4736, %v459_v7  }
 0x318   :  { %10523 = vst [vmem:[#allocation129_spill] sm:$0xff] %v7015_v14  ;;  %10524 = vst [vmem:[#allocation127_spill] sm:$0xff] %v7017_v32 }
 0x319   :  { %10525 = vst [vmem:[#allocation130_spill] sm:$0xff] %v7020_v29  ;;  %10526 = vst [vmem:[#allocation131_spill] sm:$0xff] %v7023_v52  ;;  %v10533_v29 = vld [vmem:[#allocation26_spill] sm:$0xff]  ;;  %v10537_v52 = vld [vmem:[#allocation135_spill] sm:$0xff] }
 0x31a   :  { %10527 = vst [vmem:[#allocation132_spill] sm:$0xff] %v7026_v54  ;;  %10530 = vst [vmem:[#allocation25_spill] sm:$0xff] %v7032_v16  ;;  %v7041_v53 = vmul.f32 %v10533_v29, %v2082_v11  ;;  %v7047_v34 = vmul.f32 %v10533_v29, %v2083_v45  ;;  %v7053_v14 = vmul.f32 %v10537_v52, %v6509_v8  ;;  %v10541_v11 = vld [vmem:[#allocation145_spill] sm:$0xff]  ;;  %v10559_v54 = vld [vmem:[#allocation84_spill] sm:$0xff] }
 0x31b   :  { %10532 = vst [vmem:[#allocation24_spill] sm:$0xff] %v7038_v49  ;;  %10535 = vst [vmem:[#allocation141_spill] sm:$0xff] %v7044_v15  ;;  %v7057_v4 = vmul.f32 %v10537_v52, %v6497_v42  ;;  %v10540_v49 = vld [vmem:[#allocation142_spill] sm:$0xff]  ;;  %v639_v45 = vsel %vm607_vm2, %v10541_v11, %v10529_v60  ;;  %v7069_v15 = vmul.f32 %v10537_v52, %v6506_v41  ;;  %v10546_v41 = vld [vmem:[#allocation137_spill] sm:$0xff] }
 0x31c   :  { %10534 = vst [vmem:[#allocation143_spill] sm:$0xff] %v7041_v53  ;;  %10536 = vst [vmem:[#allocation30_spill] sm:$0xff] %v7047_v34  ;;  %v1562_v58 = vsel %vm1550_vm4, %v10495_v46, %v10540_v49  ;;  %v1554_v8 = vsel %vm1550_vm4, %v10540_v49, %v10497_v0  ;;  %v691_v42 = vmul.f32 %v6208_v27, %v631_v33  ;;  %v10543_v34 = vld [vmem:[#allocation147_spill] sm:$0xff]  ;;  %v7080_v53 = vpop.permute.xlu0 %2447 }
 0x31d   :  { %10538 = vst [vmem:[#allocation26_spill] sm:$0xff] %v7053_v14  ;;  %10539 = vst [vmem:[#allocation135_spill] sm:$0xff] %v7057_v4  ;;  %v940_v46 = vsel %vm926_vm1, %v10454_v25, %v10543_v34  ;;  %v7084_v60 = vmul.f32 %v10537_v52, %v6512_v47  ;;  %v7090_v4 = vmul.f32 %v10546_v41, %v1619_v50  ;;  %v10549_v0 = vld [vmem:[#allocation139_spill] sm:$0xff]  ;;  %v7096_v14 = vpop.permute.xlu1 %1220  ;;  %v10552_v25 = vld [vmem:[#allocation48_spill] sm:$0xff] }
 0x31e   :  { %10542 = vst [vmem:[#allocation142_spill] sm:$0xff] %v7069_v15  ;;  %10544 = vst [vmem:[#allocation145_spill] sm:$0xff] %v7080_v53  ;;  %v7087_v15 = vmul.f32 %v10546_v41, %v1618_v43  ;;  %v10550_v33 = vld [vmem:[#allocation123_spill] sm:$0xff]  ;;  %v1620_v7 = vmul.f32 %v10552_v25, %v1562_v58  ;;  %v690_v53 = vmul.f32 %v6214_v18, %v639_v45  ;;  %v10554_v47 = vld [vmem:[#allocation144_spill] sm:$0xff] }
 0x31f   :  { %10545 = vst [vmem:[#allocation147_spill] sm:$0xff] %v7084_v60  ;;  %10548 = vst [vmem:[#allocation255_spill] sm:$0xff] %v7090_v4  ;;  %v638_v49 = vsel %vm607_vm2, %v10550_v33, %v10549_v0  ;;  %v2351_v43 = vsel %vm2334_vm6, %v10554_v47, %v10553_v31  ;;  %v10555_v52 = vld [vmem:[#allocation111_spill] sm:$0xff]  ;;  %v10556_v4 = vld [vmem:[#allocation44_spill] sm:$0xff]  ;;  %v1004_v13 = vmul.f32 %v6195_v57, %v940_v46 }
 0x320   :  { %10547 = vst [vmem:[#allocation137_spill] sm:$0xff] %v7087_v15  ;;  %10551 = vst [vmem:[#allocation139_spill] sm:$0xff] %v7096_v14  ;;  %v932_v50 = vsel %vm926_vm1, %v10543_v34, %v10555_v52  ;;  %2608 = vrot.lane.b32.xlu1 %v10556_v4, %s4801_s25  ;;  %v10557_v15 = vld [vmem:[#allocation121_spill] sm:$0xff]  ;;  %v10558_v60 = vld [vmem:[#allocation50_spill] sm:$0xff]  ;;  %v7118_v16 = vrot.slane %v10559_v54, %v10481_v22  ;;  %v7121_v32 = vmul.f32 %v6214_v18, %v638_v49  ;;  %v7150_v57 = vpop.permute.xlu0 %2739 }
 0x321   :  { %v630_v58 = vsel %vm607_vm2, %v10549_v0, %v10557_v15  ;;  %v1621_v45 = vmul.f32 %v10558_v60, %v1554_v8  ;;  %v10562_v34 = vld [vmem:[#allocation27_spill] sm:$0xff]  ;;  %v10563_v14 = vld [vmem:[#allocation148_spill] sm:$0xff]  ;;  %v7130_v0 = vrot.slane %v10559_v54, %v10486_v63  ;;  %v10567_v18 = vld [vmem:[#allocation89_spill] sm:$0xff]  ;;  %10572 = vst [vmem:[#allocation121_spill] sm:$0xff] %v7150_v57  ;;  %v1068_v57 = vmul.f32 %v10474_v62, %v1004_v13 }
 0x322   :  { %10560 = vst [vmem:[#allocation123_spill] sm:$0xff] %v7118_v16  ;;  %10561 = vst [vmem:[#allocation48_spill] sm:$0xff] %v7121_v32  ;;  %v763_v52 = vmul.f32 %v10562_v34, %v691_v42  ;;  %v2343_v47 = vsel %vm2334_vm6, %v10553_v31, %v10563_v14  ;;  %v7135_v8 = vld [vmem:[%s9626_s1 + $0x20] ss:$8 sm:$0xf]  ;;  %v2390_v49 = vmul.f32 %v10567_v18, %v2351_v43 }
 0x323   :  { %10564 = vst [vmem:[#allocation146_spill] sm:$0xff] %v7130_v0  ;;  %10565 = vst [vmem:[#allocation111_spill] sm:$0xff] %v7135_v8  ;;  %v10566_v46 = vld [vmem:[#allocation164_spill] sm:$0xff]  ;;  %v1005_v42 = vmul.f32 %v6205_v19, %v932_v50  ;;  %v10568_v32 = vld [vmem:[#allocation151_spill] sm:$0xff]  ;;  %v7148_v0 = vpop.permute.xlu1 %1500  ;;  %v7156_v43 = vmul.f32 %v10546_v41, %v1620_v7  ;;  %v762_v50 = vmul.f32 %v10562_v34, %v690_v53 }
 0x324   :  { %701 = vperm.xlu0 %4736, %v10566_v46   ;;  %v10569_v16 = vld [vmem:[#allocation149_spill] sm:$0xff]  ;;  %10571 = vst [vmem:[#allocation44_spill] sm:$0xff] %v7148_v0  ;;  %v7153_v46 = vmul.f32 %v6208_v27, %v630_v58  ;;  %v7161_v19 = vrot.slane %v6974_v17, %v10486_v63  ;;  %v10578_v0 = vld [vmem:[#allocation38_spill] sm:$0xff]  ;;  %v7172_v7 = vrot.slane %v7135_v8, %v6136_v20 }
 0x325   :  { %v1260_v31 = vsel %vm1238_vm3, %v10569_v16, %v10568_v32  ;;  %v10570_v14 = vld [vmem:[#allocation153_spill] sm:$0xff]  ;;  %10574 = vst [vmem:[#allocation27_spill] sm:$0xff] %v7156_v43  ;;  %v2391_v27 = vmul.f32 %v10578_v0, %v2343_v47  ;;  %v10581_v43 = vld [vmem:[#allocation152_spill] sm:$0xff]  ;;  %v10582_v63 = vld [vmem:[#allocation150_spill] sm:$0xff]  ;;  %v7196_v20 = vrot.slane %v7135_v8, %v6132_v28 }
 0x326   :  { %v1268_v54 = vsel %vm1238_vm3, %v10570_v14, %v10569_v16  ;;  %10573 = vst [vmem:[#allocation84_spill] sm:$0xff] %v7153_v46  ;;  %10575 = vst [vmem:[#allocation164_spill] sm:$0xff] %v7161_v19  ;;  %v10576_v32 = vld [vmem:[#allocation41_spill] sm:$0xff]  ;;  %v7166_v16 = vmul.f32 %v10546_v41, %v1621_v45  ;;  %v1315_v46 = vmul.f32 %v6227_v48, %v1260_v31 }
 0x327   :  { %2624 = vrot.lane.b32.xlu1 %v10576_v32, %s4801_s25  ;;  %10579 = vst [vmem:[#allocation153_spill] sm:$0xff] %v7172_v7  ;;  %v10580_v58 = vld [vmem:[#allocation9_spill] sm:$0xff]  ;;  %v949_v19 = vsel %vm926_vm1, %v10582_v63, %v10581_v43  ;;  %v1314_v41 = vmul.f32 %v6243_v39, %v1268_v54  ;;  %10586 = vst [vmem:[#allocation38_spill] sm:$0xff] %v7196_v20  ;;  %v7198_v54 = vpop.permute.xlu1 %1516  ;;  %v7200_v43 = vpop.permute.xlu0 %2743 }
 0x328   :  { %10577 = vst [vmem:[#allocation149_spill] sm:$0xff] %v7166_v16  ;;  %v7175_v53 = vadd.f32 %v763_v52, %v10580_v58  ;;  %v4750_v13 = vld [vmem:[%s9630_s5 + $0x18] sm:$0xff]  ;;  %v1069_v52 = vmul.f32 %v10474_v62, %v1005_v42  ;;  %v10585_v16 = vld [vmem:[#allocation154_spill] sm:$0xff]  ;;  %10587 = vst [vmem:[#allocation9_spill] sm:$0xff] %v7198_v54  ;;  %v7215_v42 = vrot.slane %v6974_v17, %v10481_v22  ;;  %v10605_v22 = vmov 8  }
 0x329   :  { %711 = vperm.xlu0 %4736, %v4750_v13   ;;  %v10583_v47 = vld [vmem:[#allocation33_spill] sm:$0xff]  ;;  %v957_v31 = vsel %vm926_vm1, %v10585_v16, %v10582_v63  ;;  %10588 = vst [vmem:[#allocation150_spill] sm:$0xff] %v7200_v43  ;;  %v7203_v13 = vadd.f32 %v762_v50, %v10580_v58  ;;  %v7221_v50 = vadd.f32 %v1068_v57, %v6870_v5  ;;  %v10593_v17 = vld [vmem:[#allocation106_spill] sm:$0xff] }
 0x32a   :  { %v7187_v45 = vmul.f32 %v10583_v47, %v2390_v49  ;;  %v10589_v49 = vld [vmem:[#allocation156_spill] sm:$0xff]  ;;  %10590 = vst [vmem:[#allocation33_spill] sm:$0xff] %v7215_v42  ;;  %v7224_v28 = vmul.f32 %v10583_v47, %v2391_v27  ;;  %v10592_v43 = vld [vmem:[#allocation157_spill] sm:$0xff]  ;;  %v1378_v54 = vmul.f32 %v10593_v17, %v1314_v41  ;;  %v1006_v8 = vmul.f32 %v6198_v2, %v957_v31  ;;  %v10595_v41 = vld [vmem:[#allocation158_spill] sm:$0xff] }
 0x32b   :  { %v1243_v62 = vsel %vm1238_vm3, %v10589_v49, %v10511_v21  ;;  %v1251_v63 = vsel %vm1238_vm3, %v10507_v6, %v10589_v49  ;;  %v1007_v21 = vmul.f32 %v6192_v1, %v949_v19  ;;  %v1561_v6 = vsel %vm1550_vm4, %v10501_v51, %v10592_v43  ;;  %v4752_v19 = vld [vmem:[%s9630_s5 + $0x20] sm:$0xff]  ;;  %v10594_v27 = vld [vmem:[#allocation160_spill] sm:$0xff]  ;;  %v7250_v31 = vpop.permute.xlu1 %1548 }
 0x32c   :  { %10584 = vst [vmem:[#allocation41_spill] sm:$0xff] %v7187_v45  ;;  %v4751_v45 = vld [vmem:[%s9630_s5 + $0x38] sm:$0xff]  ;;  %10591 = vst [vmem:[#allocation156_spill] sm:$0xff] %v7224_v28  ;;  %v1379_v49 = vmul.f32 %v10593_v17, %v1315_v46  ;;  %v1553_v57 = vsel %vm1550_vm4, %v10592_v43, %v10503_v9  ;;  %v7242_v5 = vadd.f32 %v1069_v52, %v6873_v12  ;;  %v7252_v9 = vpop.permute.xlu0 %2755  ;;  %v10606_v42 = vld [vmem:[#allocation8_spill] sm:$0xff] }
 0x32d   :  { %2763 = vperm.xlu1 %4734, %v4751_v45   ;;  %716 = vperm.xlu0 %4736, %v4752_v19   ;;  %v1312_v51 = vmul.f32 %v6230_v59, %v1251_v63  ;;  %v1313_v46 = vmul.f32 %v6246_v10, %v1243_v62  ;;  %v1571_v45 = vsel %vm1550_vm4, %v10595_v41, %v10594_v27  ;;  %v10598_v28 = vld [vmem:[#allocation161_spill] sm:$0xff]  ;;  %v10599_v62 = vld [vmem:[#allocation162_spill] sm:$0xff]  ;;  %v10600_v19 = vld [vmem:[#allocation23_spill] sm:$0xff] }
 0x32e   :  { %10596 = vst [vmem:[#allocation157_spill] sm:$0xff] %v7250_v31  ;;  %10597 = vst [vmem:[#allocation106_spill] sm:$0xff] %v7252_v9  ;;  %v1616_v43 = vmul.f32 %v10552_v25, %v1561_v6  ;;  %v2023_v12 = vsel %vm2022_vm5, %v10499_v38, %v10598_v28  ;;  %v2047_v52 = vsel %vm2022_vm5, %v10598_v28, %v10506_v30  ;;  %v10601_v6 = vld [vmem:[#allocation102_spill] sm:$0xff]  ;;  %v10603_v31 = vld [vmem:[#allocation163_spill] sm:$0xff] }
 0x32f   :  { %v1579_v63 = vsel %vm1550_vm4, %v10599_v62, %v10595_v41  ;;  %v7271_v9 = vmul.f32 %v10601_v6, %v1007_v21  ;;  %v1617_v38 = vmul.f32 %v10558_v60, %v1553_v57  ;;  %v2024_v28 = vsel %vm2022_vm5, %v10512_v3, %v10603_v31  ;;  %v10604_v30 = vld [vmem:[#allocation128_spill] sm:$0xff]  ;;  %v10607_v27 = vld [vmem:[#allocation253_spill] sm:$0xff] }
 0x330   :  { %v2048_v41 = vsel %vm2022_vm5, %v10603_v31, %v10604_v30  ;;  %v7284_v20 = vadd.f32 %v1379_v49, %v10606_v42  ;;  %v7287_v21 = vadd.f32 %v1378_v54, %v10607_v27  ;;  %v7290_v57 = vmul.f32 %v10601_v6, %v1006_v8  ;;  %v7296_v3 = vld [vmem:[%s9630_s5 + $0x30] sm:$0xff]  ;;  %v10611_v42 = vld [vmem:[#allocation17_spill] sm:$0xff]  ;;  %v10612_v31 = vld [vmem:[#allocation34_spill] sm:$0xff]  ;;  %v7305_v8 = vpop.permute.xlu1 %1968  ;;  %v7307_v30 = vpop.permute.xlu0 %2636  ;;  %s4803_s5 = smov [#allocation3]  }
 0x331   :  { %2946 = vrot.lane.b32.xlu1 %v10600_v19, %s4802_s18  ;;  %10602 = vst [vmem:[#allocation158_spill] sm:$0xff] %v7271_v9  ;;  %v1623_v9 = vmul.f32 %v6259_v24, %v1571_v45  ;;  %10609 = vst [vmem:[#allocation23_spill] sm:$0xff] %v7296_v3  ;;  %726 = vperm.xlu0 %4736, %v7296_v3   ;;  %v2080_v49 = vmul.f32 %v10611_v42, %v2023_v12  ;;  %v10617_v12 = vld [vmem:[#allocation65_spill] sm:$0xff] }
 0x332   :  { %4735 = vset.pattern.permute.xlu1 %v10605_v22  ;;  %10608 = vst [vmem:[#allocation161_spill] sm:$0xff] %v7290_v57  ;;  %v7300_v22 = vmul.f32 %v10531_v61, %v1312_v51  ;;  %v2081_v54 = vmul.f32 %v10612_v31, %v2047_v52  ;;  %v1622_v27 = vmul.f32 %v6277_v40, %v1579_v63  ;;  %10613 = vst [vmem:[#allocation128_spill] sm:$0xff] %v7305_v8  ;;  %v10619_v63 = vld [vmem:[#allocation29_spill] sm:$0xff] }
 0x333   :  { %10614 = vst [vmem:[#allocation8_spill] sm:$0xff] %v7307_v30  ;;  %v7310_v45 = vmul.f32 %v10531_v61, %v1313_v46  ;;  %v7313_v57 = vmul.f32 %v10521_v26, %v1616_v43  ;;  %v2084_v6 = vmul.f32 %v10611_v42, %v2024_v28  ;;  %v2085_v51 = vmul.f32 %v10612_v31, %v2048_v41  ;;  %v10622_v30 = vld [vmem:[#allocation32_spill] sm:$0xff]  ;;  %v10626_v28 = vld [vmem:[#allocation35_spill] sm:$0xff]  ;;  %v10687_v3 = vld [vmem:[#allocation185_spill] sm:$0xff] }
 0x334   :  { %10610 = vst [vmem:[#allocation163_spill] sm:$0xff] %v7300_v22  ;;  %v7320_v52 = vmul.f32 %v10521_v26, %v1617_v38  ;;  %v10620_v22 = vld [vmem:[#allocation159_spill] sm:$0xff]  ;;  %v10624_v46 = vld [vmem:[#allocation36_spill] sm:$0xff]  ;;  %v10630_v26 = vld [vmem:[#allocation173_spill] sm:$0xff]  ;;  %v7364_v42 = vpop.permute.xlu1 %1984 }
 0x335   :  { %10615 = vst [vmem:[#allocation253_spill] sm:$0xff] %v7310_v45  ;;  %10616 = vst [vmem:[#allocation256_spill] sm:$0xff] %v7313_v57  ;;  %2018 = vrot.lane.b32.xlu1 %v10617_v12, %s4797_s22  ;;  %v7324_v8 = vmul.f32 %v10620_v22, %v10619_v63  ;;  %v7328_v61 = vmul.f32 %v10620_v22, %v10622_v30  ;;  %v7332_v43 = vmul.f32 %v10620_v22, %v10624_v46  ;;  %v10628_v45 = vld [vmem:[#allocation124_spill] sm:$0xff]  ;;  %v10631_v38 = vld [vmem:[#allocation171_spill] sm:$0xff]  ;;  %s4467_s22 = sshll.u32 %s4803_s5, 4  ;;  %s4468_s22 = int_to_ptr.vmem [resolvable:$true] %s4467_s22 }
 0x336   :  { %10618 = vst [vmem:[#allocation65_spill] sm:$0xff] %v7320_v52  ;;  %v7336_v41 = vmul.f32 %v10620_v22, %v10626_v28  ;;  %v7339_v57 = vmul.f32 %v10628_v45, %v1623_v9  ;;  %v10632_v52 = vld [vmem:[#allocation175_spill] sm:$0xff]  ;;  %v10633_v31 = vld [vmem:[#allocation80_spill] sm:$0xff]  ;;  %v7355_v22 = vmul.f32 %v10519_v56, %v2081_v54  ;;  %v7358_v9 = vmul.f32 %v10628_v45, %v1622_v27  ;;  %v10646_v27 = vld [vmem:[#allocation21_spill] sm:$0xff]  ;;  %s4762_s20 = scalar_lea.vmem %s4468_s22, 1024  ;;  %p4767_p1 = scmp.lt.s32.totalorder %s4468_s22, %s4468_s22 }
 0x337   :  { %10621 = vst [vmem:[#allocation29_spill] sm:$0xff] %v7324_v8  ;;  %10623 = vst [vmem:[#allocation159_spill] sm:$0xff] %v7328_v61  ;;  %v2042_v8 = vsel %vm2022_vm5, %v10631_v38, %v10630_v26  ;;  %v2034_v61 = vsel %vm2022_vm5, %v10630_v26, %v10632_v52  ;;  %2594 = vrot.lane.b32.xlu0 %v10633_v31, %s4801_s25  ;;  %v7366_v26 = vpop.permute.xlu0 %2900  ;;  %v7369_v52 = vmul.f32 %v10533_v29, %v2084_v6  ;;  %v10644_v54 = vld [vmem:[#allocation167_spill] sm:$0xff]  ;;  %v10650_v6 = vld [vmem:[#allocation170_spill] sm:$0xff]  ;;  %p4763_p0 = scmp.ne.s32.totalorder %s4468_s22, %s4762_s20  ;;  %p4768_p2 = scmp.lt.s32.totalorder %s4762_s20, %s4762_s20 }
 0x338   :  { %10625 = vst [vmem:[#allocation32_spill] sm:$0xff] %v7332_v43  ;;  %10627 = vst [vmem:[#allocation36_spill] sm:$0xff] %v7336_v41  ;;  %v7352_v43 = vmul.f32 %v10519_v56, %v2080_v49  ;;  %v10637_v41 = vld [vmem:[#allocation168_spill] sm:$0xff]  ;;  %v7372_v49 = vmul.f32 %v10533_v29, %v2085_v51  ;;  %v2090_v51 = vmul.f32 %v6601_v44, %v2042_v8  ;;  %v10655_v8 = vld [vmem:[#allocation62_spill] sm:$0xff] }
 0x339   :  { %10629 = vst [vmem:[#allocation35_spill] sm:$0xff] %v7339_v57  ;;  %10635 = vst [vmem:[#allocation80_spill] sm:$0xff] %v7355_v22  ;;  %v10638_v57 = vld [vmem:[#allocation166_spill] sm:$0xff]  ;;  %v10643_v56 = vld [vmem:[#allocation20_spill] sm:$0xff]  ;;  %2282 = vrot.lane.b32.xlu1 %v10633_v31, %s4799_s23  ;;  %v2344_v29 = vsel %vm2334_vm6, %v10637_v41, %v10650_v6  ;;  %p4769_p3 = por %p4768_p2, %p4767_p1 }
 0x33a   :  { %10634 = vst [vmem:[#allocation173_spill] sm:$0xff] %v7352_v43  ;;  %10636 = vst [vmem:[#allocation257_spill] sm:$0xff] %v7358_v9  ;;  %v2352_v38 = vsel %vm2334_vm6, %v10638_v57, %v10637_v41  ;;  %v7376_v22 = vmul.f32 %v10644_v54, %v10643_v56  ;;  %v7380_v9 = vmul.f32 %v10644_v54, %v10646_v27  ;;  %v10648_v43 = vld [vmem:[#allocation19_spill] sm:$0xff] }
 0x33b   :  { %10639 = vst [vmem:[#allocation168_spill] sm:$0xff] %v7364_v42  ;;  %10640 = vst [vmem:[#allocation166_spill] sm:$0xff] %v7366_v26  ;;  %v7386_v42 = vmul.f32 %v10644_v54, %v10648_v43  ;;  %v2091_v56 = vmul.f32 %v6429_v23, %v2034_v61  ;;  %v7396_v27 = vmul.f32 %v10644_v54, %v10600_v19  ;;  %2610 = vrot.lane.b32.xlu0 %v10655_v8, %s4801_s25  ;;  %v7427_v54 = vpop.permute.xlu1 %2000  ;;  %v10672_v45 = vld [vmem:[#allocation183_spill] sm:$0xff]  ;;  %p4770_p4 = pnand %p4769_p3, %p4763_p0 }
 0x33c   :  { %10641 = vst [vmem:[#allocation258_spill] sm:$0xff] %v7369_v52  ;;  %10642 = vst [vmem:[#allocation259_spill] sm:$0xff] %v7372_v49  ;;  %v7399_v49 = vmul.f32 %v10567_v18, %v2352_v38  ;;  %v10653_v52 = vld [vmem:[#allocation169_spill] sm:$0xff]  ;;  %v10656_v38 = vld [vmem:[#allocation178_spill] sm:$0xff] }
 0x33d   :  { %10645 = vst [vmem:[#allocation20_spill] sm:$0xff] %v7376_v22  ;;  %10647 = vst [vmem:[#allocation167_spill] sm:$0xff] %v7380_v9  ;;  %v7403_v43 = vmul.f32 %v10653_v52, %v10435_v37  ;;  %v7413_v61 = vmul.f32 %v10653_v52, %v10556_v4  ;;  %v7417_v19 = vmul.f32 %v10653_v52, %v10576_v32  ;;  %v10659_v4 = vld [vmem:[#allocation47_spill] sm:$0xff]  ;;  %v10662_v22 = vld [vmem:[#allocation177_spill] sm:$0xff]  ;;  %2298 = vrot.lane.b32.xlu1 %v10655_v8, %s4799_s23 }
 0x33e   :  { %10649 = vst [vmem:[#allocation21_spill] sm:$0xff] %v7386_v42  ;;  %10651 = vst [vmem:[#allocation19_spill] sm:$0xff] %v7396_v27  ;;  %v10654_v42 = vld [vmem:[#allocation176_spill] sm:$0xff]  ;;  %v7429_v27 = vpop.permute.xlu0 %2916  ;;  %v7433_v9 = vmul.f32 %v10653_v52, %v10659_v4  ;;  %v7436_v32 = vmul.f32 %v10578_v0, %v2344_v29  ;;  %v10666_v29 = vld [vmem:[#allocation238_spill] sm:$0xff] }
 0x33f   :  { %10652 = vst [vmem:[#allocation170_spill] sm:$0xff] %v7399_v49  ;;  %v622_v41 = vsel %vm607_vm2, %v10557_v15, %v10654_v42  ;;  %v614_v37 = vsel %vm607_vm2, %v10654_v42, %v10550_v33  ;;  %v623_v15 = vsel %vm607_vm2, %v10528_v36, %v10656_v38  ;;  %10657 = vst [vmem:[#allocation169_spill] sm:$0xff] %v7427_v54  ;;  %v10661_v42 = vld [vmem:[#allocation179_spill] sm:$0xff]  ;;  %v10668_v4 = vld [vmem:[#allocation182_spill] sm:$0xff] }
 0x340   :  { %10658 = vst [vmem:[#allocation176_spill] sm:$0xff] %v7429_v27  ;;  %10660 = vst [vmem:[#allocation62_spill] sm:$0xff] %v7436_v32  ;;  %v615_v33 = vsel %vm607_vm2, %v10656_v38, %v10541_v11  ;;  %v2663_v36 = vsel %vm2646_vm7, %v10662_v22, %v10661_v42  ;;  %v10663_v27 = vld [vmem:[#allocation134_spill] sm:$0xff]  ;;  %v7455_v26 = vmul.f32 %v10666_v29, %v622_v41  ;;  %v10669_v32 = vld [vmem:[#allocation180_spill] sm:$0xff] }
 0x341   :  { %v7449_v54 = vmul.f32 %v10663_v27, %v2090_v51  ;;  %v7452_v52 = vmul.f32 %v10663_v27, %v2091_v56  ;;  %v950_v11 = vsel %vm926_vm1, %v10669_v32, %v10668_v4  ;;  %v10670_v38 = vld [vmem:[#allocation239_spill] sm:$0xff]  ;;  %v692_v22 = vmul.f32 %v10666_v29, %v623_v15  ;;  %v10673_v56 = vld [vmem:[#allocation184_spill] sm:$0xff]  ;;  %v10675_v29 = vld [vmem:[#allocation186_spill] sm:$0xff] }
 0x342   :  { %10667 = vst [vmem:[#allocation238_spill] sm:$0xff] %v7455_v26  ;;  %v7462_v49 = vmul.f32 %v10670_v38, %v614_v37  ;;  %v942_v51 = vsel %vm926_vm1, %v10668_v4, %v10672_v45  ;;  %v958_v41 = vsel %vm926_vm1, %v10673_v56, %v10669_v32  ;;  %v10674_v26 = vld [vmem:[#allocation109_spill] sm:$0xff]  ;;  %v2702_v37 = vmul.f32 %v6999_v55, %v2663_v36  ;;  %v7487_v32 = vpop.permute.xlu0 %2932  ;;  %v10686_v55 = vld [vmem:[#allocation187_spill] sm:$0xff] }
 0x343   :  { %10664 = vst [vmem:[#allocation178_spill] sm:$0xff] %v7449_v54  ;;  %10665 = vst [vmem:[#allocation179_spill] sm:$0xff] %v7452_v52  ;;  %2626 = vrot.lane.b32.xlu0 %v10674_v26, %s4801_s25  ;;  %v693_v52 = vmul.f32 %v10670_v38, %v615_v33  ;;  %v934_v15 = vsel %vm926_vm1, %v10672_v45, %v10673_v56  ;;  %v7485_v54 = vpop.permute.xlu1 %2139  ;;  %v10679_v27 = vld [vmem:[#allocation181_spill] sm:$0xff]  ;;  %v1011_v36 = vmul.f32 %v6192_v1, %v950_v11  ;;  %v10680_v38 = vld [vmem:[#allocation190_spill] sm:$0xff] }
 0x344   :  { %10671 = vst [vmem:[#allocation182_spill] sm:$0xff] %v7462_v49  ;;  %v10676_v49 = vld [vmem:[#allocation151_spill] sm:$0xff]  ;;  %10677 = vst [vmem:[#allocation180_spill] sm:$0xff] %v7485_v54  ;;  %v2655_v33 = vsel %vm2646_vm7, %v10661_v42, %v10679_v27  ;;  %v1244_v45 = vsel %vm1238_vm3, %v10675_v29, %v10570_v14  ;;  %v10681_v56 = vld [vmem:[#allocation188_spill] sm:$0xff]  ;;  %2314 = vrot.lane.b32.xlu1 %v10674_v26, %s4799_s23  ;;  %v1010_v62 = vmul.f32 %v6198_v2, %v958_v41 }
 0x345   :  { %v1252_v4 = vsel %vm1238_vm3, %v10676_v49, %v10675_v29  ;;  %10678 = vst [vmem:[#allocation239_spill] sm:$0xff] %v7487_v32  ;;  %v1572_v49 = vsel %vm1550_vm4, %v10681_v56, %v10680_v38  ;;  %v10682_v54 = vld [vmem:[#allocation235_spill] sm:$0xff]  ;;  %v10684_v11 = vld [vmem:[#allocation192_spill] sm:$0xff]  ;;  %v10685_v29 = vld [vmem:[#allocation237_spill] sm:$0xff] }
 0x346   :  { %v1012_v32 = vmul.f32 %v10682_v54, %v942_v51  ;;  %v10683_v42 = vld [vmem:[#allocation191_spill] sm:$0xff]  ;;  %v1580_v14 = vsel %vm1550_vm4, %v10684_v11, %v10681_v56  ;;  %v1013_v27 = vmul.f32 %v10685_v29, %v934_v15  ;;  %v1316_v16 = vmul.f32 %v6230_v59, %v1252_v4  ;;  %v10688_v2 = vld [vmem:[#allocation189_spill] sm:$0xff] }
 0x347   :  { %v1564_v1 = vsel %vm1550_vm4, %v10680_v38, %v10683_v42  ;;  %v1262_v51 = vsel %vm1238_vm3, %v10687_v3, %v10686_v55  ;;  %v1270_v41 = vsel %vm1238_vm3, %v10688_v2, %v10687_v3  ;;  %2950 = vrot.lane.b32.xlu0 %v10626_v28, %s4802_s18  ;;  %v764_v38 = vmul.f32 %v10562_v34, %v692_v22  ;;  %v7533_v59 = vpop.permute.xlu1 %2322  ;;  %v7535_v55 = vpop.permute.xlu0 %1986  ;;  %v10691_v2 = vld [vmem:[#allocation118_spill] sm:$0xff] }
 0x348   :  { %v1317_v56 = vmul.f32 %v6246_v10, %v1244_v45  ;;  %v1627_v15 = vmul.f32 %v6259_v24, %v1572_v49  ;;  %v1556_v4 = vsel %vm1550_vm4, %v10683_v42, %v10684_v11  ;;  %10689 = vst [vmem:[#allocation183_spill] sm:$0xff] %v7533_v59  ;;  %10690 = vst [vmem:[#allocation184_spill] sm:$0xff] %v7535_v55  ;;  %2638 = vrot.lane.b32.xlu1 %v10626_v28, %s4801_s25  ;;  %v10692_v45 = vld [vmem:[#allocation114_spill] sm:$0xff]  ;;  %v10766_v59 = vld [vmem:[#allocation160_spill] sm:$0xff] }
 0x349   :  { %v765_v3 = vmul.f32 %v10562_v34, %v693_v52  ;;  %v2703_v29 = vmul.f32 %v10691_v2, %v2655_v33  ;;  %v1628_v54 = vmul.f32 %v10552_v25, %v1564_v1  ;;  %v1626_v22 = vmul.f32 %v6277_v40, %v1580_v14 }
 0x34a   :  { %v1075_v49 = vmul.f32 %v10692_v45, %v1011_v36  ;;  %v1076_v10 = vmul.f32 %v10692_v45, %v1012_v32  ;;  %v1323_v42 = vmul.f32 %v6227_v48, %v1262_v51  ;;  %v1322_v11 = vmul.f32 %v6243_v39, %v1270_v41  ;;  %v10693_v32 = vld [vmem:[#allocation136_spill] sm:$0xff] }
 0x34b   :  { %v1074_v34 = vmul.f32 %v10692_v45, %v1010_v62  ;;  %v1077_v52 = vmul.f32 %v10692_v45, %v1013_v27  ;;  %v1380_v33 = vmul.f32 %v10593_v17, %v1316_v16  ;;  %v1629_v1 = vmul.f32 %v10558_v60, %v1556_v4  ;;  %2642 = vrot.lane.b32.xlu0 %v10617_v12, %s4801_s25  ;;  %v10695_v51 = vld [vmem:[#allocation140_spill] sm:$0xff]  ;;  %v7560_v55 = vpop.permute.xlu1 %2586  ;;  %v7562_v62 = vpop.permute.xlu0 %2002 }
 0x34c   :  { %v828_v28 = vadd.f32 %v764_v38, %v10580_v58  ;;  %v7556_v36 = vmul.f32 %v10693_v32, %v2702_v37  ;;  %v1381_v14 = vmul.f32 %v10593_v17, %v1317_v56  ;;  %v1691_v41 = vmul.f32 %v10695_v51, %v1627_v15  ;;  %10696 = vst [vmem:[#allocation186_spill] sm:$0xff] %v7560_v55  ;;  %v10700_v56 = vld [vmem:[#allocation155_spill] sm:$0xff] }
 0x34d   :  { %10697 = vst [vmem:[#allocation151_spill] sm:$0xff] %v7562_v62  ;;  %v829_v16 = vadd.f32 %v765_v3, %v10580_v58  ;;  %v7566_v27 = vmul.f32 %v10693_v32, %v2703_v29  ;;  %v1692_v4 = vmul.f32 %v10695_v51, %v1628_v54  ;;  %v1690_v38 = vmul.f32 %v10695_v51, %v1626_v22  ;;  %v10703_v22 = vld [vmem:[#allocation196_spill] sm:$0xff] }
 0x34e   :  { %10694 = vst [vmem:[#allocation109_spill] sm:$0xff] %v7556_v36  ;;  %2902 = vrot.lane.b32.xlu1 %v10619_v63, %s4802_s18  ;;  %v1139_v17 = vadd.f32 %v1075_v49, %v7175_v53  ;;  %v7573_v37 = vadd.f32 %v1076_v10, %v828_v28  ;;  %v1387_v15 = vmul.f32 %v10700_v56, %v1323_v42  ;;  %v10702_v53 = vld [vmem:[#allocation198_spill] sm:$0xff]  ;;  %v10704_v42 = vld [vmem:[#allocation200_spill] sm:$0xff] }
 0x34f   :  { %10698 = vst [vmem:[#allocation190_spill] sm:$0xff] %v7566_v27  ;;  %v1386_v45 = vmul.f32 %v10700_v56, %v1322_v11  ;;  %v1138_v58 = vadd.f32 %v1074_v34, %v7203_v13  ;;  %v7578_v3 = vadd.f32 %v1077_v52, %v829_v16  ;;  %v1444_v29 = vadd.f32 %v1380_v33, %v7221_v50  ;;  %v7594_v50 = vpop.permute.xlu1 %2602  ;;  %v7596_v11 = vpop.permute.xlu0 %2326  ;;  %v10708_v33 = vld [vmem:[#allocation148_spill] sm:$0xff]  ;;  %v10713_v16 = vld [vmem:[#allocation193_spill] sm:$0xff] }
 0x350   :  { %10699 = vst [vmem:[#allocation188_spill] sm:$0xff] %v7573_v37  ;;  %v1693_v54 = vmul.f32 %v10695_v51, %v1629_v1  ;;  %2906 = vrot.lane.b32.xlu0 %v10633_v31, %s4802_s18  ;;  %v1445_v63 = vadd.f32 %v1381_v14, %v7242_v5  ;;  %v1755_v10 = vadd.f32 %v1691_v41, %v7284_v20  ;;  %10705 = vst [vmem:[#allocation192_spill] sm:$0xff] %v7594_v50  ;;  %v10707_v5 = vld [vmem:[#allocation204_spill] sm:$0xff]  ;;  %v10712_v41 = vld [vmem:[#allocation82_spill] sm:$0xff] }
 0x351   :  { %10701 = vst [vmem:[#allocation191_spill] sm:$0xff] %v7578_v3  ;;  %v2041_v49 = vsel %vm2022_vm5, %v10703_v22, %v10702_v53  ;;  %v2033_v13 = vsel %vm2022_vm5, %v10702_v53, %v10704_v42  ;;  %10706 = vst [vmem:[#allocation185_spill] sm:$0xff] %v7596_v11  ;;  %v1756_v34 = vadd.f32 %v1692_v4, %v1444_v29  ;;  %v10709_v1 = vld [vmem:[#allocation144_spill] sm:$0xff]  ;;  %v10715_v4 = vld [vmem:[#allocation85_spill] sm:$0xff] }
 0x352   :  { %v1754_v52 = vadd.f32 %v1690_v38, %v7287_v21  ;;  %v2335_v20 = vsel %vm2334_vm6, %v10708_v33, %v10707_v5  ;;  %v2359_v28 = vsel %vm2334_vm6, %v10707_v5, %v10709_v1  ;;  %2918 = vrot.lane.b32.xlu1 %v10622_v30, %s4802_s18  ;;  %v7609_v14 = vadd.f32 %v1387_v15, %v1139_v17  ;;  %v10717_v53 = vld [vmem:[#allocation112_spill] sm:$0xff]  ;;  %v10719_v17 = vld [vmem:[#allocation87_spill] sm:$0xff]  ;;  %v10722_v1 = vld [vmem:[#allocation146_spill] sm:$0xff] }
 0x353   :  { %v7611_v51 = vadd.f32 %v1386_v45, %v1138_v58  ;;  %v7615_v21 = vmul.f32 %v10713_v16, %v10712_v41  ;;  %v7619_v38 = vmul.f32 %v10713_v16, %v10715_v4  ;;  %v1757_v29 = vadd.f32 %v1693_v54, %v1445_v63  ;;  %v10721_v45 = vld [vmem:[#allocation123_spill] sm:$0xff]  ;;  %v7638_v63 = vpop.permute.xlu1 %2618  ;;  %v7640_v36 = vpop.permute.xlu0 %2590  ;;  %v10760_v50 = vld [vmem:[#allocation37_spill] sm:$0xff]  ;;  %v10761_v62 = vld [vmem:[#allocation236_spill] sm:$0xff] }
 0x354   :  { %10710 = vst [vmem:[#allocation114_spill] sm:$0xff] %v7609_v14  ;;  %v7623_v33 = vmul.f32 %v10713_v16, %v10717_v53  ;;  %v2086_v5 = vmul.f32 %v6601_v44, %v2041_v49  ;;  %v2087_v30 = vmul.f32 %v6429_v23, %v2033_v13  ;;  %2922 = vrot.lane.b32.xlu0 %v10655_v8, %s4802_s18  ;;  %10724 = vst [vmem:[#allocation148_spill] sm:$0xff] %v7638_v63  ;;  %v10726_v49 = vld [vmem:[#allocation201_spill] sm:$0xff]  ;;  %v10727_v13 = vld [vmem:[#allocation199_spill] sm:$0xff]  ;;  %v10772_v14 = vmov 0  }
 0x355   :  { %10711 = vst [vmem:[#allocation136_spill] sm:$0xff] %v7611_v51  ;;  %10714 = vst [vmem:[#allocation140_spill] sm:$0xff] %v7615_v21  ;;  %v7631_v15 = vmul.f32 %v10713_v16, %v10719_v17  ;;  %v2392_v58 = vmul.f32 %v10721_v45, %v2335_v20  ;;  %v2393_v27 = vmul.f32 %v10722_v1, %v2359_v28  ;;  %v10728_v11 = vld [vmem:[#allocation203_spill] sm:$0xff]  ;;  %v10765_v21 = vld [vmem:[#allocation54_spill] sm:$0xff] }
 0x356   :  { %10716 = vst [vmem:[#allocation198_spill] sm:$0xff] %v7619_v38  ;;  %10718 = vst [vmem:[#allocation196_spill] sm:$0xff] %v7623_v33  ;;  %v7636_v54 = vadd.f32 %v7413_v61, %v1755_v10  ;;  %v2353_v33 = vsel %vm2334_vm6, %v10727_v13, %v10726_v49  ;;  %v2345_v16 = vsel %vm2334_vm6, %v10726_v49, %v10728_v11  ;;  %2934 = vrot.lane.b32.xlu1 %v10624_v46, %s4802_s18  ;;  %v10731_v10 = vld [vmem:[#allocation206_spill] sm:$0xff]  ;;  %v10732_v49 = vld [vmem:[#allocation208_spill] sm:$0xff] }
 0x357   :  { %10720 = vst [vmem:[#allocation200_spill] sm:$0xff] %v7631_v15  ;;  %10725 = vst [vmem:[#allocation144_spill] sm:$0xff] %v7640_v36  ;;  %v7651_v20 = vadd.f32 %v7403_v43, %v1754_v52  ;;  %v7656_v61 = vadd.f32 %v7417_v19, %v1756_v34  ;;  %v2336_v28 = vsel %vm2334_vm6, %v10650_v6, %v10731_v10  ;;  %v10734_v52 = vld [vmem:[#allocation209_spill] sm:$0xff]  ;;  %v10735_v46 = vld [vmem:[#allocation207_spill] sm:$0xff] }
 0x358   :  { %10723 = vst [vmem:[#allocation204_spill] sm:$0xff] %v7636_v54  ;;  %v2360_v15 = vsel %vm2334_vm6, %v10731_v10, %v10638_v57  ;;  %v10733_v54 = vld [vmem:[#allocation205_spill] sm:$0xff]  ;;  %v2976_v19 = vsel %vm2958_vm8, %v10735_v46, %v10734_v52  ;;  %v10736_v34 = vld [vmem:[#allocation195_spill] sm:$0xff]  ;;  %v10739_v36 = vld [vmem:[#allocation210_spill] sm:$0xff]  ;;  %2938 = vrot.lane.b32.xlu0 %v10674_v26, %s4802_s18  ;;  %v7687_v10 = vadd.f32 %v7433_v9, %v1757_v29 }
 0x359   :  { %10729 = vst [vmem:[#allocation82_spill] sm:$0xff] %v7651_v20  ;;  %10730 = vst [vmem:[#allocation193_spill] sm:$0xff] %v7656_v61  ;;  %v2672_v43 = vsel %vm2646_vm7, %v10733_v54, %v10732_v49  ;;  %v7675_v61 = vmul.f32 %v10736_v34, %v2086_v5  ;;  %v7678_v6 = vmul.f32 %v10736_v34, %v2087_v30  ;;  %v10745_v29 = vld [vmem:[#allocation164_spill] sm:$0xff]  ;;  %v10764_v20 = vld [vmem:[#allocation162_spill] sm:$0xff] }
 0x35a   :  { %v2664_v57 = vsel %vm2646_vm7, %v10732_v49, %v10739_v36  ;;  %10740 = vst [vmem:[#allocation87_spill] sm:$0xff] %v7687_v10  ;;  %v7690_v63 = vmul.f32 %v10567_v18, %v2353_v33  ;;  %v7693_v5 = vmul.f32 %v10578_v0, %v2345_v16  ;;  %v7696_v30 = vmul.f32 %v10583_v47, %v2392_v58  ;;  %v7703_v49 = vpop.permute.xlu0 %2606  ;;  %v10748_v58 = vld [vmem:[#allocation23_spill] sm:$0xff]  ;;  %v10753_v10 = vld [vmem:[#allocation213_spill] sm:$0xff]  ;;  %v10763_v13 = vld [vmem:[#allocation52_spill] sm:$0xff] }
 0x35b   :  { %10737 = vst [vmem:[#allocation85_spill] sm:$0xff] %v7675_v61  ;;  %10738 = vst [vmem:[#allocation112_spill] sm:$0xff] %v7678_v6  ;;  %v7699_v6 = vmul.f32 %v10583_v47, %v2393_v27  ;;  %v7701_v61 = vpop.permute.xlu1 %2751  ;;  %v7706_v46 = vmul.f32 %v10721_v45, %v2336_v28  ;;  %v7709_v9 = vmul.f32 %v10722_v1, %v2360_v15  ;;  %3071 = vperm.xlu1 %4735, %v10748_v58   ;;  %v10749_v47 = vld [vmem:[#allocation120_spill] sm:$0xff] }
 0x35c   :  { %10741 = vst [vmem:[#allocation201_spill] sm:$0xff] %v7696_v30  ;;  %10743 = vst [vmem:[#allocation208_spill] sm:$0xff] %v7701_v61  ;;  %v7712_v33 = vmul.f32 %v10745_v29, %v2672_v43  ;;  %v7715_v16 = vmul.f32 %v7172_v7, %v2976_v19  ;;  %v7719_v27 = vmul.f32 %v10749_v47, %v2664_v57  ;;  %v10752_v30 = vld [vmem:[#allocation215_spill] sm:$0xff]  ;;  %v10754_v43 = vld [vmem:[#allocation216_spill] sm:$0xff]  ;;  %2954 = vrot.lane.b32.xlu0 %v10617_v12, %s4802_s18 }
 0x35d   :  { %10742 = vst [vmem:[#allocation206_spill] sm:$0xff] %v7699_v6  ;;  %10744 = vst [vmem:[#allocation205_spill] sm:$0xff] %v7703_v49  ;;  %v10751_v6 = vld [vmem:[#allocation211_spill] sm:$0xff]  ;;  %v1573_v15 = vsel %vm1550_vm4, %v10753_v10, %v10752_v30  ;;  %v10755_v61 = vld [vmem:[#allocation152_spill] sm:$0xff]  ;;  %v1555_v11 = vsel %vm1550_vm4, %v10765_v21, %v10764_v20  ;;  %v1563_v38 = vsel %vm1550_vm4, %v10766_v59, %v10765_v21 }
 0x35e   :  { %10746 = vst [vmem:[#allocation209_spill] sm:$0xff] %v7712_v33  ;;  %10747 = vst [vmem:[#allocation195_spill] sm:$0xff] %v7715_v16  ;;  %v2968_v28 = vsel %vm2958_vm8, %v10734_v52, %v10751_v6  ;;  %v941_v19 = vsel %vm926_vm1, %v10755_v61, %v10754_v43  ;;  %v10756_v16 = vld [vmem:[#allocation154_spill] sm:$0xff]  ;;  %v10757_v58 = vld [vmem:[#allocation224_spill] sm:$0xff]  ;;  %v2043_v61 = vsel %vm2022_vm5, %v10761_v62, %v10760_v50  ;;  %v7769_v37 = vpop.permute.xlu0 %2622 }
 0x35f   :  { %10750 = vst [vmem:[#allocation210_spill] sm:$0xff] %v7719_v27  ;;  %v933_v57 = vsel %vm926_vm1, %v10754_v43, %v10756_v16  ;;  %v1581_v52 = vsel %vm1550_vm4, %v10757_v58, %v10753_v10  ;;  %v10758_v6 = vld [vmem:[#allocation241_spill] sm:$0xff]  ;;  %v10762_v16 = vld [vmem:[#allocation40_spill] sm:$0xff]  ;;  %v2035_v10 = vsel %vm2022_vm5, %v10760_v50, %v10763_v13  ;;  %v7767_v3 = vpop.permute.xlu1 %2942  ;;  %10768 = vst [vmem:[#allocation215_spill] sm:$0xff] %v7769_v37  ;;  %2330 = vrot.lane.b32.xlu1 %v10617_v12, %s4799_s23 }
 0x360   :  { %v10759_v49 = vld [vmem:[#allocation229_spill] sm:$0xff]  ;;  %10767 = vst [vmem:[#allocation23_spill] sm:$0xff] %v7767_v3  ;;  %v1631_v20 = vmul.f32 %v6259_v24, %v1573_v15  ;;  %v10770_v27 = vld [vmem:[#allocation235_spill] sm:$0xff]  ;;  %v1630_v37 = vmul.f32 %v6277_v40, %v1581_v52  ;;  %4737 = vset.pattern.permute.xlu1 %v10772_v14  ;;  %v1624_v15 = vmul.f32 %v10552_v25, %v1563_v38  ;;  %v10785_v14 = vld [vmem:[#allocation60_spill] sm:$0xff] }
 0x361   :  { %v1261_v55 = vsel %vm1238_vm3, %v10759_v49, %v10758_v6  ;;  %v1269_v43 = vsel %vm1238_vm3, %v10762_v16, %v10759_v49  ;;  %v10769_v49 = vld [vmem:[#allocation212_spill] sm:$0xff]  ;;  %v1008_v51 = vmul.f32 %v10770_v27, %v941_v19  ;;  %v10771_v59 = vld [vmem:[#allocation237_spill] sm:$0xff]  ;;  %v1625_v27 = vmul.f32 %v10558_v60, %v1555_v11  ;;  %v10773_v19 = vld [vmem:[#allocation38_spill] sm:$0xff] }
 0x362   :  { %v2648_v33 = vsel %vm2646_vm7, %v10769_v49, %v10733_v54  ;;  %v2656_v50 = vsel %vm2646_vm7, %v10739_v36, %v10769_v49  ;;  %v1009_v21 = vmul.f32 %v10771_v59, %v933_v57  ;;  %v1319_v3 = vmul.f32 %v6227_v48, %v1261_v55  ;;  %v10775_v52 = vld [vmem:[#allocation33_spill] sm:$0xff]  ;;  %v10776_v55 = vld [vmem:[#allocation222_spill] sm:$0xff] }
 0x363   :  { %v2094_v54 = vmul.f32 %v6601_v44, %v2043_v61  ;;  %v1318_v56 = vmul.f32 %v6243_v39, %v1269_v43  ;;  %v2095_v36 = vmul.f32 %v6429_v23, %v2035_v10  ;;  %v7793_v49 = vmul.f32 %v10773_v19, %v2968_v28  ;;  %v10777_v61 = vld [vmem:[#allocation111_spill] sm:$0xff]  ;;  %v7805_v39 = vpop.permute.xlu1 %2944  ;;  %v7807_v43 = vpop.permute.xlu0 %2759  ;;  %v10781_v38 = vld [vmem:[#allocation165_spill] sm:$0xff]  ;;  %v10783_v11 = vld [vmem:[#allocation102_spill] sm:$0xff]  ;;  %2332 = vrot.lane.b32.xlu1 %v10719_v17, %s4799_s23 }
 0x364   :  { %v7796_v57 = vmul.f32 %v10691_v2, %v2656_v50  ;;  %v7799_v48 = vmul.f32 %v10775_v52, %v2648_v33  ;;  %v7803_v59 = vrot.slane %v10777_v61, %v10776_v55  ;;  %10779 = vst [vmem:[#allocation152_spill] sm:$0xff] %v7805_v39  ;;  %10780 = vst [vmem:[#allocation154_spill] sm:$0xff] %v7807_v43  ;;  %v10786_v50 = vld [vmem:[#allocation225_spill] sm:$0xff] }
 0x365   :  { %10774 = vst [vmem:[#allocation213_spill] sm:$0xff] %v7793_v49  ;;  %v7810_v10 = vmul.f32 %v10781_v38, %v1631_v20  ;;  %v7813_v28 = vmul.f32 %v10783_v11, %v1008_v51  ;;  %v2025_v33 = vsel %vm2022_vm5, %v10704_v42, %v10785_v14  ;;  %v7821_v49 = vrot.slane %v10777_v61, %v10786_v50  ;;  %v10789_v51 = vld [vmem:[#allocation133_spill] sm:$0xff]  ;;  %v10795_v50 = vld [vmem:[#allocation124_spill] sm:$0xff] }
 0x366   :  { %10778 = vst [vmem:[#allocation216_spill] sm:$0xff] %v7803_v59  ;;  %v7826_v43 = vmul.f32 %v10783_v11, %v1009_v21  ;;  %v7829_v20 = vmul.f32 %v10781_v38, %v1630_v37  ;;  %v7838_v42 = vmul.f32 %v10789_v51, %v1318_v56  ;;  %v7844_v39 = vmul.f32 %v10795_v50, %v1624_v15  ;;  %v10798_v37 = vld [vmem:[#allocation53_spill] sm:$0xff] }
 0x367   :  { %10782 = vst [vmem:[#allocation224_spill] sm:$0xff] %v7810_v10  ;;  %10784 = vst [vmem:[#allocation241_spill] sm:$0xff] %v7813_v28  ;;  %v7832_v10 = vmul.f32 %v10789_v51, %v1319_v3  ;;  %v10791_v28 = vld [vmem:[#allocation202_spill] sm:$0xff]  ;;  %v7847_v21 = vmul.f32 %v10795_v50, %v1625_v27  ;;  %v7851_v11 = vmul.f32 %v10798_v37, %v10633_v31  ;;  %v7862_v15 = vpop.permute.xlu1 %1532  ;;  %2596 = vrot.lane.b32.xlu1 %v10712_v41, %s4801_s25 }
 0x368   :  { %10787 = vst [vmem:[#allocation229_spill] sm:$0xff] %v7826_v43  ;;  %10788 = vst [vmem:[#allocation37_spill] sm:$0xff] %v7829_v20  ;;  %v7835_v55 = vmul.f32 %v10791_v28, %v2094_v54  ;;  %v7841_v61 = vmul.f32 %v10791_v28, %v2095_v36  ;;  %v7855_v3 = vmul.f32 %v10798_v37, %v10655_v8  ;;  %v10801_v54 = vld [vmem:[#allocation17_spill] sm:$0xff]  ;;  %v10805_v50 = vld [vmem:[#allocation170_spill] sm:$0xff] }
 0x369   :  { %10790 = vst [vmem:[#allocation236_spill] sm:$0xff] %v7832_v10  ;;  %10793 = vst [vmem:[#allocation52_spill] sm:$0xff] %v7838_v42  ;;  %v2049_v56 = vsel %vm2022_vm5, %v10785_v14, %v10703_v22  ;;  %v2088_v36 = vmul.f32 %v10801_v54, %v2025_v33  ;;  %v7866_v27 = vmul.f32 %v10798_v37, %v10674_v26  ;;  %v10806_v8 = vld [vmem:[#allocation16_spill] sm:$0xff]  ;;  %v7882_v22 = vpop.permute.xlu0 %3051  ;;  %v10813_v14 = vld [vmem:[#allocation70_spill] sm:$0xff] }
 0x36a   :  { %10792 = vst [vmem:[#allocation40_spill] sm:$0xff] %v7835_v55  ;;  %10794 = vst [vmem:[#allocation162_spill] sm:$0xff] %v7841_v61  ;;  %v7870_v31 = vmul.f32 %v10798_v37, %v10617_v12  ;;  %v7874_v61 = vmul.f32 %v10806_v8, %v10805_v50  ;;  %v10808_v55 = vld [vmem:[#allocation62_spill] sm:$0xff]  ;;  %v7886_v26 = vmul.f32 %v10806_v8, %v7706_v46  ;;  %v10814_v33 = vld [vmem:[#allocation175_spill] sm:$0xff] }
 0x36b   :  { %10796 = vst [vmem:[#allocation54_spill] sm:$0xff] %v7844_v39  ;;  %10797 = vst [vmem:[#allocation160_spill] sm:$0xff] %v7847_v21  ;;  %v7890_v12 = vmul.f32 %v10806_v8, %v7709_v9  ;;  %v2026_v37 = vsel %vm2022_vm5, %v10814_v33, %v10813_v14  ;;  %v10824_v42 = vld [vmem:[#allocation105_spill] sm:$0xff]  ;;  %v7928_v43 = vpop.permute.xlu1 %2016  ;;  %v10826_v21 = vld [vmem:[#allocation138_spill] sm:$0xff]  ;;  %2612 = vrot.lane.b32.xlu1 %v10715_v4, %s4801_s25 }
 0x36c   :  { %10799 = vst [vmem:[#allocation212_spill] sm:$0xff] %v7851_v11  ;;  %10800 = vst [vmem:[#allocation235_spill] sm:$0xff] %v7855_v3  ;;  %v7878_v3 = vmul.f32 %v10806_v8, %v10808_v55  ;;  %v10815_v55 = vld [vmem:[#allocation171_spill] sm:$0xff]  ;;  %v10816_v11 = vld [vmem:[#allocation34_spill] sm:$0xff] }
 0x36d   :  { %10802 = vst [vmem:[#allocation237_spill] sm:$0xff] %v7862_v15  ;;  %10803 = vst [vmem:[#allocation111_spill] sm:$0xff] %v7866_v27  ;;  %v2050_v50 = vsel %vm2022_vm5, %v10813_v14, %v10815_v55  ;;  %v2089_v20 = vmul.f32 %v10816_v11, %v2049_v56  ;;  %v10818_v27 = vld [vmem:[#allocation72_spill] sm:$0xff]  ;;  %v10822_v14 = vld [vmem:[#allocation83_spill] sm:$0xff] }
 0x36e   :  { %10804 = vst [vmem:[#allocation165_spill] sm:$0xff] %v7870_v31  ;;  %10807 = vst [vmem:[#allocation102_spill] sm:$0xff] %v7874_v61  ;;  %v10817_v31 = vld [vmem:[#allocation49_spill] sm:$0xff]  ;;  %v10820_v8 = vld [vmem:[#allocation88_spill] sm:$0xff] }
 0x36f   :  { %10809 = vst [vmem:[#allocation60_spill] sm:$0xff] %v7878_v3  ;;  %10810 = vst [vmem:[#allocation133_spill] sm:$0xff] %v7882_v22  ;;  %v2362_v46 = vsel %vm2334_vm6, %v10818_v27, %v10817_v31  ;;  %v2338_v56 = vsel %vm2334_vm6, %v10820_v8, %v10818_v27  ;;  %v10823_v55 = vld [vmem:[#allocation248_spill] sm:$0xff]  ;;  %v10827_v39 = vld [vmem:[#allocation181_spill] sm:$0xff]  ;;  %v7952_v22 = vmul.f32 %v10736_v34, %v2089_v20  ;;  %2628 = vrot.lane.b32.xlu1 %v10717_v53, %s4801_s25 }
 0x370   :  { %10811 = vst [vmem:[#allocation202_spill] sm:$0xff] %v7886_v26  ;;  %10812 = vst [vmem:[#allocation124_spill] sm:$0xff] %v7890_v12  ;;  %v10819_v26 = vld [vmem:[#allocation71_spill] sm:$0xff]  ;;  %v7914_v12 = vmul.f32 %v10736_v34, %v2088_v36  ;;  %v2666_v10 = vsel %vm2646_vm7, %v10823_v55, %v10822_v14  ;;  %v2092_v36 = vmul.f32 %v10801_v54, %v2026_v37  ;;  %v7967_v34 = vpop.permute.xlu1 %2280  ;;  %v10836_v20 = vld [vmem:[#allocation134_spill] sm:$0xff] }
 0x371   :  { %v2354_v9 = vsel %vm2334_vm6, %v10817_v31, %v10819_v26  ;;  %v2346_v33 = vsel %vm2334_vm6, %v10819_v26, %v10820_v8  ;;  %v2658_v31 = vsel %vm2646_vm7, %v10822_v14, %v10824_v42  ;;  %10825 = vst [vmem:[#allocation170_spill] sm:$0xff] %v7928_v43  ;;  %v2093_v26 = vmul.f32 %v10816_v11, %v2050_v50  ;;  %v10828_v8 = vld [vmem:[#allocation177_spill] sm:$0xff]  ;;  %v7942_v14 = vpop.permute.xlu0 %3059  ;;  %v10830_v61 = vld [vmem:[#allocation15_spill] sm:$0xff] }
 0x372   :  { %10821 = vst [vmem:[#allocation53_spill] sm:$0xff] %v7914_v12  ;;  %v2647_v27 = vsel %vm2646_vm7, %v10827_v39, %v10826_v21  ;;  %v2671_v12 = vsel %vm2646_vm7, %v10826_v21, %v10828_v8  ;;  %10829 = vst [vmem:[#allocation16_spill] sm:$0xff] %v7942_v14  ;;  %v2405_v3 = vmul.f32 %v10722_v1, %v2362_v46  ;;  %v10832_v46 = vld [vmem:[#allocation245_spill] sm:$0xff] }
 0x373   :  { %v2402_v37 = vmul.f32 %v10567_v18, %v2354_v9  ;;  %v2403_v50 = vmul.f32 %v10578_v0, %v2346_v33  ;;  %v1565_v39 = vsel %vm1550_vm4, %v10752_v30, %v10830_v61  ;;  %10831 = vst [vmem:[#allocation62_spill] sm:$0xff] %v7952_v22  ;;  %v2404_v21 = vmul.f32 %v10721_v45, %v2338_v56 }
 0x374   :  { %v2714_v8 = vmul.f32 %v10749_v47, %v2666_v10  ;;  %v2715_v43 = vmul.f32 %v10691_v2, %v2658_v31  ;;  %v7959_v15 = vmul.f32 %v10832_v46, %v7690_v63  ;;  %v7963_v9 = vmul.f32 %v10832_v46, %v7693_v5  ;;  %10835 = vst [vmem:[#allocation171_spill] sm:$0xff] %v7967_v34 }
 0x375   :  { %v2704_v33 = vmul.f32 %v10775_v52, %v2647_v27  ;;  %v2705_v30 = vmul.f32 %v10745_v29, %v2671_v12  ;;  %v7970_v56 = vmul.f32 %v10836_v20, %v2092_v36  ;;  %v7973_v10 = vmul.f32 %v10836_v20, %v2093_v26  ;;  %v7982_v31 = vpop.permute.xlu0 %3067  ;;  %v10840_v12 = vld [vmem:[#allocation172_spill] sm:$0xff] }
 0x376   :  { %10833 = vst [vmem:[#allocation70_spill] sm:$0xff] %v7959_v15  ;;  %10834 = vst [vmem:[#allocation175_spill] sm:$0xff] %v7963_v9  ;;  %v1557_v63 = vsel %vm1550_vm4, %v10830_v61, %v10757_v58  ;;  %v1632_v5 = vmul.f32 %v10552_v25, %v1565_v39  ;;  %v7985_v27 = vmul.f32 %v10840_v12, %v2405_v3  ;;  %v10844_v20 = vld [vmem:[#allocation96_spill] sm:$0xff]  ;;  %v10846_v39 = vld [vmem:[#allocation214_spill] sm:$0xff] }
 0x377   :  { %10837 = vst [vmem:[#allocation49_spill] sm:$0xff] %v7970_v56  ;;  %10838 = vst [vmem:[#allocation72_spill] sm:$0xff] %v7973_v10  ;;  %v7988_v36 = vmul.f32 %v10840_v12, %v2402_v37  ;;  %v7991_v26 = vmul.f32 %v10840_v12, %v2403_v50  ;;  %v2027_v58 = vsel %vm2022_vm5, %v10763_v13, %v10844_v20  ;;  %v10863_v10 = vld [vmem:[#allocation113_spill] sm:$0xff] }
 0x378   :  { %10839 = vst [vmem:[#allocation71_spill] sm:$0xff] %v7982_v31  ;;  %10841 = vst [vmem:[#allocation88_spill] sm:$0xff] %v7985_v27  ;;  %v7998_v61 = vmul.f32 %v10840_v12, %v2404_v21  ;;  %v8001_v22 = vmul.f32 %v10846_v39, %v2714_v8  ;;  %v8004_v3 = vmul.f32 %v10846_v39, %v2715_v43  ;;  %v10851_v21 = vld [vmem:[#allocation9_spill] sm:$0xff]  ;;  %v10852_v12 = vld [vmem:[#allocation44_spill] sm:$0xff]  ;;  %v8021_v43 = vpop.permute.xlu1 %2296 }
 0x379   :  { %10842 = vst [vmem:[#allocation83_spill] sm:$0xff] %v7988_v36  ;;  %10843 = vst [vmem:[#allocation248_spill] sm:$0xff] %v7991_v26  ;;  %v2051_v37 = vsel %vm2022_vm5, %v10844_v20, %v10761_v62  ;;  %v8011_v50 = vmul.f32 %v10693_v32, %v2704_v33  ;;  %v8014_v27 = vmul.f32 %v10693_v32, %v2705_v30  ;;  %v10855_v20 = vld [vmem:[#allocation107_spill] sm:$0xff]  ;;  %v10856_v33 = vld [vmem:[#allocation93_spill] sm:$0xff] }
 0x37a   :  { %10845 = vst [vmem:[#allocation105_spill] sm:$0xff] %v7998_v61  ;;  %10847 = vst [vmem:[#allocation138_spill] sm:$0xff] %v8001_v22  ;;  %v1633_v13 = vmul.f32 %v10558_v60, %v1557_v63  ;;  %v1574_v8 = vsel %vm1550_vm4, %v10852_v12, %v10851_v21  ;;  %v2096_v62 = vmul.f32 %v10801_v54, %v2027_v58  ;;  %v10857_v30 = vld [vmem:[#allocation157_spill] sm:$0xff]  ;;  %v10858_v22 = vld [vmem:[#allocation47_spill] sm:$0xff]  ;;  %v2949_v61 = vpop.permute.xlu0 %2948 }
 0x37b   :  { %10848 = vst [vmem:[#allocation181_spill] sm:$0xff] %v8004_v3  ;;  %10849 = vst [vmem:[#allocation177_spill] sm:$0xff] %v8011_v50  ;;  %v8024_v3 = vmul.f32 %v10781_v38, %v1632_v5  ;;  %v2975_v32 = vsel %vm2958_vm8, %v10856_v33, %v10855_v20  ;;  %v1582_v63 = vsel %vm1550_vm4, %v10857_v30, %v10852_v12  ;;  %2952 = vrot.lane.b32.xlu1 %v10858_v22, %s4802_s18  ;;  %v10859_v5 = vld [vmem:[#allocation110_spill] sm:$0xff]  ;;  %v10860_v50 = vld [vmem:[#allocation239_spill] sm:$0xff] }
 0x37c   :  { %10850 = vst [vmem:[#allocation15_spill] sm:$0xff] %v8014_v27  ;;  %10853 = vst [vmem:[#allocation245_spill] sm:$0xff] %v8021_v43  ;;  %v2097_v27 = vmul.f32 %v10816_v11, %v2051_v37  ;;  %v2967_v58 = vsel %vm2958_vm8, %v10855_v20, %v10859_v5  ;;  %v10861_v26 = vld [vmem:[#allocation166_spill] sm:$0xff]  ;;  %v10862_v12 = vld [vmem:[#allocation115_spill] sm:$0xff]  ;;  %v1635_v37 = vmul.f32 %v6259_v24, %v1574_v8  ;;  %v8065_v43 = vpop.permute.xlu1 %2312 }
 0x37d   :  { %10854 = vst [vmem:[#allocation134_spill] sm:$0xff] %v8024_v3  ;;  %v2962_v3 = vsel %vm2958_vm8, %v10860_v50, %v2949_v61  ;;  %v2986_v36 = vsel %vm2958_vm8, %v2949_v61, %v10861_v26  ;;  %v2355_v22 = vsel %vm2334_vm6, %v10863_v10, %v10862_v12  ;;  %v3014_v20 = vmul.f32 %v7172_v7, %v2975_v32  ;;  %v10864_v15 = vld [vmem:[#allocation189_spill] sm:$0xff]  ;;  %v10865_v31 = vld [vmem:[#allocation139_spill] sm:$0xff] }
 0x37e   :  { %v3028_v56 = vmul.f32 %v7803_v59, %v2962_v3  ;;  %v3029_v9 = vmul.f32 %v7821_v49, %v2986_v36  ;;  %v1246_v11 = vsel %vm1238_vm3, %v10865_v31, %v10864_v15  ;;  %v10866_v61 = vld [vmem:[#allocation187_spill] sm:$0xff]  ;;  %v1634_v34 = vmul.f32 %v6277_v40, %v1582_v63  ;;  %10867 = vst [vmem:[#allocation172_spill] sm:$0xff] %v8065_v43  ;;  %v10869_v3 = vld [vmem:[#allocation25_spill] sm:$0xff]  ;;  %v8083_v40 = vpop.permute.xlu0 %2020 }
 0x37f   :  { %v1254_v54 = vsel %vm1238_vm3, %v10866_v61, %v10865_v31  ;;  %v10868_v24 = vld [vmem:[#allocation127_spill] sm:$0xff]  ;;  %v1253_v8 = vsel %vm1238_vm3, %v10758_v6, %v10869_v3  ;;  %2644 = vrot.lane.b32.xlu1 %v10719_v17, %s4801_s25  ;;  %10872 = vst [vmem:[#allocation9_spill] sm:$0xff] %v8083_v40  ;;  %v3015_v31 = vmul.f32 %v10773_v19, %v2967_v58  ;;  %v10877_v40 = vld [vmem:[#allocation46_spill] sm:$0xff] }
 0x380   :  { %v2347_v36 = vsel %vm2334_vm6, %v10862_v12, %v10868_v24  ;;  %v8076_v15 = vmul.f32 %v7942_v14, %v3028_v56  ;;  %v8079_v32 = vmul.f32 %v7942_v14, %v3029_v9  ;;  %v2406_v63 = vmul.f32 %v10567_v18, %v2355_v22  ;;  %v10873_v12 = vld [vmem:[#allocation168_spill] sm:$0xff]  ;;  %v10878_v58 = vld [vmem:[#allocation194_spill] sm:$0xff]  ;;  %v8107_v60 = vpop.permute.xlu1 %2451 }
 0x381   :  { %v1245_v6 = vsel %vm1238_vm3, %v10869_v3, %v10762_v16  ;;  %v10874_v56 = vld [vmem:[#allocation128_spill] sm:$0xff]  ;;  %v8096_v61 = vmul.f32 %v10781_v38, %v1633_v13  ;;  %v1325_v14 = vmul.f32 %v10877_v40, %v1246_v11  ;;  %v1699_v43 = vmul.f32 %v10878_v58, %v1635_v37  ;;  %10880 = vst [vmem:[#allocation93_spill] sm:$0xff] %v8107_v60 }
 0x382   :  { %10870 = vst [vmem:[#allocation96_spill] sm:$0xff] %v8076_v15  ;;  %10871 = vst [vmem:[#allocation214_spill] sm:$0xff] %v8079_v32  ;;  %v2044_v9 = vsel %vm2022_vm5, %v10874_v56, %v10873_v12  ;;  %v10876_v32 = vld [vmem:[#allocation240_spill] sm:$0xff]  ;;  %v8102_v22 = vmul.f32 %v10791_v28, %v2096_v62  ;;  %v2407_v18 = vmul.f32 %v10578_v0, %v2347_v36  ;;  %v10884_v36 = vld [vmem:[#allocation174_spill] sm:$0xff] }
 0x383   :  { %10875 = vst [vmem:[#allocation44_spill] sm:$0xff] %v8096_v61  ;;  %v1324_v15 = vmul.f32 %v10876_v32, %v1254_v54  ;;  %v1320_v16 = vmul.f32 %v10876_v32, %v1253_v8  ;;  %v1698_v3 = vmul.f32 %v10878_v58, %v1634_v34  ;;  %v1321_v38 = vmul.f32 %v10877_v40, %v1245_v6  ;;  %v10881_v13 = vld [vmem:[#allocation8_spill] sm:$0xff]  ;;  %v8121_v34 = vpop.permute.xlu0 %2284  ;;  %v10887_v32 = vld [vmem:[#allocation66_spill] sm:$0xff] }
 0x384   :  { %10879 = vst [vmem:[#allocation107_spill] sm:$0xff] %v8102_v22  ;;  %v2650_v11 = vsel %vm2646_vm7, %v10824_v42, %v10881_v13  ;;  %v2674_v54 = vsel %vm2646_vm7, %v10881_v13, %v10823_v55  ;;  %v2098_v62 = vmul.f32 %v6601_v44, %v2044_v9  ;;  %2908 = vrot.lane.b32.xlu1 %v10712_v41, %s4802_s18  ;;  %10882 = vst [vmem:[#allocation157_spill] sm:$0xff] %v8121_v34  ;;  %v10889_v55 = vld [vmem:[#allocation155_spill] sm:$0xff]  ;;  %v10890_v13 = vld [vmem:[#allocation114_spill] sm:$0xff] }
 0x385   :  { %v8124_v37 = vmul.f32 %v10791_v28, %v2097_v27  ;;  %v8127_v8 = vmul.f32 %v10884_v36, %v3014_v20  ;;  %v8130_v42 = vmul.f32 %v10884_v36, %v3015_v31  ;;  %v8133_v40 = vmul.f32 %v10887_v32, %v2406_v63  ;;  %v10891_v22 = vld [vmem:[#allocation169_spill] sm:$0xff]  ;;  %v10893_v20 = vld [vmem:[#allocation136_spill] sm:$0xff] }
 0x386   :  { %v1388_v6 = vmul.f32 %v10889_v55, %v1324_v15  ;;  %v1389_v9 = vmul.f32 %v10889_v55, %v1325_v14  ;;  %v1763_v41 = vadd.f32 %v1699_v43, %v10890_v13  ;;  %v2036_v28 = vsel %vm2022_vm5, %v10873_v12, %v10891_v22  ;;  %v10896_v15 = vld [vmem:[#allocation210_spill] sm:$0xff]  ;;  %v10897_v55 = vld [vmem:[#allocation121_spill] sm:$0xff] }
 0x387   :  { %10883 = vst [vmem:[#allocation47_spill] sm:$0xff] %v8124_v37  ;;  %10885 = vst [vmem:[#allocation110_spill] sm:$0xff] %v8127_v8  ;;  %v8143_v27 = vmul.f32 %v10887_v32, %v2407_v18  ;;  %v1762_v31 = vadd.f32 %v1698_v3, %v10893_v20  ;;  %v2716_v37 = vmul.f32 %v10775_v52, %v2650_v11  ;;  %v10899_v18 = vld [vmem:[#allocation197_spill] sm:$0xff]  ;;  %v8163_v3 = vpop.permute.xlu0 %2300  ;;  %v10923_v8 = vld [vmem:[#allocation144_spill] sm:$0xff] }
 0x388   :  { %10886 = vst [vmem:[#allocation239_spill] sm:$0xff] %v8130_v42  ;;  %10888 = vst [vmem:[#allocation166_spill] sm:$0xff] %v8133_v40  ;;  %v2717_v63 = vmul.f32 %v10745_v29, %v2674_v54  ;;  %v8148_v40 = vpop.permute.xlu1 %2634  ;;  %v8151_v14 = vmul.f32 %v10789_v51, %v1320_v16  ;;  %v8154_v43 = vmul.f32 %v10789_v51, %v1321_v38  ;;  %2924 = vrot.lane.b32.xlu1 %v10715_v4, %s4802_s18  ;;  %v10902_v51 = vld [vmem:[#allocation209_spill] sm:$0xff]  ;;  %v10905_v4 = vld [vmem:[#allocation191_spill] sm:$0xff] }
 0x389   :  { %10892 = vst [vmem:[#allocation115_spill] sm:$0xff] %v8143_v27  ;;  %v8158_v12 = vmul.f32 %v10897_v55, %v10896_v15  ;;  %v2162_v13 = vmul.f32 %v10899_v18, %v2098_v62  ;;  %v8167_v11 = vmul.f32 %v10897_v55, %v7796_v57  ;;  %v8171_v16 = vmul.f32 %v10897_v55, %v7799_v48  ;;  %v10904_v62 = vld [vmem:[#allocation188_spill] sm:$0xff]  ;;  %v10922_v42 = vld [vmem:[#allocation205_spill] sm:$0xff] }
 0x38a   :  { %10894 = vst [vmem:[#allocation113_spill] sm:$0xff] %v8151_v14  ;;  %10895 = vst [vmem:[#allocation189_spill] sm:$0xff] %v8154_v43  ;;  %v8175_v38 = vmul.f32 %v10897_v55, %v10902_v51  ;;  %v2099_v54 = vmul.f32 %v6429_v23, %v2036_v28  ;;  %v8179_v20 = vadd.f32 %v1388_v6, %v10904_v62  ;;  %v10906_v27 = vld [vmem:[#allocation176_spill] sm:$0xff]  ;;  %v10910_v28 = vld [vmem:[#allocation183_spill] sm:$0xff] }
 0x38b   :  { %10898 = vst [vmem:[#allocation139_spill] sm:$0xff] %v8158_v12  ;;  %10900 = vst [vmem:[#allocation187_spill] sm:$0xff] %v8167_v11  ;;  %v8182_v15 = vadd.f32 %v1389_v9, %v10905_v4  ;;  %v2978_v57 = vsel %vm2958_vm8, %v10861_v26, %v10906_v27  ;;  %v10907_v11 = vld [vmem:[#allocation198_spill] sm:$0xff]  ;;  %v8195_v55 = vmul.f32 %v10846_v39, %v2717_v63  ;;  %v10911_v6 = vld [vmem:[#allocation203_spill] sm:$0xff] }
 0x38c   :  { %10901 = vst [vmem:[#allocation127_spill] sm:$0xff] %v8171_v16  ;;  %10903 = vst [vmem:[#allocation25_spill] sm:$0xff] %v8175_v38  ;;  %v8189_v48 = vadd.f32 %v10907_v11, %v1763_v41  ;;  %v8192_v16 = vmul.f32 %v10846_v39, %v2716_v37  ;;  %v2337_v9 = vsel %vm2334_vm6, %v10911_v6, %v10910_v28  ;;  %v8201_v51 = vpop.permute.xlu1 %2898  ;;  %v10912_v62 = vld [vmem:[#allocation140_spill] sm:$0xff]  ;;  %v10913_v26 = vld [vmem:[#allocation82_spill] sm:$0xff]  ;;  %2940 = vrot.lane.b32.xlu1 %v10717_v53, %s4802_s18 }
 0x38d   :  { %10909 = vst [vmem:[#allocation128_spill] sm:$0xff] %v8195_v55  ;;  %v8204_v4 = vadd.f32 %v10912_v62, %v1762_v31  ;;  %v8207_v38 = vadd.f32 %v2162_v13, %v10913_v26  ;;  %v10914_v41 = vld [vmem:[#allocation199_spill] sm:$0xff]  ;;  %v10916_v63 = vld [vmem:[#allocation184_spill] sm:$0xff]  ;;  %v10918_v6 = vld [vmem:[#allocation186_spill] sm:$0xff]  ;;  %v8223_v31 = vpop.permute.xlu0 %2316  ;;  %v2163_v13 = vmul.f32 %v10899_v18, %v2099_v54  ;;  %v8227_v62 = vmul.f32 %v7172_v7, %v2978_v57 }
 0x38e   :  { %10908 = vst [vmem:[#allocation168_spill] sm:$0xff] %v8192_v16  ;;  %v2361_v37 = vsel %vm2334_vm6, %v10910_v28, %v10914_v41  ;;  %v10915_v39 = vld [vmem:[#allocation151_spill] sm:$0xff]  ;;  %v10917_v55 = vld [vmem:[#allocation192_spill] sm:$0xff]  ;;  %10919 = vst [vmem:[#allocation240_spill] sm:$0xff] %v8223_v31  ;;  %v2970_v53 = vsel %vm2958_vm8, %v10906_v27, %v10860_v50  ;;  %v2400_v54 = vmul.f32 %v10721_v45, %v2337_v9 }
 0x38f   :  { %v2037_v11 = vsel %vm2022_vm5, %v10916_v63, %v10915_v39  ;;  %v2665_v16 = vsel %vm2646_vm7, %v10918_v6, %v10917_v55  ;;  %v10920_v28 = vld [vmem:[#allocation185_spill] sm:$0xff]  ;;  %v10921_v12 = vld [vmem:[#allocation148_spill] sm:$0xff]  ;;  %v2401_v61 = vmul.f32 %v10722_v1, %v2361_v37  ;;  %v10924_v43 = vld [vmem:[#allocation23_spill] sm:$0xff] }
 0x390   :  { %v2339_v26 = vsel %vm2334_vm6, %v10868_v24, %v10920_v28  ;;  %v2363_v41 = vsel %vm2334_vm6, %v10920_v28, %v10863_v10  ;;  %v2657_v57 = vsel %vm2646_vm7, %v10917_v55, %v10921_v12  ;;  %v2667_v24 = vsel %vm2646_vm7, %v10923_v8, %v10922_v42  ;;  %v8257_v27 = vpop.permute.xlu1 %2914  ;;  %v10925_v8 = vld [vmem:[#allocation215_spill] sm:$0xff]  ;;  %2956 = vrot.lane.b32.xlu1 %v10719_v17, %s4802_s18  ;;  %v10927_v39 = vld [vmem:[#allocation237_spill] sm:$0xff] }
 0x391   :  { %v2103_v10 = vmul.f32 %v6429_v23, %v2037_v11  ;;  %v2710_v28 = vmul.f32 %v10749_v47, %v2665_v16  ;;  %v2959_v50 = vsel %vm2958_vm8, %v10859_v5, %v10924_v43  ;;  %v2408_v55 = vmul.f32 %v10721_v45, %v2339_v26  ;;  %v8271_v5 = vpop.permute.xlu0 %2640  ;;  %v10926_v11 = vld [vmem:[#allocation204_spill] sm:$0xff] }
 0x392   :  { %v2409_v9 = vmul.f32 %v10722_v1, %v2363_v41  ;;  %v2983_v37 = vsel %vm2958_vm8, %v10924_v43, %v10856_v33  ;;  %v2659_v16 = vsel %vm2646_vm7, %v10922_v42, %v10925_v8  ;;  %v8274_v14 = vadd.f32 %v2163_v13, %v10926_v11 }
 0x393   :  { %v2711_v26 = vmul.f32 %v10691_v2, %v2657_v57  ;;  %v2718_v41 = vmul.f32 %v10749_v47, %v2667_v24  ;;  %v1566_v33 = vsel %vm1550_vm4, %v10851_v21, %v10927_v39  ;;  %v3027_v43 = vmul.f32 %v10773_v19, %v2970_v53  ;;  %v10930_v24 = vld [vmem:[#allocation11_spill] sm:$0xff] }
 0x394   :  { %v8284_v42 = vmul.f32 %v10832_v46, %v2400_v54  ;;  %v3016_v17 = vmul.f32 %v7803_v59, %v2959_v50  ;;  %v1558_v13 = vsel %vm1550_vm4, %v10927_v39, %v10857_v30  ;;  %v8292_v57 = vmul.f32 %v10832_v46, %v2401_v61  ;;  %v8299_v8 = vpop.permute.xlu1 %2930  ;;  %v10932_v54 = vld [vmem:[#allocation150_spill] sm:$0xff] }
 0x395   :  { %v8295_v11 = vmul.f32 %v10930_v24, %v2103_v10  ;;  %v3017_v21 = vmul.f32 %v7821_v49, %v2983_v37  ;;  %v2719_v53 = vmul.f32 %v10691_v2, %v2659_v16  ;;  %v8305_v50 = vmul.f32 %v10887_v32, %v2408_v55  ;;  %v8311_v61 = vpop.permute.xlu0 %2904  ;;  %v10938_v10 = vld [vmem:[#allocation208_spill] sm:$0xff]  ;;  %v10942_v55 = vld [vmem:[#allocation50_spill] sm:$0xff] }
 0x396   :  { %10928 = vst [vmem:[#allocation46_spill] sm:$0xff] %v8284_v42  ;;  %10929 = vst [vmem:[#allocation194_spill] sm:$0xff] %v8292_v57  ;;  %v8302_v42 = vmul.f32 %v10932_v54, %v2710_v28  ;;  %v8308_v30 = vmul.f32 %v10887_v32, %v2409_v9  ;;  %v1636_v46 = vmul.f32 %v10552_v25, %v1566_v33  ;;  %v10940_v16 = vld [vmem:[#allocation152_spill] sm:$0xff]  ;;  %v3398_v32 = vld [vmem:[%s9627_s2] ss:$2 sm:$0xf] }
 0x397   :  { %10931 = vst [vmem:[#allocation8_spill] sm:$0xff] %v8295_v11  ;;  %10934 = vst [vmem:[#allocation66_spill] sm:$0xff] %v8305_v50  ;;  %v8314_v39 = vmul.f32 %v10932_v54, %v2711_v26  ;;  %v8317_v37 = vmul.f32 %v10938_v10, %v2718_v41  ;;  %v10941_v11 = vld [vmem:[#allocation211_spill] sm:$0xff]  ;;  %v8328_v25 = vmul.f32 %v10884_v36, %v3016_v17  ;;  %v10945_v41 = vld [vmem:[#allocation170_spill] sm:$0xff] }
 0x398   :  { %10933 = vst [vmem:[#allocation174_spill] sm:$0xff] %v8302_v42  ;;  %10935 = vst [vmem:[#allocation155_spill] sm:$0xff] %v8308_v30  ;;  %v2960_v28 = vsel %vm2958_vm8, %v10941_v11, %v10940_v16  ;;  %v1637_v42 = vmul.f32 %v10942_v55, %v1558_v13  ;;  %v10944_v9 = vld [vmem:[#allocation207_spill] sm:$0xff]  ;;  %v2028_v33 = vsel %vm2022_vm5, %v10891_v22, %v10945_v41  ;;  %v10948_v55 = vld [vmem:[#allocation245_spill] sm:$0xff] }
 0x399   :  { %10936 = vst [vmem:[#allocation114_spill] sm:$0xff] %v8311_v61  ;;  %10937 = vst [vmem:[#allocation169_spill] sm:$0xff] %v8314_v39  ;;  %v2984_v26 = vsel %vm2958_vm8, %v10940_v16, %v10944_v9  ;;  %v2052_v13 = vsel %vm2022_vm5, %v10945_v41, %v10874_v56  ;;  %v8343_v11 = vmul.f32 %v10884_v36, %v3017_v21  ;;  %v10950_v9 = vld [vmem:[#allocation172_spill] sm:$0xff]  ;;  %v8356_v39 = vpop.permute.xlu1 %3063  ;;  %v2921_v21 = vpop.permute.xlu0 %2920  ;;  %v10952_v41 = vld [vmem:[#allocation223_spill] sm:$0xff] }
 0x39a   :  { %10939 = vst [vmem:[#allocation136_spill] sm:$0xff] %v8317_v37  ;;  %10943 = vst [vmem:[#allocation210_spill] sm:$0xff] %v8328_v25  ;;  %v8346_v17 = vmul.f32 %v10938_v10, %v2719_v53  ;;  %v10949_v37 = vld [vmem:[#allocation171_spill] sm:$0xff]  ;;  %v2348_v22 = vsel %vm2334_vm6, %v10948_v55, %v10950_v9  ;;  %v3020_v56 = vmul.f32 %v7803_v59, %v2960_v28 }
 0x39b   :  { %10946 = vst [vmem:[#allocation121_spill] sm:$0xff] %v8343_v11  ;;  %v2356_v16 = vsel %vm2334_vm6, %v10949_v37, %v10948_v55  ;;  %10951 = vst [vmem:[#allocation209_spill] sm:$0xff] %v8356_v39  ;;  %v1700_v36 = vmul.f32 %v10878_v58, %v1636_v46  ;;  %v8361_v53 = vrot.slane %v3398_v32, %v10952_v41  ;;  %v10956_v11 = vld [vmem:[#allocation17_spill] sm:$0xff]  ;;  %v10957_v55 = vld [vmem:[#allocation34_spill] sm:$0xff] }
 0x39c   :  { %10947 = vst [vmem:[#allocation197_spill] sm:$0xff] %v8346_v17  ;;  %v10954_v17 = vld [vmem:[#allocation221_spill] sm:$0xff]  ;;  %v3021_v50 = vmul.f32 %v7821_v49, %v2984_v26  ;;  %v1701_v10 = vmul.f32 %v10878_v58, %v1637_v42  ;;  %v2100_v25 = vmul.f32 %v10956_v11, %v2028_v33  ;;  %v2101_v57 = vmul.f32 %v10957_v55, %v2052_v13  ;;  %v10959_v46 = vld [vmem:[#allocation222_spill] sm:$0xff] }
 0x39d   :  { %10953 = vst [vmem:[#allocation188_spill] sm:$0xff] %v8361_v53  ;;  %v8364_v30 = vrot.slane %v3398_v32, %v10954_v17  ;;  %v10958_v39 = vld [vmem:[#allocation89_spill] sm:$0xff]  ;;  %v2411_v28 = vmul.f32 %v10578_v0, %v2348_v22  ;;  %v8373_v59 = vrot.slane %v3398_v32, %v10959_v46  ;;  %v10963_v17 = vld [vmem:[#allocation195_spill] sm:$0xff]  ;;  %v8392_v13 = vpop.permute.xlu1 %1970 }
 0x39e   :  { %v2410_v2 = vmul.f32 %v10958_v39, %v2356_v16  ;;  %v10961_v41 = vld [vmem:[#allocation225_spill] sm:$0xff]  ;;  %v1764_v16 = vadd.f32 %v1700_v36, %v8179_v20  ;;  %v1765_v22 = vadd.f32 %v1701_v10, %v8182_v15  ;;  %v2164_v20 = vmul.f32 %v10899_v18, %v2100_v25 }
 0x39f   :  { %10955 = vst [vmem:[#allocation191_spill] sm:$0xff] %v8364_v30  ;;  %10960 = vst [vmem:[#allocation176_spill] sm:$0xff] %v8373_v59  ;;  %v8376_v53 = vrot.slane %v3398_v32, %v10961_v41  ;;  %v10964_v30 = vld [vmem:[#allocation133_spill] sm:$0xff]  ;;  %v2649_v32 = vsel %vm2646_vm7, %v10921_v12, %v8148_v40  ;;  %v10971_v12 = vld [vmem:[#allocation16_spill] sm:$0xff]  ;;  %v2977_v15 = vsel %vm2958_vm8, %v8201_v51, %v8257_v27 }
 0x3a0   :  { %v8380_v47 = vmul.f32 %v10964_v30, %v10963_v17  ;;  %v10966_v26 = vld [vmem:[#allocation213_spill] sm:$0xff]  ;;  %v8387_v42 = vmul.f32 %v10964_v30, %v3020_v56  ;;  %v8390_v33 = vmul.f32 %v10964_v30, %v3021_v50  ;;  %v2673_v17 = vsel %vm2646_vm7, %v8148_v40, %v10918_v6  ;;  %v11009_v59 = vld [vmem:[#allocation226_spill] sm:$0xff] }
 0x3a1   :  { %10962 = vst [vmem:[#allocation198_spill] sm:$0xff] %v8376_v53  ;;  %v8384_v58 = vmul.f32 %v10964_v30, %v10966_v26  ;;  %v2358_v50 = vsel %vm2334_vm6, %v8121_v34, %v8163_v3  ;;  %v8407_v30 = vpop.permute.xlu0 %2936  ;;  %v2165_v56 = vmul.f32 %v10899_v18, %v2101_v57  ;;  %v8414_v36 = vmul.f32 %v10971_v12, %v8227_v62  ;;  %v10973_v26 = vld [vmem:[#allocation250_spill] sm:$0xff]  ;;  %v1973_v10 = vpop.permute.xlu1 %1972  ;;  %v10978_v34 = vld [vmem:[#allocation196_spill] sm:$0xff] }
 0x3a2   :  { %10965 = vst [vmem:[#allocation183_spill] sm:$0xff] %v8380_v47  ;;  %10968 = vst [vmem:[#allocation140_spill] sm:$0xff] %v8387_v42  ;;  %v2474_v41 = vmul.f32 %v10973_v26, %v2410_v2  ;;  %v2475_v40 = vmul.f32 %v10973_v26, %v2411_v28  ;;  %v2350_v6 = vsel %vm2334_vm6, %v8163_v3, %v8223_v31  ;;  %v10975_v28 = vld [vmem:[#allocation9_spill] sm:$0xff]  ;;  %v10994_v42 = vld [vmem:[#allocation56_spill] sm:$0xff] }
 0x3a3   :  { %10967 = vst [vmem:[#allocation203_spill] sm:$0xff] %v8384_v58  ;;  %10969 = vst [vmem:[#allocation82_spill] sm:$0xff] %v8390_v33  ;;  %v8427_v18 = vmul.f32 %v10971_v12, %v3027_v43  ;;  %v2712_v62 = vmul.f32 %v10775_v52, %v2649_v32  ;;  %v2713_v57 = vmul.f32 %v10745_v29, %v2673_v17 }
 0x3a4   :  { %10970 = vst [vmem:[#allocation199_spill] sm:$0xff] %v8407_v30  ;;  %10972 = vst [vmem:[#allocation184_spill] sm:$0xff] %v8414_v36  ;;  %v2418_v2 = vmul.f32 %v10958_v39, %v2358_v50  ;;  %v2969_v3 = vsel %vm2958_vm8, %v8257_v27, %v8299_v8  ;;  %v2980_v25 = vsel %vm2958_vm8, %v8311_v61, %v2921_v21  ;;  %v10977_v27 = vld [vmem:[#allocation200_spill] sm:$0xff]  ;;  %v10979_v61 = vld [vmem:[#allocation193_spill] sm:$0xff] }
 0x3a5   :  { %10974 = vst [vmem:[#allocation192_spill] sm:$0xff] %v8427_v18  ;;  %v2045_v43 = vsel %vm2022_vm5, %v8392_v13, %v10916_v63  ;;  %v2054_v32 = vsel %vm2022_vm5, %v10975_v28, %v1973_v10  ;;  %v8446_v17 = vpop.permute.xlu0 %3075  ;;  %v2419_v50 = vmul.f32 %v10578_v0, %v2350_v6  ;;  %v3022_v12 = vmul.f32 %v7172_v7, %v2977_v15  ;;  %v10980_v36 = vld [vmem:[#allocation87_spill] sm:$0xff] }
 0x3a6   :  { %10976 = vst [vmem:[#allocation186_spill] sm:$0xff] %v8446_v17  ;;  %v1925_v46 = vadd.f32 %v10977_v27, %v1765_v22  ;;  %v8452_v31 = vadd.f32 %v10978_v34, %v1764_v16  ;;  %v8455_v18 = vadd.f32 %v2164_v20, %v10979_v61  ;;  %v8458_v63 = vadd.f32 %v2165_v56, %v10980_v36  ;;  %v1989_v61 = vpop.permute.xlu1 %1988  ;;  %v10983_v36 = vld [vmem:[#allocation119_spill] sm:$0xff]  ;;  %v10988_v27 = vld [vmem:[#allocation242_spill] sm:$0xff] }
 0x3a7   :  { %v8461_v33 = vadd.f32 %v2474_v41, %v8207_v38  ;;  %v8464_v17 = vadd.f32 %v2475_v40, %v8274_v14  ;;  %v8467_v6 = vmul.f32 %v10932_v54, %v2712_v62  ;;  %v3023_v22 = vmul.f32 %v10773_v19, %v2969_v3  ;;  %v10986_v3 = vld [vmem:[#allocation43_spill] sm:$0xff] }
 0x3a8   :  { %v3034_v34 = vmul.f32 %v7172_v7, %v2980_v25  ;;  %v2102_v16 = vmul.f32 %v6601_v44, %v2045_v43  ;;  %v8473_v20 = vmul.f32 %v10932_v54, %v2713_v57  ;;  %v8476_v56 = vmul.f32 %v8107_v60, %v2418_v2  ;;  %v10985_v57 = vld [vmem:[#allocation58_spill] sm:$0xff]  ;;  %v11001_v7 = vld [vmem:[#allocation79_spill] sm:$0xff] }
 0x3a9   :  { %v2972_v14 = vsel %vm2958_vm8, %v2921_v21, %v8407_v30  ;;  %v2046_v38 = vsel %vm2022_vm5, %v1973_v10, %v1989_v61  ;;  %v8484_v41 = vmul.f32 %v8107_v60, %v2419_v50  ;;  %v8487_v40 = vmul.f32 %v10983_v36, %v3022_v12  ;;  %v464_v62 = vpop.permute.xlu0 %463  ;;  %v10987_v43 = vld [vmem:[#allocation10_spill] sm:$0xff]  ;;  %v10990_v50 = vld [vmem:[#allocation71_spill] sm:$0xff] }
 0x3aa   :  { %10981 = vst [vmem:[#allocation185_spill] sm:$0xff] %v8476_v56  ;;  %v2109_v15 = vmul.f32 %v10957_v55, %v2054_v32  ;;  %v2106_v54 = vmul.f32 %v6601_v44, %v2046_v38  ;;  %v798_v2 = vadd.f32 %v10985_v57, %v464_v62  ;;  %v799_v25 = vadd.f32 %v10986_v3, %v464_v62  ;;  %v2005_v32 = vpop.permute.xlu1 %2004  ;;  %v10991_v38 = vld [vmem:[#allocation45_spill] sm:$0xff]  ;;  %v10993_v56 = vld [vmem:[#allocation42_spill] sm:$0xff] }
 0x3ab   :  { %10982 = vst [vmem:[#allocation148_spill] sm:$0xff] %v8484_v41  ;;  %10984 = vst [vmem:[#allocation205_spill] sm:$0xff] %v8487_v40  ;;  %v800_v21 = vadd.f32 %v10987_v43, %v464_v62  ;;  %v801_v30 = vadd.f32 %v10988_v27, %v464_v62  ;;  %v8496_v10 = vmul.f32 %v10983_v36, %v3023_v22  ;;  %v10992_v41 = vld [vmem:[#allocation39_spill] sm:$0xff]  ;;  %v10995_v27 = vld [vmem:[#allocation180_spill] sm:$0xff] }
 0x3ac   :  { %v8499_v60 = vmul.f32 %v10990_v50, %v3034_v34  ;;  %v8502_v12 = vmul.f32 %v10930_v24, %v2102_v16  ;;  %v3035_v44 = vmul.f32 %v10773_v19, %v2972_v14  ;;  %v1110_v57 = vadd.f32 %v10991_v38, %v798_v2  ;;  %v10996_v19 = vld [vmem:[#allocation244_spill] sm:$0xff]  ;;  %v10997_v38 = vld [vmem:[#allocation13_spill] sm:$0xff]  ;;  %v11002_v40 = vld [vmem:[#allocation59_spill] sm:$0xff] }
 0x3ad   :  { %10989 = vst [vmem:[#allocation23_spill] sm:$0xff] %v8496_v10  ;;  %v1111_v3 = vadd.f32 %v10992_v41, %v799_v25  ;;  %v1112_v43 = vadd.f32 %v10993_v56, %v800_v21  ;;  %v1113_v62 = vadd.f32 %v10994_v42, %v801_v30  ;;  %v2173_v22 = vmul.f32 %v10995_v27, %v2109_v15  ;;  %v474_v14 = vpop.permute.xlu0 %473  ;;  %v10998_v25 = vld [vmem:[#allocation243_spill] sm:$0xff]  ;;  %v10999_v21 = vld [vmem:[#allocation61_spill] sm:$0xff] }
 0x3ae   :  { %v2170_v58 = vmul.f32 %v10995_v27, %v2106_v54  ;;  %v2030_v34 = vsel %vm2022_vm5, %v2005_v32, %v10975_v28  ;;  %v2038_v16 = vsel %vm2022_vm5, %v1989_v61, %v2005_v32  ;;  %v1422_v2 = vadd.f32 %v10996_v19, %v1110_v57  ;;  %v11000_v54 = vld [vmem:[#allocation78_spill] sm:$0xff]  ;;  %v2329_v10 = vpop.permute.xlu1 %2328  ;;  %v11003_v32 = vld [vmem:[#allocation51_spill] sm:$0xff]  ;;  %v11004_v19 = vld [vmem:[#allocation64_spill] sm:$0xff] }
 0x3af   :  { %v1423_v41 = vadd.f32 %v10997_v38, %v1111_v3  ;;  %v1424_v56 = vadd.f32 %v10998_v25, %v1112_v43  ;;  %v1425_v42 = vadd.f32 %v10999_v21, %v1113_v62  ;;  %v2107_v30 = vmul.f32 %v6429_v23, %v2038_v16  ;;  %v11005_v3 = vld [vmem:[#allocation57_spill] sm:$0xff] }
 0x3b0   :  { %v2108_v15 = vmul.f32 %v10956_v11, %v2030_v34  ;;  %v806_v47 = vadd.f32 %v11000_v54, %v474_v14  ;;  %v807_v28 = vadd.f32 %v11001_v7, %v474_v14  ;;  %v1734_v61 = vadd.f32 %v11002_v40, %v1422_v2  ;;  %v11006_v23 = vld [vmem:[#allocation73_spill] sm:$0xff]  ;;  %v11007_v34 = vld [vmem:[#allocation28_spill] sm:$0xff]  ;;  %v11008_v7 = vld [vmem:[#allocation230_spill] sm:$0xff] }
 0x3b1   :  { %v1735_v53 = vadd.f32 %v11003_v32, %v1423_v41  ;;  %v1736_v57 = vadd.f32 %v11004_v19, %v1424_v56  ;;  %v1737_v38 = vadd.f32 %v11005_v3, %v1425_v42  ;;  %v2171_v43 = vmul.f32 %v10995_v27, %v2107_v30  ;;  %v8532_v21 = vpop.permute.xlu0 %483  ;;  %v11010_v2 = vld [vmem:[#allocation227_spill] sm:$0xff]  ;;  %v11011_v32 = vld [vmem:[#allocation228_spill] sm:$0xff] }
 0x3b2   :  { %v2172_v62 = vmul.f32 %v10995_v27, %v2108_v15  ;;  %v808_v16 = vadd.f32 %v11006_v23, %v474_v14  ;;  %v809_v25 = vadd.f32 %v11007_v34, %v474_v14  ;;  %v1894_v54 = vadd.f32 %v11008_v7, %v1734_v61  ;;  %v11013_v27 = vld [vmem:[#allocation249_spill] sm:$0xff]  ;;  %v11014_v19 = vld [vmem:[#allocation12_spill] sm:$0xff]  ;;  %v2593_v14 = vpop.permute.xlu1 %2592  ;;  %v11022_v7 = vld [vmem:[#allocation18_spill] sm:$0xff] }
 0x3b3   :  { %v1895_v40 = vadd.f32 %v11009_v59, %v1735_v53  ;;  %v1896_v41 = vadd.f32 %v11010_v2, %v1736_v57  ;;  %v1897_v56 = vadd.f32 %v11011_v32, %v1737_v38  ;;  %v8539_v42 = vmul.f32 %v10990_v50, %v3035_v44  ;;  %v11016_v61 = vld [vmem:[#allocation132_spill] sm:$0xff]  ;;  %v11019_v44 = vld [vmem:[#allocation31_spill] sm:$0xff]  ;;  %v11021_v38 = vld [vmem:[#allocation86_spill] sm:$0xff] }
 0x3b4   :  { %v8541_v30 = vadd.f32 %v2173_v22, %v1925_v46  ;;  %v1118_v15 = vadd.f32 %v11013_v27, %v806_v47  ;;  %v1119_v3 = vadd.f32 %v11014_v19, %v807_v28  ;;  %v8546_v23 = vadd.f32 %v2170_v58, %v8204_v4  ;;  %v11020_v46 = vld [vmem:[#allocation81_spill] sm:$0xff]  ;;  %v11025_v27 = vld [vmem:[#allocation80_spill] sm:$0xff]  ;;  %v11043_v50 = vld [vmem:[#allocation67_spill] sm:$0xff] }
 0x3b5   :  { %v2206_v34 = vadd.f32 %v11016_v61, %v1894_v54  ;;  %v8550_v59 = vadd.f32 %v2171_v43, %v8189_v48  ;;  %v8553_v53 = vadd.f32 %v2172_v62, %v8452_v31  ;;  %v1120_v57 = vadd.f32 %v11019_v44, %v808_v16  ;;  %v8559_v2 = vpop.permute.xlu0 %493  ;;  %v11023_v4 = vld [vmem:[#allocation125_spill] sm:$0xff]  ;;  %v11027_v16 = vld [vmem:[#allocation122_spill] sm:$0xff] }
 0x3b6   :  { %11012 = vst [vmem:[#allocation204_spill] sm:$0xff] %v8541_v30  ;;  %11015 = vst [vmem:[#allocation237_spill] sm:$0xff] %v8546_v23  ;;  %v1121_v22 = vadd.f32 %v11020_v46, %v809_v25  ;;  %v1430_v47 = vadd.f32 %v11021_v38, %v1118_v15  ;;  %v1431_v28 = vadd.f32 %v11022_v7, %v1119_v3  ;;  %v11024_v32 = vld [vmem:[#allocation173_spill] sm:$0xff]  ;;  %v11029_v3 = vld [vmem:[#allocation126_spill] sm:$0xff]  ;;  %v2609_v44 = vpop.permute.xlu1 %2608 }
 0x3b7   :  { %11017 = vst [vmem:[#allocation11_spill] sm:$0xff] %v8550_v59  ;;  %11018 = vst [vmem:[#allocation150_spill] sm:$0xff] %v8553_v53  ;;  %v2207_v58 = vadd.f32 %v11023_v4, %v1895_v40  ;;  %v2208_v54 = vadd.f32 %v11024_v32, %v1896_v41  ;;  %v8564_v48 = vadd.f32 %v11025_v27, %v1897_v56  ;;  %v11026_v43 = vld [vmem:[#allocation117_spill] sm:$0xff]  ;;  %v11053_v30 = vld [vmem:[#allocation76_spill] sm:$0xff] }
 0x3b8   :  { %v2340_v31 = vsel %vm2334_vm6, %v10950_v9, %v2329_v10  ;;  %v1432_v62 = vadd.f32 %v11026_v43, %v1120_v57  ;;  %v1433_v25 = vadd.f32 %v11027_v16, %v1121_v22  ;;  %v11028_v15 = vld [vmem:[#allocation129_spill] sm:$0xff]  ;;  %v1743_v61 = vadd.f32 %v11029_v3, %v1431_v28  ;;  %v11031_v22 = vld [vmem:[#allocation256_spill] sm:$0xff]  ;;  %v11033_v28 = vld [vmem:[#allocation167_spill] sm:$0xff] }
 0x3b9   :  { %v1742_v19 = vadd.f32 %v11028_v15, %v1430_v47  ;;  %v2364_v40 = vsel %vm2334_vm6, %v2329_v10, %v10949_v37  ;;  %v2412_v41 = vmul.f32 %v10721_v45, %v2340_v31  ;;  %v2676_v56 = vsel %vm2646_vm7, %v8271_v5, %v2593_v14  ;;  %v11030_v57 = vld [vmem:[#allocation41_spill] sm:$0xff]  ;;  %v11032_v47 = vld [vmem:[#allocation20_spill] sm:$0xff]  ;;  %v702_v32 = vpop.permute.xlu0 %701 }
 0x3ba   :  { %v2668_v9 = vsel %vm2646_vm7, %v2593_v14, %v2609_v44  ;;  %v8583_v46 = vadd.f32 %v11030_v57, %v2206_v34  ;;  %v1744_v38 = vadd.f32 %v11031_v22, %v1432_v62  ;;  %v1903_v4 = vadd.f32 %v11033_v28, %v1743_v61  ;;  %v11034_v31 = vld [vmem:[#allocation120_spill] sm:$0xff]  ;;  %v11036_v34 = vld [vmem:[#allocation201_spill] sm:$0xff]  ;;  %v2625_v61 = vpop.permute.xlu1 %2624 }
 0x3bb   :  { %v1902_v7 = vadd.f32 %v11032_v47, %v1742_v19  ;;  %v2413_v37 = vmul.f32 %v10722_v1, %v2364_v40  ;;  %v2476_v10 = vmul.f32 %v10973_v26, %v2412_v41  ;;  %v2725_v27 = vmul.f32 %v10745_v29, %v2676_v56  ;;  %v11035_v16 = vld [vmem:[#allocation156_spill] sm:$0xff]  ;;  %v11037_v62 = vld [vmem:[#allocation65_spill] sm:$0xff]  ;;  %v11040_v47 = vld [vmem:[#allocation106_spill] sm:$0xff] }
 0x3bc   :  { %v2722_v43 = vmul.f32 %v11034_v31, %v2668_v9  ;;  %v8593_v14 = vadd.f32 %v11035_v16, %v2207_v58  ;;  %v8596_v15 = vadd.f32 %v11036_v34, %v2208_v54  ;;  %v1745_v3 = vadd.f32 %v11037_v62, %v1433_v25  ;;  %v11038_v19 = vld [vmem:[#allocation21_spill] sm:$0xff]  ;;  %v11041_v28 = vld [vmem:[#allocation112_spill] sm:$0xff]  ;;  %v11042_v54 = vld [vmem:[#allocation63_spill] sm:$0xff] }
 0x3bd   :  { %v8600_v57 = vadd.f32 %v11038_v19, %v1744_v38  ;;  %v11039_v22 = vld [vmem:[#allocation85_spill] sm:$0xff]  ;;  %v2477_v41 = vmul.f32 %v10973_v26, %v2413_v37  ;;  %v2789_v56 = vmul.f32 %v11040_v47, %v2725_v27  ;;  %v2215_v58 = vadd.f32 %v11041_v28, %v1903_v4  ;;  %v11046_v37 = vld [vmem:[#allocation6_spill] sm:$0xff]  ;;  %v11088_v23 = vld [vmem:[#allocation116_spill] sm:$0xff] }
 0x3be   :  { %v2214_v40 = vadd.f32 %v11039_v22, %v1902_v7  ;;  %v2786_v9 = vmul.f32 %v11040_v47, %v2722_v43  ;;  %v2540_v16 = vadd.f32 %v2476_v10, %v8455_v18  ;;  %v738_v34 = vmul.f32 %v702_v32, %v11042_v54  ;;  %v11044_v19 = vld [vmem:[#allocation69_spill] sm:$0xff]  ;;  %v11045_v22 = vld [vmem:[#allocation14_spill] sm:$0xff]  ;;  %v8621_v10 = vpop.permute.xlu1 %2763  ;;  %v11050_v54 = vld [vmem:[#allocation75_spill] sm:$0xff] }
 0x3bf   :  { %v739_v25 = vmul.f32 %v702_v32, %v11043_v50  ;;  %v2541_v38 = vadd.f32 %v2477_v41, %v8458_v63  ;;  %v740_v7 = vmul.f32 %v702_v32, %v11044_v19  ;;  %v741_v26 = vmul.f32 %v702_v32, %v11045_v22  ;;  %v712_v50 = vpop.permute.xlu0 %711  ;;  %11047 = vst [vmem:[#allocation152_spill] sm:$0xff] %v8621_v10  ;;  %v11107_v45 = vld [vmem:[#allocation60_spill] sm:$0xff] }
 0x3c0   :  { %v2850_v62 = vadd.f32 %v2786_v9, %v8461_v33  ;;  %v802_v27 = vadd.f32 %v738_v34, %v11046_v37  ;;  %v2652_v18 = vsel %vm2646_vm7, %v2625_v61, %v8271_v5  ;;  %v2660_v4 = vsel %vm2646_vm7, %v2609_v44, %v2625_v61  ;;  %v11049_v9 = vld [vmem:[#allocation77_spill] sm:$0xff]  ;;  %v11052_v61 = vld [vmem:[#allocation74_spill] sm:$0xff] }
 0x3c1   :  { %v803_v43 = vadd.f32 %v739_v25, %v11046_v37  ;;  %v8623_v63 = vadd.f32 %v2789_v56, %v2541_v38  ;;  %v804_v32 = vadd.f32 %v740_v7, %v11046_v37  ;;  %v805_v41 = vadd.f32 %v741_v26, %v11046_v37  ;;  %v11051_v25 = vld [vmem:[#allocation118_spill] sm:$0xff]  ;;  %v11056_v7 = vld [vmem:[#allocation55_spill] sm:$0xff] }
 0x3c2   :  { %v3162_v33 = vadd.f32 %v8499_v60, %v2850_v62  ;;  %v1114_v28 = vadd.f32 %v11049_v9, %v802_v27  ;;  %v2723_v5 = vmul.f32 %v11051_v25, %v2660_v4  ;;  %v2724_v19 = vmul.f32 %v10775_v52, %v2652_v18  ;;  %v11054_v38 = vld [vmem:[#allocation90_spill] sm:$0xff]  ;;  %v8639_v27 = vpop.permute.xlu1 %2946  ;;  %v11057_v4 = vld [vmem:[#allocation68_spill] sm:$0xff]  ;;  %v11058_v9 = vld [vmem:[#allocation247_spill] sm:$0xff] }
 0x3c3   :  { %11048 = vst [vmem:[#allocation211_spill] sm:$0xff] %v8623_v63  ;;  %v1115_v34 = vadd.f32 %v11050_v54, %v803_v43  ;;  %v1116_v22 = vadd.f32 %v11052_v61, %v804_v32  ;;  %v1117_v56 = vadd.f32 %v11053_v30, %v805_v41  ;;  %v746_v63 = vmul.f32 %v712_v50, %v11054_v38  ;;  %v11055_v60 = vld [vmem:[#allocation246_spill] sm:$0xff]  ;;  %v11059_v32 = vld [vmem:[#allocation91_spill] sm:$0xff] }
 0x3c4   :  { %v3258_v44 = vadd.f32 3.0, %v3162_v33  ;;  %v1426_v62 = vadd.f32 %v11055_v60, %v1114_v28  ;;  %v2787_v26 = vmul.f32 %v11040_v47, %v2723_v5  ;;  %v2788_v37 = vmul.f32 %v11040_v47, %v2724_v19  ;;  %v11060_v30 = vld [vmem:[#allocation26_spill] sm:$0xff]  ;;  %v11061_v38 = vld [vmem:[#allocation135_spill] sm:$0xff] }
 0x3c5   :  { %v1427_v10 = vadd.f32 %v11056_v7, %v1115_v34  ;;  %v1428_v18 = vadd.f32 %v11057_v4, %v1116_v22  ;;  %v1429_v54 = vadd.f32 %v11058_v9, %v1117_v56  ;;  %v747_v61 = vmul.f32 %v712_v50, %v11059_v32  ;;  %v11063_v60 = vld [vmem:[#allocation142_spill] sm:$0xff]  ;;  %v11064_v19 = vld [vmem:[#allocation147_spill] sm:$0xff]  ;;  %v11067_v56 = vld [vmem:[#allocation232_spill] sm:$0xff] }
 0x3c6   :  { %v3290_v43 = vmax.f32 %v3258_v44, 0.0  ;;  %v1738_v41 = vadd.f32 %v11060_v30, %v1426_v62  ;;  %v2851_v28 = vadd.f32 %v2787_v26, %v8464_v17  ;;  %v8647_v34 = vadd.f32 %v2788_v37, %v2540_v16  ;;  %v11065_v44 = vld [vmem:[#allocation94_spill] sm:$0xff]  ;;  %v11066_v22 = vld [vmem:[#allocation231_spill] sm:$0xff]  ;;  %v11070_v37 = vld [vmem:[#allocation233_spill] sm:$0xff] }
 0x3c7   :  { %v1739_v53 = vadd.f32 %v11061_v38, %v1427_v10  ;;  %v1740_v47 = vadd.f32 %v11063_v60, %v1428_v18  ;;  %v1741_v7 = vadd.f32 %v11064_v19, %v1429_v54  ;;  %v748_v59 = vmul.f32 %v712_v50, %v11065_v44  ;;  %v11068_v62 = vld [vmem:[#allocation251_spill] sm:$0xff]  ;;  %v8656_v10 = vpop.permute.xlu1 %2018  ;;  %v11072_v38 = vld [vmem:[#allocation70_spill] sm:$0xff] }
 0x3c8   :  { %11062 = vst [vmem:[#allocation50_spill] sm:$0xff] %v8647_v34  ;;  %v3322_v5 = vmin.f32 %v3290_v43, 6.0  ;;  %v1898_v4 = vadd.f32 %v11066_v22, %v1738_v41  ;;  %v3163_v32 = vadd.f32 %v8539_v42, %v2851_v28  ;;  %v749_v30 = vmul.f32 %v712_v50, %v11068_v62  ;;  %v11069_v17 = vld [vmem:[#allocation19_spill] sm:$0xff]  ;;  %v717_v50 = vpop.permute.xlu0 %716  ;;  %v11074_v28 = vld [vmem:[#allocation234_spill] sm:$0xff] }
 0x3c9   :  { %v1899_v9 = vadd.f32 %v11067_v56, %v1739_v53  ;;  %v8659_v16 = vadd.f32 %v11069_v17, %v1745_v3  ;;  %v1900_v43 = vadd.f32 %v11070_v37, %v1740_v47  ;;  %v11071_v18 = vld [vmem:[#allocation7_spill] sm:$0xff]  ;;  %v8664_v60 = vadd.f32 %v11072_v38, %v2214_v40  ;;  %v11076_v56 = vld [vmem:[#allocation30_spill] sm:$0xff] }
 0x3ca   :  { %v3354_v26 = vmul.f32 %v3322_v5, %v3162_v33  ;;  %v810_v54 = vadd.f32 %v746_v63, %v11071_v18  ;;  %v11073_v41 = vld [vmem:[#allocation175_spill] sm:$0xff]  ;;  %v3259_v53 = vadd.f32 3.0, %v3163_v32  ;;  %v811_v42 = vadd.f32 %v747_v61, %v11071_v18  ;;  %v11078_v63 = vld [vmem:[#allocation258_spill] sm:$0xff] }
 0x3cb   :  { %v8667_v19 = vadd.f32 %v11073_v41, %v2215_v58  ;;  %v1901_v44 = vadd.f32 %v11074_v28, %v1741_v7  ;;  %v11075_v22 = vld [vmem:[#allocation143_spill] sm:$0xff]  ;;  %v2211_v33 = vadd.f32 %v11076_v56, %v1899_v9  ;;  %v812_v5 = vadd.f32 %v748_v59, %v11071_v18  ;;  %v8680_v17 = vpop.permute.xlu1 %2282  ;;  %v11081_v41 = vld [vmem:[#allocation97_spill] sm:$0xff]  ;;  %v11082_v28 = vld [vmem:[#allocation108_spill] sm:$0xff] }
 0x3cc   :  { %v2210_v3 = vadd.f32 %v11075_v22, %v1898_v4  ;;  %v8674_v47 = vmul.f32 0.16666667, %v3354_v26  ;;  %v8677_v40 = vadd.f32 %v11078_v63, %v1900_v43  ;;  %v3291_v62 = vmax.f32 %v3259_v53, 0.0  ;;  %v11079_v61 = vld [vmem:[#allocation99_spill] sm:$0xff]  ;;  %v11083_v59 = vld [vmem:[#allocation101_spill] sm:$0xff]  ;;  %v11084_v56 = vld [vmem:[#allocation252_spill] sm:$0xff] }
 0x3cd   :  { %v813_v58 = vadd.f32 %v749_v30, %v11071_v18  ;;  %v1122_v37 = vadd.f32 %v11079_v61, %v810_v54  ;;  %v11080_v38 = vld [vmem:[#allocation103_spill] sm:$0xff]  ;;  %v1124_v4 = vadd.f32 %v11081_v41, %v812_v5  ;;  %v750_v9 = vmul.f32 %v717_v50, %v11082_v28  ;;  %v11085_v43 = vld [vmem:[#allocation98_spill] sm:$0xff]  ;;  %v11087_v30 = vld [vmem:[#allocation104_spill] sm:$0xff] }
 0x3ce   :  { %11077 = vst [vmem:[#allocation207_spill] sm:$0xff] %v8674_v47  ;;  %v1123_v7 = vadd.f32 %v11080_v38, %v811_v42  ;;  %v3323_v22 = vmin.f32 %v3291_v62, 6.0  ;;  %v751_v47 = vmul.f32 %v717_v50, %v11084_v56  ;;  %v752_v63 = vmul.f32 %v717_v50, %v11085_v43  ;;  %v11086_v53 = vld [vmem:[#allocation22_spill] sm:$0xff]  ;;  %v11089_v54 = vld [vmem:[#allocation92_spill] sm:$0xff]  ;;  %v11090_v42 = vld [vmem:[#allocation259_spill] sm:$0xff] }
 0x3cf   :  { %v1125_v26 = vadd.f32 %v11083_v59, %v813_v58  ;;  %v1434_v34 = vadd.f32 %v11086_v53, %v1122_v37  ;;  %v1436_v1 = vadd.f32 %v11088_v23, %v1124_v4  ;;  %v753_v61 = vmul.f32 %v717_v50, %v11089_v54  ;;  %v11092_v5 = vld [vmem:[#allocation254_spill] sm:$0xff]  ;;  %v11093_v28 = vld [vmem:[#allocation137_spill] sm:$0xff]  ;;  %v11094_v56 = vld [vmem:[#allocation255_spill] sm:$0xff] }
 0x3d0   :  { %v1435_v18 = vadd.f32 %v11087_v30, %v1123_v7  ;;  %v8694_v38 = vadd.f32 %v11090_v42, %v1901_v44  ;;  %v814_v62 = vadd.f32 %v750_v9, %v8532_v21  ;;  %v815_v58 = vadd.f32 %v751_v47, %v8532_v21  ;;  %v11095_v37 = vld [vmem:[#allocation27_spill] sm:$0xff]  ;;  %v11096_v4 = vld [vmem:[#allocation149_spill] sm:$0xff]  ;;  %v8706_v42 = vpop.permute.xlu1 %2298 }
 0x3d1   :  { %v1437_v41 = vadd.f32 %v11092_v5, %v1125_v26  ;;  %v1746_v59 = vadd.f32 %v11093_v28, %v1434_v34  ;;  %v1748_v53 = vadd.f32 %v11095_v37, %v1436_v1  ;;  %v816_v7 = vadd.f32 %v752_v63, %v8532_v21  ;;  %v11097_v30 = vld [vmem:[#allocation95_spill] sm:$0xff]  ;;  %v727_v26 = vpop.permute.xlu0 %726  ;;  %v11098_v9 = vld [vmem:[#allocation217_spill] sm:$0xff]  ;;  %v11099_v5 = vld [vmem:[#allocation218_spill] sm:$0xff] }
 0x3d2   :  { %11091 = vst [vmem:[#allocation170_spill] sm:$0xff] %v8694_v38  ;;  %v1747_v43 = vadd.f32 %v11094_v56, %v1435_v18  ;;  %v3355_v23 = vmul.f32 %v3323_v22, %v3163_v32  ;;  %v817_v44 = vadd.f32 %v753_v61, %v8532_v21  ;;  %v1126_v54 = vadd.f32 %v11097_v30, %v814_v62  ;;  %v11100_v28 = vld [vmem:[#allocation219_spill] sm:$0xff]  ;;  %v11101_v56 = vld [vmem:[#allocation100_spill] sm:$0xff]  ;;  %v11103_v32 = vld [vmem:[#allocation130_spill] sm:$0xff] }
 0x3d3   :  { %v1749_v50 = vadd.f32 %v11096_v4, %v1437_v41  ;;  %v1906_v47 = vadd.f32 %v11098_v9, %v1746_v59  ;;  %v1908_v18 = vadd.f32 %v11100_v28, %v1748_v53  ;;  %v1127_v1 = vadd.f32 %v11101_v56, %v815_v58  ;;  %v11102_v37 = vld [vmem:[#allocation220_spill] sm:$0xff]  ;;  %v11104_v41 = vld [vmem:[#allocation131_spill] sm:$0xff]  ;;  %v11105_v21 = vld [vmem:[#allocation141_spill] sm:$0xff] }
 0x3d4   :  { %v1907_v34 = vadd.f32 %v11099_v5, %v1747_v43  ;;  %v1128_v22 = vadd.f32 %v11103_v32, %v816_v7  ;;  %v1129_v4 = vadd.f32 %v11104_v41, %v817_v44  ;;  %v1438_v61 = vadd.f32 %v11105_v21, %v1126_v54  ;;  %v11106_v62 = vld [vmem:[#allocation102_spill] sm:$0xff]  ;;  %v11109_v9 = vld [vmem:[#allocation179_spill] sm:$0xff]  ;;  %v11111_v58 = vld [vmem:[#allocation49_spill] sm:$0xff] }
 0x3d5   :  { %v1909_v63 = vadd.f32 %v11102_v37, %v1749_v50  ;;  %v8717_v30 = vadd.f32 %v11106_v62, %v2210_v3  ;;  %v8720_v38 = vadd.f32 %v11107_v45, %v2211_v33  ;;  %v11108_v59 = vld [vmem:[#allocation178_spill] sm:$0xff]  ;;  %v8724_v5 = vmul.f32 0.16666667, %v3355_v23  ;;  %v11112_v7 = vld [vmem:[#allocation72_spill] sm:$0xff]  ;;  %v11114_v56 = vld [vmem:[#allocation163_spill] sm:$0xff] }
 0x3d6   :  { %v2218_v43 = vadd.f32 %v11108_v59, %v1906_v47  ;;  %v2219_v53 = vadd.f32 %v11109_v9, %v1907_v34  ;;  %v8727_v50 = vadd.f32 %v11111_v58, %v1908_v18  ;;  %v11113_v44 = vld [vmem:[#allocation24_spill] sm:$0xff]  ;;  %v1440_v3 = vadd.f32 %v11114_v56, %v1128_v22  ;;  %v11115_v37 = vld [vmem:[#allocation253_spill] sm:$0xff]  ;;  %v11118_v23 = vld [vmem:[#allocation83_spill] sm:$0xff]  ;;  %v8752_v22 = vpop.permute.xlu0 %2594 }
 0x3d7   :  { %11110 = vst [vmem:[#allocation245_spill] sm:$0xff] %v8724_v5  ;;  %v8730_v28 = vadd.f32 %v11112_v7, %v1909_v63  ;;  %v1439_v54 = vadd.f32 %v11113_v44, %v1127_v1  ;;  %v1441_v32 = vadd.f32 %v11115_v37, %v1129_v4  ;;  %v11116_v45 = vld [vmem:[#allocation257_spill] sm:$0xff]  ;;  %v11119_v18 = vld [vmem:[#allocation248_spill] sm:$0xff]  ;;  %v11120_v63 = vld [vmem:[#allocation62_spill] sm:$0xff]  ;;  %v2961_v1 = vsel %vm2958_vm8, %v8299_v8, %v8639_v27  ;;  %v8754_v4 = vpop.permute.xlu1 %2314 }
 0x3d8   :  { %v8736_v33 = vadd.f32 %v11116_v45, %v1438_v61  ;;  %v11117_v47 = vld [vmem:[#allocation53_spill] sm:$0xff]  ;;  %v8741_v41 = vadd.f32 %v11118_v23, %v2218_v43  ;;  %v8744_v21 = vadd.f32 %v11119_v18, %v2219_v53  ;;  %v2217_v62 = vadd.f32 %v11120_v63, %v8659_v16  ;;  %v11121_v61 = vld [vmem:[#allocation46_spill] sm:$0xff]  ;;  %v11122_v43 = vld [vmem:[#allocation216_spill] sm:$0xff] }
 0x3d9   :  { %v2216_v34 = vadd.f32 %v11117_v47, %v8600_v57  ;;  %v2985_v59 = vsel %vm2958_vm8, %v8639_v27, %v8201_v51  ;;  %v3024_v9 = vmul.f32 %v11122_v43, %v2961_v1  ;;  %v11123_v53 = vld [vmem:[#allocation48_spill] sm:$0xff]  ;;  %v11124_v58 = vld [vmem:[#allocation194_spill] sm:$0xff] }
 0x3da   :  { %v758_v16 = vmul.f32 %v727_v26, %v11123_v53  ;;  %v2529_v7 = vadd.f32 %v11124_v58, %v2217_v62  ;;  %v3025_v44 = vmul.f32 %v7821_v49, %v2985_v59  ;;  %v11125_v8 = vld [vmem:[#allocation84_spill] sm:$0xff]  ;;  %v11126_v37 = vld [vmem:[#allocation238_spill] sm:$0xff] }
 0x3db   :  { %v2528_v57 = vadd.f32 %v11121_v61, %v2216_v34  ;;  %v759_v56 = vmul.f32 %v727_v26, %v11125_v8  ;;  %v760_v45 = vmul.f32 %v727_v26, %v11126_v37  ;;  %v3088_v34 = vmul.f32 %v10983_v36, %v3024_v9  ;;  %v11127_v23 = vld [vmem:[#allocation182_spill] sm:$0xff]  ;;  %v11128_v61 = vld [vmem:[#allocation35_spill] sm:$0xff]  ;;  %v11131_v8 = vld [vmem:[#allocation241_spill] sm:$0xff] }
 0x3dc   :  { %v761_v18 = vmul.f32 %v727_v26, %v11127_v23  ;;  %v822_v51 = vadd.f32 %v758_v16, %v8559_v2  ;;  %v2841_v27 = vadd.f32 %v8473_v20, %v2529_v7  ;;  %v3089_v63 = vmul.f32 %v10983_v36, %v3025_v44  ;;  %v11130_v58 = vld [vmem:[#allocation54_spill] sm:$0xff]  ;;  %v11132_v36 = vld [vmem:[#allocation151_spill] sm:$0xff]  ;;  %v2611_v44 = vpop.permute.xlu0 %2610 }
 0x3dd   :  { %v2840_v47 = vadd.f32 %v8467_v6, %v2528_v57  ;;  %v823_v62 = vadd.f32 %v759_v56, %v8559_v2  ;;  %v824_v1 = vadd.f32 %v760_v45, %v8559_v2  ;;  %v8776_v59 = vadd.f32 %v11128_v61, %v1439_v54  ;;  %v11129_v57 = vld [vmem:[#allocation161_spill] sm:$0xff]  ;;  %v8788_v56 = vpop.permute.xlu1 %2638  ;;  %v11133_v54 = vld [vmem:[#allocation160_spill] sm:$0xff]  ;;  %v11135_v23 = vld [vmem:[#allocation158_spill] sm:$0xff] }
 0x3de   :  { %v825_v6 = vadd.f32 %v761_v18, %v8559_v2  ;;  %v1134_v9 = vadd.f32 %v11129_v57, %v822_v51  ;;  %v8781_v26 = vadd.f32 %v11130_v58, %v1440_v3  ;;  %v3153_v16 = vadd.f32 %v3089_v63, %v2841_v27  ;;  %v11134_v45 = vld [vmem:[#allocation229_spill] sm:$0xff]  ;;  %v11136_v51 = vld [vmem:[#allocation52_spill] sm:$0xff] }
 0x3df   :  { %v3152_v53 = vadd.f32 %v3088_v34, %v2840_v47  ;;  %v1136_v20 = vadd.f32 %v11131_v8, %v824_v1  ;;  %v2029_v7 = vsel %vm2022_vm5, %v11132_v36, %v8656_v10  ;;  %v8791_v37 = vadd.f32 %v11133_v54, %v1441_v32  ;;  %v11137_v63 = vld [vmem:[#allocation113_spill] sm:$0xff]  ;;  %v11139_v36 = vld [vmem:[#allocation134_spill] sm:$0xff] }
 0x3e0   :  { %v1137_v47 = vadd.f32 %v11134_v45, %v825_v6  ;;  %v2053_v3 = vsel %vm2022_vm5, %v8656_v10, %v8392_v13  ;;  %v3249_v34 = vadd.f32 3.0, %v3153_v16  ;;  %v1135_v18 = vadd.f32 %v11135_v23, %v823_v62  ;;  %v11138_v57 = vld [vmem:[#allocation189_spill] sm:$0xff]  ;;  %v11143_v23 = vld [vmem:[#allocation236_spill] sm:$0xff] }
 0x3e1   :  { %v3248_v2 = vadd.f32 3.0, %v3152_v53  ;;  %v1446_v27 = vadd.f32 %v11136_v51, %v1134_v9  ;;  %v1448_v1 = vadd.f32 %v11137_v63, %v1136_v20  ;;  %v2104_v32 = vmul.f32 %v10956_v11, %v2029_v7  ;;  %v11140_v9 = vld [vmem:[#allocation44_spill] sm:$0xff]  ;;  %v11141_v20 = vld [vmem:[#allocation206_spill] sm:$0xff]  ;;  %v11144_v63 = vld [vmem:[#allocation111_spill] sm:$0xff] }
 0x3e2   :  { %v1449_v58 = vadd.f32 %v11138_v57, %v1137_v47  ;;  %v2669_v6 = vsel %vm2646_vm7, %v8752_v22, %v2611_v44  ;;  %v3281_v8 = vmax.f32 %v3249_v34, 0.0  ;;  %v2105_v13 = vmul.f32 %v10957_v55, %v2053_v3  ;;  %v11142_v47 = vld [vmem:[#allocation109_spill] sm:$0xff]  ;;  %v8818_v55 = vpop.permute.xlu1 %2902 }
 0x3e3   :  { %v3280_v61 = vmax.f32 %v3248_v2, 0.0  ;;  %v1760_v54 = vadd.f32 %v11139_v36, %v1448_v1  ;;  %v2726_v10 = vmul.f32 %v11034_v31, %v2669_v6  ;;  %v2521_v2 = vadd.f32 %v11141_v20, %v8564_v48  ;;  %v11145_v1 = vld [vmem:[#allocation190_spill] sm:$0xff]  ;;  %v11147_v48 = vld [vmem:[#allocation15_spill] sm:$0xff] }
 0x3e4   :  { %v1761_v45 = vadd.f32 %v11140_v9, %v1449_v58  ;;  %v2830_v11 = vadd.f32 %v11142_v47, %v8583_v46  ;;  %v3313_v7 = vmin.f32 %v3281_v8, 6.0  ;;  %v1447_v51 = vadd.f32 %v11143_v23, %v1135_v18  ;;  %v11146_v58 = vld [vmem:[#allocation177_spill] sm:$0xff]  ;;  %v11148_v8 = vld [vmem:[#allocation154_spill] sm:$0xff]  ;;  %v11150_v20 = vld [vmem:[#allocation239_spill] sm:$0xff] }
 0x3e5   :  { %v3312_v62 = vmin.f32 %v3280_v61, 6.0  ;;  %v1920_v34 = vadd.f32 %v11144_v63, %v1760_v54  ;;  %v2831_v57 = vadd.f32 %v11145_v1, %v8593_v14  ;;  %v2168_v61 = vmul.f32 %v10930_v24, %v2104_v32  ;;  %v11149_v18 = vld [vmem:[#allocation110_spill] sm:$0xff]  ;;  %v8830_v14 = vpop.permute.xlu0 %2626  ;;  %v11153_v1 = vld [vmem:[#allocation121_spill] sm:$0xff] }
 0x3e6   :  { %v2832_v6 = vadd.f32 %v11146_v58, %v8596_v15  ;;  %v2833_v36 = vadd.f32 %v11147_v48, %v2521_v2  ;;  %v2169_v46 = vmul.f32 %v10930_v24, %v2105_v13  ;;  %v8826_v9 = vmul.f32 %v11148_v8, %v2726_v10  ;;  %v11152_v32 = vld [vmem:[#allocation210_spill] sm:$0xff]  ;;  %v11154_v13 = vld [vmem:[#allocation37_spill] sm:$0xff] }
 0x3e7   :  { %v3344_v3 = vmul.f32 %v3312_v62, %v3152_v53  ;;  %v3142_v54 = vadd.f32 %v11149_v18, %v2830_v11  ;;  %v3143_v47 = vadd.f32 %v11150_v20, %v2831_v57  ;;  %v3345_v23 = vmul.f32 %v3313_v7, %v3153_v16  ;;  %v11151_v53 = vld [vmem:[#allocation165_spill] sm:$0xff]  ;;  %v11155_v57 = vld [vmem:[#allocation212_spill] sm:$0xff] }
 0x3e8   :  { %v1921_v62 = vadd.f32 %v11151_v53, %v1761_v45  ;;  %v3144_v63 = vadd.f32 %v11152_v32, %v2832_v6  ;;  %v3145_v15 = vadd.f32 %v11153_v1, %v2833_v36  ;;  %v8835_v58 = vadd.f32 %v2168_v61, %v1920_v34  ;;  %v8846_v61 = vpop.permute.xlu1 %2918 }
 0x3e9   :  { %v3238_v2 = vadd.f32 3.0, %v3142_v54  ;;  %v3239_v24 = vadd.f32 3.0, %v3143_v47  ;;  %v1758_v10 = vadd.f32 %v11154_v13, %v1446_v27  ;;  %v8838_v48 = vmul.f32 0.16666667, %v3344_v3  ;;  %v11156_v3 = vld [vmem:[#allocation224_spill] sm:$0xff]  ;;  %v8854_v5 = vpop.permute.xlu0 %2950 }
 0x3ea   :  { %v3240_v11 = vadd.f32 3.0, %v3144_v63  ;;  %v3241_v18 = vadd.f32 3.0, %v3145_v15  ;;  %v2357_v16 = vsel %vm2334_vm6, %v8680_v17, %v8706_v42  ;;  %v2661_v27 = vsel %vm2646_vm7, %v2611_v44, %v8830_v14 }
 0x3eb   :  { %v3270_v45 = vmax.f32 %v3238_v2, 0.0  ;;  %v3271_v7 = vmax.f32 %v3239_v24, 0.0  ;;  %v1918_v6 = vadd.f32 %v11155_v57, %v1758_v10  ;;  %v2414_v34 = vmul.f32 %v10958_v39, %v2357_v16  ;;  %v11157_v2 = vld [vmem:[#allocation145_spill] sm:$0xff] }
 0x3ec   :  { %v3272_v36 = vmax.f32 %v3240_v11, 0.0  ;;  %v3273_v20 = vmax.f32 %v3241_v18, 0.0  ;;  %v1759_v53 = vadd.f32 %v11156_v3, %v1447_v51  ;;  %v8856_v10 = vadd.f32 %v2169_v46, %v1921_v62  ;;  %v11158_v11 = vld [vmem:[#allocation235_spill] sm:$0xff] }
 0x3ed   :  { %v3302_v32 = vmin.f32 %v3270_v45, 6.0  ;;  %v3303_v1 = vmin.f32 %v3271_v7, 6.0  ;;  %v2230_v13 = vadd.f32 %v8502_v12, %v1918_v6  ;;  %v2478_v24 = vmul.f32 %v11157_v2, %v2414_v34  ;;  %v11161_v34 = vld [vmem:[#allocation8_spill] sm:$0xff] }
 0x3ee   :  { %v3304_v39 = vmin.f32 %v3272_v36, 6.0  ;;  %v3305_v16 = vmin.f32 %v3273_v20, 6.0  ;;  %v1919_v18 = vadd.f32 %v11158_v11, %v1759_v53  ;;  %v2727_v44 = vmul.f32 %v11051_v25, %v2661_v27  ;;  %v8872_v20 = vpop.permute.xlu1 %2934 }
 0x3ef   :  { %v3334_v57 = vmul.f32 %v3302_v32, %v3142_v54  ;;  %v3335_v31 = vmul.f32 %v3303_v1, %v3143_v47  ;;  %v2349_v51 = vsel %vm2334_vm6, %v8706_v42, %v8754_v4  ;;  %v2542_v7 = vadd.f32 %v2478_v24, %v2230_v13  ;;  %v11162_v54 = vld [vmem:[#allocation32_spill] sm:$0xff]  ;;  %v11168_v32 = vld [vmem:[#allocation191_spill] sm:$0xff]  ;;  %v2643_v24 = vpop.permute.xlu0 %2642 }
 0x3f0   :  { %v3336_v12 = vmul.f32 %v3304_v39, %v3144_v63  ;;  %v3337_v45 = vmul.f32 %v3305_v16, %v3145_v15  ;;  %v2415_v6 = vmul.f32 %v10578_v0, %v2349_v51  ;;  %v2231_v36 = vadd.f32 %v11161_v34, %v1919_v18  ;;  %v11165_v63 = vld [vmem:[#allocation36_spill] sm:$0xff]  ;;  %v11172_v51 = vld [vmem:[#allocation47_spill] sm:$0xff] }
 0x3f1   :  { %v8865_v46 = vmul.f32 0.16666667, %v3334_v57  ;;  %v8867_v62 = vmul.f32 0.16666667, %v3335_v31  ;;  %v1912_v47 = vadd.f32 %v11162_v54, %v8781_v26  ;;  %v1913_v0 = vadd.f32 %v11165_v63, %v8791_v37  ;;  %v11167_v31 = vld [vmem:[#allocation188_spill] sm:$0xff]  ;;  %v11169_v26 = vld [vmem:[#allocation215_spill] sm:$0xff] }
 0x3f2   :  { %v8874_v27 = vmul.f32 0.16666667, %v3336_v12  ;;  %v8876_v3 = vmul.f32 0.16666667, %v3337_v45  ;;  %v2479_v42 = vmul.f32 %v11157_v2, %v2415_v6  ;;  %v8881_v15 = vmul.f32 0.16666667, %v3345_v23 }
 0x3f3   :  { %11159 = vst [vmem:[#allocation171_spill] sm:$0xff] %v8865_v46  ;;  %11160 = vst [vmem:[#allocation172_spill] sm:$0xff] %v8867_v62  ;;  %v3420_v53 = vmul.f32 %v11167_v31, %v8865_v46  ;;  %v3421_v1 = vmul.f32 %v11168_v32, %v8867_v62  ;;  %v2651_v13 = vsel %vm2646_vm7, %v11169_v26, %v8788_v56  ;;  %v11170_v39 = vld [vmem:[#allocation176_spill] sm:$0xff]  ;;  %v11171_v23 = vld [vmem:[#allocation107_spill] sm:$0xff] }
 0x3f4   :  { %11163 = vst [vmem:[#allocation17_spill] sm:$0xff] %v8874_v27  ;;  %11164 = vst [vmem:[#allocation34_spill] sm:$0xff] %v8876_v3  ;;  %v3422_v16 = vmul.f32 %v11170_v39, %v8874_v27  ;;  %v2791_v11 = vmul.f32 %v11148_v8, %v2727_v44  ;;  %v2543_v37 = vadd.f32 %v2479_v42, %v2231_v36  ;;  %v11173_v45 = vld [vmem:[#allocation144_spill] sm:$0xff]  ;;  %v11174_v54 = vld [vmem:[#allocation198_spill] sm:$0xff] }
 0x3f5   :  { %11166 = vst [vmem:[#allocation89_spill] sm:$0xff] %v8881_v15  ;;  %v2224_v18 = vadd.f32 %v11171_v23, %v1912_v47  ;;  %v3452_v57 = vadd.f32 %v3421_v1, %v3420_v53  ;;  %v2225_v12 = vadd.f32 %v11172_v51, %v1913_v0  ;;  %v2675_v6 = vsel %vm2646_vm7, %v8788_v56, %v11173_v45  ;;  %v11175_v42 = vld [vmem:[#allocation208_spill] sm:$0xff]  ;;  %v8915_v1 = vpop.permute.xlu1 %3071 }
 0x3f6   :  { %v2720_v34 = vmul.f32 %v10775_v52, %v2651_v13  ;;  %v3423_v63 = vmul.f32 %v11174_v54, %v8876_v3  ;;  %v8904_v26 = vadd.f32 %v8826_v9, %v2542_v7  ;;  %v2721_v44 = vmul.f32 %v10745_v29, %v2675_v6  ;;  %v11176_v13 = vld [vmem:[#allocation66_spill] sm:$0xff] }
 0x3f7   :  { %v2653_v36 = vsel %vm2646_vm7, %v8830_v14, %v2643_v24  ;;  %v3453_v47 = vadd.f32 %v3452_v57, %v3422_v16  ;;  %v2677_v56 = vsel %vm2646_vm7, %v2643_v24, %v8752_v22  ;;  %v2536_v9 = vadd.f32 %v11176_v13, %v2224_v18  ;;  %v11177_v16 = vld [vmem:[#allocation174_spill] sm:$0xff]  ;;  %v11178_v22 = vld [vmem:[#allocation155_spill] sm:$0xff] }
 0x3f8   :  { %v2784_v0 = vmul.f32 %v11175_v42, %v2720_v34  ;;  %v2728_v53 = vmul.f32 %v10775_v52, %v2653_v36  ;;  %v2785_v7 = vmul.f32 %v11175_v42, %v2721_v44  ;;  %v2987_v14 = vsel %vm2958_vm8, %v8854_v5, %v8818_v55  ;;  %v11179_v34 = vld [vmem:[#allocation169_spill] sm:$0xff] }
 0x3f9   :  { %v2838_v23 = vadd.f32 %v11177_v16, %v8664_v60  ;;  %v3454_v57 = vadd.f32 %v3453_v47, %v3423_v63  ;;  %v8925_v51 = vadd.f32 %v2791_v11, %v2543_v37  ;;  %v2537_v24 = vadd.f32 %v11178_v22, %v2225_v12  ;;  %v11180_v36 = vld [vmem:[#allocation205_spill] sm:$0xff]  ;;  %v11184_v47 = vld [vmem:[#allocation23_spill] sm:$0xff]  ;;  %v11186_v16 = vld [vmem:[#allocation40_spill] sm:$0xff] }
 0x3fa   :  { %v3033_v45 = vmul.f32 %v7821_v49, %v2987_v14  ;;  %v8929_v6 = vadd.f32 %v2784_v0, %v2536_v9  ;;  %v8932_v18 = vmul.f32 %v10745_v29, %v2677_v56  ;;  %v2839_v44 = vadd.f32 %v11179_v34, %v8667_v19  ;;  %v11182_v11 = vld [vmem:[#allocation209_spill] sm:$0xff]  ;;  %v11185_v56 = vld [vmem:[#allocation202_spill] sm:$0xff]  ;;  %v11197_v29 = vld [vmem:[#allocation203_spill] sm:$0xff] }
 0x3fb   :  { %v3150_v42 = vadd.f32 %v11180_v36, %v2838_v23  ;;  %3455 = vadd.xlane.f32.xlu0 %v3454_v57  ;;  %v2849_v13 = vadd.f32 %v2785_v7, %v2537_v24  ;;  %v8938_v60 = vmul.f32 %v11148_v8, %v2728_v53  ;;  %v11183_v12 = vld [vmem:[#allocation29_spill] sm:$0xff]  ;;  %v2979_v19 = vsel %vm2958_vm8, %v8818_v55, %v8846_v61  ;;  %v11188_v22 = vld [vmem:[#allocation170_spill] sm:$0xff]  ;;  %v11189_v24 = vld [vmem:[#allocation124_spill] sm:$0xff] }
 0x3fc   :  { %v3097_v37 = vmul.f32 %v11182_v11, %v3033_v45  ;;  %v1910_v63 = vadd.f32 %v11183_v12, %v8736_v33  ;;  %v3151_v0 = vadd.f32 %v11184_v47, %v2839_v44  ;;  %v2524_v14 = vadd.f32 %v11185_v56, %v8677_v40  ;;  %v11187_v23 = vld [vmem:[#allocation153_spill] sm:$0xff]  ;;  %v8954_v33 = vpop.permute.xlu1 %2330  ;;  %v11190_v36 = vld [vmem:[#allocation139_spill] sm:$0xff]  ;;  %v8960_v40 = vpop.permute.xlu0 %2906 }
 0x3fd   :  { %11181 = vst [vmem:[#allocation195_spill] sm:$0xff] %v8938_v60  ;;  %v3246_v9 = vadd.f32 3.0, %v3150_v42  ;;  %v3030_v57 = vmul.f32 %v11187_v23, %v2979_v19  ;;  %v2525_v45 = vadd.f32 %v11189_v24, %v11188_v22  ;;  %v2834_v12 = vadd.f32 %v11190_v36, %v8717_v30  ;;  %v11191_v55 = vld [vmem:[#allocation187_spill] sm:$0xff]  ;;  %v11194_v24 = vld [vmem:[#allocation25_spill] sm:$0xff]  ;;  %v11196_v30 = vld [vmem:[#allocation136_spill] sm:$0xff] }
 0x3fe   :  { %v3161_v7 = vadd.f32 %v3097_v37, %v2849_v13  ;;  %v2222_v53 = vadd.f32 %v11186_v16, %v1910_v63  ;;  %v3247_v34 = vadd.f32 3.0, %v3151_v0  ;;  %v2835_v47 = vadd.f32 %v11191_v55, %v8720_v38  ;;  %v11192_v13 = vld [vmem:[#allocation166_spill] sm:$0xff]  ;;  %v11193_v19 = vld [vmem:[#allocation127_spill] sm:$0xff]  ;;  %v11198_v55 = vld [vmem:[#allocation140_spill] sm:$0xff] }
 0x3ff   :  { %v3278_v44 = vmax.f32 %v3246_v9, 0.0  ;;  %v3094_v63 = vmul.f32 %v11182_v11, %v3030_v57  ;;  %v2836_v56 = vadd.f32 %v11193_v19, %v2524_v14  ;;  %v2837_v27 = vadd.f32 %v11194_v24, %v2525_v45  ;;  %v11195_v9 = vld [vmem:[#allocation183_spill] sm:$0xff] }
 0x400   :  { %v3257_v3 = vadd.f32 3.0, %v3161_v7  ;;  %v2534_v37 = vadd.f32 %v11192_v13, %v2222_v53  ;;  %v3279_v16 = vmax.f32 %v3247_v34, 0.0  ;;  %v3146_v62 = vadd.f32 %v11195_v9, %v2834_v12  ;;  %v11199_v53 = vld [vmem:[#allocation82_spill] sm:$0xff]  ;;  %v8973_v19 = vpop.permute.xlu1 %2332 }
 0x401   :  { %v3310_v22 = vmin.f32 %v3278_v44, 6.0  ;;  %v3147_v38 = vadd.f32 %v11197_v29, %v2835_v47  ;;  %v3148_v52 = vadd.f32 %v11198_v55, %v2836_v56  ;;  %v3149_v13 = vadd.f32 %v11199_v53, %v2837_v27 }
 0x402   :  { %v3289_v46 = vmax.f32 %v3257_v3, 0.0  ;;  %v2846_v36 = vadd.f32 %v11196_v30, %v2534_v37  ;;  %v3311_v25 = vmin.f32 %v3279_v16, 6.0  ;;  %v3242_v57 = vadd.f32 3.0, %v3146_v62 }
 0x403   :  { %v3342_v60 = vmul.f32 %v3310_v22, %v3150_v42  ;;  %v3430_v14 = vmul.f32 %v11170_v39, %v8838_v48  ;;  %v3243_v44 = vadd.f32 3.0, %v3147_v38  ;;  %v3244_v45 = vadd.f32 3.0, %v3148_v52  ;;  %v2923_v22 = vpop.permute.xlu0 %2922 }
 0x404   :  { %v3158_v34 = vadd.f32 %v3094_v63, %v2846_v36  ;;  %v3343_v3 = vmul.f32 %v3311_v25, %v3151_v0  ;;  %v3245_v37 = vadd.f32 3.0, %v3149_v13  ;;  %v3274_v29 = vmax.f32 %v3242_v57, 0.0 }
 0x405   :  { %v8975_v12 = vmul.f32 0.16666667, %v3342_v60  ;;  %v3321_v47 = vmin.f32 %v3289_v46, 6.0  ;;  %v3275_v16 = vmax.f32 %v3243_v44, 0.0  ;;  %v3276_v42 = vmax.f32 %v3244_v45, 0.0 }
 0x406   :  { %v3254_v56 = vadd.f32 3.0, %v3158_v34  ;;  %v8977_v27 = vmul.f32 0.16666667, %v3343_v3  ;;  %v3277_v63 = vmax.f32 %v3245_v37, 0.0  ;;  %v3306_v9 = vmin.f32 %v3274_v29, 6.0  ;;  %v8990_v37 = vpop.permute.xlu1 %2596 }
 0x407   :  { %v3428_v24 = vmul.f32 %v11167_v31, %v8975_v12  ;;  %v3431_v30 = vmul.f32 %v11174_v54, %v8881_v15  ;;  %v3307_v60 = vmin.f32 %v3275_v16, 6.0  ;;  %v3308_v0 = vmin.f32 %v3276_v42, 6.0  ;;  %v11201_v42 = vld [vmem:[#allocation159_spill] sm:$0xff] }
 0x408   :  { %v3286_v25 = vmax.f32 %v3254_v56, 0.0  ;;  %v3429_v46 = vmul.f32 %v11168_v32, %v8977_v27  ;;  %v3309_v36 = vmin.f32 %v3277_v63, 6.0  ;;  %v3338_v55 = vmul.f32 %v3306_v9, %v3146_v62 }
 0x409   :  { %v2981_v53 = vsel %vm2958_vm8, %v8960_v40, %v2923_v22  ;;  %v8988_v57 = vmul.f32 %v3321_v47, %v3161_v7  ;;  %v3339_v45 = vmul.f32 %v3307_v60, %v3147_v38  ;;  %v3340_v3 = vmul.f32 %v3308_v0, %v3148_v52  ;;  %v11205_v47 = vld [vmem:[#allocation162_spill] sm:$0xff] }
 0x40a   :  { %v3318_v44 = vmin.f32 %v3286_v25, 6.0  ;;  %v3462_v29 = vadd.f32 %v3429_v46, %v3428_v24  ;;  %v3341_v56 = vmul.f32 %v3309_v36, %v3149_v13  ;;  %v8992_v16 = vmul.f32 0.16666667, %v3338_v55  ;;  %v11206_v46 = vld [vmem:[#allocation115_spill] sm:$0xff] }
 0x40b   :  { %v1911_v15 = vadd.f32 %v11201_v42, %v8776_v59  ;;  %v8996_v63 = vmul.f32 0.16666667, %v3339_v45  ;;  %v8998_v62 = vmul.f32 0.16666667, %v3340_v3  ;;  %v3038_v9 = vmul.f32 %v11187_v23, %v2981_v53  ;;  %v11209_v3 = vld [vmem:[#allocation88_spill] sm:$0xff]  ;;  %v9029_v42 = vpop.permute.xlu1 %2612 }
 0x40c   :  { %11200 = vst [vmem:[#allocation133_spill] sm:$0xff] %v8992_v16  ;;  %v2963_v52 = vsel %vm2958_vm8, %v8872_v20, %v8854_v5  ;;  %v3463_v7 = vadd.f32 %v3462_v29, %v3430_v14  ;;  %v9005_v38 = vmul.f32 0.16666667, %v3341_v56  ;;  %v3424_v13 = vmul.f32 %v11167_v31, %v8992_v16  ;;  %v2939_v56 = vpop.permute.xlu0 %2938 }
 0x40d   :  { %11202 = vst [vmem:[#allocation213_spill] sm:$0xff] %v8996_v63  ;;  %11203 = vst [vmem:[#allocation16_spill] sm:$0xff] %v8998_v62  ;;  %v2223_v24 = vadd.f32 %v11205_v47, %v1911_v15  ;;  %v9010_v59 = vmul.f32 %v3318_v44, %v3158_v34  ;;  %v3425_v25 = vmul.f32 %v11168_v32, %v8996_v63  ;;  %v11207_v15 = vld [vmem:[#allocation38_spill] sm:$0xff]  ;;  %v11208_v44 = vld [vmem:[#allocation105_spill] sm:$0xff] }
 0x40e   :  { %11204 = vst [vmem:[#allocation250_spill] sm:$0xff] %v9005_v38  ;;  %v3426_v60 = vmul.f32 %v11170_v39, %v8998_v62  ;;  %v2971_v5 = vsel %vm2958_vm8, %v8846_v61, %v8872_v20  ;;  %v3464_v14 = vadd.f32 %v3463_v7, %v3431_v30  ;;  %v3427_v0 = vmul.f32 %v11174_v54, %v9005_v38  ;;  %v11210_v61 = vld [vmem:[#allocation197_spill] sm:$0xff]  ;;  %v11211_v7 = vld [vmem:[#allocation138_spill] sm:$0xff]  ;;  %v11216_v38 = vld [vmem:[#allocation192_spill] sm:$0xff] }
 0x40f   :  { %v2535_v36 = vadd.f32 %v11206_v46, %v2223_v24  ;;  %v3031_v34 = vmul.f32 %v11207_v15, %v2971_v5  ;;  %v3457_v55 = vadd.f32 %v3425_v25, %v3424_v13  ;;  %v3032_v53 = vmul.f32 %v11122_v43, %v2963_v52  ;;  %v11212_v13 = vld [vmem:[#allocation181_spill] sm:$0xff]  ;;  %v11213_v25 = vld [vmem:[#allocation168_spill] sm:$0xff] }
 0x410   :  { %v2532_v45 = vadd.f32 %v11208_v44, %v8727_v50  ;;  %v2533_v29 = vadd.f32 %v11209_v3, %v8730_v28  ;;  %3465 = vadd.xlane.f32.xlu0 %v3464_v14  ;;  %v2842_v47 = vadd.f32 %v11211_v7, %v8741_v41  ;;  %v2843_v52 = vadd.f32 %v11212_v13, %v8744_v21  ;;  %v11214_v28 = vld [vmem:[#allocation128_spill] sm:$0xff]  ;;  %v9049_v13 = vpop.permute.xlu1 %2628  ;;  %v2955_v62 = vpop.permute.xlu0 %2954 }
 0x411   :  { %v2847_v20 = vadd.f32 %v11210_v61, %v2535_v36  ;;  %v3095_v30 = vmul.f32 %v11182_v11, %v3031_v34  ;;  %v3458_v24 = vadd.f32 %v3457_v55, %v3426_v60  ;;  %v3096_v50 = vmul.f32 %v11182_v11, %v3032_v53  ;;  %v11215_v3 = vld [vmem:[#allocation184_spill] sm:$0xff]  ;;  %v11218_v60 = vld [vmem:[#allocation214_spill] sm:$0xff] }
 0x412   :  { %v2844_v5 = vadd.f32 %v11213_v25, %v2532_v45  ;;  %v2845_v46 = vadd.f32 %v11214_v28, %v2533_v29  ;;  %v3154_v14 = vadd.f32 %v11215_v3, %v2842_v47  ;;  %v3155_v36 = vadd.f32 %v11216_v38, %v2843_v52  ;;  %v11217_v7 = vld [vmem:[#allocation96_spill] sm:$0xff] }
 0x413   :  { %v3159_v44 = vadd.f32 %v3095_v30, %v2847_v20  ;;  %v2973_v34 = vsel %vm2958_vm8, %v2923_v22, %v2939_v56  ;;  %v3459_v61 = vadd.f32 %v3458_v24, %v3427_v0  ;;  %v3160_v41 = vadd.f32 %v3096_v50, %v8929_v6 }
 0x414   :  { %v3156_v21 = vadd.f32 %v11217_v7, %v2844_v5  ;;  %v3157_v55 = vadd.f32 %v11218_v60, %v2845_v46  ;;  %v3250_v53 = vadd.f32 3.0, %v3154_v14  ;;  %v3251_v45 = vadd.f32 3.0, %v3155_v36  ;;  %v9054_v16 = vpop.permute.xlu1 %2952 }
 0x415   :  { %v3255_v11 = vadd.f32 3.0, %v3159_v44  ;;  %v3039_v29 = vmul.f32 %v11207_v15, %v2973_v34  ;;  %3460 = vadd.xlane.f32.xlu1 %v3459_v61  ;;  %v3256_v20 = vadd.f32 3.0, %v3160_v41  ;;  %v3102_v38 = vmul.f32 %v8915_v1, %v3038_v9 }
 0x416   :  { %v3252_v30 = vadd.f32 3.0, %v3156_v21  ;;  %v3253_v47 = vadd.f32 3.0, %v3157_v55  ;;  %v3282_v0 = vmax.f32 %v3250_v53, 0.0  ;;  %v3283_v6 = vmax.f32 %v3251_v45, 0.0 }
 0x417   :  { %v3287_v22 = vmax.f32 %v3255_v11, 0.0  ;;  %v3103_v52 = vmul.f32 %v8915_v1, %v3039_v29  ;;  %v3288_v24 = vmax.f32 %v3256_v20, 0.0  ;;  %v3166_v5 = vadd.f32 %v3102_v38, %v8904_v26 }
 0x418   :  { %v3284_v50 = vmax.f32 %v3252_v30, 0.0  ;;  %v3285_v25 = vmax.f32 %v3253_v47, 0.0  ;;  %v3314_v46 = vmin.f32 %v3282_v0, 6.0  ;;  %v3315_v3 = vmin.f32 %v3283_v6, 6.0 }
 0x419   :  { %v3319_v28 = vmin.f32 %v3287_v22, 6.0  ;;  %v3167_v34 = vadd.f32 %v3103_v52, %v8925_v51  ;;  %v3320_v61 = vmin.f32 %v3288_v24, 6.0  ;;  %v3262_v60 = vadd.f32 3.0, %v3166_v5 }
 0x41a   :  { %v3316_v7 = vmin.f32 %v3284_v50, 6.0  ;;  %v3317_v9 = vmin.f32 %v3285_v25, 6.0  ;;  %v3346_v53 = vmul.f32 %v3314_v46, %v3154_v14  ;;  %v3347_v45 = vmul.f32 %v3315_v3, %v3155_v36  ;;  %v11224_v25 = vld [vmem:[#allocation123_spill] sm:$0xff]  ;;  %v2645_v46 = vpop.permute.xlu1 %2644 }
 0x41b   :  { %v3351_v11 = vmul.f32 %v3319_v28, %v3159_v44  ;;  %v3263_v63 = vadd.f32 3.0, %v3167_v34  ;;  %v3352_v29 = vmul.f32 %v3320_v61, %v3160_v41  ;;  %v3294_v47 = vmax.f32 %v3262_v60, 0.0 }
 0x41c   :  { %v3348_v20 = vmul.f32 %v3316_v7, %v3156_v21  ;;  %v3349_v30 = vmul.f32 %v3317_v9, %v3157_v55  ;;  %v2793_v26 = vmul.f32 %v11148_v8, %v8932_v18  ;;  %v9058_v38 = vmul.f32 0.16666667, %v3346_v53  ;;  %v11225_v9 = vld [vmem:[#allocation146_spill] sm:$0xff] }
 0x41d   :  { %v9060_v51 = vmul.f32 0.16666667, %v3347_v45  ;;  %v2965_v22 = vsel %vm2958_vm8, %v2939_v56, %v2955_v62  ;;  %v9065_v44 = vmul.f32 0.16666667, %v8988_v57  ;;  %v2989_v41 = vsel %vm2958_vm8, %v2955_v62, %v8960_v40  ;;  %v11227_v45 = vld [vmem:[#allocation157_spill] sm:$0xff] }
 0x41e   :  { %v9067_v14 = vmul.f32 0.16666667, %v3348_v20  ;;  %v9069_v36 = vmul.f32 0.16666667, %v3349_v30  ;;  %v3432_v8 = vmul.f32 %v11167_v31, %v9058_v38  ;;  %v3295_v21 = vmax.f32 %v3263_v63, 0.0 }
 0x41f   :  { %11219 = vst [vmem:[#allocation9_spill] sm:$0xff] %v9065_v44  ;;  %v3433_v18 = vmul.f32 %v11168_v32, %v9060_v51  ;;  %v3326_v55 = vmin.f32 %v3294_v47, 6.0  ;;  %v9079_v56 = vmul.f32 0.16666667, %v9010_v59  ;;  %v9081_v57 = vmul.f32 0.16666667, %v3351_v11 }
 0x420   :  { %11220 = vst [vmem:[#allocation200_spill] sm:$0xff] %v9067_v14  ;;  %v9083_v0 = vmul.f32 0.16666667, %v3352_v29  ;;  %v3040_v6 = vmul.f32 %v11122_v43, %v2965_v22  ;;  %v3434_v40 = vmul.f32 %v11170_v39, %v9067_v14  ;;  %v3327_v52 = vmin.f32 %v3295_v21, 6.0  ;;  %v11226_v11 = vld [vmem:[#allocation240_spill] sm:$0xff]  ;;  %v11229_v29 = vld [vmem:[#allocation185_spill] sm:$0xff] }
 0x421   :  { %11221 = vst [vmem:[#allocation196_spill] sm:$0xff] %v9079_v56  ;;  %11222 = vst [vmem:[#allocation193_spill] sm:$0xff] %v9081_v57  ;;  %v3467_v62 = vadd.f32 %v3433_v18, %v3432_v8  ;;  %v2341_v63 = vsel %vm2334_vm6, %v8754_v4, %v8954_v33  ;;  %v3435_v59 = vmul.f32 %v11174_v54, %v9069_v36  ;;  %v11230_v21 = vld [vmem:[#allocation11_spill] sm:$0xff] }
 0x422   :  { %11223 = vst [vmem:[#allocation87_spill] sm:$0xff] %v9083_v0  ;;  %v3041_v24 = vmul.f32 %v7821_v49, %v2989_v41  ;;  %v2365_v50 = vsel %vm2334_vm6, %v8954_v33, %v8680_v17  ;;  %v2416_v28 = vmul.f32 %v11224_v25, %v2341_v63  ;;  %v3358_v61 = vmul.f32 %v3326_v55, %v3166_v5  ;;  %v11228_v33 = vld [vmem:[#allocation237_spill] sm:$0xff] }
 0x423   :  { %v3468_v3 = vadd.f32 %v3467_v62, %v3434_v40  ;;  %v3104_v7 = vmul.f32 %v8915_v1, %v3040_v6  ;;  %v2417_v60 = vmul.f32 %v11225_v9, %v2365_v50  ;;  %v2342_v53 = vsel %vm2334_vm6, %v11226_v11, %v8973_v19  ;;  %v11239_v11 = vld [vmem:[#allocation118_spill] sm:$0xff] }
 0x424   :  { %v2480_v4 = vmul.f32 %v11157_v2, %v2416_v28  ;;  %v2366_v17 = vsel %vm2334_vm6, %v8973_v19, %v11227_v45  ;;  %v2546_v20 = vadd.f32 %v11229_v29, %v11228_v33  ;;  %v3359_v30 = vmul.f32 %v3327_v52, %v3167_v34  ;;  %v11231_v19 = vld [vmem:[#allocation148_spill] sm:$0xff]  ;;  %v11232_v34 = vld [vmem:[#allocation93_spill] sm:$0xff]  ;;  %v9135_v28 = vpop.permute.xlu1 %2908 }
 0x425   :  { %v3469_v5 = vadd.f32 %v3468_v3, %v3435_v59  ;;  %v2481_v47 = vmul.f32 %v11157_v2, %v2417_v60  ;;  %v2420_v22 = vmul.f32 %v11224_v25, %v2342_v53  ;;  %v2421_v8 = vmul.f32 %v11225_v9, %v2366_v17  ;;  %v11233_v2 = vld [vmem:[#allocation120_spill] sm:$0xff]  ;;  %v11235_v59 = vld [vmem:[#allocation195_spill] sm:$0xff] }
 0x426   :  { %v2544_v41 = vadd.f32 %v2480_v4, %v8835_v58  ;;  %v2670_v18 = vsel %vm2646_vm7, %v8990_v37, %v9029_v42  ;;  %v2547_v55 = vadd.f32 %v11231_v19, %v11230_v21  ;;  %v2662_v58 = vsel %vm2646_vm7, %v9029_v42, %v9049_v13  ;;  %v11240_v17 = vld [vmem:[#allocation204_spill] sm:$0xff] }
 0x427   :  { %3470 = vadd.xlane.f32.xlu0 %v3469_v5  ;;  %v2545_v6 = vadd.f32 %v2481_v47, %v8856_v10  ;;  %v2484_v40 = vmul.f32 %v11232_v34, %v2420_v22  ;;  %v2730_v62 = vmul.f32 %v11233_v2, %v2670_v18  ;;  %v9130_v52 = vmul.f32 0.16666667, %v3358_v61  ;;  %v11237_v61 = vld [vmem:[#allocation150_spill] sm:$0xff] }
 0x428   :  { %v3105_v63 = vmul.f32 %v8915_v1, %v3041_v24  ;;  %v2856_v50 = vadd.f32 %v11235_v59, %v2544_v41  ;;  %v2485_v25 = vmul.f32 %v11232_v34, %v2421_v8  ;;  %v9137_v10 = vmul.f32 0.16666667, %v3359_v30  ;;  %v11238_v1 = vld [vmem:[#allocation152_spill] sm:$0xff]  ;;  %v11242_v22 = vld [vmem:[#allocation114_spill] sm:$0xff] }
 0x429   :  { %11234 = vst [vmem:[#allocation119_spill] sm:$0xff] %v9130_v52  ;;  %v2857_v3 = vadd.f32 %v2793_v26, %v2545_v6  ;;  %v3436_v9 = vmul.f32 %v11167_v31, %v9079_v56  ;;  %v3437_v60 = vmul.f32 %v11168_v32, %v9081_v57  ;;  %v9144_v4 = vadd.f32 %v2484_v40, %v11237_v61  ;;  %v11245_v61 = vld [vmem:[#allocation164_spill] sm:$0xff] }
 0x42a   :  { %11236 = vst [vmem:[#allocation58_spill] sm:$0xff] %v9137_v10  ;;  %v3168_v42 = vadd.f32 %v3104_v7, %v2856_v50  ;;  %v2794_v24 = vmul.f32 %v11238_v1, %v2730_v62  ;;  %v2731_v53 = vmul.f32 %v11239_v11, %v2662_v58  ;;  %v2549_v33 = vadd.f32 %v2485_v25, %v11240_v17  ;;  %v11241_v7 = vld [vmem:[#allocation199_spill] sm:$0xff]  ;;  %v2925_v62 = vpop.permute.xlu1 %2924 }
 0x42b   :  { %v3169_v45 = vadd.f32 %v3105_v63, %v2857_v3  ;;  %v3438_v26 = vmul.f32 %v11170_v39, %v9083_v0  ;;  %v3472_v29 = vadd.f32 %v3437_v60, %v3436_v9  ;;  %v3439_v30 = vmul.f32 %v11174_v54, %v9065_v44  ;;  %v11243_v63 = vld [vmem:[#allocation71_spill] sm:$0xff]  ;;  %v11244_v9 = vld [vmem:[#allocation33_spill] sm:$0xff] }
 0x42c   :  { %v3264_v5 = vadd.f32 3.0, %v3168_v42  ;;  %v2964_v47 = vsel %vm2958_vm8, %v11241_v7, %v9054_v16  ;;  %v2988_v41 = vsel %vm2958_vm8, %v9054_v16, %v11242_v22  ;;  %v2795_v34 = vmul.f32 %v11238_v1, %v2731_v53  ;;  %v11246_v53 = vld [vmem:[#allocation50_spill] sm:$0xff]  ;;  %v11247_v17 = vld [vmem:[#allocation211_spill] sm:$0xff] }
 0x42d   :  { %v3265_v8 = vadd.f32 3.0, %v3169_v45  ;;  %v3473_v18 = vadd.f32 %v3472_v29, %v3438_v26  ;;  %v3036_v21 = vmul.f32 %v11122_v43, %v2964_v47  ;;  %v3037_v19 = vmul.f32 %v7821_v49, %v2988_v41 }
 0x42e   :  { %v3296_v6 = vmax.f32 %v3264_v5, 0.0  ;;  %v2654_v40 = vsel %vm2646_vm7, %v9049_v13, %v2645_v46  ;;  %v2678_v2 = vsel %vm2646_vm7, %v2645_v46, %v8990_v37  ;;  %v2858_v3 = vadd.f32 %v2794_v24, %v2546_v20  ;;  %v4507_v46 = vld [vmem:[%s9627_s2 + $0x1] ss:$2 sm:$0xf] }
 0x42f   :  { %v3297_v58 = vmax.f32 %v3265_v8, 0.0  ;;  %v3474_v16 = vadd.f32 %v3473_v18, %v3439_v30  ;;  %v3100_v59 = vmul.f32 %v11243_v63, %v3036_v21  ;;  %v3101_v50 = vmul.f32 %v11243_v63, %v3037_v19  ;;  %v11249_v19 = vld [vmem:[#allocation223_spill] sm:$0xff] }
 0x430   :  { %v3328_v25 = vmin.f32 %v3296_v6, 6.0  ;;  %v2732_v60 = vmul.f32 %v11244_v9, %v2654_v40  ;;  %v2733_v11 = vmul.f32 %v11245_v61, %v2678_v2  ;;  %v2982_v37 = vsel %vm2958_vm8, %v9135_v28, %v2925_v62  ;;  %v11251_v2 = vld [vmem:[#allocation186_spill] sm:$0xff] }
 0x431   :  { %3475 = vadd.xlane.f32.xlu1 %v3474_v16  ;;  %v3164_v13 = vadd.f32 %v3100_v59, %v11246_v53  ;;  %v3165_v26 = vadd.f32 %v3101_v50, %v11247_v17  ;;  %v3329_v29 = vmin.f32 %v3297_v58, 6.0  ;;  %v2859_v20 = vadd.f32 %v2795_v34, %v2547_v55  ;;  %v2941_v55 = vpop.permute.xlu1 %2940  ;;  %v11252_v16 = vld [vmem:[#allocation221_spill] sm:$0xff]  ;;  %v11255_v17 = vld [vmem:[#allocation171_spill] sm:$0xff] }
 0x432   :  { %v3360_v5 = vmul.f32 %v3328_v25, %v3168_v42  ;;  %v3444_v24 = vmul.f32 %v11167_v31, %v9130_v52  ;;  %v3445_v30 = vmul.f32 %v11168_v32, %v9137_v10  ;;  %v3042_v41 = vmul.f32 %v11187_v23, %v2982_v37  ;;  %v11256_v37 = vld [vmem:[#allocation172_spill] sm:$0xff] }
 0x433   :  { %v3260_v7 = vadd.f32 3.0, %v3164_v13  ;;  %v3261_v47 = vadd.f32 3.0, %v3165_v26  ;;  %v3361_v22 = vmul.f32 %v3329_v29, %v3169_v45  ;;  %v2796_v8 = vmul.f32 %v11238_v1, %v2732_v60  ;;  %v11254_v60 = vld [vmem:[#allocation225_spill] sm:$0xff] }
 0x434   :  { %v2797_v18 = vmul.f32 %v11238_v1, %v2733_v11  ;;  %v9189_v21 = vmul.f32 0.16666667, %v3360_v5  ;;  %v9192_v42 = vrot.slane %v4507_v46, %v11249_v19  ;;  %v3106_v58 = vmul.f32 %v11251_v2, %v3042_v41  ;;  %v11253_v1 = vld [vmem:[#allocation222_spill] sm:$0xff] }
 0x435   :  { %v3292_v6 = vmax.f32 %v3260_v7, 0.0  ;;  %v3293_v34 = vmax.f32 %v3261_v47, 0.0  ;;  %v9194_v40 = vmul.f32 0.16666667, %v3361_v22  ;;  %v3482_v23 = vadd.f32 %v3445_v30, %v3444_v24  ;;  %v11257_v47 = vld [vmem:[#allocation17_spill] sm:$0xff] }
 0x436   :  { %11248 = vst [vmem:[#allocation43_spill] sm:$0xff] %v9189_v21  ;;  %v3446_v45 = vmul.f32 %v11170_v39, %v9189_v21  ;;  %v9200_v63 = vrot.slane %v4507_v46, %v11252_v16  ;;  %v9203_v59 = vrot.slane %v4507_v46, %v11253_v1  ;;  %v3170_v9 = vadd.f32 %v3106_v58, %v2858_v3 }
 0x437   :  { %11250 = vst [vmem:[#allocation10_spill] sm:$0xff] %v9194_v40  ;;  %v3324_v50 = vmin.f32 %v3292_v6, 6.0  ;;  %v3325_v25 = vmin.f32 %v3293_v34, 6.0  ;;  %v9206_v61 = vrot.slane %v4507_v46, %v11254_v60  ;;  %v3447_v11 = vmul.f32 %v11174_v54, %v9194_v40  ;;  %v2957_v6 = vpop.permute.xlu1 %2956 }
 0x438   :  { %v3483_v53 = vadd.f32 %v3482_v23, %v3446_v45  ;;  %v3892_v29 = vmul.f32 %v9192_v42, %v11255_v17  ;;  %v3893_v5 = vmul.f32 %v9200_v63, %v11256_v37  ;;  %v2860_v24 = vadd.f32 %v2796_v8, %v9144_v4  ;;  %v11258_v4 = vld [vmem:[#allocation34_spill] sm:$0xff] }
 0x439   :  { %v2861_v30 = vadd.f32 %v2797_v18, %v2549_v33  ;;  %v3266_v7 = vadd.f32 3.0, %v3170_v9  ;;  %v3894_v3 = vmul.f32 %v9203_v59, %v11257_v47  ;;  %v2974_v41 = vsel %vm2958_vm8, %v2925_v62, %v2941_v55 }
 0x43a   :  { %v3484_v22 = vadd.f32 %v3483_v53, %v3447_v11  ;;  %v3924_v46 = vadd.f32 %v3893_v5, %v3892_v29  ;;  %v3900_v19 = vmul.f32 %v9192_v42, %v8975_v12  ;;  %v3356_v34 = vmul.f32 %v3324_v50, %v3164_v13 }
 0x43b   :  { %v3357_v58 = vmul.f32 %v3325_v25, %v3165_v26  ;;  %v3298_v45 = vmax.f32 %v3266_v7, 0.0  ;;  %v3043_v23 = vmul.f32 %v11207_v15, %v2974_v41  ;;  %v3895_v33 = vmul.f32 %v9206_v61, %v11258_v4 }
 0x43c   :  { %3485 = vadd.xlane.f32.xlu1 %v3484_v22  ;;  %v3925_v8 = vadd.f32 %v3924_v46, %v3894_v3  ;;  %v3901_v18 = vmul.f32 %v9200_v63, %v8977_v27  ;;  %v3902_v62 = vmul.f32 %v9203_v59, %v8838_v48  ;;  %v2966_v13 = vsel %vm2958_vm8, %v2941_v55, %v2957_v6  ;;  %v11260_v55 = vld [vmem:[#allocation89_spill] sm:$0xff] }
 0x43d   :  { %v3330_v16 = vmin.f32 %v3298_v45, 6.0  ;;  %v3107_v1 = vmul.f32 %v11251_v2, %v3043_v23  ;;  %v2990_v15 = vsel %vm2958_vm8, %v2957_v6, %v9135_v28  ;;  %v3044_v25 = vmul.f32 %v11122_v43, %v2966_v13 }
 0x43e   :  { %v3926_v26 = vadd.f32 %v3925_v8, %v3895_v33  ;;  %v3934_v50 = vadd.f32 %v3901_v18, %v3900_v19  ;;  %v3045_v60 = vmul.f32 %v7821_v49, %v2990_v15  ;;  %v9236_v11 = vmul.f32 0.16666667, %v3356_v34 }
 0x43f   :  { %v3171_v53 = vadd.f32 %v3107_v1, %v2859_v20  ;;  %v3908_v29 = vmul.f32 %v9192_v42, %v9079_v56  ;;  %v3909_v5 = vmul.f32 %v9200_v63, %v9081_v57  ;;  %v3903_v35 = vmul.f32 %v9206_v61, %v11260_v55  ;;  %v11263_v1 = vld [vmem:[#allocation245_spill] sm:$0xff] }
 0x440   :  { %11259 = vst [vmem:[#allocation242_spill] sm:$0xff] %v9236_v11  ;;  %3927 = vadd.xlane.f32.xlu1 %v3926_v26  ;;  %v3935_v28 = vadd.f32 %v3934_v50, %v3902_v62  ;;  %v3108_v7 = vmul.f32 %v11251_v2, %v3044_v25  ;;  %v3109_v43 = vmul.f32 %v11251_v2, %v3045_v60  ;;  %v11262_v62 = vld [vmem:[#allocation207_spill] sm:$0xff] }
 0x441   :  { %v3362_v3 = vmul.f32 %v3330_v16, %v3170_v9  ;;  %v3267_v49 = vadd.f32 3.0, %v3171_v53  ;;  %v3910_v20 = vmul.f32 %v9203_v59, %v9083_v0  ;;  %v3944_v22 = vadd.f32 %v3909_v5, %v3908_v29 }
 0x442   :  { %v3936_v46 = vadd.f32 %v3935_v28, %v3903_v35  ;;  %v3172_v41 = vadd.f32 %v3108_v7, %v2860_v24  ;;  %v3173_v19 = vadd.f32 %v3109_v43, %v2861_v30  ;;  %v3916_v6 = vmul.f32 %v9192_v42, %v9130_v52 }
 0x443   :  { %v3299_v34 = vmax.f32 %v3267_v49, 0.0  ;;  %v3945_v45 = vadd.f32 %v3944_v22, %v3910_v20  ;;  %v3917_v23 = vmul.f32 %v9200_v63, %v9137_v10  ;;  %v3918_v2 = vmul.f32 %v9203_v59, %v9189_v21  ;;  %v11266_v22 = vld [vmem:[#allocation133_spill] sm:$0xff] }
 0x444   :  { %v9254_v9 = vmul.f32 0.16666667, %v3357_v58  ;;  %3937 = vadd.xlane.f32.xlu1 %v3936_v46  ;;  %v3268_v33 = vadd.f32 3.0, %v3172_v41  ;;  %v3269_v8 = vadd.f32 3.0, %v3173_v19  ;;  %v3911_v24 = vmul.f32 %v9206_v61, %v9065_v44 }
 0x445   :  { %v3331_v30 = vmin.f32 %v3299_v34, 6.0  ;;  %v3954_v18 = vadd.f32 %v3917_v23, %v3916_v6  ;;  %v3440_v16 = vmul.f32 %v11167_v31, %v11262_v62  ;;  %v3441_v13 = vmul.f32 %v11168_v32, %v11263_v1 }
 0x446   :  { %11261 = vst [vmem:[#allocation45_spill] sm:$0xff] %v9254_v9  ;;  %v3300_v15 = vmax.f32 %v3268_v33, 0.0  ;;  %v3301_v26 = vmax.f32 %v3269_v8, 0.0  ;;  %v3946_v50 = vadd.f32 %v3945_v45, %v3911_v24  ;;  %v3442_v58 = vmul.f32 %v11170_v39, %v9236_v11 }
 0x447   :  { %v9264_v25 = vmul.f32 0.16666667, %v3362_v3  ;;  %v3363_v60 = vmul.f32 %v3331_v30, %v3171_v53  ;;  %v3955_v29 = vadd.f32 %v3954_v18, %v3918_v2  ;;  %v3477_v5 = vadd.f32 %v3441_v13, %v3440_v16  ;;  %v11267_v3 = vld [vmem:[#allocation213_spill] sm:$0xff] }
 0x448   :  { %v3332_v35 = vmin.f32 %v3300_v15, 6.0  ;;  %v3333_v28 = vmin.f32 %v3301_v26, 6.0  ;;  %3947 = vadd.xlane.f32.xlu1 %v3946_v50  ;;  %v3919_v7 = vmul.f32 %v9206_v61, %v9194_v40  ;;  %v3443_v43 = vmul.f32 %v11174_v54, %v9254_v9  ;;  %v11270_v26 = vld [vmem:[#allocation16_spill] sm:$0xff] }
 0x449   :  { %11264 = vst [vmem:[#allocation39_spill] sm:$0xff] %v9264_v25  ;;  %v9270_v49 = vmul.f32 0.16666667, %v3363_v60  ;;  %v3478_v20 = vadd.f32 %v3477_v5, %v3442_v58  ;;  %v3896_v46 = vmul.f32 %v9192_v42, %v11266_v22  ;;  %v3897_v53 = vmul.f32 %v9200_v63, %v11267_v3  ;;  %v11271_v5 = vld [vmem:[#allocation250_spill] sm:$0xff] }
 0x44a   :  { %v3364_v6 = vmul.f32 %v3332_v35, %v3172_v41  ;;  %v3365_v34 = vmul.f32 %v3333_v28, %v3173_v19  ;;  %v3956_v45 = vadd.f32 %v3955_v29, %v3919_v7  ;;  %v3448_v24 = vmul.f32 %v11167_v31, %v9264_v25 }
 0x44b   :  { %11265 = vst [vmem:[#allocation42_spill] sm:$0xff] %v9270_v49  ;;  %v3479_v23 = vadd.f32 %v3478_v20, %v3443_v43  ;;  %v3449_v2 = vmul.f32 %v11168_v32, %v9270_v49  ;;  %v3929_v30 = vadd.f32 %v3897_v53, %v3896_v46  ;;  %v3904_v19 = vmul.f32 %v9192_v42, %v9058_v38 }
 0x44c   :  { %v9278_v33 = vmul.f32 0.16666667, %v3364_v6  ;;  %v9280_v8 = vmul.f32 0.16666667, %v3365_v34  ;;  %3957 = vadd.xlane.f32.xlu1 %v3956_v45  ;;  %v3905_v16 = vmul.f32 %v9200_v63, %v9060_v51  ;;  %v3898_v50 = vmul.f32 %v9203_v59, %v11270_v26 }
 0x44d   :  { %3480 = vadd.xlane.f32.xlu0 %v3479_v23  ;;  %v3487_v41 = vadd.f32 %v3449_v2, %v3448_v24  ;;  %v3899_v35 = vmul.f32 %v9206_v61, %v11271_v5  ;;  %v3906_v28 = vmul.f32 %v9203_v59, %v9067_v14  ;;  %v3913_v7 = vmul.f32 %v9200_v63, %v11263_v1 }
 0x44e   :  { %11268 = vst [vmem:[#allocation56_spill] sm:$0xff] %v9278_v33  ;;  %11269 = vst [vmem:[#allocation180_spill] sm:$0xff] %v9280_v8  ;;  %v3450_v18 = vmul.f32 %v11170_v39, %v9278_v33  ;;  %v3451_v13 = vmul.f32 %v11174_v54, %v9280_v8  ;;  %v3930_v60 = vadd.f32 %v3929_v30, %v3898_v50  ;;  %v3500_v50 = vld [vmem:[%s9632_s7] sm:$0xff] }
 0x44f   :  { %v3939_v29 = vadd.f32 %v3905_v16, %v3904_v19  ;;  %v3912_v46 = vmul.f32 %v9192_v42, %v11262_v62  ;;  %v3914_v53 = vmul.f32 %v9203_v59, %v9236_v11  ;;  %v3907_v6 = vmul.f32 %v9206_v61, %v9069_v36  ;;  %4577 = vmatprep.mubr.msk.f32.mxu0 %vm3504_vm9, %v3500_v50 }
 0x450   :  { %v3488_v15 = vadd.f32 %v3487_v41, %v3450_v18  ;;  %v3931_v43 = vadd.f32 %v3930_v60, %v3899_v35  ;;  %v3921_v45 = vmul.f32 %v9200_v63, %v9270_v49  ;;  %v3920_v24 = vmul.f32 %v9192_v42, %v9264_v25 }
 0x451   :  { %v3940_v20 = vadd.f32 %v3939_v29, %v3906_v28  ;;  %v3949_v34 = vadd.f32 %v3913_v7, %v3912_v46  ;;  %v3922_v30 = vmul.f32 %v9203_v59, %v9278_v33  ;;  %v3915_v18 = vmul.f32 %v9206_v61, %v9254_v9 }
 0x452   :  { %v3489_v58 = vadd.f32 %v3488_v15, %v3451_v13  ;;  %v3959_v41 = vadd.f32 %v3921_v45, %v3920_v24  ;;  %v3923_v13 = vmul.f32 %v9206_v61, %v9280_v8 }
 0x453   :  { %v3941_v23 = vadd.f32 %v3940_v20, %v3907_v6  ;;  %v3950_v2 = vadd.f32 %v3949_v34, %v3914_v53 }
 0x454   :  { %3490 = vadd.xlane.f32.xlu0 %v3489_v58  ;;  %v3960_v16 = vadd.f32 %v3959_v41, %v3922_v30 }
 0x455   :  { %v3951_v19 = vadd.f32 %v3950_v2, %v3915_v18 }
 0x456   :  { %v3961_v15 = vadd.f32 %v3960_v16, %v3923_v13 }
 0x458   :  { %3932 = vadd.xlane.f32.xlu0 %v3931_v43 }
 0x45c   :  { %3942 = vadd.xlane.f32.xlu0 %v3941_v23 }
 0x460   :  { %3952 = vadd.xlane.f32.xlu0 %v3951_v19 }
 0x464   :  { %3962 = vadd.xlane.f32.xlu0 %v3961_v15 }
 0x488   :  { %v3456_v58 = vpop.xlane.xlu0 %3455 }
 0x489   :  { %v3492_v29 = vmul.f32 0.00390625, %v3456_v58 }
 0x49d   :  { %v3466_v7 = vpop.xlane.xlu0 %3465 }
 0x49e   :  { %v3494_v20 = vmul.f32 0.00390625, %v3466_v7 }
 0x4a2   :  { %v3461_v60 = vpop.xlane.xlu1 %3460 }
 0x4a3   :  { %v3493_v35 = vmul.f32 0.00390625, %v3461_v60 }
 0x4a5   :  { %v4631_v28 = vpack.c.bf16 %v3493_v35, %v3492_v29  ;;  %v3501_v29 = vld [vmem:[%s9632_s7 + $0x8] sm:$0xff] }
 0x4a7   :  { %4632 = vmatprep.subr.bf16.mxu0 %v4631_v28 }
 0x4a8   :  { %4634 = vmatpush3.bf16.msra.mxu0 %v4631_v28 }
 0x4b4   :  { %v3471_v43 = vpop.xlane.xlu0 %3470 }
 0x4b5   :  { %v3495_v46 = vmul.f32 0.00390625, %v3471_v43 }
 0x4b7   :  { %v4635_v53 = vpack.c.bf16 %v3495_v46, %v3494_v20 }
 0x4b9   :  { %4636 = vmatprep.subr.bf16.mxu0 %v4635_v53 }
 0x4ba   :  { %4638 = vmatpush3.bf16.msra.mxu0 %v4635_v53 }
 0x4be   :  { %v3476_v6 = vpop.xlane.xlu1 %3475 }
 0x4bf   :  { %v3496_v23 = vmul.f32 0.00390625, %v3476_v6 }
 0x4c9   :  { %v3486_v34 = vpop.xlane.xlu1 %3485 }
 0x4ca   :  { %v3498_v41 = vmul.f32 0.00390625, %v3486_v34 }
 0x4cd   :  { %v3928_v24 = vpop.xlane.xlu1 %3927 }
 0x4ce   :  { %v3964_v58 = vmul.f32 0.00390625, %v3928_v24 }
 0x4d1   :  { %v3938_v16 = vpop.xlane.xlu1 %3937 }
 0x4d2   :  { %v3966_v43 = vmul.f32 0.00390625, %v3938_v16  ;;  %v3502_v16 = vld [vmem:[%s9633_s8] sm:$0xff] }
 0x4d5   :  { %v3948_v28 = vpop.xlane.xlu1 %3947 }
 0x4d6   :  { %v3968_v6 = vmul.f32 0.00390625, %v3948_v28 }
 0x4da   :  { %v3481_v45 = vpop.xlane.xlu0 %3480 }
 0x4db   :  { %v3497_v2 = vmul.f32 0.00390625, %v3481_v45  ;;  %v3958_v45 = vpop.xlane.xlu1 %3957 }
 0x4dc   :  { %v3970_v24 = vmul.f32 0.00390625, %v3958_v45  ;;  %v3593_v45 = vld [vmem:[%s9634_s9 + $0x28] sm:$0xff] }
 0x4dd   :  { %v4639_v30 = vpack.c.bf16 %v3497_v2, %v3496_v23 }
 0x4df   :  { %4640 = vmatprep.subr.bf16.mxu0 %v4639_v30 }
 0x4e0   :  { %4642 = vmatpush3.bf16.msra.mxu0 %v4639_v30 }
 0x4e1   :  { %v3491_v18 = vpop.xlane.xlu0 %3490 }
 0x4e2   :  { %v3499_v19 = vmul.f32 0.00390625, %v3491_v18 }
 0x4e4   :  { %v4643_v13 = vpack.c.bf16 %v3499_v19, %v3498_v41  ;;  %v11272_v41 = vmov 0   ;;  %v3503_v19 = vld [vmem:[%s9633_s8 + $0x8] sm:$0xff] }
 0x4e5   :  { %v3933_v15 = vpop.xlane.xlu0 %3932 }
 0x4e6   :  { %v3965_v60 = vmul.f32 0.00390625, %v3933_v15  ;;  %4644 = vmatprep.subr.bf16.mxu0 %v4643_v13 }
 0x4e7   :  { %4646 = vmatpush3.bf16.msra.mxu0 %v4643_v13 }
 0x4e8   :  { %v4651_v35 = vpack.c.bf16 %v3965_v60, %v3964_v58 }
 0x4e9   :  { %v3943_v7 = vpop.xlane.xlu0 %3942 }
 0x4ea   :  { %v3967_v20 = vmul.f32 0.00390625, %v3943_v7  ;;  %4578 = vmatmul.mubr.msk.f32.vlgmr.msra.gmra.mrb[16].mxu0 %vm3504_vm9, %v3501_v29  ;;  %4652 = vmatprep.subr.bf16.mxu0 %v4651_v35  ;;  %v3589_v7 = vld [vmem:[%s9634_s9 + $0x8] sm:$0xff] }
 0x4eb   :  { %4654 = vmatpush3.bf16.msra.mxu0 %v4651_v35  ;;  %4612 = vmatprep.mubr.msk.f32.mxu0 %vm3504_vm9, %v3500_v50  ;;  %v3588_v50 = vld [vmem:[%s9634_s9] sm:$0xff] }
 0x4ec   :  { %v4655_v46 = vpack.c.bf16 %v3967_v20, %v3966_v43  ;;  %4584 = vmatprep.mubr.msk.f32.mxu1 %vm134_vm0, %v3588_v50  ;;  %v3590_v43 = vld [vmem:[%s9634_s9 + $0x10] sm:$0xff]  ;;  %v3591_v20 = vld [vmem:[%s9634_s9 + $0x18] sm:$0xff] }
 0x4ed   :  { %v3953_v53 = vpop.xlane.xlu0 %3952 }
 0x4ee   :  { %v3969_v34 = vmul.f32 0.00390625, %v3953_v53  ;;  %4656 = vmatprep.subr.bf16.mxu0 %v4655_v46 }
 0x4ef   :  { %4658 = vmatpush3.bf16.msra.mxu0 %v4655_v46  ;;  %v3592_v46 = vld [vmem:[%s9634_s9 + $0x20] sm:$0xff] }
 0x4f0   :  { %v4659_v23 = vpack.c.bf16 %v3969_v34, %v3968_v6 }
 0x4f1   :  { %v3963_v2 = vpop.xlane.xlu0 %3962 }
 0x4f2   :  { %v3971_v30 = vmul.f32 0.00390625, %v3963_v2  ;;  %4660 = vmatprep.subr.bf16.mxu0 %v4659_v23  ;;  %v3594_v2 = vld [vmem:[%s9634_s9 + $0x30] sm:$0xff] }
 0x4f3   :  { %4662 = vmatpush3.bf16.msra.mxu0 %v4659_v23 }
 0x4f4   :  { %v4663_v18 = vpack.c.bf16 %v3971_v30, %v3970_v24 }
 0x4f6   :  { %4664 = vmatprep.subr.bf16.mxu0 %v4663_v18 }
 0x4f7   :  { %4666 = vmatpush3.bf16.msra.mxu0 %v4663_v18  ;;  %v3595_v18 = vld [vmem:[%s9634_s9 + $0x38] sm:$0xff] }
 0x4fa   :  { %4613 = vmatmul.mubr.msk.f32.vlgmr.msra.gmra.mrb[18].mxu0 %vm3504_vm9, %v3501_v29 }
 0x4fb   :  { %4392 = vmatprep.mubr.bf16.mxu0 %v11272_v41 }
 0x5bd   :  { %v4579_v13 = vpop.f32.mrb[16].mxu0 }
 0x5be   :  { %v3583_v15 = vadd.f32 %v4579_v13, %v3503_v19  ;;  %v3577_v58 = vpop.f32.mrb[17].mxu0 }
 0x5bf   :  { %v3578_v60 = vadd.f32 %v3577_v58, %v3502_v16 }
 0x5c0   :  { %v3587_v29 = vmax.f32 %v3583_v15, 0.0 }
 0x5c1   :  { %v3586_v35 = vmax.f32 %v3578_v60, 0.0 }
 0x5c3   :  { %v4647_v28 = vpack.c.bf16 %v3587_v29, %v3586_v35  ;;  %v3599_v29 = vld [vmem:[%s9635_s10 + $0x18] sm:$0xff] }
 0x5c5   :  { %4648 = vmatprep.subr.bf16.mxu1 %v4647_v28 }
 0x5c6   :  { %4650 = vmatpush3.bf16.msra.mxu1 %v4647_v28 }
 0x5c9   :  { %4585 = vmatmul.mubr.msk.f32.vlgmr.msra.gmra.mrb[16].mxu1 %vm134_vm0, %v3589_v7 }
 0x5ca   :  { %4587 = vmatprep.mubr.msk.f32.mxu1 %vm134_vm0, %v3590_v43 }
 0x5cd   :  { %4588 = vmatmul.mubr.msk.f32.gmra.mrb[18].mxu1 %vm134_vm0, %v3591_v20  ;;  %v4614_v53 = vpop.f32.mrb[18].mxu0 }
 0x5ce   :  { %v4044_v6 = vadd.f32 %v4614_v53, %v3503_v19  ;;  %v4038_v34 = vpop.f32.mrb[19].mxu0  ;;  %4590 = vmatprep.mubr.msk.f32.mxu1 %vm134_vm0, %v3592_v46 }
 0x5cf   :  { %v4039_v23 = vadd.f32 %v4038_v34, %v3502_v16  ;;  %v3596_v16 = vld [vmem:[%s9635_s10] sm:$0xff]  ;;  %v9392_v34 = vld [vmem:[%s9635_s10 + $0x28] sm:$0xff] }
 0x5d0   :  { %v4048_v24 = vmax.f32 %v4044_v6, 0.0 }
 0x5d1   :  { %v4047_v30 = vmax.f32 %v4039_v23, 0.0  ;;  %4591 = vmatmul.mubr.msk.f32.gmra.mrb[20].mxu1 %vm134_vm0, %v3593_v45 }
 0x5d2   :  { %4593 = vmatprep.mubr.msk.f32.mxu1 %vm134_vm0, %v3594_v2 }
 0x5d3   :  { %v4667_v19 = vpack.c.bf16 %v4048_v24, %v4047_v30 }
 0x5d5   :  { %4594 = vmatmul.mubr.msk.f32.gmra.mrb[22].mxu1 %vm134_vm0, %v3595_v18  ;;  %4668 = vmatprep.subr.bf16.mxu1 %v4667_v19 }
 0x5d6   :  { %4670 = vmatpush3.bf16.msra.mxu1 %v4667_v19  ;;  %4619 = vmatprep.mubr.msk.f32.mxu1 %vm134_vm0, %v3588_v50  ;;  %v3597_v50 = vld [vmem:[%s9635_s10 + $0x8] sm:$0xff] }
 0x5d9   :  { %4620 = vmatmul.mubr.msk.f32.vlgmr.msra.gmra.mrb[24].mxu1 %vm134_vm0, %v3589_v7 }
 0x5da   :  { %4622 = vmatprep.mubr.msk.f32.mxu1 %vm134_vm0, %v3590_v43 }
 0x5dd   :  { %4623 = vmatmul.mubr.msk.f32.gmra.mrb[26].mxu1 %vm134_vm0, %v3591_v20 }
 0x5de   :  { %4625 = vmatprep.mubr.msk.f32.mxu1 %vm134_vm0, %v3592_v46 }
 0x5e1   :  { %4626 = vmatmul.mubr.msk.f32.gmra.mrb[28].mxu1 %vm134_vm0, %v3593_v45 }
 0x5e2   :  { %4628 = vmatprep.mubr.msk.f32.mxu1 %vm134_vm0, %v3594_v2  ;;  %v3600_v2 = vld [vmem:[%s9635_s10 + $0x20] sm:$0xff] }
 0x5e5   :  { %4629 = vmatmul.mubr.msk.f32.gmra.mrb[30].mxu1 %vm134_vm0, %v3595_v18 }
 0x5e6   :  { %4435 = vmatprep.mubr.bf16.mxu1 %v11272_v41  ;;  %v9386_v41 = vld [vmem:[%s9635_s10 + $0x10] sm:$0xff] }
 0x69c   :  { %v4586_v13 = vpop.f32.mrb[16].mxu1 }
 0x69d   :  { %v3700_v15 = vadd.f32 %v4586_v13, %v3597_v50  ;;  %v3694_v58 = vpop.f32.mrb[17].mxu1 }
 0x69e   :  { %v3695_v60 = vadd.f32 %v3694_v58, %v3596_v16 }
 0x69f   :  { %v3734_v35 = vmul.f32 0.16666667, %v3700_v15 }
 0x6a0   :  { %v3733_v28 = vmul.f32 0.16666667, %v3695_v60  ;;  %v4589_v7 = vpop.f32.mrb[18].mxu1 }
 0x6a1   :  { %v3742_v43 = vadd.f32 0.5, %v3734_v35  ;;  %v3710_v20 = vadd.f32 %v4589_v7, %v3599_v29  ;;  %v3704_v46 = vpop.f32.mrb[19].mxu1  ;;  %v9401_v7 = vld [vmem:[%s9635_s10 + $0x38] sm:$0xff] }
 0x6a2   :  { %v3741_v53 = vadd.f32 0.5, %v3733_v28  ;;  %v3705_v6 = vadd.f32 %v3704_v46, %v9386_v41  ;;  %v3602_v46 = vld [vmem:[%s9635_s10 + $0x30] sm:$0xff] }
 0x6a3   :  { %v3750_v45 = vmax.f32 %v3742_v43, 0.0  ;;  %v3736_v23 = vmul.f32 0.16666667, %v3710_v20 }
 0x6a4   :  { %v3749_v24 = vmax.f32 %v3741_v53, 0.0  ;;  %v3735_v30 = vmul.f32 0.16666667, %v3705_v6  ;;  %v4592_v18 = vpop.f32.mrb[20].mxu1 }
 0x6a5   :  { %v3758_v19 = vmin.f32 %v3750_v45, 1.0  ;;  %v3744_v13 = vadd.f32 0.5, %v3736_v23  ;;  %v3720_v15 = vadd.f32 %v4592_v18, %v9392_v34  ;;  %v3714_v58 = vpop.f32.mrb[21].mxu1 }
 0x6a6   :  { %v3757_v60 = vmin.f32 %v3749_v24, 1.0  ;;  %v3743_v35 = vadd.f32 0.5, %v3735_v30  ;;  %v3715_v28 = vadd.f32 %v3714_v58, %v3600_v2 }
 0x6a7   :  { %v3752_v43 = vmax.f32 %v3744_v13, 0.0  ;;  %v3738_v20 = vmul.f32 0.16666667, %v3720_v15  ;;  %3772 = vperm.xlu0 %4736, %v3758_v19  }
 0x6a8   :  { %v4595_v53 = vpop.f32.mrb[22].mxu1  ;;  %3767 = vperm.xlu1 %4737, %v3757_v60   ;;  %v3751_v30 = vmax.f32 %v3743_v35, 0.0  ;;  %v3737_v18 = vmul.f32 0.16666667, %v3715_v28 }
 0x6a9   :  { %v3760_v6 = vmin.f32 %v3752_v43, 1.0  ;;  %v3746_v45 = vadd.f32 0.5, %v3738_v20  ;;  %v3730_v23 = vadd.f32 %v4595_v53, %v9401_v7  ;;  %v3724_v24 = vpop.f32.mrb[23].mxu1 }
 0x6aa   :  { %v3725_v58 = vadd.f32 %v3724_v24, %v3602_v46  ;;  %v3759_v52 = vmin.f32 %v3751_v30, 1.0  ;;  %v3745_v8 = vadd.f32 0.5, %v3737_v18 }
 0x6ab   :  { %v3754_v33 = vmax.f32 %v3746_v45, 0.0  ;;  %v3740_v21 = vmul.f32 0.16666667, %v3730_v23 }
 0x6ac   :  { %v3739_v25 = vmul.f32 0.16666667, %v3725_v58  ;;  %3782 = vperm.xlu1 %4737, %v3760_v6   ;;  %v4621_v13 = vpop.f32.mrb[24].mxu1  ;;  %v3753_v35 = vmax.f32 %v3745_v8, 0.0 }
 0x6ad   :  { %v4121_v19 = vadd.f32 %v4621_v13, %v3597_v50  ;;  %v4115_v15 = vpop.f32.mrb[25].mxu1  ;;  %v3762_v60 = vmin.f32 %v3754_v33, 1.0  ;;  %v3748_v43 = vadd.f32 0.5, %v3740_v21 }
 0x6ae   :  { %v3747_v40 = vadd.f32 0.5, %v3739_v25  ;;  %v4116_v24 = vadd.f32 %v4115_v15, %v3596_v16  ;;  %v3761_v30 = vmin.f32 %v3753_v35, 1.0 }
 0x6af   :  { %v4155_v49 = vmul.f32 0.16666667, %v4121_v19  ;;  %v3756_v23 = vmax.f32 %v3748_v43, 0.0 }
 0x6b0   :  { %v3755_v20 = vmax.f32 %v3747_v40, 0.0  ;;  %3777 = vperm.xlu1 %4737, %v3759_v52   ;;  %v4624_v53 = vpop.f32.mrb[26].mxu1  ;;  %v4154_v18 = vmul.f32 0.16666667, %v4116_v24 }
 0x6b1   :  { %v4125_v10 = vpop.f32.mrb[27].mxu1  ;;  %v4163_v45 = vadd.f32 0.5, %v4155_v49  ;;  %v4131_v58 = vadd.f32 %v4624_v53, %v3599_v29  ;;  %v3764_v33 = vmin.f32 %v3756_v23, 1.0 }
 0x6b2   :  { %v3763_v28 = vmin.f32 %v3755_v20, 1.0  ;;  %v4162_v8 = vadd.f32 0.5, %v4154_v18  ;;  %v4126_v16 = vadd.f32 %v4125_v10, %v9386_v41 }
 0x6b3   :  { %v4171_v13 = vmax.f32 %v4163_v45, 0.0  ;;  %v4157_v21 = vmul.f32 0.16666667, %v4131_v58 }
 0x6b4   :  { %3797 = vperm.xlu0 %4736, %v3763_v28   ;;  %3792 = vperm.xlu1 %4737, %v3762_v60   ;;  %v4627_v50 = vpop.f32.mrb[28].mxu1  ;;  %v4156_v35 = vmul.f32 0.16666667, %v4126_v16 }
 0x6b5   :  { %v4135_v6 = vpop.f32.mrb[29].mxu1  ;;  %v4179_v29 = vmin.f32 %v4171_v13, 1.0  ;;  %v4165_v43 = vadd.f32 0.5, %v4157_v21  ;;  %v4141_v60 = vadd.f32 %v4627_v50, %v9392_v34  ;;  %v4340_v50 = vld [vmem:[%s9637_s12] sm:$0xff] }
 0x6b6   :  { %v4136_v25 = vadd.f32 %v4135_v6, %v3600_v2  ;;  %v4170_v2 = vmax.f32 %v4162_v8, 0.0  ;;  %v4164_v41 = vadd.f32 0.5, %v4156_v35 }
 0x6b7   :  { %v4173_v45 = vmax.f32 %v4165_v43, 0.0  ;;  %v4159_v23 = vmul.f32 0.16666667, %v4141_v60 }
 0x6b8   :  { %v4158_v40 = vmul.f32 0.16666667, %v4136_v25  ;;  %3787 = vperm.xlu1 %4737, %v3761_v30   ;;  %v4630_v52 = vpop.f32.mrb[30].mxu1  ;;  %v4178_v10 = vmin.f32 %v4170_v2, 1.0  ;;  %v4172_v25 = vmax.f32 %v4164_v41, 0.0 }
 0x6b9   :  { %v4145_v19 = vpop.f32.mrb[31].mxu1  ;;  %v4151_v58 = vadd.f32 %v4630_v52, %v9401_v7  ;;  %v4181_v30 = vmin.f32 %v4173_v45, 1.0  ;;  %v4167_v18 = vadd.f32 0.5, %v4159_v23 }
 0x6ba   :  { %v4166_v49 = vadd.f32 0.5, %v4158_v40  ;;  %v4146_v15 = vadd.f32 %v4145_v19, %v3602_v46  ;;  %v4180_v7 = vmin.f32 %v4172_v25, 1.0  ;;  %v4341_v19 = vld [vmem:[%s9637_s12 + $0x8] sm:$0xff] }
 0x6bb   :  { %v4161_v34 = vmul.f32 0.16666667, %v4151_v58  ;;  %v4175_v13 = vmax.f32 %v4167_v18, 0.0 }
 0x6bc   :  { %v4174_v20 = vmax.f32 %v4166_v49, 0.0  ;;  %v4160_v53 = vmul.f32 0.16666667, %v4146_v15  ;;  %3802 = vperm.xlu1 %4737, %v3764_v33  }
 0x6bd   :  { %v4169_v33 = vadd.f32 0.5, %v4161_v34  ;;  %v4183_v21 = vmin.f32 %v4175_v13, 1.0 }
 0x6be   :  { %v4182_v28 = vmin.f32 %v4174_v20, 1.0  ;;  %v4168_v24 = vadd.f32 0.5, %v4160_v53 }
 0x6bf   :  { %v4177_v40 = vmax.f32 %v4169_v33, 0.0 }
 0x6c0   :  { %v4176_v6 = vmax.f32 %v4168_v24, 0.0  ;;  %4193 = vperm.xlu1 %4737, %v4179_v29   ;;  %4208 = vperm.xlu0 %4736, %v4182_v28  }
 0x6c1   :  { %v4185_v52 = vmin.f32 %v4177_v40, 1.0 }
 0x6c2   :  { %v4184_v46 = vmin.f32 %v4176_v6, 1.0 }
 0x6c4   :  { %4218 = vperm.xlu0 %4736, %v4184_v46   ;;  %4188 = vperm.xlu1 %4737, %v4178_v10  }
 0x6c8   :  { %4344 = vperm.xlu0 %4736, %v4340_v50   ;;  %4203 = vperm.xlu1 %4737, %v4181_v30  }
 0x6cc   :  { %4198 = vperm.xlu1 %4737, %v4180_v7  }
 0x6d0   :  { %4213 = vperm.xlu1 %4737, %v4183_v21  }
 0x6d4   :  { %4223 = vperm.xlu1 %4737, %v4185_v52  }
 0x6d8   :  { %4349 = vperm.xlu1 %4737, %v4341_v19  }
 0x726   :  { %v3773_v29 = vpop.permute.xlu0 %3772 }
 0x727   :  { %v3768_v8 = vpop.permute.xlu1 %3767  ;;  %v3809_v60 = vmul.f32 %v3773_v29, %v11167_v31  ;;  %v3810_v20 = vmul.f32 %v3773_v29, %v11168_v32  ;;  %v3811_v53 = vmul.f32 %v3773_v29, %v11170_v39  ;;  %v3812_v2 = vmul.f32 %v3773_v29, %v11174_v54 }
 0x728   :  { %v3805_v35 = vmul.f32 %v3768_v8, %v11167_v31  ;;  %v3806_v28 = vmul.f32 %v3768_v8, %v11168_v32  ;;  %v3807_v24 = vmul.f32 %v3768_v8, %v11170_v39  ;;  %v3808_v45 = vmul.f32 %v3768_v8, %v11174_v54 }
 0x72b   :  { %v3783_v16 = vpop.permute.xlu1 %3782 }
 0x72c   :  { %v9425_v23 = vmul.f32 %v3783_v16, %v11167_v31  ;;  %v9428_v58 = vmul.f32 %v3783_v16, %v11168_v32  ;;  %v9431_v6 = vmul.f32 %v3783_v16, %v11170_v39  ;;  %v9434_v10 = vmul.f32 %v3783_v16, %v11174_v54 }
 0x72f   :  { %v3778_v49 = vpop.permute.xlu1 %3777 }
 0x730   :  { %v9437_v46 = vmul.f32 %v3778_v49, %v11167_v31  ;;  %v9440_v30 = vmul.f32 %v3778_v49, %v11168_v32  ;;  %v9443_v18 = vmul.f32 %v3778_v49, %v11170_v39  ;;  %v9446_v34 = vmul.f32 %v3778_v49, %v11174_v54 }
 0x733   :  { %v3793_v15 = vpop.permute.xlu1 %3792  ;;  %v3798_v41 = vpop.permute.xlu0 %3797 }
 0x734   :  { %v9449_v25 = vmul.f32 %v3793_v15, %v11167_v31  ;;  %v9452_v13 = vmul.f32 %v3793_v15, %v11168_v32  ;;  %v9455_v33 = vmul.f32 %v3793_v15, %v11170_v39  ;;  %v9458_v7 = vmul.f32 %v3793_v15, %v11174_v54 }
 0x735   :  { %v3829_v21 = vmul.f32 %v3798_v41, %v11167_v31  ;;  %v3830_v40 = vmul.f32 %v3798_v41, %v11168_v32  ;;  %v3831_v52 = vmul.f32 %v3798_v41, %v11170_v39  ;;  %v3832_v19 = vmul.f32 %v3798_v41, %v11174_v54 }
 0x736   :  { %11273 = vst [vmem:[#allocation244_spill] sm:$0xff] %v9449_v25  ;;  %11274 = vst [vmem:[#allocation13_spill] sm:$0xff] %v9452_v13 }
 0x737   :  { %v3788_v43 = vpop.permute.xlu1 %3787  ;;  %11275 = vst [vmem:[#allocation243_spill] sm:$0xff] %v9455_v33  ;;  %11276 = vst [vmem:[#allocation61_spill] sm:$0xff] %v9458_v7 }
 0x738   :  { %v3821_v8 = vmul.f32 %v3788_v43, %v11167_v31  ;;  %v3822_v16 = vmul.f32 %v3788_v43, %v11168_v32  ;;  %v3823_v49 = vmul.f32 %v3788_v43, %v11170_v39  ;;  %v3824_v29 = vmul.f32 %v3788_v43, %v11174_v54 }
 0x73b   :  { %v3803_v50 = vpop.permute.xlu1 %3802 }
 0x73c   :  { %v9469_v11 = vmul.f32 %v3803_v50, %v11167_v31  ;;  %v9472_v15 = vmul.f32 %v3803_v50, %v11168_v32  ;;  %v9475_v0 = vmul.f32 %v3803_v50, %v11170_v39  ;;  %v9478_v62 = vmul.f32 %v3803_v50, %v11174_v54 }
 0x73e   :  { %11277 = vst [vmem:[#allocation78_spill] sm:$0xff] %v9469_v11  ;;  %11278 = vst [vmem:[#allocation79_spill] sm:$0xff] %v9472_v15 }
 0x73f   :  { %11279 = vst [vmem:[#allocation59_spill] sm:$0xff] %v9475_v0  ;;  %11280 = vst [vmem:[#allocation51_spill] sm:$0xff] %v9478_v62  ;;  %v4194_v41 = vpop.permute.xlu1 %4193  ;;  %v4209_v56 = vpop.permute.xlu0 %4208 }
 0x740   :  { %v4230_v9 = vmul.f32 %v4194_v41, %v9192_v42  ;;  %v4231_v44 = vmul.f32 %v4194_v41, %v9200_v63  ;;  %v4232_v43 = vmul.f32 %v4194_v41, %v9203_v59  ;;  %v4233_v31 = vmul.f32 %v4194_v41, %v9206_v61 }
 0x741   :  { %v4242_v11 = vmul.f32 %v4209_v56, %v9192_v42  ;;  %v4243_v32 = vmul.f32 %v4209_v56, %v9200_v63  ;;  %v4244_v39 = vmul.f32 %v4209_v56, %v9203_v59  ;;  %v4245_v0 = vmul.f32 %v4209_v56, %v9206_v61 }
 0x742   :  { %v4262_v54 = vadd.f32 %v4230_v9, %v3809_v60  ;;  %v4263_v50 = vadd.f32 %v4231_v44, %v3810_v20  ;;  %v4264_v62 = vadd.f32 %v4232_v43, %v3811_v53  ;;  %v4265_v15 = vadd.f32 %v4233_v31, %v3812_v2 }
 0x743   :  { %v9488_v1 = vadd.f32 %v4242_v11, %v3821_v8  ;;  %v9490_v57 = vadd.f32 %v4243_v32, %v3822_v16  ;;  %v9492_v14 = vadd.f32 %v4244_v39, %v3823_v49  ;;  %v9494_v7 = vadd.f32 %v4245_v0, %v3824_v29  ;;  %v4189_v41 = vpop.permute.xlu1 %4188  ;;  %v4219_v33 = vpop.permute.xlu0 %4218 }
 0x744   :  { %v4226_v13 = vmul.f32 %v4189_v41, %v9192_v42  ;;  %v4227_v25 = vmul.f32 %v4189_v41, %v9200_v63  ;;  %v4228_v56 = vmul.f32 %v4189_v41, %v9203_v59  ;;  %v4229_v44 = vmul.f32 %v4189_v41, %v9206_v61 }
 0x745   :  { %v4250_v9 = vmul.f32 %v4219_v33, %v9192_v42  ;;  %v4251_v11 = vmul.f32 %v4219_v33, %v9200_v63  ;;  %v4252_v60 = vmul.f32 %v4219_v33, %v9203_v59  ;;  %v4253_v20 = vmul.f32 %v4219_v33, %v9206_v61 }
 0x746   :  { %v4258_v0 = vadd.f32 %v4226_v13, %v3805_v35  ;;  %v4259_v53 = vadd.f32 %v4227_v25, %v3806_v28  ;;  %v4260_v2 = vadd.f32 %v4228_v56, %v3807_v24  ;;  %v4261_v8 = vadd.f32 %v4229_v44, %v3808_v45 }
 0x747   :  { %v9504_v16 = vadd.f32 %v4250_v9, %v3829_v21  ;;  %v9506_v49 = vadd.f32 %v4251_v11, %v3830_v40  ;;  %v9508_v29 = vadd.f32 %v4252_v60, %v3831_v52  ;;  %v9510_v43 = vadd.f32 %v4253_v20, %v3832_v19  ;;  %v4204_v31 = vpop.permute.xlu1 %4203 }
 0x748   :  { %v4238_v32 = vmul.f32 %v4204_v31, %v9192_v42  ;;  %v4239_v39 = vmul.f32 %v4204_v31, %v9200_v63  ;;  %v4240_v41 = vmul.f32 %v4204_v31, %v9203_v59  ;;  %v4241_v35 = vmul.f32 %v4204_v31, %v9206_v61  ;;  %v11284_v31 = vld [vmem:[#allocation61_spill] sm:$0xff] }
 0x749   :  { %v4291_v28 = vmul.f32 %v4259_v53, %v11256_v37  ;;  %v4295_v24 = vmul.f32 %v4263_v50, %v11267_v3  ;;  %v4293_v45 = vmul.f32 %v4261_v8, %v11258_v4  ;;  %v4297_v25 = vmul.f32 %v4265_v15, %v11271_v5 }
 0x74a   :  { %v4270_v13 = vadd.f32 %v4238_v32, %v9425_v23  ;;  %v4271_v33 = vadd.f32 %v4239_v39, %v9428_v58  ;;  %v4272_v21 = vadd.f32 %v4240_v41, %v9431_v6  ;;  %v4273_v40 = vadd.f32 %v4241_v35, %v9434_v10 }
 0x74b   :  { %v4199_v52 = vpop.permute.xlu1 %4198  ;;  %v4325_v19 = vpack.c.bf16 %v4295_v24, %v4291_v28  ;;  %v4327_v56 = vpack.c.bf16 %v4297_v25, %v4293_v45  ;;  %v4290_v44 = vmul.f32 %v4258_v0, %v11255_v17  ;;  %v4294_v37 = vmul.f32 %v4262_v54, %v11266_v22  ;;  %v11285_v24 = vld [vmem:[#allocation200_spill] sm:$0xff] }
 0x74c   :  { %v4234_v3 = vmul.f32 %v4199_v52, %v9192_v42  ;;  %v4235_v4 = vmul.f32 %v4199_v52, %v9200_v63  ;;  %v4236_v5 = vmul.f32 %v4199_v52, %v9203_v59  ;;  %v4237_v23 = vmul.f32 %v4199_v52, %v9206_v61 }
 0x74d   :  { %4360 = vmatprep.subr.bf16.mxu0 %v4325_v19  ;;  %4403 = vmatprep.subr.bf16.mxu1 %v4327_v56  ;;  %v4324_v58 = vpack.c.bf16 %v4294_v37, %v4290_v44  ;;  %v4292_v6 = vmul.f32 %v4260_v2, %v11257_v47  ;;  %v4296_v10 = vmul.f32 %v4264_v62, %v11270_v26  ;;  %v11283_v2 = vld [vmem:[#allocation243_spill] sm:$0xff]  ;;  %v11288_v19 = vld [vmem:[#allocation78_spill] sm:$0xff] }
 0x74e   :  { %v4266_v15 = vadd.f32 %v4234_v3, %v9437_v46  ;;  %v4267_v17 = vadd.f32 %v4235_v4, %v9440_v30  ;;  %v4268_v22 = vadd.f32 %v4236_v5, %v9443_v18  ;;  %v4269_v54 = vadd.f32 %v4237_v23, %v9446_v34  ;;  %v11289_v44 = vld [vmem:[#allocation79_spill] sm:$0xff]  ;;  %v11293_v5 = vld [vmem:[#allocation45_spill] sm:$0xff] }
 0x74f   :  { %4361 = vmatpush1.bf16.msra.mxu0 %v4324_v58  ;;  %v4326_v50 = vpack.c.bf16 %v4296_v10, %v4292_v6  ;;  %v4214_v9 = vpop.permute.xlu1 %4213  ;;  %v4303_v11 = vmul.f32 %v4271_v33, %v9060_v51  ;;  %v4305_v60 = vmul.f32 %v4273_v40, %v9069_v36  ;;  %v4302_v20 = vmul.f32 %v4270_v13, %v9058_v38  ;;  %v11281_v36 = vld [vmem:[#allocation244_spill] sm:$0xff]  ;;  %v11282_v38 = vld [vmem:[#allocation13_spill] sm:$0xff]  ;;  %v11290_v37 = vld [vmem:[#allocation59_spill] sm:$0xff] }
 0x750   :  { %v4246_v47 = vmul.f32 %v4214_v9, %v9192_v42  ;;  %v4247_v62 = vmul.f32 %v4214_v9, %v9200_v63  ;;  %v4248_v26 = vmul.f32 %v4214_v9, %v9203_v59  ;;  %v4249_v46 = vmul.f32 %v4214_v9, %v9206_v61  ;;  %v11286_v13 = vld [vmem:[#allocation193_spill] sm:$0xff]  ;;  %v11291_v3 = vld [vmem:[#allocation51_spill] sm:$0xff]  ;;  %v11294_v58 = vld [vmem:[#allocation196_spill] sm:$0xff] }
 0x751   :  { %4404 = vmatpush1.bf16.msra.mxu1 %v4326_v50  ;;  %v4299_v30 = vmul.f32 %v4267_v17, %v8977_v27  ;;  %v4301_v18 = vmul.f32 %v4269_v54, %v11260_v55  ;;  %v4298_v34 = vmul.f32 %v4266_v15, %v8975_v12  ;;  %v4300_v51 = vmul.f32 %v4268_v22, %v8838_v48  ;;  %v11287_v40 = vld [vmem:[#allocation245_spill] sm:$0xff]  ;;  %v11295_v6 = vld [vmem:[#allocation207_spill] sm:$0xff]  ;;  %v11297_v22 = vld [vmem:[#allocation242_spill] sm:$0xff] }
 0x752   :  { %v4278_v0 = vadd.f32 %v4246_v47, %v11281_v36  ;;  %v4279_v53 = vadd.f32 %v4247_v62, %v11282_v38  ;;  %v4280_v8 = vadd.f32 %v4248_v26, %v11283_v2  ;;  %v4281_v32 = vadd.f32 %v4249_v46, %v11284_v31  ;;  %v11296_v15 = vld [vmem:[#allocation87_spill] sm:$0xff]  ;;  %v11298_v50 = vld [vmem:[#allocation58_spill] sm:$0xff]  ;;  %v11301_v62 = vld [vmem:[#allocation180_spill] sm:$0xff] }
 0x753   :  { %v4224_v39 = vpop.permute.xlu1 %4223  ;;  %v4329_v41 = vpack.c.bf16 %v4303_v11, %v4299_v30  ;;  %v4331_v35 = vpack.c.bf16 %v4305_v60, %v4301_v18  ;;  %v4328_v28 = vpack.c.bf16 %v4302_v20, %v4298_v34  ;;  %v4304_v27 = vmul.f32 %v4272_v21, %v11285_v24  ;;  %v11299_v60 = vld [vmem:[#allocation42_spill] sm:$0xff]  ;;  %v11302_v30 = vld [vmem:[#allocation119_spill] sm:$0xff]  ;;  %v11305_v38 = vld [vmem:[#allocation56_spill] sm:$0xff] }
 0x754   :  { %v4254_v55 = vmul.f32 %v4224_v39, %v9192_v42  ;;  %v4255_v12 = vmul.f32 %v4224_v39, %v9200_v63  ;;  %v4256_v48 = vmul.f32 %v4224_v39, %v9203_v59  ;;  %v4257_v45 = vmul.f32 %v4224_v39, %v9206_v61  ;;  %v11292_v61 = vld [vmem:[#allocation9_spill] sm:$0xff] }
 0x755   :  { %4362 = vmatprep.subr.bf16.mxu0 %v4329_v41  ;;  %4405 = vmatprep.subr.bf16.mxu1 %v4331_v35  ;;  %v4330_v25 = vpack.c.bf16 %v4304_v27, %v4300_v51  ;;  %v4307_v33 = vmul.f32 %v9490_v57, %v11286_v13  ;;  %v4311_v52 = vmul.f32 %v4279_v53, %v11287_v40 }
 0x756   :  { %v4286_v56 = vadd.f32 %v4254_v55, %v11288_v19  ;;  %v4287_v21 = vadd.f32 %v4255_v12, %v11289_v44  ;;  %v4288_v42 = vadd.f32 %v4256_v48, %v11290_v37  ;;  %v4289_v63 = vadd.f32 %v4257_v45, %v11291_v3  ;;  %4363 = vmatpush1.bf16.msra.mxu0 %v4328_v28  ;;  %v4754_v48 = vld [vmem:[%s9625_s0] sm:$0xff] }
 0x757   :  { %4406 = vmatpush1.bf16.msra.mxu1 %v4330_v25  ;;  %v4333_v59 = vpack.c.bf16 %v4311_v52, %v4307_v33  ;;  %v4309_v4 = vmul.f32 %v9494_v7, %v11292_v61  ;;  %v4313_v23 = vmul.f32 %v4281_v32, %v11293_v5  ;;  %v4306_v57 = vmul.f32 %v9488_v1, %v11294_v58  ;;  %v11300_v7 = vld [vmem:[#allocation10_spill] sm:$0xff]  ;;  %v4755_v25 = vld [vmem:[%s9625_s0 + $0x10] sm:$0xff]  ;;  %v4760_v5 = vld [vmem:[%s9625_s0 + $0x28] sm:$0xff] }
 0x758   :  { %v4310_v10 = vmul.f32 %v4278_v0, %v11295_v6  ;;  %v4308_v17 = vmul.f32 %v9492_v14, %v11296_v15  ;;  %v4312_v54 = vmul.f32 %v4280_v8, %v11297_v22  ;;  %v4315_v9 = vmul.f32 %v9506_v49, %v11298_v50  ;;  %v11303_v14 = vld [vmem:[#allocation39_spill] sm:$0xff]  ;;  %v4345_v8 = vpop.permute.xlu0 %4344  ;;  %v4759_v61 = vld [vmem:[%s9625_s0 + $0x30] sm:$0xff]  ;;  %v4761_v58 = vld [vmem:[%s9625_s0 + $0x38] sm:$0xff] }
 0x759   :  { %4364 = vmatprep.subr.bf16.mxu0 %v4333_v59  ;;  %v4335_v11 = vpack.c.bf16 %v4313_v23, %v4309_v4  ;;  %v4319_v20 = vmul.f32 %v4287_v21, %v11299_v60  ;;  %v4317_v47 = vmul.f32 %v9510_v43, %v11300_v7  ;;  %v4321_v26 = vmul.f32 %v4289_v63, %v11301_v62  ;;  %v11304_v49 = vld [vmem:[#allocation43_spill] sm:$0xff]  ;;  %v4757_v21 = vld [vmem:[%s9625_s0 + $0x18] sm:$0xff]  ;;  %v4758_v63 = vld [vmem:[%s9625_s0 + $0x20] sm:$0xff] }
 0x75a   :  { %v4332_v1 = vpack.c.bf16 %v4310_v10, %v4306_v57  ;;  %v4334_v46 = vpack.c.bf16 %v4312_v54, %v4308_v17  ;;  %v4314_v18 = vmul.f32 %v9504_v16, %v11302_v30  ;;  %v4318_v34 = vmul.f32 %v4286_v56, %v11303_v14  ;;  %v4742_v16 = vld [vmem:[%s9636_s11] sm:$0xff]   ;;  %v4756_v56 = vld [vmem:[%s9625_s0 + $0x8] sm:$0xff] }
 0x75b   :  { %4407 = vmatprep.subr.bf16.mxu1 %v4335_v11  ;;  %v4337_v51 = vpack.c.bf16 %v4319_v20, %v4315_v9  ;;  %v4339_v36 = vpack.c.bf16 %v4321_v26, %v4317_v47  ;;  %v4316_v0 = vmul.f32 %v9508_v29, %v11304_v49  ;;  %v4320_v53 = vmul.f32 %v4288_v42, %v11305_v38  ;;  %v4350_v29 = vpop.permute.xlu1 %4349 }
 0x75c   :  { %4365 = vmatpush1.bf16.msra.mxu0 %v4332_v1  ;;  %4408 = vmatpush1.bf16.msra.mxu1 %v4334_v46  ;;  %v4336_v43 = vpack.c.bf16 %v4318_v34, %v4314_v18 }
 0x75d   :  { %4366 = vmatprep.subr.bf16.mxu0 %v4337_v51  ;;  %4409 = vmatprep.subr.bf16.mxu1 %v4339_v36  ;;  %v4338_v2 = vpack.c.bf16 %v4320_v53, %v4316_v0 }
 0x760   :  { %4367 = vmatpush1.bf16.msra.mxu0 %v4336_v43  ;;  %4410 = vmatpush1.bf16.msra.mxu1 %v4338_v2 }
 0x763   :  { %4519 = vmatmul.mubr.msk.bf16.vlgmr.msra.gmra.mrb[20].mxu0 %vm3504_vm9, %v4742_v16  ;;  %4520 = vmatmul.mubr.msk.bf16.vlgmr.msra.gmra.mrb[32].mxu1 %vm3504_vm9, %v4742_v16 }
 0x836   :  { %v4394_v31 = vpop.f32.mrb[20].mxu0  ;;  %v4437_v32 = vpop.f32.mrb[32].mxu1 }
 0x837   :  { %v4395_v39 = vadd.f32 %v4394_v31, %v4345_v8  ;;  %v4438_v41 = vadd.f32 %v4437_v32, %v4345_v8  ;;  %v4396_v35 = vpop.f32.mrb[21].mxu0  ;;  %v4439_v28 = vpop.f32.mrb[33].mxu1 }
 0x838   :  { %v4397_v24 = vadd.f32 %v4396_v35, %v4345_v8  ;;  %v4440_v27 = vadd.f32 %v4439_v28, %v4345_v8  ;;  %v4398_v55 = vpop.f32.mrb[22].mxu0  ;;  %v4441_v12 = vpop.f32.mrb[34].mxu1 }
 0x839   :  { %v4446_v45 = vadd.f32 %v4754_v48, %v4395_v39  ;;  %v4448_v13 = vadd.f32 %v4755_v25, %v4438_v41  ;;  %v4399_v33 = vadd.f32 %v4398_v55, %v4350_v29  ;;  %v4442_v40 = vadd.f32 %v4441_v12, %v4350_v29  ;;  %v4400_v52 = vpop.f32.mrb[23].mxu0  ;;  %v4443_v19 = vpop.f32.mrb[35].mxu1 }
 0x83a   :  { %v4447_v44 = vadd.f32 %v4756_v56, %v4397_v24  ;;  %v4449_v37 = vadd.f32 %v4757_v21, %v4440_v27  ;;  %v4401_v42 = vadd.f32 %v4400_v52, %v4350_v29  ;;  %v4444_v3 = vadd.f32 %v4443_v19, %v4350_v29 }
 0x83b   :  { %4454 = vst [vmem:[#allocation3] sm:$0xff] %v4446_v45  ;;  %4456 = vst [vmem:[#allocation3 + $0x10] sm:$0xff] %v4448_v13  ;;  %v4450_v59 = vadd.f32 %v4758_v63, %v4399_v33  ;;  %v4452_v4 = vadd.f32 %v4759_v61, %v4442_v40 }
 0x83c   :  { %4455 = vst [vmem:[#allocation3 + $0x8] sm:$0xff] %v4447_v44  ;;  %4457 = vst [vmem:[#allocation3 + $0x18] sm:$0xff] %v4449_v37  ;;  %v4451_v23 = vadd.f32 %v4760_v5, %v4401_v42  ;;  %v4453_v57 = vadd.f32 %v4761_v58, %v4444_v3 }
 0x83d   :  { %4458 = vst [vmem:[#allocation3 + $0x20] sm:$0xff] %v4450_v59  ;;  %4460 = vst [vmem:[#allocation3 + $0x30] sm:$0xff] %v4452_v4 }
 0x83e   :  { %4459 = vst [vmem:[#allocation3 + $0x28] sm:$0xff] %v4451_v23  ;;  %4461 = vst [vmem:[#allocation3 + $0x38] sm:$0xff] %v4453_v57 }
 0x83f   :  { %4773 = shalt.err (!%p4770_p4)
}
 0x840   :  { %s4774_s1 = scalar_lea.hbm %s9638_s13, 1024 }
 0x841   :  { %p4775_p5 = scmp.ne.s32.totalorder %s9638_s13, %s4774_s1  ;;  %p4778_p6 = scmp.lt.u32.totalorder %s4774_s1, %s9638_s13 }
 0x843   :  { %p4780_p7 = pnand %p4778_p6, %p4775_p5 }
 0x845   :  { %4783 = shalt.err (!%p4780_p7)
}
 0x846   :  { %s4804_s15 = smov 512   ;;  %s4805_s16 = smov 32  }
 0x847   :  { %4473 = dma.vmem_to_hbm [thread:$0]  %s4468_s22, 1024, %s9638_s13, [#allocation4], %s4804_s15, %s4804_s15, %s4805_s16  }
 0x848   :  { %4784 = dma.done.wait [#allocation4], 1024  }
 0x849   :  { %4785 = vsyncadd [#allocation4], 4294966272 }
 0x84a   :  { %4477 = vsyncpa [#allocation4], 1 }

</bundles_post_ra>
